<compile_context>
chip_gen: v7x
topology: tpu7x:2x2x1
jax: 0.10.0
libtpu: 0.0.40
codegen_flags: <defaults>
</compile_context>

<pallas_src>
import math

import jax
import jax.numpy as jnp
from jax.experimental import pallas as pl
from jax.experimental.pallas import tpu as pltpu


_HAS_BUFFERED = hasattr(pl, "Buffered")


def _cdiv(a, b):
    return -(-a // b)


def _round_up(a, b):
    return _cdiv(a, b) * b


def _const_spec(shape, buffered):
    """BlockSpec for a grid-invariant operand; single-buffered when supported."""
    n = len(shape)

    def idx_map(g):
        return (0,) * n

    if buffered:
        try:
            return pl.BlockSpec(shape, idx_map, pipeline_mode=pl.Buffered(1))
        except Exception:
            pass
    return pl.BlockSpec(shape, idx_map)


def _tpu_limits():
    """Best-effort (VMEM capacity, TensorCores-per-chip) query."""
    vmem_cap = 0
    num_cores = 1
    try:
        info = pltpu.get_tpu_info()
        vmem_cap = int(getattr(info, "vmem_capacity_bytes", 0) or 0)
        for name in ("num_cores", "core_count", "num_tensorcores",
                     "tensorcores_per_chip"):
            v = getattr(info, name, None)
            if v:
                num_cores = int(v)
                break
    except Exception:
        pass
    if not vmem_cap:
        kind = ""
        try:
            kind = jax.devices()[0].device_kind.lower()
        except Exception:
            pass
        vmem_cap = 64 * 2**20 if "v7" in kind else 128 * 2**20
    return vmem_cap, max(1, num_cores)


def _make_kernel(gpb, s, ep, scale, exact):
    """Per-block kernel.

    gpb: packed-group rows per block, s: number of key/value rows,
    ep:  packed feature width (pack * E), scale: 1/sqrt(head_dim),
    exact: True -> keep everything f32 and use an exact softmax divide.
    """

    def kernel(q_ref, kv_ref, wq_ref, bq_ref, wkv_ref, bkv_ref,
               wo_ref, bo_ref, sel_ref, selt_ref, o_ref):
        # ---- projections: Q-only for the query rows, fused KV for the kv rows ----
        wq = wq_ref[...]
        qp = jnp.dot(q_ref[...].astype(wq.dtype), wq,
                     preferred_element_type=jnp.float32) + bq_ref[...]
        qp = qp * scale                                     # 1/sqrt(head_dim), f32 VPU

        wkv = wkv_ref[...]
        kv2d = kv_ref[...].reshape(gpb * s, ep)
        kvp = jnp.dot(kv2d.astype(wkv.dtype), wkv,
                      preferred_element_type=jnp.float32) + bkv_ref[...]
        kvp = kvp.reshape(gpb, s, 2 * ep)
        kp = kvp[..., :ep]            # lane-aligned slices (offset 0 / ep)
        vp = kvp[..., ep:]

        # ---- per-head scores: elementwise q*k, then 0/1 head-selector matmul ----
        qk = qp[:, None, :] * kp                                         # f32, VPU
        sel = sel_ref[...]
        hp = sel.shape[-1]
        scores = jnp.dot(qk.reshape(gpb * s, ep).astype(sel.dtype), sel,
                         preferred_element_type=jnp.float32)
        scores = scores.reshape(gpb, s, hp)

        # ---- softmax over the key axis, independently per (group, head), f32 ----
        m = jnp.max(scores, axis=1, keepdims=True)
        e = jnp.exp(scores - m)
        denom = jnp.sum(e, axis=1, keepdims=True)
        if exact:
            p = e / denom
        else:
            p = e * pl.reciprocal(denom, approx=True)                    # EUP slot

        # ---- broadcast head probs back to features, weight values, reduce keys ---
        selt = selt_ref[...]
        p_full = jnp.dot(p.reshape(gpb * s, hp).astype(selt.dtype), selt,
                         preferred_element_type=jnp.float32)
        p_full = p_full.reshape(gpb, s, ep)
        attn = jnp.sum(p_full * vp, axis=1)                              # [gpb, ep]

        # ---- output projection; lane-dense store ---------------------------------
        wo = wo_ref[...]
        out = jnp.dot(attn.astype(wo.dtype), wo,
                      preferred_element_type=jnp.float32) + bo_ref[...]
        o_ref[...] = out.astype(o_ref.dtype)

    return kernel


def attn_fusion(in_feats, feats_list, params, num_heads, mxu_dtype=jnp.bfloat16):
    """Pallas implementation of AttnFusion.forward.

    in_feats:   [G, E]
    feats_list: list of [G, E] or [G, L_i, E]
    returns:    [G, E] float32
    """
    G, E = in_feats.shape
    H = num_heads
    assert E % H == 0
    head_dim = E // H
    scale = 1.0 / math.sqrt(head_dim)
    exact = jnp.dtype(mxu_dtype) == jnp.dtype(jnp.float32)

    # ---- glue (plain JAX): concatenate key/value rows -----------------------------
    kv_list = [f[:, None, :] if f.ndim == 2 else f for f in feats_list]
    kv = jnp.concatenate(kv_list, axis=1)                   # [G, S, E]
    S = kv.shape[1]

    # ---- lane packing: pack consecutive groups onto the 128-lane axis -------------
    pack = 128 // E if (E < 128 and 128 % E == 0) else 1
    Ep, Hp = pack * E, pack * H

    # ---- block sizing from an explicit VMEM budget ---------------------------------
    wb = jnp.dtype(mxu_dtype).itemsize
    sel_b = 4 if exact else 2
    vmem_cap, num_cores = _tpu_limits()
    budget = min(int(vmem_cap * 0.75), 100 * 2**20)          # ~48 MiB on v7x, 96 MiB else

    const_buf = 1 if _HAS_BUFFERED else 2
    const_bytes = const_buf * (
        2 * Ep * Ep * wb + Ep * 2 * Ep * wb                  # W_q, W_o, fused W_kv
        + 4 * Ep * 4                                         # biases (f32)
        + 2 * Ep * Hp * sel_b)                               # sel + sel^T

    per_row = (2 * Ep * wb                  # query activations   (double-buffered)
               + 2 * S * Ep * wb            # key/value activations (double-buffered)
               + 2 * Ep * 4                 # f32 output block    (double-buffered)
               + 14 * S * Ep * 4            # peak f32 temporaries (kvp, qk, p_full, ...)
               + 8 * Ep * 4)                # qp / attn / out temporaries
    avail = max(budget - const_bytes, 8 * per_row)
    gpb_max = max(8, (avail // per_row) // 8 * 8)

    total_prows = _cdiv(G, pack)                             # packed-group rows overall
    gpb = min(gpb_max, _round_up(total_prows, 8))
    if num_cores > 1 and total_prows >= 8 * num_cores:
        # Give every TensorCore at least one grid step (v7x); never forced on 1-TC chips.
        want_steps = max(_cdiv(total_prows, gpb), num_cores)
        want_steps = _round_up(want_steps, num_cores)
        gpb = min(gpb, max(8, _round_up(_cdiv(total_prows, want_steps), 8)))
    steps = _cdiv(total_prows, gpb)
    prows = steps * gpb
    Gp = prows * pack

    # ---- pad + pack the activations (wrapper-side layout plumbing, plain XLA) ------
    q = in_feats
    if Gp != G:
        q = jnp.pad(q, ((0, Gp - G), (0, 0)))
        kv = jnp.pad(kv, ((0, Gp - G), (0, 0), (0, 0)))
    q = q.reshape(prows, Ep).astype(mxu_dtype)
    kv = kv.reshape(prows, pack, S, E).transpose(0, 2, 1, 3).reshape(prows, S, Ep)
    kv = kv.astype(mxu_dtype)

    # ---- weights: block-diagonal expansion for lane packing ------------------------
    w_in, b_in = params["in_proj_weight"], params["in_proj_bias"]
    w_out, b_out = params["out_proj_weight"], params["out_proj_bias"]
    eye = jnp.eye(pack, dtype=jnp.float32)

    w_q = jnp.kron(eye, w_in[:E].T).astype(mxu_dtype)                        # (Ep, Ep)
    b_q = jnp.tile(b_in[None, :E], (1, pack))                                # (1, Ep) f32
    w_kv = jnp.concatenate([jnp.kron(eye, w_in[E:2 * E].T),
                            jnp.kron(eye, w_in[2 * E:].T)],
                           axis=1).astype(mxu_dtype)                         # (Ep, 2Ep)
    b_kv = jnp.concatenate([jnp.tile(b_in[None, E:2 * E], (1, pack)),
                            jnp.tile(b_in[None, 2 * E:], (1, pack))],
                           axis=1)                                           # (1, 2Ep) f32
    w_o = jnp.kron(eye, w_out.T).astype(mxu_dtype)                           # (Ep, Ep)
    b_o = jnp.tile(b_out[None, :], (1, pack))                                # (1, Ep) f32

    # Head selector (exact 0/1 entries, NO scale folded in) and its transpose.
    sel_dtype = jnp.float32 if exact else jnp.bfloat16
    feat_head = jnp.arange(E) // head_dim
    sel = (feat_head[:, None] == jnp.arange(H)[None, :]).astype(jnp.float32)  # (E, H)
    sel_p = jnp.kron(eye, sel).astype(sel_dtype)                              # (Ep, Hp)
    selt_p = jnp.kron(eye, sel.T).astype(sel_dtype)                           # (Hp, Ep)

    kernel = _make_kernel(gpb, S, Ep, scale, exact)

    # ---- cost estimate: useful work only (no block-diag zeros / discarded cols) ----
    flops = (2 * G * E * E                   # Q projection
             + 2 * G * S * E * 2 * E         # fused KV projection
             + 2 * G * S * E                 # per-head q·k
             + 2 * G * S * E                 # attention-weighted value reduction
             + 2 * G * E * E)                # output projection
    bytes_accessed = (prows * Ep * wb + prows * S * Ep * wb + prows * Ep * 4
                      + (2 * Ep * Ep + Ep * 2 * Ep) * wb + 4 * Ep * 4
                      + 2 * Ep * Hp * sel_b)
    cost = pl.CostEstimate(flops=int(flops),
                           transcendentals=int(G * S * H),
                           bytes_accessed=int(bytes_accessed))

    vmem_limit = int(max(16 * 2**20, min(int(vmem_cap * 0.85), 110 * 2**20)))

    def _call(buffered):
        grid_spec = pltpu.PrefetchScalarGridSpec(
            num_scalar_prefetch=0,
            grid=(steps,),
            in_specs=[
                pl.BlockSpec((gpb, Ep), lambda g: (g, 0)),        # packed queries
                pl.BlockSpec((gpb, S, Ep), lambda g: (g, 0, 0)),  # packed key/value rows
                _const_spec((Ep, Ep), buffered),                  # W_q
                _const_spec((1, Ep), buffered),                   # b_q
                _const_spec((Ep, 2 * Ep), buffered),              # fused W_kv
                _const_spec((1, 2 * Ep), buffered),               # fused b_kv
                _const_spec((Ep, Ep), buffered),                  # W_o
                _const_spec((1, Ep), buffered),                   # b_o
                _const_spec((Ep, Hp), buffered),                  # head selector
                _const_spec((Hp, Ep), buffered),                  # head selector^T
            ],
            out_specs=pl.BlockSpec((gpb, Ep), lambda g: (g, 0)),
        )
        return pl.pallas_call(
            kernel,
            out_shape=jax.ShapeDtypeStruct((prows, Ep), jnp.float32),
            grid_spec=grid_spec,
            compiler_params=pltpu.CompilerParams(
                dimension_semantics=("parallel",),
                vmem_limit_bytes=vmem_limit),
            cost_estimate=cost,
        )(q, kv, w_q, b_q, w_kv, b_kv, w_o, b_o, sel_p, selt_p)

    try:
        out = _call(_HAS_BUFFERED)
    except Exception:
        if not _HAS_BUFFERED:
            raise
        out = _call(False)     # fallback: default double-buffered constants

    # ---- unpack lanes back to [G, E] (wrapper-side layout plumbing) ----------------
    out = out.reshape(prows, pack, E).reshape(Gp, E)[:G]
    return out


def attn_fusion_ref(in_feats, feats_list, params, num_heads):
    """Pure-JAX reference mirroring torch.nn.MultiheadAttention(batch_first=True)."""
    E = in_feats.shape[-1]
    H = num_heads
    d = E // H
    q = in_feats[:, None, :]
    kv_list = [f[:, None, :] if f.ndim == 2 else f for f in feats_list]
    kv = jnp.concatenate(kv_list, axis=1)
    G, S, _ = kv.shape

    w_in, b_in, w_out, b_out = (params["in_proj_weight"], params["in_proj_bias"],
                                params["out_proj_weight"], params["out_proj_bias"])
    qp = q @ w_in[:E].T + b_in[:E]
    kp = kv @ w_in[E:2 * E].T + b_in[E:2 * E]
    vp = kv @ w_in[2 * E:].T + b_in[2 * E:]

    qh = qp.reshape(G, 1, H, d).transpose(0, 2, 1, 3)
    kh = kp.reshape(G, S, H, d).transpose(0, 2, 1, 3)
    vh = vp.reshape(G, S, H, d).transpose(0, 2, 1, 3)

    scores = jnp.einsum("ghqd,ghkd->ghqk", qh, kh) / math.sqrt(d)
    p = jax.nn.softmax(scores, axis=-1)
    o = jnp.einsum("ghqk,ghkd->ghqd", p, vh)
    o = o.transpose(0, 2, 1, 3).reshape(G, 1, E)
    out = o @ w_out.T + b_out
    return out[:, 0, :]


if __name__ == "__main__":
    # Small deterministic setup: embed_dim=32, num_heads=4, 64 groups, 6 kv rows.
    G, E, H = 64, 32, 4
    key = jax.random.PRNGKey(0)
    k1, k2, k3, k4, k5, k6, k7 = jax.random.split(key, 7)

    params = {
        "in_proj_weight": 0.1 * jax.random.normal(k1, (3 * E, E), jnp.float32),
        "in_proj_bias":   0.1 * jax.random.normal(k2, (3 * E,), jnp.float32),
        "out_proj_weight": 0.1 * jax.random.normal(k3, (E, E), jnp.float32),
        "out_proj_bias":   0.1 * jax.random.normal(k4, (E,), jnp.float32),
    }

    in_feats = jax.random.normal(k5, (G, E), jnp.float32)
    feats_list = [
        jax.random.normal(k6, (G, E), jnp.float32),        # 2-D entry -> [G, 1, E]
        jax.random.normal(k7, (G, 5, E), jnp.float32),     # 3-D entry
    ]

    ref = attn_fusion_ref(in_feats, feats_list, params, num_heads=H)

    # Default config: bf16 MXU inputs, f32 accumulation / softmax.
    out_bf16 = jax.block_until_ready(
        attn_fusion(in_feats, feats_list, params, num_heads=H))
    assert out_bf16.shape == (G, E)
    assert jnp.allclose(out_bf16, ref, rtol=3e-2, atol=3e-2), (
        f"bf16 max abs err {jnp.max(jnp.abs(out_bf16 - ref))}")

    # Exact-f32 matmul / exact-divide variant (strict accuracy path).
    out_f32 = jax.block_until_ready(
        attn_fusion(in_feats, feats_list, params, num_heads=H, mxu_dtype=jnp.float32))
    assert jnp.allclose(out_f32, ref, rtol=1e-2, atol=1e-2), (
        f"f32 max abs err {jnp.max(jnp.abs(out_f32 - ref))}")

    print("KERNEL_OK")
</pallas_src>

<mosaic_0001>
module attributes {stable_mosaic.version = 11 : i64} {
  func.func @kernel(%arg0: i32, %arg1: memref<16x128xbf16, #tpu.memory_space<vmem>>, %arg2: memref<16x6x128xbf16, #tpu.memory_space<vmem>>, %arg3: memref<128x128xbf16, #tpu.memory_space<vmem>>, %arg4: memref<1x128xf32, #tpu.memory_space<vmem>>, %arg5: memref<128x256xbf16, #tpu.memory_space<vmem>>, %arg6: memref<1x256xf32, #tpu.memory_space<vmem>>, %arg7: memref<128x128xbf16, #tpu.memory_space<vmem>>, %arg8: memref<1x128xf32, #tpu.memory_space<vmem>>, %arg9: memref<128x16xbf16, #tpu.memory_space<vmem>>, %arg10: memref<16x128xbf16, #tpu.memory_space<vmem>>, %arg11: memref<16x128xf32, #tpu.memory_space<vmem>>) attributes {dimension_semantics = [#tpu.dimension_semantics<parallel>], iteration_bounds = array<i64: 1>, scalar_prefetch = 0 : i64, scratch_operands = 0 : i64, tpu.core_type = #tpu.core_type<tc>, window_params = [{transform_indices = @transform_0, window_bounds = array<i64: 16, 128>}, {transform_indices = @transform_1, window_bounds = array<i64: 16, 6, 128>}, {pipeline_mode = #tpu.pipeline_mode<synchronous>, transform_indices = @transform_2, window_bounds = array<i64: 128, 128>}, {pipeline_mode = #tpu.pipeline_mode<synchronous>, transform_indices = @transform_3, window_bounds = array<i64: 1, 128>}, {pipeline_mode = #tpu.pipeline_mode<synchronous>, transform_indices = @transform_4, window_bounds = array<i64: 128, 256>}, {pipeline_mode = #tpu.pipeline_mode<synchronous>, transform_indices = @transform_5, window_bounds = array<i64: 1, 256>}, {pipeline_mode = #tpu.pipeline_mode<synchronous>, transform_indices = @transform_6, window_bounds = array<i64: 128, 128>}, {pipeline_mode = #tpu.pipeline_mode<synchronous>, transform_indices = @transform_7, window_bounds = array<i64: 1, 128>}, {pipeline_mode = #tpu.pipeline_mode<synchronous>, transform_indices = @transform_8, window_bounds = array<i64: 128, 16>}, {pipeline_mode = #tpu.pipeline_mode<synchronous>, transform_indices = @transform_9, window_bounds = array<i64: 16, 128>}, {transform_indices = @transform_10, window_bounds = array<i64: 16, 128>}]} {
    %c0 = arith.constant 0 : index
    %c0_0 = arith.constant 0 : index
    %0 = vector.load %arg3[%c0, %c0_0] : memref<128x128xbf16, #tpu.memory_space<vmem>>, vector<128x128xbf16>
    %c0_1 = arith.constant 0 : index
    %c0_2 = arith.constant 0 : index
    %1 = vector.load %arg1[%c0_1, %c0_2] : memref<16x128xbf16, #tpu.memory_space<vmem>>, vector<16x128xbf16>
    %cst = arith.constant dense<0.000000e+00> : vector<16x128xf32>
    %2 = tpu.matmul %1, %0, %cst {dimension_numbers = #tpu.dot_dimension_numbers<[1], [0], [0], [1], [0, 0, 1, 1], [], []>} : vector<16x128xbf16>, vector<128x128xbf16>, vector<16x128xf32> -> vector<16x128xf32>
    %c0_3 = arith.constant 0 : index
    %c0_4 = arith.constant 0 : index
    %3 = vector.load %arg4[%c0_3, %c0_4] : memref<1x128xf32, #tpu.memory_space<vmem>>, vector<1x128xf32>
    %4 = vector.broadcast %3 : vector<1x128xf32> to vector<16x128xf32>
    %5 = arith.addf %2, %4 : vector<16x128xf32>
    %cst_5 = arith.constant 0.353553385 : f32
    %6 = vector.broadcast %cst_5 : f32 to vector<16x128xf32>
    %7 = arith.mulf %5, %6 : vector<16x128xf32>
    %c0_6 = arith.constant 0 : index
    %c0_7 = arith.constant 0 : index
    %8 = vector.load %arg5[%c0_6, %c0_7] : memref<128x256xbf16, #tpu.memory_space<vmem>>, vector<128x256xbf16>
    %c0_8 = arith.constant 0 : index
    %c0_9 = arith.constant 0 : index
    %c0_10 = arith.constant 0 : index
    %9 = vector.load %arg2[%c0_8, %c0_9, %c0_10] : memref<16x6x128xbf16, #tpu.memory_space<vmem>>, vector<16x6x128xbf16>
    %10 = vector.shape_cast %9 : vector<16x6x128xbf16> to vector<96x128xbf16>
    %cst_11 = arith.constant dense<0.000000e+00> : vector<96x256xf32>
    %11 = tpu.matmul %10, %8, %cst_11 {dimension_numbers = #tpu.dot_dimension_numbers<[1], [0], [0], [1], [0, 0, 1, 1], [], []>} : vector<96x128xbf16>, vector<128x256xbf16>, vector<96x256xf32> -> vector<96x256xf32>
    %c0_12 = arith.constant 0 : index
    %c0_13 = arith.constant 0 : index
    %12 = vector.load %arg6[%c0_12, %c0_13] : memref<1x256xf32, #tpu.memory_space<vmem>>, vector<1x256xf32>
    %13 = vector.broadcast %12 : vector<1x256xf32> to vector<96x256xf32>
    %14 = arith.addf %11, %13 : vector<96x256xf32>
    %15 = vector.shape_cast %14 : vector<96x256xf32> to vector<16x6x256xf32>
    %16 = vector.extract_strided_slice %15 {offsets = [0, 0, 0], sizes = [16, 6, 128], strides = [1, 1, 1]} : vector<16x6x256xf32> to vector<16x6x128xf32>
    %17 = vector.extract_strided_slice %15 {offsets = [0, 0, 128], sizes = [16, 6, 128], strides = [1, 1, 1]} : vector<16x6x256xf32> to vector<16x6x128xf32>
    %18 = vector.shape_cast %7 : vector<16x128xf32> to vector<16x1x128xf32>
    %19 = vector.broadcast %18 : vector<16x1x128xf32> to vector<16x6x128xf32>
    %20 = arith.mulf %19, %16 : vector<16x6x128xf32>
    %c0_14 = arith.constant 0 : index
    %c0_15 = arith.constant 0 : index
    %21 = vector.load %arg9[%c0_14, %c0_15] : memref<128x16xbf16, #tpu.memory_space<vmem>>, vector<128x16xbf16>
    %22 = vector.shape_cast %20 : vector<16x6x128xf32> to vector<96x128xf32>
    %23 = arith.truncf %22 : vector<96x128xf32> to vector<96x128xbf16>
    %cst_16 = arith.constant dense<0.000000e+00> : vector<96x16xf32>
    %24 = tpu.matmul %23, %21, %cst_16 {dimension_numbers = #tpu.dot_dimension_numbers<[1], [0], [0], [1], [0, 0, 1, 1], [], []>} : vector<96x128xbf16>, vector<128x16xbf16>, vector<96x16xf32> -> vector<96x16xf32>
    %25 = vector.shape_cast %24 : vector<96x16xf32> to vector<16x6x16xf32>
    %cst_17 = arith.constant dense<0xFF800000> : vector<16x16xf32>
    %26 = vector.multi_reduction <maximumf>, %25, %cst_17 [1] : vector<16x6x16xf32> to vector<16x16xf32>
    %27 = vector.shape_cast %26 : vector<16x16xf32> to vector<16x1x16xf32>
    %28 = vector.broadcast %27 : vector<16x1x16xf32> to vector<16x6x16xf32>
    %29 = arith.subf %25, %28 : vector<16x6x16xf32>
    %30 = math.exp %29 : vector<16x6x16xf32>
    %cst_18 = arith.constant dense<0.000000e+00> : vector<16x16xf32>
    %31 = vector.multi_reduction <add>, %30, %cst_18 [1] : vector<16x6x16xf32> to vector<16x16xf32>
    %32 = vector.shape_cast %31 : vector<16x16xf32> to vector<16x1x16xf32>
    %33 = tpu.reciprocal %32 {approx = true} : vector<16x1x16xf32> -> vector<16x1x16xf32>
    %34 = vector.broadcast %33 : vector<16x1x16xf32> to vector<16x6x16xf32>
    %35 = arith.mulf %30, %34 : vector<16x6x16xf32>
    %c0_19 = arith.constant 0 : index
    %c0_20 = arith.constant 0 : index
    %36 = vector.load %arg10[%c0_19, %c0_20] : memref<16x128xbf16, #tpu.memory_space<vmem>>, vector<16x128xbf16>
    %37 = vector.shape_cast %35 : vector<16x6x16xf32> to vector<96x16xf32>
    %38 = arith.truncf %37 : vector<96x16xf32> to vector<96x16xbf16>
    %cst_21 = arith.constant dense<0.000000e+00> : vector<96x128xf32>
    %39 = tpu.matmul %38, %36, %cst_21 {dimension_numbers = #tpu.dot_dimension_numbers<[1], [0], [0], [1], [0, 0, 1, 1], [], []>} : vector<96x16xbf16>, vector<16x128xbf16>, vector<96x128xf32> -> vector<96x128xf32>
    %40 = vector.shape_cast %39 : vector<96x128xf32> to vector<16x6x128xf32>
    %41 = arith.mulf %40, %17 : vector<16x6x128xf32>
    %cst_22 = arith.constant dense<0.000000e+00> : vector<16x128xf32>
    %42 = vector.multi_reduction <add>, %41, %cst_22 [1] : vector<16x6x128xf32> to vector<16x128xf32>
    %c0_23 = arith.constant 0 : index
    %c0_24 = arith.constant 0 : index
    %43 = vector.load %arg7[%c0_23, %c0_24] : memref<128x128xbf16, #tpu.memory_space<vmem>>, vector<128x128xbf16>
    %44 = arith.truncf %42 : vector<16x128xf32> to vector<16x128xbf16>
    %cst_25 = arith.constant dense<0.000000e+00> : vector<16x128xf32>
    %45 = tpu.matmul %44, %43, %cst_25 {dimension_numbers = #tpu.dot_dimension_numbers<[1], [0], [0], [1], [0, 0, 1, 1], [], []>} : vector<16x128xbf16>, vector<128x128xbf16>, vector<16x128xf32> -> vector<16x128xf32>
    %c0_26 = arith.constant 0 : index
    %c0_27 = arith.constant 0 : index
    %46 = vector.load %arg8[%c0_26, %c0_27] : memref<1x128xf32, #tpu.memory_space<vmem>>, vector<1x128xf32>
    %47 = vector.broadcast %46 : vector<1x128xf32> to vector<16x128xf32>
    %48 = arith.addf %45, %47 : vector<16x128xf32>
    %c0_28 = arith.constant 0 : index
    %c0_29 = arith.constant 0 : index
    %49 = vector.load %arg11[%c0_28, %c0_29] : memref<16x128xf32, #tpu.memory_space<vmem>>, vector<16x128xf32>
    tpu.vector_store %arg11[%c0_28, %c0_29], %48 {strides = array<i32>} : memref<16x128xf32, #tpu.memory_space<vmem>>, vector<16x128xf32>,
    return
  }
  func.func @transform_0(%arg0: i32) -> (i32, i32) {
    %c0_i32 = arith.constant 0 : i32
    %c0_i32_0 = arith.constant 0 : i32
    return %arg0, %c0_i32 : i32, i32
  }
  func.func @transform_1(%arg0: i32) -> (i32, i32, i32) {
    %c0_i32 = arith.constant 0 : i32
    %c0_i32_0 = arith.constant 0 : i32
    %c0_i32_1 = arith.constant 0 : i32
    return %arg0, %c0_i32, %c0_i32_0 : i32, i32, i32
  }
  func.func @transform_2(%arg0: i32) -> (i32, i32) {
    %c0_i32 = arith.constant 0 : i32
    %c0_i32_0 = arith.constant 0 : i32
    %c0_i32_1 = arith.constant 0 : i32
    return %c0_i32, %c0_i32_0 : i32, i32
  }
  func.func @transform_3(%arg0: i32) -> (i32, i32) {
    %c0_i32 = arith.constant 0 : i32
    %c0_i32_0 = arith.constant 0 : i32
    %c0_i32_1 = arith.constant 0 : i32
    return %c0_i32, %c0_i32_0 : i32, i32
  }
  func.func @transform_4(%arg0: i32) -> (i32, i32) {
    %c0_i32 = arith.constant 0 : i32
    %c0_i32_0 = arith.constant 0 : i32
    %c0_i32_1 = arith.constant 0 : i32
    return %c0_i32, %c0_i32_0 : i32, i32
  }
  func.func @transform_5(%arg0: i32) -> (i32, i32) {
    %c0_i32 = arith.constant 0 : i32
    %c0_i32_0 = arith.constant 0 : i32
    %c0_i32_1 = arith.constant 0 : i32
    return %c0_i32, %c0_i32_0 : i32, i32
  }
  func.func @transform_6(%arg0: i32) -> (i32, i32) {
    %c0_i32 = arith.constant 0 : i32
    %c0_i32_0 = arith.constant 0 : i32
    %c0_i32_1 = arith.constant 0 : i32
    return %c0_i32, %c0_i32_0 : i32, i32
  }
  func.func @transform_7(%arg0: i32) -> (i32, i32) {
    %c0_i32 = arith.constant 0 : i32
    %c0_i32_0 = arith.constant 0 : i32
    %c0_i32_1 = arith.constant 0 : i32
    return %c0_i32, %c0_i32_0 : i32, i32
  }
  func.func @transform_8(%arg0: i32) -> (i32, i32) {
    %c0_i32 = arith.constant 0 : i32
    %c0_i32_0 = arith.constant 0 : i32
    %c0_i32_1 = arith.constant 0 : i32
    return %c0_i32, %c0_i32_0 : i32, i32
  }
  func.func @transform_9(%arg0: i32) -> (i32, i32) {
    %c0_i32 = arith.constant 0 : i32
    %c0_i32_0 = arith.constant 0 : i32
    %c0_i32_1 = arith.constant 0 : i32
    return %c0_i32, %c0_i32_0 : i32, i32
  }
  func.func @transform_10(%arg0: i32) -> (i32, i32) {
    %c0_i32 = arith.constant 0 : i32
    %c0_i32_0 = arith.constant 0 : i32
    return %arg0, %c0_i32 : i32, i32
  }
}

module attributes {stable_mosaic.version = 11 : i64} {
  func.func @kernel(%arg0: i32, %arg1: memref<16x128xbf16, #tpu.memory_space<vmem>>, %arg2: memref<16x6x128xbf16, #tpu.memory_space<vmem>>, %arg3: memref<128x128xbf16, #tpu.memory_space<vmem>>, %arg4: memref<1x128xf32, #tpu.memory_space<vmem>>, %arg5: memref<128x256xbf16, #tpu.memory_space<vmem>>, %arg6: memref<1x256xf32, #tpu.memory_space<vmem>>, %arg7: memref<128x128xbf16, #tpu.memory_space<vmem>>, %arg8: memref<1x128xf32, #tpu.memory_space<vmem>>, %arg9: memref<128x16xbf16, #tpu.memory_space<vmem>>, %arg10: memref<16x128xbf16, #tpu.memory_space<vmem>>, %arg11: memref<16x128xf32, #tpu.memory_space<vmem>>) attributes {dimension_semantics = [#tpu.dimension_semantics<parallel>], iteration_bounds = array<i64: 1>, scalar_prefetch = 0 : i64, scratch_operands = 0 : i64, tpu.core_type = #tpu.core_type<tc>, window_params = [{transform_indices = @transform_0, window_bounds = array<i64: 16, 128>}, {transform_indices = @transform_1, window_bounds = array<i64: 16, 6, 128>}, {pipeline_mode = #tpu.pipeline_mode<synchronous>, transform_indices = @transform_2, window_bounds = array<i64: 128, 128>}, {pipeline_mode = #tpu.pipeline_mode<synchronous>, transform_indices = @transform_3, window_bounds = array<i64: 1, 128>}, {pipeline_mode = #tpu.pipeline_mode<synchronous>, transform_indices = @transform_4, window_bounds = array<i64: 128, 256>}, {pipeline_mode = #tpu.pipeline_mode<synchronous>, transform_indices = @transform_5, window_bounds = array<i64: 1, 256>}, {pipeline_mode = #tpu.pipeline_mode<synchronous>, transform_indices = @transform_6, window_bounds = array<i64: 128, 128>}, {pipeline_mode = #tpu.pipeline_mode<synchronous>, transform_indices = @transform_7, window_bounds = array<i64: 1, 128>}, {pipeline_mode = #tpu.pipeline_mode<synchronous>, transform_indices = @transform_8, window_bounds = array<i64: 128, 16>}, {pipeline_mode = #tpu.pipeline_mode<synchronous>, transform_indices = @transform_9, window_bounds = array<i64: 16, 128>}, {transform_indices = @transform_10, window_bounds = array<i64: 16, 128>}]} {
    %c0 = arith.constant 0 : index
    %c0_0 = arith.constant 0 : index
    %0 = vector.load %arg3[%c0, %c0_0] : memref<128x128xbf16, #tpu.memory_space<vmem>>, vector<128x128xbf16>
    %c0_1 = arith.constant 0 : index
    %c0_2 = arith.constant 0 : index
    %1 = vector.load %arg1[%c0_1, %c0_2] : memref<16x128xbf16, #tpu.memory_space<vmem>>, vector<16x128xbf16>
    %cst = arith.constant dense<0.000000e+00> : vector<16x128xf32>
    %2 = tpu.matmul %1, %0, %cst {dimension_numbers = #tpu.dot_dimension_numbers<[1], [0], [0], [1], [0, 0, 1, 1], [], []>} : vector<16x128xbf16>, vector<128x128xbf16>, vector<16x128xf32> -> vector<16x128xf32>
    %c0_3 = arith.constant 0 : index
    %c0_4 = arith.constant 0 : index
    %3 = vector.load %arg4[%c0_3, %c0_4] : memref<1x128xf32, #tpu.memory_space<vmem>>, vector<1x128xf32>
    %4 = vector.broadcast %3 : vector<1x128xf32> to vector<16x128xf32>
    %5 = arith.addf %2, %4 : vector<16x128xf32>
    %cst_5 = arith.constant 0.353553385 : f32
    %6 = vector.broadcast %cst_5 : f32 to vector<16x128xf32>
    %7 = arith.mulf %5, %6 : vector<16x128xf32>
    %c0_6 = arith.constant 0 : index
    %c0_7 = arith.constant 0 : index
    %8 = vector.load %arg5[%c0_6, %c0_7] : memref<128x256xbf16, #tpu.memory_space<vmem>>, vector<128x256xbf16>
    %c0_8 = arith.constant 0 : index
    %c0_9 = arith.constant 0 : index
    %c0_10 = arith.constant 0 : index
    %9 = vector.load %arg2[%c0_8, %c0_9, %c0_10] : memref<16x6x128xbf16, #tpu.memory_space<vmem>>, vector<16x6x128xbf16>
    %10 = vector.shape_cast %9 : vector<16x6x128xbf16> to vector<96x128xbf16>
    %cst_11 = arith.constant dense<0.000000e+00> : vector<96x256xf32>
    %11 = tpu.matmul %10, %8, %cst_11 {dimension_numbers = #tpu.dot_dimension_numbers<[1], [0], [0], [1], [0, 0, 1, 1], [], []>} : vector<96x128xbf16>, vector<128x256xbf16>, vector<96x256xf32> -> vector<96x256xf32>
    %c0_12 = arith.constant 0 : index
    %c0_13 = arith.constant 0 : index
    %12 = vector.load %arg6[%c0_12, %c0_13] : memref<1x256xf32, #tpu.memory_space<vmem>>, vector<1x256xf32>
    %13 = vector.broadcast %12 : vector<1x256xf32> to vector<96x256xf32>
    %14 = arith.addf %11, %13 : vector<96x256xf32>
    %15 = vector.shape_cast %14 : vector<96x256xf32> to vector<16x6x256xf32>
    %16 = vector.extract_strided_slice %15 {offsets = [0, 0, 0], sizes = [16, 6, 128], strides = [1, 1, 1]} : vector<16x6x256xf32> to vector<16x6x128xf32>
    %17 = vector.extract_strided_slice %15 {offsets = [0, 0, 128], sizes = [16, 6, 128], strides = [1, 1, 1]} : vector<16x6x256xf32> to vector<16x6x128xf32>
    %18 = vector.shape_cast %7 : vector<16x128xf32> to vector<16x1x128xf32>
    %19 = vector.broadcast %18 : vector<16x1x128xf32> to vector<16x6x128xf32>
    %20 = arith.mulf %19, %16 : vector<16x6x128xf32>
    %c0_14 = arith.constant 0 : index
    %c0_15 = arith.constant 0 : index
    %21 = vector.load %arg9[%c0_14, %c0_15] : memref<128x16xbf16, #tpu.memory_space<vmem>>, vector<128x16xbf16>
    %22 = vector.shape_cast %20 : vector<16x6x128xf32> to vector<96x128xf32>
    %23 = arith.truncf %22 : vector<96x128xf32> to vector<96x128xbf16>
    %cst_16 = arith.constant dense<0.000000e+00> : vector<96x16xf32>
    %24 = tpu.matmul %23, %21, %cst_16 {dimension_numbers = #tpu.dot_dimension_numbers<[1], [0], [0], [1], [0, 0, 1, 1], [], []>} : vector<96x128xbf16>, vector<128x16xbf16>, vector<96x16xf32> -> vector<96x16xf32>
    %25 = vector.shape_cast %24 : vector<96x16xf32> to vector<16x6x16xf32>
    %cst_17 = arith.constant dense<0xFF800000> : vector<16x16xf32>
    %26 = vector.multi_reduction <maximumf>, %25, %cst_17 [1] : vector<16x6x16xf32> to vector<16x16xf32>
    %27 = vector.shape_cast %26 : vector<16x16xf32> to vector<16x1x16xf32>
    %28 = vector.broadcast %27 : vector<16x1x16xf32> to vector<16x6x16xf32>
    %29 = arith.subf %25, %28 : vector<16x6x16xf32>
    %30 = math.exp %29 : vector<16x6x16xf32>
    %cst_18 = arith.constant dense<0.000000e+00> : vector<16x16xf32>
    %31 = vector.multi_reduction <add>, %30, %cst_18 [1] : vector<16x6x16xf32> to vector<16x16xf32>
    %32 = vector.shape_cast %31 : vector<16x16xf32> to vector<16x1x16xf32>
    %33 = tpu.reciprocal %32 {approx = true} : vector<16x1x16xf32> -> vector<16x1x16xf32>
    %34 = vector.broadcast %33 : vector<16x1x16xf32> to vector<16x6x16xf32>
    %35 = arith.mulf %30, %34 : vector<16x6x16xf32>
    %c0_19 = arith.constant 0 : index
    %c0_20 = arith.constant 0 : index
    %36 = vector.load %arg10[%c0_19, %c0_20] : memref<16x128xbf16, #tpu.memory_space<vmem>>, vector<16x128xbf16>
    %37 = vector.shape_cast %35 : vector<16x6x16xf32> to vector<96x16xf32>
    %38 = arith.truncf %37 : vector<96x16xf32> to vector<96x16xbf16>
    %cst_21 = arith.constant dense<0.000000e+00> : vector<96x128xf32>
    %39 = tpu.matmul %38, %36, %cst_21 {dimension_numbers = #tpu.dot_dimension_numbers<[1], [0], [0], [1], [0, 0, 1, 1], [], []>} : vector<96x16xbf16>, vector<16x128xbf16>, vector<96x128xf32> -> vector<96x128xf32>
    %40 = vector.shape_cast %39 : vector<96x128xf32> to vector<16x6x128xf32>
    %41 = arith.mulf %40, %17 : vector<16x6x128xf32>
    %cst_22 = arith.constant dense<0.000000e+00> : vector<16x128xf32>
    %42 = vector.multi_reduction <add>, %41, %cst_22 [1] : vector<16x6x128xf32> to vector<16x128xf32>
    %c0_23 = arith.constant 0 : index
    %c0_24 = arith.constant 0 : index
    %43 = vector.load %arg7[%c0_23, %c0_24] : memref<128x128xbf16, #tpu.memory_space<vmem>>, vector<128x128xbf16>
    %44 = arith.truncf %42 : vector<16x128xf32> to vector<16x128xbf16>
    %cst_25 = arith.constant dense<0.000000e+00> : vector<16x128xf32>
    %45 = tpu.matmul %44, %43, %cst_25 {dimension_numbers = #tpu.dot_dimension_numbers<[1], [0], [0], [1], [0, 0, 1, 1], [], []>} : vector<16x128xbf16>, vector<128x128xbf16>, vector<16x128xf32> -> vector<16x128xf32>
    %c0_26 = arith.constant 0 : index
    %c0_27 = arith.constant 0 : index
    %46 = vector.load %arg8[%c0_26, %c0_27] : memref<1x128xf32, #tpu.memory_space<vmem>>, vector<1x128xf32>
    %47 = vector.broadcast %46 : vector<1x128xf32> to vector<16x128xf32>
    %48 = arith.addf %45, %47 : vector<16x128xf32>
    %c0_28 = arith.constant 0 : index
    %c0_29 = arith.constant 0 : index
    %49 = vector.load %arg11[%c0_28, %c0_29] : memref<16x128xf32, #tpu.memory_space<vmem>>, vector<16x128xf32>
    tpu.vector_store %arg11[%c0_28, %c0_29], %48 {strides = array<i32>} : memref<16x128xf32, #tpu.memory_space<vmem>>, vector<16x128xf32>,
    return
  }
  func.func @transform_0(%arg0: i32) -> (i32, i32) {
    %c0_i32 = arith.constant 0 : i32
    %c0_i32_0 = arith.constant 0 : i32
    return %arg0, %c0_i32 : i32, i32
  }
  func.func @transform_1(%arg0: i32) -> (i32, i32, i32) {
    %c0_i32 = arith.constant 0 : i32
    %c0_i32_0 = arith.constant 0 : i32
    %c0_i32_1 = arith.constant 0 : i32
    return %arg0, %c0_i32, %c0_i32_0 : i32, i32, i32
  }
  func.func @transform_2(%arg0: i32) -> (i32, i32) {
    %c0_i32 = arith.constant 0 : i32
    %c0_i32_0 = arith.constant 0 : i32
    %c0_i32_1 = arith.constant 0 : i32
    return %c0_i32, %c0_i32_0 : i32, i32
  }
  func.func @transform_3(%arg0: i32) -> (i32, i32) {
    %c0_i32 = arith.constant 0 : i32
    %c0_i32_0 = arith.constant 0 : i32
    %c0_i32_1 = arith.constant 0 : i32
    return %c0_i32, %c0_i32_0 : i32, i32
  }
  func.func @transform_4(%arg0: i32) -> (i32, i32) {
    %c0_i32 = arith.constant 0 : i32
    %c0_i32_0 = arith.constant 0 : i32
    %c0_i32_1 = arith.constant 0 : i32
    return %c0_i32, %c0_i32_0 : i32, i32
  }
  func.func @transform_5(%arg0: i32) -> (i32, i32) {
    %c0_i32 = arith.constant 0 : i32
    %c0_i32_0 = arith.constant 0 : i32
    %c0_i32_1 = arith.constant 0 : i32
    return %c0_i32, %c0_i32_0 : i32, i32
  }
  func.func @transform_6(%arg0: i32) -> (i32, i32) {
    %c0_i32 = arith.constant 0 : i32
    %c0_i32_0 = arith.constant 0 : i32
    %c0_i32_1 = arith.constant 0 : i32
    return %c0_i32, %c0_i32_0 : i32, i32
  }
  func.func @transform_7(%arg0: i32) -> (i32, i32) {
    %c0_i32 = arith.constant 0 : i32
    %c0_i32_0 = arith.constant 0 : i32
    %c0_i32_1 = arith.constant 0 : i32
    return %c0_i32, %c0_i32_0 : i32, i32
  }
  func.func @transform_8(%arg0: i32) -> (i32, i32) {
    %c0_i32 = arith.constant 0 : i32
    %c0_i32_0 = arith.constant 0 : i32
    %c0_i32_1 = arith.constant 0 : i32
    return %c0_i32, %c0_i32_0 : i32, i32
  }
  func.func @transform_9(%arg0: i32) -> (i32, i32) {
    %c0_i32 = arith.constant 0 : i32
    %c0_i32_0 = arith.constant 0 : i32
    %c0_i32_1 = arith.constant 0 : i32
    return %c0_i32, %c0_i32_0 : i32, i32
  }
  func.func @transform_10(%arg0: i32) -> (i32, i32) {
    %c0_i32 = arith.constant 0 : i32
    %c0_i32_0 = arith.constant 0 : i32
    return %arg0, %c0_i32 : i32, i32
  }
}

</mosaic_0001>

<bundles_post_ra>
// kernel: tpu_custom_call.1
= control target key start
LH: loop header
LB: loop body
LE: loop exit
PB: predicated region body
PF: predicated region fallthrough
CT: control target
= control target key end

     0   :  { %15 = vsyncpa [#allocation3], 0  ;;  %s8531_s0 = inlined_call_operand.hbm [shape: bf16[16,128], index: 0, kind: input, shape index: {}]   ;;  %s8532_s1 = inlined_call_operand.hbm [shape: bf16[16,6,128], index: 1, kind: input, shape index: {}]   ;;  %s8533_s2 = inlined_call_operand.hbm [shape: bf16[128,128], index: 2, kind: input, shape index: {}]   ;;  %s8534_s3 = inlined_call_operand.hbm [shape: f32[1,128], index: 3, kind: input, shape index: {}]   ;;  %s8535_s4 = inlined_call_operand.hbm [shape: bf16[128,256], index: 4, kind: input, shape index: {}]   ;;  %s8536_s5 = inlined_call_operand.hbm [shape: f32[1,256], index: 5, kind: input, shape index: {}]   ;;  %s8537_s6 = inlined_call_operand.hbm [shape: bf16[128,128], index: 6, kind: input, shape index: {}]   ;;  %s8538_s7 = inlined_call_operand.hbm [shape: f32[1,128], index: 7, kind: input, shape index: {}]   ;;  %s8539_s8 = inlined_call_operand.hbm [shape: bf16[128,16], index: 8, kind: input, shape index: {}]   ;;  %s8540_s9 = inlined_call_operand.hbm [shape: bf16[16,128], index: 9, kind: input, shape index: {}]   ;;  %s8541_s10 = inlined_call_operand.hbm [shape: f32[16,128], index: 10, kind: output, shape index: {}]  }
   0x1   :  { %16 = vsyncpa [#allocation6], 0 }
   0x2   :  { %17 = vsyncpa [#allocation9], 0 }
   0x3   :  { %18 = vsyncpa [#allocation12], 0 }
   0x4   :  { %19 = vsyncpa [#allocation15], 0 }
   0x5   :  { %20 = vsyncpa [#allocation18], 0 }
   0x6   :  { %21 = vsyncpa [#allocation4], 0  ;;  %s6533_s13 = smov [#allocation5]   ;;  %s6534_s15 = smov [#allocation8]  }
   0x7   :  { %s39_s14 = sshll.u32 %s6533_s13, 4  ;;  %s64_s16 = sshll.u32 %s6534_s15, 4  ;;  %s40_s14 = int_to_ptr.vmem [resolvable:$true] %s39_s14  ;;  %s6608_s16 = int_to_ptr.vmem [resolvable:$true] %s64_s16 }
   0x8   :  { %s6277_s19 = scalar_lea.hbm %s8532_s1, 1024 }
   0x9   :  { %p6278_p0 = scmp.ne.s32.totalorder %s8532_s1, %s6277_s19  ;;  %p6281_p1 = scmp.lt.u32.totalorder %s6277_s19, %s8532_s1 }
   0xb   :  { %p6283_p2 = pnand %p6281_p1, %p6278_p0 }
   0xd   :  { %6286 = shalt.err (!%p6283_p2)
}
   0xe   :  { %s6287_s24 = scalar_lea.vmem %s40_s14, 1024  ;;  %p6292_p4 = scmp.lt.s32.totalorder %s40_s14, %s40_s14 }
   0xf   :  { %p6288_p3 = scmp.ne.s32.totalorder %s40_s14, %s6287_s24  ;;  %p6293_p5 = scmp.lt.s32.totalorder %s6287_s24, %s6287_s24 }
  0x11   :  { %p6294_p6 = por %p6293_p5, %p6292_p4 }
  0x13   :  { %p6295_p7 = pnand %p6294_p6, %p6288_p3 }
  0x15   :  { %6298 = shalt.err (!%p6295_p7)
}
  0x16   :  { %s6535_s25 = smov 64   ;;  %s6536_s26 = smov 4  }
  0x17   :  { %45 = dma.hbm_to_vmem [thread:$0]  %s8532_s1, 1024, %s40_s14, [#allocation6], %s6535_s25, %s6535_s25, %s6536_s26  }
  0x18   :  { %s6299_s11 = scalar_lea.hbm %s8534_s3, 16 }
  0x19   :  { %p6300_p8 = scmp.ne.s32.totalorder %s8534_s3, %s6299_s11  ;;  %p6303_p9 = scmp.lt.u32.totalorder %s6299_s11, %s8534_s3 }
  0x1b   :  { %p6305_p10 = pnand %p6303_p9, %p6300_p8 }
  0x1d   :  { %6308 = shalt.err (!%p6305_p10)
}
  0x1e   :  { %s6309_s18 = scalar_lea.vmem %s6608_s16, 16  ;;  %s6313_s1 = scalar_lea.vmem %s6608_s16, 32 }
  0x1f   :  { %p6310_p11 = scmp.ne.s32.totalorder %s6608_s16, %s6309_s18  ;;  %p6314_p12 = scmp.lt.s32.totalorder %s6608_s16, %s6608_s16 }
  0x20   :  { %p6315_p13 = scmp.lt.s32.totalorder %s6313_s1, %s6309_s18 }
  0x22   :  { %p6316_p0 = por %p6315_p13, %p6314_p12 }
  0x24   :  { %p6317_p1 = pnand %p6316_p0, %p6310_p11 }
  0x26   :  { %6320 = shalt.err (!%p6317_p1)
}
  0x27   :  { %67 = dma.hbm_to_vmem [thread:$0]  %s8534_s3, 16, %s6608_s16, [#allocation9]  }
  0x28   :  { %s6537_s20 = smov [#allocation11]   ;;  %s6538_s22 = smov [#allocation14]  }
  0x29   :  { %s86_s21 = sshll.u32 %s6537_s20, 4  ;;  %s108_s23 = sshll.u32 %s6538_s22, 4  ;;  %s87_s21 = int_to_ptr.vmem [resolvable:$true] %s86_s21  ;;  %s109_s23 = int_to_ptr.vmem [resolvable:$true] %s108_s23 }
  0x2a   :  { %s6321_s28 = scalar_lea.hbm %s8536_s5, 32 }
  0x2b   :  { %p6322_p2 = scmp.ne.s32.totalorder %s8536_s5, %s6321_s28  ;;  %p6325_p3 = scmp.lt.u32.totalorder %s6321_s28, %s8536_s5 }
  0x2d   :  { %p6327_p4 = pnand %p6325_p3, %p6322_p2 }
  0x2f   :  { %6330 = shalt.err (!%p6327_p4)
}
  0x30   :  { %s6331_s3 = scalar_lea.vmem %s87_s21, 32  ;;  %p6336_p6 = scmp.lt.s32.totalorder %s87_s21, %s87_s21 }
  0x31   :  { %p6332_p5 = scmp.ne.s32.totalorder %s87_s21, %s6331_s3  ;;  %p6337_p7 = scmp.lt.s32.totalorder %s6331_s3, %s6331_s3 }
  0x33   :  { %p6338_p8 = por %p6337_p7, %p6336_p6 }
  0x35   :  { %p6339_p9 = pnand %p6338_p8, %p6332_p5 }
  0x37   :  { %6342 = shalt.err (!%p6339_p9)
}
  0x38   :  { %89 = dma.hbm_to_vmem [thread:$0]  %s8536_s5, 32, %s87_s21, [#allocation12]  }
  0x39   :  { %s6343_s18 = scalar_lea.hbm %s8538_s7, 16 }
  0x3a   :  { %p6344_p10 = scmp.ne.s32.totalorder %s8538_s7, %s6343_s18  ;;  %p6347_p11 = scmp.lt.u32.totalorder %s6343_s18, %s8538_s7 }
  0x3c   :  { %p6349_p12 = pnand %p6347_p11, %p6344_p10 }
  0x3e   :  { %6352 = shalt.err (!%p6349_p12)
}
  0x3f   :  { %s6353_s22 = scalar_lea.vmem %s109_s23, 16  ;;  %s6357_s24 = scalar_lea.vmem %s109_s23, 32 }
  0x40   :  { %p6354_p13 = scmp.ne.s32.totalorder %s109_s23, %s6353_s22  ;;  %p6358_p0 = scmp.lt.s32.totalorder %s109_s23, %s109_s23 }
  0x41   :  { %p6359_p1 = scmp.lt.s32.totalorder %s6357_s24, %s6353_s22 }
  0x43   :  { %p6360_p2 = por %p6359_p1, %p6358_p0 }
  0x45   :  { %p6361_p3 = pnand %p6360_p2, %p6354_p13 }
  0x47   :  { %6364 = shalt.err (!%p6361_p3)
}
  0x48   :  { %111 = dma.hbm_to_vmem [thread:$0]  %s8538_s7, 16, %s109_s23, [#allocation15]  }
  0x49   :  { %s6539_s27 = smov [#allocation2]   ;;  %s6540_s29 = smov [#allocation7]  }
  0x4a   :  { %s27_s28 = sshll.u32 %s6539_s27, 4  ;;  %s51_s30 = sshll.u32 %s6540_s29, 4  ;;  %s28_s28 = int_to_ptr.vmem [resolvable:$true] %s27_s28  ;;  %s6667_s30 = int_to_ptr.vmem [resolvable:$true] %s51_s30 }
  0x4b   :  { %s6365_s3 = scalar_lea.hbm %s8531_s0, 128 }
  0x4c   :  { %p6366_p4 = scmp.ne.s32.totalorder %s8531_s0, %s6365_s3  ;;  %p6369_p5 = scmp.lt.u32.totalorder %s6365_s3, %s8531_s0 }
  0x4e   :  { %p6371_p6 = pnand %p6369_p5, %p6366_p4 }
  0x50   :  { %6374 = shalt.err (!%p6371_p6)
}
  0x51   :  { %s6375_s7 = scalar_lea.vmem %s28_s28, 128  ;;  %p6380_p8 = scmp.lt.s32.totalorder %s28_s28, %s28_s28 }
  0x52   :  { %p6376_p7 = scmp.ne.s32.totalorder %s28_s28, %s6375_s7  ;;  %p6381_p9 = scmp.lt.s32.totalorder %s6375_s7, %s6375_s7 }
  0x54   :  { %p6382_p10 = por %p6381_p9, %p6380_p8 }
  0x56   :  { %p6383_p11 = pnand %p6382_p10, %p6376_p7 }
  0x58   :  { %6386 = shalt.err (!%p6383_p11)
}
  0x59   :  { %33 = dma.hbm_to_vmem [thread:$0]  %s8531_s0, 128, %s28_s28, [#allocation3], %s6535_s25, %s6535_s25, %s6536_s26  }
  0x5a   :  { %s6387_s19 = scalar_lea.hbm %s8533_s2, 1024 }
  0x5b   :  { %p6388_p12 = scmp.ne.s32.totalorder %s8533_s2, %s6387_s19  ;;  %p6391_p13 = scmp.lt.u32.totalorder %s6387_s19, %s8533_s2 }
  0x5d   :  { %p6393_p0 = pnand %p6391_p13, %p6388_p12 }
  0x5f   :  { %6396 = shalt.err (!%p6393_p0)
}
  0x60   :  { %s6397_s21 = scalar_lea.vmem %s6667_s30, 1024  ;;  %p6402_p2 = scmp.lt.s32.totalorder %s6667_s30, %s6667_s30 }
  0x61   :  { %p6398_p1 = scmp.ne.s32.totalorder %s6667_s30, %s6397_s21  ;;  %p6403_p3 = scmp.lt.s32.totalorder %s6397_s21, %s6397_s21 }
  0x63   :  { %p6404_p4 = por %p6403_p3, %p6402_p2 }
  0x65   :  { %p6405_p5 = pnand %p6404_p4, %p6398_p1 }
  0x67   :  { %6408 = shalt.err (!%p6405_p5)
}
  0x68   :  { %57 = dma.hbm_to_vmem [thread:$0]  %s8533_s2, 1024, %s6667_s30, [#allocation6], %s6535_s25, %s6535_s25, %s6536_s26  }
  0x69   :  { %s6541_s28 = smov [#allocation10]   ;;  %s6409_s3 = scalar_lea.hbm %s8535_s4, 2048 }
  0x6a   :  { %s73_s29 = sshll.u32 %s6541_s28, 4  ;;  %p6410_p6 = scmp.ne.s32.totalorder %s8535_s4, %s6409_s3  ;;  %s74_s29 = int_to_ptr.vmem [resolvable:$true] %s73_s29 }
  0x6b   :  { %p6413_p7 = scmp.lt.u32.totalorder %s6409_s3, %s8535_s4 }
  0x6d   :  { %p6415_p8 = pnand %p6413_p7, %p6410_p6 }
  0x6f   :  { %6418 = shalt.err (!%p6415_p8)
}
  0x70   :  { %s6419_s7 = scalar_lea.vmem %s74_s29, 2048  ;;  %p6424_p10 = scmp.lt.s32.totalorder %s74_s29, %s74_s29 }
  0x71   :  { %p6420_p9 = scmp.ne.s32.totalorder %s74_s29, %s6419_s7  ;;  %p6425_p11 = scmp.lt.s32.totalorder %s6419_s7, %s6419_s7 }
  0x73   :  { %p6426_p12 = por %p6425_p11, %p6424_p10 }
  0x75   :  { %p6427_p13 = pnand %p6426_p12, %p6420_p9 }
  0x77   :  { %6430 = shalt.err (!%p6427_p13)
}
  0x78   :  { %s6542_s2 = smov 128   ;;  %s6543_s30 = smov 8  }
  0x79   :  { %79 = dma.hbm_to_vmem [thread:$0]  %s8535_s4, 2048, %s74_s29, [#allocation9], %s6542_s2, %s6542_s2, %s6543_s30  }
  0x7a   :  { %s6544_s1 = smov [#allocation13]   ;;  %s6545_s19 = smov [#allocation16]  }
  0x7b   :  { %s95_s14 = sshll.u32 %s6544_s1, 4  ;;  %s117_s20 = sshll.u32 %s6545_s19, 4  ;;  %s96_s14 = int_to_ptr.vmem [resolvable:$true] %s95_s14  ;;  %s118_s20 = int_to_ptr.vmem [resolvable:$true] %s117_s20 }
  0x7c   :  { %s6431_s5 = scalar_lea.hbm %s8537_s6, 1024 }
  0x7d   :  { %p6432_p0 = scmp.ne.s32.totalorder %s8537_s6, %s6431_s5  ;;  %p6435_p1 = scmp.lt.u32.totalorder %s6431_s5, %s8537_s6 }
  0x7f   :  { %p6437_p2 = pnand %p6435_p1, %p6432_p0 }
  0x81   :  { %6440 = shalt.err (!%p6437_p2)
}
  0x82   :  { %s6441_s4 = scalar_lea.vmem %s96_s14, 1024  ;;  %p6446_p4 = scmp.lt.s32.totalorder %s96_s14, %s96_s14 }
  0x83   :  { %p6442_p3 = scmp.ne.s32.totalorder %s96_s14, %s6441_s4  ;;  %p6447_p5 = scmp.lt.s32.totalorder %s6441_s4, %s6441_s4 }
  0x85   :  { %p6448_p6 = por %p6447_p5, %p6446_p4 }
  0x87   :  { %p6449_p7 = pnand %p6448_p6, %p6442_p3 }
  0x89   :  { %6452 = shalt.err (!%p6449_p7)
}
  0x8a   :  { %101 = dma.hbm_to_vmem [thread:$0]  %s8537_s6, 1024, %s96_s14, [#allocation12], %s6535_s25, %s6535_s25, %s6536_s26  }
  0x8b   :  { %s6453_s16 = scalar_lea.hbm %s8539_s8, 1024 }
  0x8c   :  { %p6454_p8 = scmp.ne.s32.totalorder %s8539_s8, %s6453_s16  ;;  %p6457_p9 = scmp.lt.u32.totalorder %s6453_s16, %s8539_s8 }
  0x8e   :  { %p6459_p10 = pnand %p6457_p9, %p6454_p8 }
  0x90   :  { %6462 = shalt.err (!%p6459_p10)
}
  0x91   :  { %s6463_s23 = scalar_lea.vmem %s118_s20, 1024  ;;  %p6468_p12 = scmp.lt.s32.totalorder %s118_s20, %s118_s20 }
  0x92   :  { %p6464_p11 = scmp.ne.s32.totalorder %s118_s20, %s6463_s23  ;;  %p6469_p13 = scmp.lt.s32.totalorder %s6463_s23, %s6463_s23 }
  0x94   :  { %p6470_p0 = por %p6469_p13, %p6468_p12 }
  0x96   :  { %p6471_p1 = pnand %p6470_p0, %p6464_p11 }
  0x98   :  { %6474 = shalt.err (!%p6471_p1)
}
  0x99   :  { %123 = dma.hbm_to_vmem [thread:$0]  %s8539_s8, 1024, %s118_s20, [#allocation15], %s6535_s25, %s6535_s25, %s6536_s26  }
  0x9a   :  { %s6546_s1 = smov [#allocation17]   ;;  %s6475_s24 = scalar_lea.hbm %s8540_s9, 128 }
  0x9b   :  { %s129_s14 = sshll.u32 %s6546_s1, 4  ;;  %p6476_p2 = scmp.ne.s32.totalorder %s8540_s9, %s6475_s24  ;;  %s130_s14 = int_to_ptr.vmem [resolvable:$true] %s129_s14 }
  0x9c   :  { %p6479_p3 = scmp.lt.u32.totalorder %s6475_s24, %s8540_s9 }
  0x9e   :  { %p6481_p4 = pnand %p6479_p3, %p6476_p2 }
  0xa0   :  { %6484 = shalt.err (!%p6481_p4)
}
  0xa1   :  { %s6485_s28 = scalar_lea.vmem %s130_s14, 128  ;;  %p6490_p6 = scmp.lt.s32.totalorder %s130_s14, %s130_s14 }
  0xa2   :  { %p6486_p5 = scmp.ne.s32.totalorder %s130_s14, %s6485_s28  ;;  %p6491_p7 = scmp.lt.s32.totalorder %s6485_s28, %s6485_s28 }
  0xa4   :  { %p6492_p8 = por %p6491_p7, %p6490_p6 }
  0xa6   :  { %p6493_p9 = pnand %p6492_p8, %p6486_p5 }
  0xa8   :  { %6496 = shalt.err (!%p6493_p9)
}
  0xa9   :  { %135 = dma.hbm_to_vmem [thread:$0]  %s8540_s9, 128, %s130_s14, [#allocation18], %s6535_s25, %s6535_s25, %s6536_s26  }
  0xaa   :  { %6519 = dma.done.wait [#allocation3], 128  }
  0xab   :  { %6520 = vsyncadd [#allocation3], 4294967168 }
  0xac   :  { %6521 = dma.done.wait [#allocation6], 2048  }
  0xad   :  { %6522 = vsyncadd [#allocation6], 4294965248 }
  0xae   :  { %6523 = dma.done.wait [#allocation9], 2064  }
  0xaf   :  { %6524 = vsyncadd [#allocation9], 4294965232 }
  0xb0   :  { %6525 = dma.done.wait [#allocation12], 1056  }
  0xb1   :  { %6526 = vsyncadd [#allocation12], 4294966240 }
  0xb2   :  { %6527 = dma.done.wait [#allocation15], 1040  }
  0xb3   :  { %6528 = vsyncadd [#allocation15], 4294966256 }
  0xb4   :  { %6529 = dma.done.wait [#allocation18], 128  }
  0xb5   :  { %6530 = vsyncadd [#allocation18], 4294967168  ;;  %v8542_v0 = vmov 0.0   ;;  %v6548_v1 = vmov 0   ;;  %vm6549_vm0 = vmmov 0   ;;  %v6102_v4 = vld [vmem:[#allocation7] sm:$0xff]   ;;  %v348_v14 = vlaneseq }
  0xb6   :  { %5997 = vmatprep.subr.bf16.mxu0 %v8542_v0  ;;  %1129 = vmatprep.mubr.bf16.mxu1 %v6548_v1  ;;  %v6099_v2 = vld [vmem:[#allocation10 + $0x4] ss:$8 sps:$4 sm:$0xff]   ;;  %v6101_v3 = vld [vmem:[#allocation10] ss:$8 sps:$4 sm:$0xff]   ;;  %v6103_v5 = vld [vmem:[#allocation10 + $0x14] ss:$8 sps:$4 sm:$0xff]  }
  0xb7   :  { %6013 = vmatprep.mubr.msk.bf16.mxu0 %vm6549_vm0, %v8542_v0  ;;  %1097 = vmatprep.subr.bf16.mxu1 %v6099_v2  ;;  %v6105_v6 = vld [vmem:[#allocation10 + $0x10] ss:$8 sps:$4 sm:$0xff]   ;;  %v6106_v7 = vld [vmem:[#allocation7 + $0x8] sm:$0xff]   ;;  %v6111_v11 = vld [vmem:[#allocation10 + $0x34] ss:$8 sps:$4 sm:$0xff]   ;;  %v6770_v19 = vshrl.u32 %v348_v14, 7 }
  0xb8   :  { %1098 = vmatpush1.bf16.msra.mxu1 %v6101_v3  ;;  %5998 = vmatpush3.bf16.msra.mxu0 %v6102_v4  ;;  %v6107_v8 = vld [vmem:[#allocation10 + $0x24] ss:$8 sps:$4 sm:$0xff]   ;;  %v6109_v9 = vld [vmem:[#allocation10 + $0x20] ss:$8 sps:$4 sm:$0xff]   ;;  %v6550_v12 = vmov 1966171168  }
  0xb9   :  { %1099 = vmatprep.subr.bf16.mxu1 %v6103_v5  ;;  %5999 = vmatprep.subr.bf16.mxu0 %v8542_v0  ;;  %v6110_v10 = vld [vmem:[#allocation7 + $0x10] sm:$0xff]   ;;  %v346_v13 = vunpack.c.l.s4 %v6550_v12  ;;  %v6114_v16 = vld [vmem:[#allocation7 + $0x18] sm:$0xff]   ;;  %v6117_v20 = vld [vmem:[#allocation10 + $0x40] ss:$8 sps:$4 sm:$0xff]   ;;  %vm3073_vm1 = vcmask 128000   ;;  %vm4744_vm2 = vcmask 130048  }
  0xba   :  { %v6113_v15 = vld [vmem:[#allocation10 + $0x30] ss:$8 sps:$4 sm:$0xff]   ;;  %v6115_v17 = vld [vmem:[#allocation10 + $0x44] ss:$8 sps:$4 sm:$0xff]   ;;  %v6119_v22 = vld [vmem:[#allocation10 + $0x54] ss:$8 sps:$4 sm:$0xff]  }
  0xbb   :  { %v347_v18 = vunpack.c.0.s8 %v346_v13  ;;  %v6118_v21 = vld [vmem:[#allocation7 + $0x20] sm:$0xff]   ;;  %v6121_v24 = vld [vmem:[#allocation10 + $0x50] ss:$8 sps:$4 sm:$0xff]   ;;  %v6122_v25 = vld [vmem:[#allocation7 + $0x28] sm:$0xff]   ;;  %vm5572_vm3 = vcmask 1045504   ;;  %vm5756_vm4 = vcmask 1041409  }
  0xbc   :  { %1100 = vmatpush1.bf16.msra.mxu1 %v6105_v6  ;;  %6000 = vmatpush3.bf16.msra.mxu0 %v6106_v7  ;;  %v5902_v26 = vld.sshfl [vmem:[#allocation5] sm:$0x13 pattern:$0x75316420]  ;;  %v6123_v27 = vld [vmem:[#allocation10 + $0x64] ss:$8 sps:$4 sm:$0xff]  }
  0xbd   :  { %1101 = vmatprep.subr.bf16.mxu1 %v6107_v8  ;;  %6001 = vmatprep.subr.bf16.mxu0 %v8542_v0  ;;  %v6774_v23 = vsub.s32 %v347_v18, %v6770_v19  ;;  %v5903_v28 = vld.sshfl [vmem:[#allocation5 + $0x4] sm:$0x13 pattern:$0x75316420]  ;;  %v344_v29 = vcombine.high %v5902_v26, %v5902_v26  ;;  %v6126_v35 = vld [vmem:[#allocation7 + $0x30] sm:$0xff]   ;;  %v6130_v60 = vld [vmem:[#allocation7 + $0x38] sm:$0xff]  }
  0xbe   :  { %v6125_v31 = vld [vmem:[#allocation10 + $0x60] ss:$8 sps:$4 sm:$0xff]   ;;  %v367_v33 = vcombine.high %v5903_v28, %v5903_v28  ;;  %v6127_v36 = vld [vmem:[#allocation10 + $0x74] ss:$8 sps:$4 sm:$0xff]   ;;  %v6129_v59 = vld [vmem:[#allocation10 + $0x70] ss:$8 sps:$4 sm:$0xff]  }
  0xbf   :  { %v351_v30 = vrot.slane %v5902_v26, %v6774_v23  ;;  %v5904_v32 = vld.sshfl [vmem:[#allocation5 + $0x8] sm:$0x13 pattern:$0x75316420]  ;;  %v374_v34 = vrot.slane %v5903_v28, %v6774_v23  ;;  %v358_v37 = vrot.slane %v344_v29, %v6774_v23  ;;  %vm5758_vm5 = vcmask 1042434   ;;  %s6552_s9 = smov [#allocation19]  }
  0xc0   :  { %1102 = vmatpush1.bf16.msra.mxu1 %v6109_v9  ;;  %6002 = vmatpush3.bf16.msra.mxu0 %v6110_v10  ;;  %v390_v39 = vcombine.high %v5904_v32, %v5904_v32  ;;  %v397_v40 = vrot.slane %v5904_v32, %v6774_v23  ;;  %v5905_v41 = vld.sshfl [vmem:[#allocation5 + $0xc] sm:$0x13 pattern:$0x75316420]  ;;  %v381_v42 = vrot.slane %v367_v33, %v6774_v23  ;;  %vm5760_vm6 = vcmask 1043459   ;;  %s5875_s25 = sshll.u32 %s6552_s9, 4  ;;  %s5876_s25 = int_to_ptr.vmem [resolvable:$true] %s5875_s25 }
  0xc1   :  { %1103 = vmatprep.subr.bf16.mxu1 %v6111_v11  ;;  %6003 = vmatprep.subr.bf16.mxu0 %v8542_v0  ;;  %v359_v38 = vcombine.high %v351_v30, %v351_v30  ;;  %v382_v43 = vcombine.high %v374_v34, %v374_v34  ;;  %v5906_v44 = vld.sshfl [vmem:[#allocation5 + $0x10] sm:$0x13 pattern:$0x75316420]  ;;  %v413_v45 = vcombine.high %v5905_v41, %v5905_v41  ;;  %vm5762_vm7 = vcmask 1044484   ;;  %s6497_s26 = scalar_lea.vmem %s5876_s25, 256  ;;  %p6502_p11 = scmp.lt.s32.totalorder %s5876_s25, %s5876_s25 }
  0xc2   :  { %v420_v46 = vrot.slane %v5905_v41, %v6774_v23  ;;  %v404_v47 = vrot.slane %v390_v39, %v6774_v23  ;;  %v717_v48 = vcombine.low %v351_v30, %v358_v37  ;;  %v5907_v50 = vld.sshfl [vmem:[#allocation5 + $0x14] sm:$0x13 pattern:$0x75316420]  ;;  %v405_v52 = vcombine.high %v397_v40, %v397_v40  ;;  %p6498_p10 = scmp.ne.s32.totalorder %s5876_s25, %s6497_s26  ;;  %p6503_p12 = scmp.lt.s32.totalorder %s6497_s26, %s6497_s26 }
  0xc3   :  { %v718_v49 = vcombine.low %v359_v38, %v374_v34  ;;  %v719_v51 = vcombine.low %v381_v42, %v382_v43  ;;  %v427_v53 = vrot.slane %v413_v45, %v6774_v23  ;;  %v436_v58 = vcombine.high %v5906_v44, %v5906_v44  ;;  %v5908_v6 = vld.sshfl [vmem:[#allocation5 + $0x18] sm:$0x13 pattern:$0x75316420] }
  0xc4   :  { %1104 = vmatpush1.bf16.msra.mxu1 %v6113_v15  ;;  %6004 = vmatpush3.bf16.msra.mxu0 %v6114_v16  ;;  %v428_v54 = vcombine.high %v420_v46, %v420_v46  ;;  %v720_v55 = vcombine.low %v397_v40, %v404_v47  ;;  %v727_v56 = vrot.slane %v717_v48, %v6774_v23  ;;  %v5909_v10 = vld.sshfl [vmem:[#allocation5 + $0x1c] sm:$0x13 pattern:$0x75316420]  ;;  %vm5764_vm8 = vcmask 1045509   ;;  %p6504_p13 = por %p6503_p12, %p6502_p11 }
  0xc5   :  { %1105 = vmatprep.subr.bf16.mxu1 %v6115_v17  ;;  %6005 = vmatprep.subr.bf16.mxu0 %v8542_v0  ;;  %v734_v57 = vrot.slane %v718_v49, %v6774_v23  ;;  %v741_v61 = vrot.slane %v719_v51, %v6774_v23  ;;  %v443_v62 = vrot.slane %v5906_v44, %v6774_v23  ;;  %v6131_v16 = vld [vmem:[#allocation2] sm:$0xff]   ;;  %v5912_v41 = vld.sshfl [vmem:[#allocation5 + $0x28] sm:$0x13 pattern:$0x75316420]  ;;  %vm5766_vm9 = vcmask 1046534  }
  0xc6   :  { %v466_v63 = vrot.slane %v5907_v50, %v6774_v23  ;;  %v766_v2 = vcombine.low %v405_v52, %v420_v46  ;;  %v748_v3 = vrot.slane %v720_v55, %v6774_v23  ;;  %v450_v5 = vrot.slane %v436_v58, %v6774_v23  ;;  %v5913_v46 = vld.sshfl [vmem:[#allocation5 + $0x2c] sm:$0x13 pattern:$0x75316420]  ;;  %p6505_p0 = pnand %p6504_p13, %p6498_p10 }
  0xc7   :  { %v749_v4 = vcombine.low %v727_v56, %v734_v57  ;;  %v451_v7 = vcombine.high %v443_v62, %v443_v62  ;;  %v767_v8 = vcombine.low %v427_v53, %v428_v54  ;;  %v459_v11 = vcombine.high %v5907_v50, %v5907_v50 }
  0xc8   :  { %1106 = vmatpush1.bf16.msra.mxu1 %v6117_v20  ;;  %6006 = vmatpush3.bf16.msra.mxu0 %v6118_v21  ;;  %v776_v9 = vrot.slane %v766_v2, %v6774_v23  ;;  %v750_v12 = vcombine.low %v741_v61, %v748_v3  ;;  %v768_v14 = vcombine.low %v443_v62, %v450_v5  ;;  %vm5768_vm10 = vcmask 1047559  }
  0xc9   :  { %1107 = vmatprep.subr.bf16.mxu1 %v6119_v22  ;;  %6007 = vmatprep.subr.bf16.mxu0 %v8542_v0  ;;  %v757_v13 = vrot.slane %v749_v4, %v6774_v23  ;;  %v474_v15 = vcombine.high %v466_v63, %v466_v63  ;;  %v769_v17 = vcombine.low %v451_v7, %v466_v63 }
  0xca   :  { %v783_v18 = vrot.slane %v767_v8, %v6774_v23  ;;  %v473_v20 = vrot.slane %v459_v11, %v6774_v23  ;;  %v482_v21 = vcombine.high %v5908_v6, %v5908_v6  ;;  %v764_v22 = vrot.slane %v750_v12, %v6774_v23 }
  0xcb   :  { %v505_v26 = vcombine.high %v5909_v10, %v5909_v10  ;;  %v512_v30 = vrot.slane %v5909_v10, %v6774_v23  ;;  %v574_v61 = vcombine.high %v5912_v41, %v5912_v41  ;;  %v581_v62 = vrot.slane %v5912_v41, %v6774_v23 }
  0xcc   :  { %1108 = vmatpush1.bf16.msra.mxu1 %v6121_v24  ;;  %6008 = vmatpush3.bf16.msra.mxu0 %v6122_v25  ;;  %v790_v24 = vrot.slane %v768_v14, %v6774_v23  ;;  %v489_v25 = vrot.slane %v5908_v6, %v6774_v23  ;;  %v798_v28 = vcombine.low %v776_v9, %v783_v18  ;;  %v5915_v9 = vld.sshfl [vmem:[#allocation5 + $0x34] sm:$0x13 pattern:$0x75316420] }
  0xcd   :  { %1109 = vmatprep.subr.bf16.mxu1 %v6123_v27  ;;  %6009 = vmatprep.subr.bf16.mxu0 %v8542_v0  ;;  %v797_v27 = vrot.slane %v769_v17, %v6774_v23  ;;  %v496_v29 = vrot.slane %v482_v21, %v6774_v23  ;;  %v765_v32 = vcombine.low %v757_v13, %v764_v22 }
  0xce   :  { %v497_v33 = vcombine.high %v489_v25, %v489_v25  ;;  %v519_v34 = vrot.slane %v505_v26, %v6774_v23  ;;  %v806_v38 = vrot.slane %v798_v28, %v6774_v23  ;;  %v520_v39 = vcombine.high %v512_v30, %v512_v30  ;;  %v5916_v28 = vld.sshfl [vmem:[#allocation5 + $0x38] sm:$0x13 pattern:$0x75316420] }
  0xcf   :  { %v799_v37 = vcombine.low %v790_v24, %v797_v27  ;;  %v816_v40 = vcombine.low %v489_v25, %v496_v29  ;;  %v597_v5 = vcombine.high %v5913_v46, %v5913_v46  ;;  %v588_v6 = vrot.slane %v574_v61, %v6774_v23 }
  0xd0   :  { %1110 = vmatpush1.bf16.msra.mxu1 %v6125_v31  ;;  %6010 = vmatpush3.bf16.msra.mxu0 %v6126_v35  ;;  %v5910_v31 = vld.sshfl [vmem:[#allocation5 + $0x20] sm:$0x13 pattern:$0x75316420]  ;;  %v815_v35 = vcombine.low %v473_v20, %v474_v15  ;;  %v817_v42 = vcombine.low %v497_v33, %v512_v30  ;;  %v818_v48 = vcombine.low %v519_v34, %v520_v39 }
  0xd1   :  { %1111 = vmatprep.subr.bf16.mxu1 %v6127_v36  ;;  %6011 = vmatprep.subr.bf16.mxu0 %v8542_v0  ;;  %v5911_v36 = vld.sshfl [vmem:[#allocation5 + $0x24] sm:$0x13 pattern:$0x75316420]  ;;  %v528_v44 = vcombine.high %v5910_v31, %v5910_v31  ;;  %v535_v45 = vrot.slane %v5910_v31, %v6774_v23  ;;  %v813_v47 = vrot.slane %v799_v37, %v6774_v23 }
  0xd2   :  { %v825_v43 = vrot.slane %v815_v35, %v6774_v23  ;;  %v832_v49 = vrot.slane %v816_v40, %v6774_v23  ;;  %v551_v50 = vcombine.high %v5911_v36, %v5911_v36  ;;  %v839_v51 = vrot.slane %v817_v42, %v6774_v23  ;;  %v5917_v31 = vld.sshfl [vmem:[#allocation5 + $0x3c] sm:$0x13 pattern:$0x75316420] }
  0xd3   :  { %v542_v52 = vrot.slane %v528_v44, %v6774_v23  ;;  %v543_v53 = vcombine.high %v535_v45, %v535_v45  ;;  %v558_v54 = vrot.slane %v5911_v36, %v6774_v23  ;;  %v814_v55 = vcombine.low %v806_v38, %v813_v47 }
  0xd4   :  { %1112 = vmatpush1.bf16.msra.mxu1 %v6129_v59  ;;  %6012 = vmatpush3.bf16.msra.mxu0 %v6130_v60  ;;  %v846_v56 = vrot.slane %v818_v48, %v6774_v23  ;;  %v847_v57 = vcombine.low %v825_v43, %v832_v49  ;;  %v565_v58 = vrot.slane %v551_v50, %v6774_v23  ;;  %v5914_v59 = vld.sshfl [vmem:[#allocation5 + $0x30] sm:$0x13 pattern:$0x75316420] }
  0xd5   :  { %v566_v60 = vcombine.high %v558_v54, %v558_v54  ;;  %v864_v63 = vcombine.low %v535_v45, %v542_v52  ;;  %v865_v4 = vcombine.low %v543_v53, %v558_v54  ;;  %v589_v10 = vcombine.high %v581_v62, %v581_v62 }
  0xd6   :  { %v848_v2 = vcombine.low %v839_v51, %v846_v56  ;;  %v855_v3 = vrot.slane %v847_v57, %v6774_v23  ;;  %v604_v13 = vrot.slane %v5913_v46, %v6774_v23  ;;  %v611_v14 = vrot.slane %v597_v5, %v6774_v23 }
  0xd7   :  { %6014 = vmatmul.mubr.bf16.vlgmr.msra.gmra.mrb[0].mxu0 %v6131_v16  ;;  %1130 = vmatmul.mubr.bf16.vlgmr.msra.gmra.mrb[0].mxu1 %v765_v32  ;;  %v866_v7 = vcombine.low %v565_v58, %v566_v60  ;;  %v874_v8 = vrot.slane %v864_v63, %v6774_v23  ;;  %v881_v12 = vrot.slane %v865_v4, %v6774_v23 }
  0xd8   :  { %1139 = vmatprep.mubr.bf16.mxu1 %v6548_v1  ;;  %v862_v11 = vrot.slane %v848_v2, %v6774_v23  ;;  %v867_v15 = vcombine.low %v581_v62, %v588_v6  ;;  %v620_v17 = vcombine.high %v5914_v59, %v5914_v59  ;;  %v627_v18 = vrot.slane %v5914_v59, %v6774_v23 }
  0xd9   :  { %v888_v16 = vrot.slane %v866_v7, %v6774_v23  ;;  %v896_v20 = vcombine.low %v874_v8, %v881_v12  ;;  %v612_v21 = vcombine.high %v604_v13, %v604_v13  ;;  %v650_v22 = vrot.slane %v5915_v9, %v6774_v23  ;;  %v6135_v12 = vld [vmem:[#allocation16 + $0x18] sm:$0xff]  }
  0xda   :  { %v895_v24 = vrot.slane %v867_v15, %v6774_v23  ;;  %v634_v25 = vrot.slane %v620_v17, %v6774_v23  ;;  %v635_v26 = vcombine.high %v627_v18, %v627_v18  ;;  %v913_v27 = vcombine.low %v589_v10, %v604_v13  ;;  %v6133_v10 = vld [vmem:[#allocation16 + $0x8] sm:$0xff]   ;;  %v6136_v13 = vld [vmem:[#allocation16 + $0x20] sm:$0xff]   ;;  %v6139_v15 = vld [vmem:[#allocation16 + $0x38] sm:$0xff]  }
  0xdb   :  { %v863_v29 = vcombine.low %v855_v3, %v862_v11  ;;  %v914_v30 = vcombine.low %v611_v14, %v612_v21  ;;  %v643_v35 = vcombine.high %v5915_v9, %v5915_v9  ;;  %v904_v36 = vrot.slane %v896_v20, %v6774_v23  ;;  %v6132_v9 = vld [vmem:[#allocation16] sm:$0xff]   ;;  %v6134_v11 = vld [vmem:[#allocation16 + $0x10] sm:$0xff]   ;;  %v6137_v14 = vld [vmem:[#allocation16 + $0x28] sm:$0xff]  }
  0xdc   :  { %v897_v32 = vcombine.low %v888_v16, %v895_v24  ;;  %v915_v33 = vcombine.low %v627_v18, %v634_v25  ;;  %v916_v34 = vcombine.low %v635_v26, %v650_v22  ;;  %v666_v37 = vcombine.high %v5916_v28, %v5916_v28  ;;  %6017 = vmatprep.subr.bf16.mxu0 %v6132_v9  ;;  %v705_v20 = vld [vmem:[#allocation11] sm:$0x3]  ;;  %v5892_v24 = vld [vmem:[#allocation8] ss:$0 sm:$0xff] }
  0xdd   :  { %v673_v38 = vrot.slane %v5916_v28, %v6774_v23  ;;  %v923_v39 = vrot.slane %v913_v27, %v6774_v23  ;;  %v930_v40 = vrot.slane %v914_v30, %v6774_v23  ;;  %v658_v41 = vcombine.high %v650_v22, %v650_v22  ;;  %6018 = vmatpush3.bf16.msra.mxu0 %v6132_v9 }
  0xde   :  { %v689_v42 = vcombine.high %v5917_v31, %v5917_v31  ;;  %v911_v43 = vrot.slane %v897_v32, %v6774_v23  ;;  %v937_v44 = vrot.slane %v915_v33, %v6774_v23  ;;  %v944_v45 = vrot.slane %v916_v34, %v6774_v23  ;;  %6019 = vmatprep.subr.bf16.mxu0 %v6133_v10 }
  0xdf   :  { %1140 = vmatmul.mubr.bf16.gmra.mrb[4].mxu1 %v814_v55  ;;  %v696_v46 = vrot.slane %v5917_v31, %v6774_v23  ;;  %v657_v47 = vrot.slane %v643_v35, %v6774_v23  ;;  %v680_v48 = vrot.slane %v666_v37, %v6774_v23  ;;  %v681_v49 = vcombine.high %v673_v38, %v673_v38 }
  0xe0   :  { %1149 = vmatprep.mubr.bf16.mxu1 %v6548_v1  ;;  %v703_v50 = vrot.slane %v689_v42, %v6774_v23  ;;  %v912_v52 = vcombine.low %v904_v36, %v911_v43  ;;  %v945_v53 = vcombine.low %v923_v39, %v930_v40  ;;  %v946_v54 = vcombine.low %v937_v44, %v944_v45 }
  0xe1   :  { %v704_v51 = vcombine.high %v696_v46, %v696_v46  ;;  %v962_v55 = vcombine.low %v657_v47, %v658_v41  ;;  %v963_v56 = vcombine.low %v673_v38, %v680_v48  ;;  %v964_v57 = vcombine.low %v681_v49, %v696_v46  ;;  %6020 = vmatpush3.bf16.msra.mxu0 %v6133_v10 }
  0xe2   :  { %v953_v59 = vrot.slane %v945_v53, %v6774_v23  ;;  %v960_v60 = vrot.slane %v946_v54, %v6774_v23  ;;  %6021 = vmatprep.subr.bf16.mxu0 %v6134_v11  ;;  %v6855_v16 = vsub.s32 0, %v6770_v19  ;;  %v6551_v17 = vmov 1983009808  }
  0xe3   :  { %v965_v58 = vcombine.low %v703_v50, %v704_v51  ;;  %v972_v61 = vrot.slane %v962_v55, %v6774_v23  ;;  %v979_v62 = vrot.slane %v963_v56, %v6774_v23  ;;  %v986_v63 = vrot.slane %v964_v57, %v6774_v23 }
  0xe4   :  { %v961_v3 = vcombine.low %v953_v59, %v960_v60  ;;  %v1217_v18 = vunpack.c.l.s4 %v6551_v17  ;;  %v713_v21 = vsub.s32 1, %v6770_v19  ;;  %v6859_v22 = vrot.slane %v705_v20, %v6855_v16 }
  0xe5   :  { %v993_v2 = vrot.slane %v965_v58, %v6774_v23  ;;  %v994_v4 = vcombine.low %v972_v61, %v979_v62  ;;  %6022 = vmatpush3.bf16.msra.mxu0 %v6134_v11 }
  0xe6   :  { %6023 = vmatprep.subr.bf16.mxu0 %v6135_v12  ;;  %v1218_v25 = vunpack.c.0.s8 %v1217_v18  ;;  %v6861_v26 = vrot.slane %v705_v20, %v713_v21 }
  0xe7   :  { %1150 = vmatmul.mubr.bf16.gmra.mrb[8].mxu1 %v863_v29  ;;  %v995_v5 = vcombine.low %v986_v63, %v993_v2  ;;  %v1002_v6 = vrot.slane %v994_v4, %v6774_v23 }
  0xe8   :  { %1159 = vmatprep.mubr.bf16.mxu1 %v6548_v1  ;;  %v6865_v34 = vsub.s32 %v1218_v25, %v6770_v19 }
  0xe9   :  { %v1009_v7 = vrot.slane %v995_v5, %v6774_v23  ;;  %6024 = vmatpush3.bf16.msra.mxu0 %v6135_v12 }
  0xea   :  { %6025 = vmatprep.subr.bf16.mxu0 %v6136_v13 }
  0xeb   :  { %v1010_v8 = vcombine.low %v1002_v6, %v1009_v7 }
  0xed   :  { %6026 = vmatpush3.bf16.msra.mxu0 %v6136_v13 }
  0xee   :  { %6027 = vmatprep.subr.bf16.mxu0 %v6137_v14 }
  0xef   :  { %1160 = vmatmul.mubr.bf16.gmra.mrb[12].mxu1 %v912_v52 }
  0xf0   :  { %1169 = vmatprep.mubr.bf16.mxu1 %v6548_v1 }
  0xf1   :  { %6028 = vmatpush3.bf16.msra.mxu0 %v6137_v14 }
  0xf7   :  { %1170 = vmatmul.mubr.bf16.gmra.mrb[16].mxu1 %v961_v3 }
  0xf8   :  { %1179 = vmatprep.mubr.bf16.mxu1 %v6548_v1  ;;  %v6138_v1 = vld [vmem:[#allocation16 + $0x30] sm:$0xff]  }
  0xf9   :  { %6029 = vmatprep.subr.bf16.mxu0 %v6138_v1 }
  0xfa   :  { %6030 = vmatpush3.bf16.msra.mxu0 %v6138_v1 }
  0xfb   :  { %6031 = vmatprep.subr.bf16.mxu0 %v6139_v15 }
  0xfe   :  { %6032 = vmatpush3.bf16.msra.mxu0 %v6139_v15 }
  0xff   :  { %1180 = vmatmul.mubr.bf16.gmra.mrb[20].mxu1 %v1010_v8  ;;  %6059 = vmatprep.subr.bf16.mxu0 %v8542_v0 }
 0x1aa   :  { %v280_v27 = vpop.f32.mrb[0].mxu0  ;;  %v1131_v28 = vpop.f32.mrb[0].mxu1 }
 0x1ab   :  { %v281_v29 = vadd.f32 %v5892_v24, %v280_v27  ;;  %v6015_v30 = vpop.f32.mrb[1].mxu0  ;;  %v1132_v31 = vadd.f32 %v1131_v28, %v6859_v22  ;;  %v1133_v32 = vpop.f32.mrb[1].mxu1 }
 0x1ac   :  { %v283_v33 = vpop.f32.mrb[2].mxu0  ;;  %v1134_v35 = vadd.f32 %v1133_v32, %v6861_v26  ;;  %v1135_v36 = vpop.f32.mrb[2].mxu1 }
 0x1ad   :  { %v287_v37 = vmul.f32 0.35355338, %v281_v29  ;;  %v284_v38 = vadd.f32 %v5892_v24, %v283_v33  ;;  %v6016_v39 = vpop.f32.mrb[3].mxu0  ;;  %v1136_v40 = vadd.f32 %v1135_v36, %v6859_v22  ;;  %v1137_v41 = vpop.f32.mrb[3].mxu1 }
 0x1ae   :  { %v1214_v42 = vcombine.low %v1132_v31, %v1134_v35  ;;  %v1215_v43 = vcombine.high %v1132_v31, %v1134_v35  ;;  %v1138_v46 = vadd.f32 %v1137_v41, %v6861_v26 }
 0x1af   :  { %v1432_v44 = vcombine.high %v287_v37, %v287_v37  ;;  %v1439_v45 = vrot.slane %v287_v37, %v6774_v23  ;;  %v6871_v47 = vmul.f32 0.35355338, %v284_v38 }
 0x1b0   :  { %v6874_v19 = vrot.slane %v1214_v42, %v6865_v34  ;;  %v6877_v48 = vrot.slane %v1215_v43, %v6865_v34  ;;  %v1232_v52 = vcombine.low %v1136_v40, %v1138_v46  ;;  %v1233_v53 = vcombine.high %v1136_v40, %v1138_v46 }
 0x1b1   :  { %v1446_v49 = vrot.slane %v1432_v44, %v6774_v23  ;;  %v1447_v50 = vcombine.high %v1439_v45, %v1439_v45  ;;  %v1455_v51 = vrot.slane %v1439_v45, %v6774_v23  ;;  %v1481_v54 = vcombine.high %v6871_v47, %v6871_v47 }
 0x1b2   :  { %8647 = vst [vmem:[#allocation27_spill] sm:$0xff] %v6874_v19  ;;  %8648 = vst [vmem:[#allocation28_spill] sm:$0xff] %v6877_v48  ;;  %v6885_v55 = vcombine.high %v6874_v19, %v6874_v19  ;;  %v6889_v56 = vcombine.high %v6877_v48, %v6877_v48  ;;  %v1624_v57 = vrot.slane %v6877_v48, %v6865_v34  ;;  %v1141_v59 = vpop.f32.mrb[4].mxu1 }
 0x1b3   :  { %v1448_v58 = vcombine.high %v1446_v49, %v1446_v49  ;;  %v6894_v60 = vrot.slane %v1446_v49, %v6774_v23  ;;  %v6897_v61 = vrot.slane %v1447_v50, %v6774_v23  ;;  %v1477_v62 = vcombine.high %v1455_v51, %v1455_v51  ;;  %v1143_v2 = vpop.f32.mrb[5].mxu1 }
 0x1b4   :  { %8649 = vst [vmem:[#allocation29_spill] sm:$0xff] %v6885_v55  ;;  %8650 = vst [vmem:[#allocation30_spill] sm:$0xff] %v6889_v56  ;;  %v1533_v63 = vrot.slane %v1455_v51, %v6855_v16  ;;  %v1610_v3 = vcombine.low %v6874_v19, %v6885_v55  ;;  %v6906_v5 = vrot.slane %v1232_v52, %v6865_v34  ;;  %v1145_v7 = vpop.f32.mrb[6].mxu1 }
 0x1b5   :  { %v6903_v4 = vrot.slane %v1448_v58, %v6774_v23  ;;  %v6909_v6 = vrot.slane %v1233_v53, %v6865_v34  ;;  %v1478_v8 = vcombine.high %v6894_v60, %v6894_v60  ;;  %v1479_v9 = vcombine.high %v6897_v61, %v6897_v61  ;;  %v1147_v12 = vpop.f32.mrb[7].mxu1 }
 0x1b6   :  { %8651 = vst [vmem:[#allocation31_spill] sm:$0xff] %v6906_v5  ;;  %v1541_v11 = vrot.slane %v1477_v62, %v6855_v16  ;;  %v1617_v13 = vrot.slane %v1610_v3, %v6865_v34  ;;  %v1549_v1 = vrot.slane %v6894_v60, %v6855_v16  ;;  %v6933_v20 = vcombine.high %v6906_v5, %v6906_v5 }
 0x1b7   :  { %8652 = vst [vmem:[#allocation32_spill] sm:$0xff] %v6909_v6  ;;  %v1480_v14 = vcombine.high %v6903_v4, %v6903_v4  ;;  %v1553_v15 = vrot.slane %v6903_v4, %v6855_v16  ;;  %v6926_v17 = vrot.slane %v1479_v9, %v6855_v16  ;;  %v6929_v18 = vrot.slane %v1478_v8, %v6855_v16 }
 0x1b8   :  { %8653 = vst [vmem:[#allocation33_spill] sm:$0xff] %v6933_v20  ;;  %v6937_v21 = vcombine.high %v6909_v6, %v6909_v6  ;;  %v1625_v25 = vcombine.low %v1617_v13, %v1624_v57  ;;  %v1626_v27 = vcombine.low %v6889_v56, %v6906_v5  ;;  %v1142_v28 = vadd.f32 %v1141_v59, %v6859_v22 }
 0x1b9   :  { %v6940_v24 = vrot.slane %v1480_v14, %v6855_v16  ;;  %v1640_v29 = vrot.slane %v6933_v20, %v6865_v34  ;;  %v1144_v31 = vadd.f32 %v1143_v2, %v6861_v26  ;;  %v1146_v32 = vadd.f32 %v1145_v7, %v6859_v22 }
 0x1ba   :  { %8654 = vst [vmem:[#allocation34_spill] sm:$0xff] %v6937_v21  ;;  %v1642_v30 = vcombine.low %v6909_v6, %v6937_v21  ;;  %v6951_v33 = vmul.f32 %v1625_v25, %v1533_v63  ;;  %v1633_v35 = vrot.slane %v1626_v27, %v6865_v34  ;;  %v1148_v36 = vadd.f32 %v1147_v12, %v6861_v26  ;;  %v1151_v37 = vpop.f32.mrb[8].mxu1 }
 0x1bb   :  { %v6957_v38 = vrot.slane %v6871_v47, %v6774_v23  ;;  %v1250_v40 = vcombine.low %v1142_v28, %v1144_v31  ;;  %v1251_v41 = vcombine.high %v1142_v28, %v1144_v31  ;;  %v1152_v42 = vadd.f32 %v1151_v37, %v6859_v22  ;;  %v1153_v43 = vpop.f32.mrb[9].mxu1 }
 0x1bc   :  { %v1649_v39 = vrot.slane %v1642_v30, %v6865_v34  ;;  %v6965_v45 = vrot.slane %v6951_v33, %v6865_v34  ;;  %v6967_v46 = vcombine.low %v1633_v35, %v1640_v29  ;;  %v1268_v49 = vcombine.low %v1146_v32, %v1148_v36  ;;  %v1155_v50 = vpop.f32.mrb[10].mxu1 }
 0x1bd   :  { %v6970_v47 = vrot.slane %v1250_v40, %v6865_v34  ;;  %v6973_v51 = vrot.slane %v1251_v41, %v6865_v34  ;;  %v1269_v52 = vcombine.high %v1146_v32, %v1148_v36  ;;  %v1154_v53 = vadd.f32 %v1153_v43, %v6861_v26  ;;  %v1157_v57 = vpop.f32.mrb[11].mxu1 }
 0x1be   :  { %v6977_v58 = vrot.slane %v1268_v49, %v6865_v34  ;;  %v1156_v59 = vadd.f32 %v1155_v50, %v6859_v22  ;;  %v1158_v62 = vadd.f32 %v1157_v57, %v6861_v26  ;;  %v6982_v63 = vrot.slane %v1481_v54, %v6774_v23 }
 0x1bf   :  { %8655 = vst [vmem:[#allocation35_spill] sm:$0xff] %v6970_v47  ;;  %8656 = vst [vmem:[#allocation36_spill] sm:$0xff] %v6973_v51  ;;  %v6986_v2 = vcombine.high %v6970_v47, %v6970_v47  ;;  %v6990_v3 = vcombine.high %v6973_v51, %v6973_v51  ;;  %v1656_v7 = vrot.slane %v6970_v47, %v6865_v34 }
 0x1c0   :  { %8657 = vst [vmem:[#allocation37_spill] sm:$0xff] %v6977_v58  ;;  %v6995_v8 = vrot.slane %v1269_v52, %v6865_v34  ;;  %v6999_v9 = vcombine.high %v6977_v58, %v6977_v58  ;;  %v1286_v54 = vcombine.low %v1152_v42, %v1154_v53  ;;  %v1287_v12 = vcombine.high %v1152_v42, %v1154_v53 }
 0x1c1   :  { %8658 = vst [vmem:[#allocation38_spill] sm:$0xff] %v6986_v2  ;;  %8659 = vst [vmem:[#allocation39_spill] sm:$0xff] %v6990_v3  ;;  %v1304_v13 = vcombine.low %v1156_v59, %v1158_v62  ;;  %v1657_v14 = vcombine.low %v1649_v39, %v1656_v7  ;;  %v1658_v25 = vcombine.low %v6986_v2, %v6973_v51 }
 0x1c2   :  { %8660 = vst [vmem:[#allocation40_spill] sm:$0xff] %v6995_v8  ;;  %8661 = vst [vmem:[#allocation41_spill] sm:$0xff] %v6999_v9  ;;  %v1672_v27 = vrot.slane %v6990_v3, %v6865_v34  ;;  %v7007_v28 = vcombine.high %v6995_v8, %v6995_v8  ;;  %v1674_v29 = vcombine.low %v6977_v58, %v6999_v9  ;;  %v1161_v35 = vpop.f32.mrb[12].mxu1 }
 0x1c3   :  { %v1688_v30 = vrot.slane %v6995_v8, %v6865_v34  ;;  %v7014_v31 = vrot.slane %v1286_v54, %v6865_v34  ;;  %v7017_v32 = vrot.slane %v1287_v12, %v6865_v34  ;;  %v1665_v36 = vrot.slane %v1658_v25, %v6865_v34  ;;  %v1163_v41 = vpop.f32.mrb[13].mxu1 }
 0x1c4   :  { %8662 = vst [vmem:[#allocation42_spill] sm:$0xff] %v7007_v28  ;;  %v7020_v37 = vmul.f32 %v1657_v14, %v1541_v11  ;;  %v1305_v39 = vcombine.high %v1156_v59, %v1158_v62  ;;  %v7023_v40 = vrot.slane %v1304_v13, %v6865_v34  ;;  %v1681_v42 = vrot.slane %v1674_v29, %v6865_v34  ;;  %v1165_v11 = vpop.f32.mrb[14].mxu1 }
 0x1c5   :  { %8663 = vst [vmem:[#allocation43_spill] sm:$0xff] %v7014_v31  ;;  %8664 = vst [vmem:[#allocation44_spill] sm:$0xff] %v7017_v32  ;;  %v7028_v43 = vcombine.high %v7014_v31, %v7014_v31  ;;  %v7032_v49 = vcombine.high %v7017_v32, %v7017_v32  ;;  %v1690_v50 = vcombine.low %v7007_v28, %v7014_v31  ;;  %v1167_v62 = vpop.f32.mrb[15].mxu1 }
 0x1c6   :  { %8665 = vst [vmem:[#allocation45_spill] sm:$0xff] %v7023_v40  ;;  %v1673_v52 = vcombine.low %v1665_v36, %v1672_v27  ;;  %v7039_v57 = vrot.slane %v1305_v39, %v6865_v34  ;;  %v7043_v59 = vcombine.high %v7023_v40, %v7023_v40  ;;  %v1689_v7 = vcombine.low %v1681_v42, %v1688_v30 }
 0x1c7   :  { %8666 = vst [vmem:[#allocation46_spill] sm:$0xff] %v7028_v43  ;;  %8667 = vst [vmem:[#allocation47_spill] sm:$0xff] %v7032_v49  ;;  %v1697_v54 = vrot.slane %v1690_v50, %v6865_v34  ;;  %v1704_v12 = vrot.slane %v7028_v43, %v6865_v34  ;;  %v1706_v13 = vcombine.low %v7017_v32, %v7032_v49 }
 0x1c8   :  { %8668 = vst [vmem:[#allocation48_spill] sm:$0xff] %v7039_v57  ;;  %8669 = vst [vmem:[#allocation49_spill] sm:$0xff] %v7043_v59  ;;  %v7051_v14 = vmul.f32 %v1673_v52, %v6926_v17  ;;  %v7055_v25 = vcombine.high %v7039_v57, %v7039_v57  ;;  %v1720_v27 = vrot.slane %v7023_v40, %v6865_v34 }
 0x1c9   :  { %v1722_v29 = vcombine.low %v7043_v59, %v7039_v57  ;;  %v7064_v30 = vmul.f32 %v1689_v7, %v1549_v1  ;;  %v1705_v36 = vcombine.low %v1697_v54, %v1704_v12  ;;  %v1713_v39 = vrot.slane %v1706_v13, %v6865_v34 }
 0x1ca   :  { %8670 = vst [vmem:[#allocation50_spill] sm:$0xff] %v7055_v25  ;;  %v1162_v17 = vadd.f32 %v1161_v35, %v6859_v22  ;;  %v1736_v52 = vrot.slane %v7055_v25, %v6865_v34  ;;  %v1496_v0 = vcombine.high %v6957_v38, %v6957_v38  ;;  %v1171_v54 = vpop.f32.mrb[16].mxu1  ;;  %v1497_v13 = vcombine.high %v6982_v63, %v6982_v63 }
 0x1cb   :  { %v1729_v50 = vrot.slane %v1722_v29, %v6865_v34  ;;  %v7079_v1 = vrot.slane %v7064_v30, %v6865_v34  ;;  %v7084_v35 = vmul.f32 %v1705_v36, %v1553_v15  ;;  %v1721_v7 = vcombine.low %v1713_v39, %v1720_v27  ;;  %v1173_v42 = vpop.f32.mrb[17].mxu1 }
 0x1cc   :  { %v7092_v29 = vrot.slane %v6957_v38, %v6774_v23  ;;  %v7096_v60 = vrot.slane %v6982_v63, %v6774_v23  ;;  %v7102_v15 = vrot.slane %v1496_v0, %v6774_v23  ;;  %v1164_v27 = vadd.f32 %v1163_v41, %v6861_v26  ;;  %v1175_v39 = vpop.f32.mrb[18].mxu1 }
 0x1cd   :  { %v7086_v12 = vcombine.low %v1729_v50, %v1736_v52  ;;  %v7099_v4 = vmul.f32 %v1721_v7, %v6929_v18  ;;  %v1166_v36 = vadd.f32 %v1165_v11, %v6859_v22  ;;  %v7107_v50 = vrot.slane %v1497_v13, %v6774_v23  ;;  %v7115_v52 = vpop.f32.mrb[19].mxu1 }
 0x1ce   :  { %v1526_v38 = vcombine.high %v7092_v29, %v7092_v29  ;;  %v1527_v63 = vcombine.high %v7096_v60, %v7096_v60  ;;  %v1565_v18 = vrot.slane %v7092_v29, %v6855_v16  ;;  %v1528_v0 = vcombine.high %v7102_v15, %v7102_v15 }
 0x1cf   :  { %v1322_v11 = vcombine.low %v1162_v17, %v1164_v27  ;;  %v1529_v7 = vcombine.high %v7107_v50, %v7107_v50  ;;  %v1323_v41 = vcombine.high %v1162_v17, %v1164_v27  ;;  %v1168_v23 = vadd.f32 %v1167_v62, %v6861_v26 }
 0x1d0   :  { %v7126_v13 = vrot.slane %v1526_v38, %v6855_v16  ;;  %v7131_v53 = vrot.slane %v1527_v63, %v6855_v16  ;;  %v7134_v44 = vrot.slane %v1528_v0, %v6855_v16  ;;  %v1172_v38 = vadd.f32 %v1171_v54, %v6859_v22 }
 0x1d1   :  { %v7137_v10 = vrot.slane %v1322_v11, %v6865_v34  ;;  %v7141_v25 = vrot.slane %v1529_v7, %v6855_v16  ;;  %v1174_v57 = vadd.f32 %v1173_v42, %v6861_v26  ;;  %v7146_v29 = vadd.f32 %v1175_v39, %v6859_v22 }
 0x1d2   :  { %v7149_v63 = vrot.slane %v1323_v41, %v6865_v34  ;;  %v1340_v27 = vcombine.low %v1166_v36, %v1168_v23  ;;  %v1341_v0 = vcombine.high %v1166_v36, %v1168_v23  ;;  %v1181_v62 = vpop.f32.mrb[20].mxu1  ;;  %v8674_v54 = vrot.slane %v6897_v61, %v6855_v16 }
 0x1d3   :  { %8671 = vst [vmem:[#allocation51_spill] sm:$0xff] %v7137_v10  ;;  %v7153_v17 = vcombine.high %v7137_v10, %v7137_v10  ;;  %v1358_v11 = vcombine.low %v1172_v38, %v1174_v57  ;;  %v1359_v7 = vcombine.high %v1172_v38, %v1174_v57  ;;  %v8675_v39 = vcombine.high %v6951_v33, %v6951_v33  ;;  %v1183_v59 = vpop.f32.mrb[21].mxu1 }
 0x1d4   :  { %8672 = vst [vmem:[#allocation52_spill] sm:$0xff] %v7149_v63  ;;  %v1883_v42 = vmul.f32 %v6967_v46, %v8674_v54  ;;  %v7165_v40 = vcombine.high %v7149_v63, %v7149_v63  ;;  %v1752_v57 = vrot.slane %v7149_v63, %v6865_v34  ;;  %v7172_v61 = vrot.slane %v1340_v27, %v6865_v34  ;;  %v1185_v46 = vpop.f32.mrb[22].mxu1 }
 0x1d5   :  { %8673 = vst [vmem:[#allocation53_spill] sm:$0xff] %v7153_v17  ;;  %v1944_v41 = vrot.slane %v8675_v39, %v6865_v34  ;;  %v1738_v36 = vcombine.low %v7137_v10, %v7153_v17  ;;  %v7175_v23 = vrot.slane %v1341_v0, %v6865_v34  ;;  %v7178_v33 = vrot.slane %v1358_v11, %v6865_v34  ;;  %v7185_v39 = vpop.f32.mrb[23].mxu1 }
 0x1d6   :  { %8676 = vst [vmem:[#allocation54_spill] sm:$0xff] %v7165_v40  ;;  %8677 = vst [vmem:[#allocation55_spill] sm:$0xff] %v7172_v61  ;;  %v7181_v38 = vrot.slane %v1359_v7, %v6865_v34  ;;  %v1945_v54 = vcombine.high %v6965_v45, %v6965_v45  ;;  %v7190_v27 = vcombine.high %v7172_v61, %v7172_v61 }
 0x1d7   :  { %8678 = vst [vmem:[#allocation56_spill] sm:$0xff] %v7175_v23  ;;  %8679 = vst [vmem:[#allocation57_spill] sm:$0xff] %v7178_v33  ;;  %v1745_v49 = vrot.slane %v1738_v36, %v6865_v34  ;;  %v1754_v0 = vcombine.low %v7165_v40, %v7172_v61  ;;  %v1946_v32 = vcombine.high %v1883_v42, %v1883_v42 }
 0x1d8   :  { %8680 = vst [vmem:[#allocation58_spill] sm:$0xff] %v7181_v38  ;;  %8681 = vst [vmem:[#allocation59_spill] sm:$0xff] %v7190_v27  ;;  %v7196_v11 = vcombine.high %v7175_v23, %v7175_v23  ;;  %v7200_v7 = vcombine.high %v7178_v33, %v7178_v33  ;;  %v7204_v43 = vcombine.high %v7181_v38, %v7181_v38 }
 0x1d9   :  { %v1784_v36 = vrot.slane %v7178_v33, %v6865_v34  ;;  %v1753_v31 = vcombine.low %v1745_v49, %v1752_v57  ;;  %v1761_v28 = vrot.slane %v1754_v0, %v6865_v34  ;;  %v1768_v61 = vrot.slane %v7190_v27, %v6865_v34 }
 0x1da   :  { %8682 = vst [vmem:[#allocation60_spill] sm:$0xff] %v7196_v11  ;;  %8683 = vst [vmem:[#allocation61_spill] sm:$0xff] %v7200_v7  ;;  %v1953_v40 = vrot.slane %v1883_v42, %v6865_v34  ;;  %v1770_v63 = vcombine.low %v7175_v23, %v7196_v11  ;;  %v1786_v17 = vcombine.low %v7200_v7, %v7181_v38 }
 0x1db   :  { %8684 = vst [vmem:[#allocation62_spill] sm:$0xff] %v7204_v43  ;;  %v1800_v10 = vrot.slane %v7204_v43, %v6865_v34  ;;  %v1960_v21 = vrot.slane %v1946_v32, %v6865_v34  ;;  %v7219_v33 = vmul.f32 %v1753_v31, %v1565_v18  ;;  %v7221_v49 = vcombine.low %v1761_v28, %v1768_v61 }
 0x1dc   :  { %v1961_v57 = vcombine.high %v1953_v40, %v1953_v40  ;;  %v1969_v0 = vrot.slane %v7020_v37, %v6865_v34  ;;  %v1777_v42 = vrot.slane %v1770_v63, %v6865_v34  ;;  %v1793_v11 = vrot.slane %v1786_v17, %v6865_v34 }
 0x1dd   :  { %v2186_v23 = vcombine.low %v6965_v45, %v1945_v54  ;;  %v2187_v38 = vcombine.low %v1944_v41, %v1953_v40  ;;  %v1178_v32 = vadd.f32 %v7115_v52, %v6861_v26  ;;  %v1182_v31 = vadd.f32 %v1181_v62, %v6859_v22 }
 0x1de   :  { %v1977_v7 = vcombine.high %v1969_v0, %v1969_v0  ;;  %v2203_v27 = vcombine.low %v1961_v57, %v1960_v21  ;;  %v1785_v28 = vcombine.low %v1777_v42, %v1784_v36  ;;  %v7231_v18 = vcombine.low %v1793_v11, %v1800_v10 }
 0x1df   :  { %v2194_v61 = vrot.slane %v2186_v23, %v6865_v34  ;;  %v2201_v43 = vrot.slane %v2187_v38, %v6865_v34  ;;  %v1376_v45 = vcombine.low %v7146_v29, %v1178_v32  ;;  %v1377_v40 = vcombine.high %v7146_v29, %v1178_v32 }
 0x1e0   :  { %v2204_v63 = vcombine.low %v1969_v0, %v1977_v7  ;;  %v2211_v17 = vrot.slane %v2203_v27, %v6865_v34  ;;  %v7239_v21 = vmul.f32 %v1785_v28, %v7126_v13  ;;  %v1184_v62 = vadd.f32 %v1183_v59, %v6861_v26 }
 0x1e1   :  { %v2202_v52 = vcombine.low %v2194_v61, %v2201_v43  ;;  %v1186_v10 = vadd.f32 %v1185_v46, %v6859_v22  ;;  %v7245_v23 = vrot.slane %v1376_v45, %v6865_v34  ;;  %v7248_v38 = vrot.slane %v1377_v40, %v6865_v34 }
 0x1e2   :  { %v2218_v41 = vrot.slane %v2204_v63, %v6865_v34  ;;  %v8687_v29 = vcombine.high %v7020_v37, %v7020_v37  ;;  %v1394_v13 = vcombine.low %v1182_v31, %v1184_v62  ;;  %v1395_v27 = vcombine.high %v1182_v31, %v1184_v62 }
 0x1e3   :  { %8685 = vst [vmem:[#allocation63_spill] sm:$0xff] %v7245_v23  ;;  %8686 = vst [vmem:[#allocation64_spill] sm:$0xff] %v7248_v38  ;;  %v1985_v43 = vrot.slane %v7051_v14, %v6865_v34  ;;  %v8688_v22 = vcombine.high %v7051_v14, %v7051_v14  ;;  %v7262_v11 = vcombine.high %v7245_v23, %v7245_v23 }
 0x1e4   :  { %v1976_v54 = vrot.slane %v8687_v29, %v6865_v34  ;;  %v2219_v46 = vcombine.low %v2211_v17, %v2218_v41  ;;  %v7266_v7 = vcombine.high %v7248_v38, %v7248_v38  ;;  %v1816_v37 = vrot.slane %v7248_v38, %v6865_v34 }
 0x1e5   :  { %v1992_v59 = vrot.slane %v8688_v22, %v6865_v34  ;;  %8689 = vst [vmem:[#allocation65_spill] sm:$0xff] %v7262_v11  ;;  %v7271_v36 = vrot.slane %v1394_v13, %v6865_v34  ;;  %v7274_v57 = vrot.slane %v1395_v27, %v6865_v34  ;;  %v1993_v14 = vcombine.high %v1985_v43, %v1985_v43 }
 0x1e6   :  { %8690 = vst [vmem:[#allocation66_spill] sm:$0xff] %v7266_v7  ;;  %v8693_v0 = vcombine.high %v7064_v30, %v7064_v30  ;;  %v2402_v32 = vpack.c.bf16 %v2219_v46, %v2202_v52  ;;  %v1802_v31 = vcombine.low %v7245_v23, %v7262_v11  ;;  %v2009_v28 = vcombine.high %v7079_v1, %v7079_v1 }
 0x1e7   :  { %8691 = vst [vmem:[#allocation67_spill] sm:$0xff] %v7271_v36  ;;  %8692 = vst [vmem:[#allocation68_spill] sm:$0xff] %v7274_v57  ;;  %v2017_v61 = vrot.slane %v7084_v35, %v6865_v34  ;;  %v7288_v63 = vcombine.high %v7271_v36, %v7271_v36  ;;  %v7292_v17 = vcombine.high %v7274_v57, %v7274_v57 }
 0x1e8   :  { %v2008_v42 = vrot.slane %v8693_v0, %v6865_v34  ;;  %v1818_v30 = vcombine.low %v7266_v7, %v7271_v36  ;;  %v2220_v45 = vcombine.low %v1976_v54, %v1985_v43  ;;  %6033 = vmatprep.mubr.bf16.mxu0 %v2402_v32  ;;  %v1809_v40 = vrot.slane %v1802_v31, %v6865_v34  ;;  %v6140_v36 = vld [vmem:[#allocation17] sm:$0xff]  }
 0x1e9   :  { %8694 = vst [vmem:[#allocation69_spill] sm:$0xff] %v7288_v63  ;;  %8695 = vst [vmem:[#allocation70_spill] sm:$0xff] %v7292_v17  ;;  %v2221_v52 = vcombine.low %v1993_v14, %v1992_v59  ;;  %v2237_v62 = vcombine.low %v7079_v1, %v2009_v28  ;;  %v1832_v13 = vrot.slane %v7288_v63, %v6865_v34  ;;  %6045 = vmatprep.subr.bf16.mxu1 %v6140_v36 }
 0x1ea   :  { %v2238_v41 = vcombine.low %v2008_v42, %v2017_v61  ;;  %v1825_v29 = vrot.slane %v1818_v30, %v6865_v34  ;;  %v1834_v27 = vcombine.low %v7274_v57, %v7292_v17  ;;  %v2228_v22 = vrot.slane %v2220_v45, %v6865_v34  ;;  %6046 = vmatpush3.bf16.msra.mxu1 %v6140_v36 }
 0x1eb   :  { %v1817_v46 = vcombine.low %v1809_v40, %v1816_v37  ;;  %v2235_v54 = vrot.slane %v2221_v52, %v6865_v34  ;;  %v2245_v43 = vrot.slane %v2237_v62, %v6865_v34  ;;  %v1188_v0 = vadd.f32 %v7185_v39, %v6861_v26 }
 0x1ec   :  { %v2252_v59 = vrot.slane %v2238_v41, %v6865_v34  ;;  %v1833_v14 = vcombine.low %v1825_v29, %v1832_v13  ;;  %v1841_v1 = vrot.slane %v1834_v27, %v6865_v34  ;;  %v1889_v42 = vmul.f32 %v7086_v12, %v6940_v24 }
 0x1ed   :  { %v8696_v32 = vrot.slane %v7096_v60, %v6855_v16  ;;  %v2236_v37 = vcombine.low %v2228_v22, %v2235_v54  ;;  %v2010_v30 = vcombine.high %v7084_v35, %v7084_v35  ;;  %v1412_v45 = vcombine.low %v1186_v10, %v1188_v0 }
 0x1ee   :  { %v2253_v28 = vcombine.low %v2245_v43, %v2252_v59  ;;  %v1413_v40 = vcombine.high %v1186_v10, %v1188_v0  ;;  %v2025_v52 = vcombine.high %v2017_v61, %v2017_v61  ;;  %v2026_v62 = vcombine.high %v7099_v4, %v7099_v4 }
 0x1ef   :  { %v7315_v31 = vmul.f32 %v1817_v46, %v8696_v32  ;;  %v2024_v39 = vrot.slane %v2010_v30, %v6865_v34  ;;  %v2033_v24 = vrot.slane %v7099_v4, %v6865_v34  ;;  %v2042_v60 = vcombine.high %v1889_v42, %v1889_v42 }
 0x1f0   :  { %v2403_v26 = vpack.c.bf16 %v2253_v28, %v2236_v37  ;;  %v7325_v12 = vrot.slane %v1412_v45, %v6865_v34  ;;  %v7328_v41 = vrot.slane %v1413_v40, %v6865_v34  ;;  %v2040_v35 = vrot.slane %v2026_v62, %v6865_v34 }
 0x1f1   :  { %v2049_v10 = vrot.slane %v1889_v42, %v6865_v34  ;;  %v2041_v61 = vcombine.high %v2033_v24, %v2033_v24  ;;  %v2056_v29 = vrot.slane %v2042_v60, %v6865_v34  ;;  %v2254_v13 = vcombine.low %v2025_v52, %v2024_v39 }
 0x1f2   :  { %8697 = vst [vmem:[#allocation71_spill] sm:$0xff] %v7325_v12  ;;  %8698 = vst [vmem:[#allocation72_spill] sm:$0xff] %v7328_v41  ;;  %6034 = vmatmul.mubr.bf16.vlgmr.msra.gmra.mrb[4].mxu0 %v2403_v26  ;;  %v8699_v27 = vrot.slane %v7102_v15, %v6855_v16  ;;  %v7339_v22 = vcombine.high %v7325_v12, %v7325_v12  ;;  %v7343_v46 = vcombine.high %v7328_v41, %v7328_v41 }
 0x1f3   :  { %v1848_v54 = vrot.slane %v7325_v12, %v6865_v34  ;;  %v2057_v43 = vcombine.high %v2049_v10, %v2049_v10  ;;  %v2255_v59 = vcombine.low %v2033_v24, %v2041_v61  ;;  %v2262_v0 = vrot.slane %v2254_v13, %v6865_v34 }
 0x1f4   :  { %v1891_v4 = vmul.f32 %v7221_v49, %v8699_v27  ;;  %8700 = vst [vmem:[#allocation73_spill] sm:$0xff] %v7339_v22  ;;  %8701 = vst [vmem:[#allocation74_spill] sm:$0xff] %v7343_v46  ;;  %v2271_v42 = vcombine.low %v2040_v35, %v2049_v10  ;;  %v2058_v15 = vcombine.high %v7219_v33, %v7219_v33 }
 0x1f5   :  { %v1849_v49 = vcombine.low %v1841_v1, %v1848_v54  ;;  %v1850_v32 = vcombine.low %v7339_v22, %v7328_v41  ;;  %v1864_v37 = vrot.slane %v7343_v46, %v6865_v34  ;;  %v2272_v28 = vcombine.low %v2057_v43, %v2056_v29 }
 0x1f6   :  { %v2269_v30 = vrot.slane %v2255_v59, %v6865_v34  ;;  %v2279_v45 = vrot.slane %v2271_v42, %v6865_v34  ;;  %v2065_v40 = vrot.slane %v7219_v33, %v6865_v34  ;;  %v2072_v52 = vrot.slane %v2058_v15, %v6865_v34 }
 0x1f7   :  { %v1857_v62 = vrot.slane %v1850_v32, %v6865_v34  ;;  %v1896_v1 = vmul.f32 %v1849_v49, %v7131_v53  ;;  %v2286_v26 = vrot.slane %v2272_v28, %v6865_v34  ;;  %v2074_v39 = vcombine.high %v1891_v4, %v1891_v4 }
 0x1f8   :  { %v2270_v24 = vcombine.low %v2262_v0, %v2269_v30  ;;  %v2073_v60 = vcombine.high %v2065_v40, %v2065_v40  ;;  %v2081_v35 = vrot.slane %v1891_v4, %v6865_v34  ;;  %v2097_v10 = vrot.slane %v7239_v21, %v6865_v34 }
 0x1f9   :  { %v1865_v61 = vcombine.low %v1857_v62, %v1864_v37  ;;  %v2287_v29 = vcombine.low %v2279_v45, %v2286_v26  ;;  %v2088_v33 = vrot.slane %v2074_v39, %v6865_v34  ;;  %v1893_v13 = vmul.f32 %v7231_v18, %v7134_v44 }
 0x1fa   :  { %v2089_v27 = vcombine.high %v2081_v35, %v2081_v35  ;;  %v2105_v54 = vcombine.high %v2097_v10, %v2097_v10  ;;  %v2288_v53 = vcombine.low %v2065_v40, %v2073_v60  ;;  %v2289_v43 = vcombine.low %v2072_v52, %v2081_v35 }
 0x1fb   :  { %v2404_v59 = vpack.c.bf16 %v2287_v29, %v2270_v24  ;;  %v8702_v0 = vrot.slane %v7107_v50, %v6855_v16  ;;  %v2090_v4 = vcombine.high %v7239_v21, %v7239_v21  ;;  %v2106_v15 = vcombine.high %v1893_v13, %v1893_v13 }
 0x1fc   :  { %v2296_v49 = vrot.slane %v2288_v53, %v6865_v34  ;;  %v2303_v32 = vrot.slane %v2289_v43, %v6865_v34  ;;  %v2305_v37 = vcombine.low %v2089_v27, %v2088_v33  ;;  %v2306_v28 = vcombine.low %v2097_v10, %v2105_v54 }
 0x1fd   :  { %v1895_v42 = vmul.f32 %v1833_v14, %v8702_v0  ;;  %6037 = vmatprep.mubr.bf16.mxu0 %v2404_v59  ;;  %v2104_v44 = vrot.slane %v2090_v4, %v6865_v34  ;;  %v2113_v18 = vrot.slane %v1893_v13, %v6865_v34  ;;  %v2120_v30 = vrot.slane %v2106_v15, %v6865_v34 }
 0x1fe   :  { %v2122_v16 = vcombine.high %v7315_v31, %v7315_v31  ;;  %v2304_v50 = vcombine.low %v2296_v49, %v2303_v32  ;;  %v2313_v21 = vrot.slane %v2305_v37, %v6865_v34  ;;  %v2320_v14 = vrot.slane %v2306_v28, %v6865_v34 }
 0x1ff   :  { %v2129_v45 = vrot.slane %v7315_v31, %v6865_v34  ;;  %v2121_v40 = vcombine.high %v2113_v18, %v2113_v18  ;;  %v2145_v62 = vrot.slane %v1895_v42, %v6865_v34  ;;  %v2322_v26 = vcombine.low %v2104_v44, %v2113_v18 }
 0x200   :  { %v2136_v52 = vrot.slane %v2122_v16, %v6865_v34  ;;  %v2321_v39 = vcombine.low %v2313_v21, %v2320_v14  ;;  %v1897_v60 = vmul.f32 %v1865_v61, %v7141_v25  ;;  %v2138_v35 = vcombine.high %v1895_v42, %v1895_v42 }
 0x201   :  { %v2137_v24 = vcombine.high %v2129_v45, %v2129_v45  ;;  %v2323_v10 = vcombine.low %v2121_v40, %v2120_v30  ;;  %v2330_v29 = vrot.slane %v2322_v26, %v6865_v34  ;;  %v2153_v13 = vcombine.high %v2145_v62, %v2145_v62 }
 0x202   :  { %v2340_v33 = vcombine.low %v2136_v52, %v2145_v62  ;;  %v2405_v27 = vpack.c.bf16 %v2321_v39, %v2304_v50  ;;  %v2152_v31 = vrot.slane %v2138_v35, %v6865_v34  ;;  %v2154_v53 = vcombine.high %v1896_v1, %v1896_v1 }
 0x203   :  { %v2339_v54 = vcombine.low %v2129_v45, %v2137_v24  ;;  %v2337_v43 = vrot.slane %v2323_v10, %v6865_v34  ;;  %v2161_v0 = vrot.slane %v1896_v1, %v6865_v34  ;;  %v2170_v4 = vcombine.high %v1897_v60, %v1897_v60 }
 0x204   :  { %v2354_v59 = vrot.slane %v2340_v33, %v6865_v34  ;;  %6038 = vmatmul.mubr.bf16.gmra.mrb[8].mxu0 %v2405_v27  ;;  %v2168_v61 = vrot.slane %v2154_v53, %v6865_v34  ;;  %v2177_v42 = vrot.slane %v1897_v60, %v6865_v34  ;;  %v2356_v37 = vcombine.low %v2153_v13, %v2152_v31 }
 0x205   :  { %v2347_v25 = vrot.slane %v2339_v54, %v6865_v34  ;;  %v2338_v15 = vcombine.low %v2330_v29, %v2337_v43  ;;  %v2169_v49 = vcombine.high %v2161_v0, %v2161_v0  ;;  %v2184_v32 = vrot.slane %v2170_v4, %v6865_v34 }
 0x206   :  { %v2185_v44 = vcombine.high %v2177_v42, %v2177_v42  ;;  %v2373_v18 = vcombine.low %v2168_v61, %v2177_v42  ;;  %v2364_v1 = vrot.slane %v2356_v37, %v6865_v34  ;;  %v8703_v26 = vmov 0.0  }
 0x207   :  { %v2355_v28 = vcombine.low %v2347_v25, %v2354_v59  ;;  %v2357_v30 = vcombine.low %v2161_v0, %v2169_v49 }
 0x208   :  { %v2374_v50 = vcombine.low %v2185_v44, %v2184_v32  ;;  %v2381_v14 = vrot.slane %v2373_v18, %v6865_v34 }
 0x209   :  { %v2406_v16 = vpack.c.bf16 %v2355_v28, %v2338_v15  ;;  %v2371_v21 = vrot.slane %v2357_v30, %v6865_v34 }
 0x20a   :  { %v2388_v45 = vrot.slane %v2374_v50, %v6865_v34 }
 0x20b   :  { %6041 = vmatprep.mubr.bf16.mxu0 %v2406_v16  ;;  %v2372_v40 = vcombine.low %v2364_v1, %v2371_v21 }
 0x20c   :  { %v2389_v52 = vcombine.low %v2381_v14, %v2388_v45 }
 0x20e   :  { %v2407_v62 = vpack.c.bf16 %v2389_v52, %v2372_v40 }
 0x210   :  { %6042 = vmatmul.mubr.bf16.gmra.mrb[12].mxu0 %v2407_v62 }
 0x211   :  { %6075 = vmatprep.mubr.msk.bf16.mxu0 %vm6549_vm0, %v8703_v26 }
 0x2c5   :  { %v6035_v39 = vpop.f32.mrb[4].mxu0 }
 0x2c6   :  { %v2583_v24 = vcombine.high %v6035_v39, %v6035_v39  ;;  %v7403_v60 = vrot.slane %v6035_v39, %v6865_v34  ;;  %v2490_v35 = vpop.f32.mrb[5].mxu0 }
 0x2c7   :  { %v2549_v10 = vcombine.high %v2490_v35, %v2490_v35  ;;  %v7406_v29 = vrot.slane %v2490_v35, %v6865_v34  ;;  %v6036_v33 = vpop.f32.mrb[6].mxu0 }
 0x2c8   :  { %v7409_v13 = vrot.slane %v2583_v24, %v6865_v34  ;;  %v7413_v27 = vcombine.high %v7403_v60, %v7403_v60  ;;  %v2600_v54 = vcombine.high %v6036_v33, %v6036_v33  ;;  %v2493_v31 = vpop.f32.mrb[7].mxu0  ;;  %v7423_v59 = vrot.slane %v6036_v33, %v6865_v34 }
 0x2c9   :  { %v7416_v53 = vrot.slane %v2549_v10, %v6865_v34  ;;  %v7420_v43 = vcombine.high %v7406_v29, %v7406_v29  ;;  %v2566_v0 = vcombine.high %v2493_v31, %v2493_v31  ;;  %v7435_v42 = vrot.slane %v2493_v31, %v6865_v34 }
 0x2ca   :  { %v7427_v4 = vcombine.high %v7409_v13, %v7409_v13  ;;  %v2849_v25 = vcombine.low %v7413_v27, %v7409_v13  ;;  %v7432_v61 = vrot.slane %v2600_v54, %v6865_v34  ;;  %v7441_v49 = vcombine.high %v7423_v59, %v7423_v59 }
 0x2cb   :  { %v2801_v15 = vcombine.low %v7406_v29, %v7420_v43  ;;  %v7445_v32 = vcombine.high %v7416_v53, %v7416_v53  ;;  %v2815_v44 = vrot.slane %v7416_v53, %v6865_v34  ;;  %v7453_v18 = vrot.slane %v2566_v0, %v6865_v34 }
 0x2cc   :  { %v2856_v37 = vrot.slane %v2849_v25, %v6865_v34  ;;  %v2863_v28 = vrot.slane %v7427_v4, %v6865_v34  ;;  %v2865_v16 = vcombine.low %v7423_v59, %v7441_v49  ;;  %v7460_v50 = vcombine.high %v7435_v42, %v7435_v42 }
 0x2cd   :  { %v2808_v30 = vrot.slane %v2801_v15, %v6865_v34  ;;  %v2817_v1 = vcombine.low %v7445_v32, %v7435_v42  ;;  %v2879_v14 = vrot.slane %v7432_v61, %v6865_v34  ;;  %v7468_v45 = vcombine.high %v7453_v18, %v7453_v18 }
 0x2ce   :  { %v2864_v21 = vcombine.low %v2856_v37, %v2863_v28  ;;  %v2872_v52 = vrot.slane %v2865_v16, %v6865_v34  ;;  %v2831_v39 = vrot.slane %v7460_v50, %v6865_v34  ;;  %v2847_v0 = vrot.slane %v7403_v60, %v6865_v34 }
 0x2cf   :  { %v2816_v40 = vcombine.low %v2808_v30, %v2815_v44  ;;  %v2824_v62 = vrot.slane %v2817_v1, %v6865_v34  ;;  %v2833_v35 = vcombine.low %v7453_v18, %v7468_v45 }
 0x2d0   :  { %v3095_v24 = vsel %vm3073_vm1, %v2864_v21, -inf  ;;  %v2880_v54 = vcombine.low %v2872_v52, %v2879_v14 }
 0x2d1   :  { %v3096_v10 = vrot.slane %v3095_v24, 4  ;;  %v3074_v33 = vsel %vm3073_vm1, %v2816_v40, -inf  ;;  %v2832_v31 = vcombine.low %v2824_v62, %v2831_v39  ;;  %v2840_v15 = vrot.slane %v2833_v35, %v6865_v34 }
 0x2d2   :  { %v3075_v25 = vrot.slane %v3074_v33, 4  ;;  %v3102_v28 = vsel %vm3073_vm1, %v2880_v54, -inf }
 0x2d3   :  { %v3097_v37 = vmax.f32 %v3095_v24, %v3096_v10  ;;  %v3081_v44 = vsel %vm3073_vm1, %v2832_v31, -inf  ;;  %v3103_v16 = vrot.slane %v3102_v28, 4  ;;  %v2848_v1 = vcombine.low %v2840_v15, %v2847_v0 }
 0x2d4   :  { %v3076_v30 = vmax.f32 %v3074_v33, %v3075_v25  ;;  %v3082_v21 = vrot.slane %v3081_v44, 4  ;;  %v7486_v24 = vcombine.high %v7432_v61, %v7432_v61 }
 0x2d5   :  { %v3098_v7 = vrot.slane %v3097_v37, 2  ;;  %v3104_v40 = vmax.f32 %v3102_v28, %v3103_v16  ;;  %v3088_v52 = vsel %vm3073_vm1, %v2848_v1, -inf }
 0x2d6   :  { %v3077_v38 = vrot.slane %v3076_v30, 2  ;;  %v3083_v14 = vmax.f32 %v3081_v44, %v3082_v21  ;;  %v3089_v39 = vrot.slane %v3088_v52, 4 }
 0x2d7   :  { %v3099_v62 = vmax.f32 %v3097_v37, %v3098_v7  ;;  %v6039_v11 = vpop.f32.mrb[8].mxu0  ;;  %v3105_v10 = vrot.slane %v3104_v40, 2 }
 0x2d8   :  { %v3078_v35 = vmax.f32 %v3076_v30, %v3077_v38  ;;  %v3084_v54 = vrot.slane %v3083_v14, 2  ;;  %v2651_v33 = vcombine.high %v6039_v11, %v6039_v11  ;;  %v7488_v31 = vpop.f32.mrb[9].mxu0  ;;  %v3090_v25 = vmax.f32 %v3088_v52, %v3089_v39 }
 0x2d9   :  { %v3100_v0 = vrot.slane %v3099_v62, 1  ;;  %v7491_v15 = vrot.slane %v6039_v11, %v6865_v34  ;;  %v7495_v37 = vpop.f32.mrb[10].mxu0  ;;  %v3106_v44 = vmax.f32 %v3104_v40, %v3105_v10  ;;  %v7508_v11 = vrot.slane %v7488_v31, %v6865_v34 }
 0x2da   :  { %v3079_v28 = vrot.slane %v3078_v35, 1  ;;  %v3085_v16 = vmax.f32 %v3083_v14, %v3084_v54  ;;  %v7498_v38 = vrot.slane %v2651_v33, %v6865_v34  ;;  %v7500_v30 = vpop.f32.mrb[11].mxu0  ;;  %v3091_v21 = vrot.slane %v3090_v25, 2 }
 0x2db   :  { %v3101_v1 = vmax.f32 %v3099_v62, %v3100_v0  ;;  %v7504_v52 = vcombine.high %v7491_v15, %v7491_v15  ;;  %v3107_v7 = vrot.slane %v3106_v44, 1 }
 0x2dc   :  { %v3080_v39 = vmax.f32 %v3078_v35, %v3079_v28  ;;  %v3086_v23 = vrot.slane %v3085_v16, 1  ;;  %v3092_v54 = vmax.f32 %v3090_v25, %v3091_v21 }
 0x2dd   :  { %v3250_v14 = vcombine.high %v3101_v1, %v3101_v1  ;;  %v3257_v10 = vrot.slane %v3101_v1, %v6865_v34  ;;  %v2929_v62 = vcombine.low %v7491_v15, %v7504_v52  ;;  %v3108_v46 = vmax.f32 %v3106_v44, %v3107_v7 }
 0x2de   :  { %v3202_v33 = vcombine.high %v3080_v39, %v3080_v39  ;;  %v3209_v0 = vrot.slane %v3080_v39, %v6865_v34  ;;  %v3087_v41 = vmax.f32 %v3085_v16, %v3086_v23  ;;  %v3093_v12 = vrot.slane %v3092_v54, 1 }
 0x2df   :  { %v3264_v22 = vrot.slane %v3250_v14, %v6865_v34  ;;  %v3265_v35 = vcombine.high %v3257_v10, %v3257_v10  ;;  %v3515_v28 = vsub.f32 %v7413_v27, %v3257_v10  ;;  %v3266_v25 = vcombine.high %v3108_v46, %v3108_v46 }
 0x2e0   :  { %v3216_v40 = vrot.slane %v3202_v33, %v6865_v34  ;;  %v3217_v17 = vcombine.high %v3209_v0, %v3209_v0  ;;  %v3506_v1 = vsub.f32 %v7406_v29, %v3209_v0  ;;  %v3273_v7 = vrot.slane %v3108_v46, %v6865_v34 }
 0x2e1   :  { %v3516_v21 = vsub.f32 %v7409_v13, %v3265_v35  ;;  %v3517_v57 = vsub.f32 %v7427_v4, %v3264_v22  ;;  %v3572_v63 = vmul.f32 1.442695, %v3515_v28  ;;  %v3280_v27 = vrot.slane %v3266_v25, %v6865_v34 }
 0x2e2   :  { %v3507_v23 = vsub.f32 %v7420_v43, %v3217_v17  ;;  %v3508_v44 = vsub.f32 %v7416_v53, %v3216_v40  ;;  %v3554_v16 = vmul.f32 1.442695, %v3506_v1  ;;  %v3281_v10 = vcombine.high %v3273_v7, %v3273_v7 }
 0x2e3   :  { %6149 = vpow2.f32 %v3572_v63  ;;  %v3574_v39 = vmul.f32 1.442695, %v3516_v21  ;;  %v3576_v14 = vmul.f32 1.442695, %v3517_v57  ;;  %v7526_v29 = vpop.f32.mrb[12].mxu0  ;;  %v3518_v22 = vsub.f32 %v7423_v59, %v3273_v7 }
 0x2e4   :  { %6151 = vpow2.f32 %v3554_v16  ;;  %v3556_v13 = vmul.f32 1.442695, %v3507_v23  ;;  %v3558_v33 = vmul.f32 1.442695, %v3508_v44  ;;  %v7529_v4 = vpop.f32.mrb[13].mxu0  ;;  %v3519_v17 = vsub.f32 %v7441_v49, %v3281_v10 }
 0x2e5   :  { %6153 = vpow2.f32 %v3574_v39  ;;  %v3520_v46 = vsub.f32 %v7432_v61, %v3280_v27  ;;  %v3094_v53 = vmax.f32 %v3092_v54, %v3093_v12  ;;  %v7533_v43 = vpop.f32.mrb[14].mxu0  ;;  %v3578_v57 = vmul.f32 1.442695, %v3518_v22 }
 0x2e6   :  { %6155 = vpow2.f32 %v3576_v14  ;;  %v3218_v63 = vcombine.high %v3087_v41, %v3087_v41  ;;  %v3225_v40 = vrot.slane %v3087_v41, %v6865_v34  ;;  %v7536_v0 = vpop.f32.mrb[15].mxu0  ;;  %v3580_v35 = vmul.f32 1.442695, %v3519_v17 }
 0x2e7   :  { %6157 = vpow2.f32 %v3556_v13  ;;  %v3582_v59 = vmul.f32 1.442695, %v3520_v46  ;;  %v3234_v28 = vcombine.high %v3094_v53, %v3094_v53  ;;  %v3241_v61 = vrot.slane %v3094_v53, %v6865_v34 }
 0x2e8   :  { %6159 = vpow2.f32 %v3558_v33  ;;  %v3232_v1 = vrot.slane %v3218_v63, %v6865_v34  ;;  %v3233_v49 = vcombine.high %v3225_v40, %v3225_v40  ;;  %v3509_v54 = vsub.f32 %v7445_v32, %v3225_v40 }
 0x2e9   :  { %6161 = vpow2.f32 %v3578_v57  ;;  %v3248_v12 = vrot.slane %v3234_v28, %v6865_v34  ;;  %v2936_v25 = vrot.slane %v2929_v62, %v6865_v34  ;;  %v3249_v41 = vcombine.high %v3241_v61, %v3241_v61 }
 0x2ea   :  { %6163 = vpow2.f32 %v3580_v35  ;;  %v3510_v21 = vsub.f32 %v7435_v42, %v3233_v49  ;;  %v3511_v7 = vsub.f32 %v7460_v50, %v3232_v1  ;;  %v3512_v23 = vsub.f32 %v7453_v18, %v3241_v61 }
 0x2eb   :  { %6165 = vpow2.f32 %v3582_v59  ;;  %v3514_v44 = vsub.f32 %v7403_v60, %v3248_v12  ;;  %v3560_v16 = vmul.f32 1.442695, %v3509_v54  ;;  %v3513_v27 = vsub.f32 %v7468_v45, %v3249_v41 }
 0x2ec   :  { %v3562_v39 = vmul.f32 1.442695, %v3510_v21  ;;  %v3564_v14 = vmul.f32 1.442695, %v3511_v7  ;;  %v8704_v32 = vrot.slane %v7498_v38, %v6865_v34  ;;  %v3566_v42 = vmul.f32 1.442695, %v3512_v23 }
 0x2ed   :  { %v7551_v10 = vpop.eup %6149  ;;  %6167 = vpow2.f32 %v3560_v16  ;;  %v3570_v13 = vmul.f32 1.442695, %v3514_v44  ;;  %v8705_v18 = vcombine.high %v7488_v31, %v7488_v31  ;;  %v3568_v45 = vmul.f32 1.442695, %v3513_v27 }
 0x2ee   :  { %v2944_v62 = vcombine.low %v2936_v25, %v8704_v32  ;;  %v7559_v60 = vpop.eup %6151  ;;  %6169 = vpow2.f32 %v3562_v39  ;;  %v7564_v22 = vcombine.high %v7508_v11, %v7508_v11  ;;  %v2881_v31 = vcombine.low %v7486_v24, %v7508_v11 }
 0x2ef   :  { %v7557_v50 = vrot.slane %v8705_v18, %v6865_v34  ;;  %v7566_v17 = vpop.eup %6153  ;;  %6171 = vpow2.f32 %v3564_v14  ;;  %v7585_v1 = vcombine.high %v7498_v38, %v7498_v38  ;;  %v2668_v23 = vcombine.high %v7495_v37, %v7495_v37 }
 0x2f0   :  { %v3130_v33 = vsel %vm3073_vm1, %v2944_v62, -inf  ;;  %v7574_v57 = vpop.eup %6155  ;;  %v3746_v63 = vcombine.low %v7551_v10, %v7566_v17  ;;  %6173 = vpow2.f32 %v3566_v42  ;;  %v2895_v40 = vrot.slane %v7564_v22, %v6865_v34 }
 0x2f1   :  { %v3131_v46 = vrot.slane %v3130_v33, 4  ;;  %v7570_v53 = vcombine.high %v7557_v50, %v7557_v50  ;;  %v7580_v35 = vpop.eup %6157  ;;  %6175 = vpow2.f32 %v3568_v45  ;;  %v2888_v28 = vrot.slane %v2881_v31, %v6865_v34 }
 0x2f2   :  { %v7587_v49 = vpop.eup %6159  ;;  %v3753_v61 = vrot.slane %v3746_v63, %v6865_v34  ;;  %v3760_v12 = vrot.slane %v7574_v57, %v6865_v34  ;;  %v3698_v54 = vcombine.low %v7559_v60, %v7580_v35  ;;  %6177 = vpow2.f32 %v3570_v13 }
 0x2f3   :  { %v3132_v59 = vmax.f32 %v3130_v33, %v3131_v46  ;;  %v7594_v25 = vpop.eup %6161  ;;  %v2896_v21 = vcombine.low %v2888_v28, %v2895_v40  ;;  %v3712_v39 = vrot.slane %v7587_v49, %v6865_v34  ;;  %v7607_v14 = vrot.slane %v7495_v37, %v6865_v34 }
 0x2f4   :  { %v7600_v44 = vpop.eup %6163  ;;  %v3761_v16 = vcombine.low %v3753_v61, %v3760_v12  ;;  %v3705_v27 = vrot.slane %v3698_v54, %v6865_v34  ;;  %v7618_v31 = vrot.slane %v2668_v23, %v6865_v34 }
 0x2f5   :  { %v3133_v41 = vrot.slane %v3132_v59, 2  ;;  %v7609_v32 = vpop.eup %6165  ;;  %v3762_v62 = vcombine.low %v7594_v25, %v7600_v44  ;;  %v3109_v13 = vsel %vm3073_vm1, %v2896_v21, -inf  ;;  %v2945_v21 = vcombine.low %v7585_v1, %v7607_v14 }
 0x2f6   :  { %v3991_v45 = vsel %vm3073_vm1, %v3761_v16, 0.0  ;;  %v3713_v33 = vcombine.low %v3705_v27, %v3712_v39  ;;  %v3110_v46 = vrot.slane %v3109_v13, 4  ;;  %v7644_v18 = vcombine.high %v7618_v31, %v7618_v31 }
 0x2f7   :  { %v3134_v42 = vmax.f32 %v3132_v59, %v3133_v41  ;;  %v7620_v37 = vpop.eup %6167  ;;  %v3992_v63 = vrot.slane %v3991_v45, 4  ;;  %v3769_v40 = vrot.slane %v3762_v62, %v6865_v34  ;;  %v3776_v59 = vrot.slane %v7609_v32, %v6865_v34 }
 0x2f8   :  { %v7625_v61 = vpop.eup %6169  ;;  %v3970_v12 = vsel %vm3073_vm1, %v3713_v33, 0.0  ;;  %v3111_v54 = vmax.f32 %v3109_v13, %v3110_v46  ;;  %v7630_v41 = vcombine.high %v7607_v14, %v7607_v14 }
 0x2f9   :  { %v3135_v28 = vrot.slane %v3134_v42, 1  ;;  %v7634_v23 = vpop.eup %6171  ;;  %v3993_v16 = vadd.f32 %v3992_v63, %v3991_v45  ;;  %v3971_v27 = vrot.slane %v3970_v12, 4  ;;  %v3777_v39 = vcombine.low %v3769_v40, %v3776_v59 }
 0x2fa   :  { %v3714_v62 = vcombine.low %v7620_v37, %v7625_v61  ;;  %v7638_v7 = vpop.eup %6173  ;;  %v3728_v13 = vrot.slane %v7634_v23, %v6865_v34  ;;  %v3112_v46 = vrot.slane %v3111_v54, 2 }
 0x2fb   :  { %v3136_v33 = vmax.f32 %v3134_v42, %v3135_v28  ;;  %v7646_v6 = vpop.eup %6175  ;;  %v3994_v45 = vrot.slane %v3993_v16, 2  ;;  %v3972_v63 = vadd.f32 %v3971_v27, %v3970_v12  ;;  %v3998_v40 = vsel %vm3073_vm1, %v3777_v39, 0.0 }
 0x2fc   :  { %v3721_v59 = vrot.slane %v3714_v62, %v6865_v34  ;;  %v7650_v20 = vpop.eup %6177  ;;  %v3999_v5 = vrot.slane %v3998_v40, 4  ;;  %v3730_v42 = vcombine.low %v7638_v7, %v7646_v6 }
 0x2fd   :  { %v3330_v28 = vcombine.high %v3136_v33, %v3136_v33  ;;  %v3337_v56 = vrot.slane %v3136_v33, %v6865_v34  ;;  %v3995_v8 = vadd.f32 %v3994_v45, %v3993_v16  ;;  %v3973_v9 = vrot.slane %v3972_v63, 2 }
 0x2fe   :  { %v3729_v58 = vcombine.low %v3721_v59, %v3728_v13  ;;  %v3744_v12 = vrot.slane %v7650_v20, %v6865_v34  ;;  %v4000_v27 = vadd.f32 %v3999_v5, %v3998_v40  ;;  %v3737_v39 = vrot.slane %v3730_v42, %v6865_v34 }
 0x2ff   :  { %v3344_v62 = vrot.slane %v3330_v28, %v6865_v34  ;;  %v3345_v48 = vcombine.high %v3337_v56, %v3337_v56  ;;  %v3996_v55 = vrot.slane %v3995_v8, 1  ;;  %v3530_v3 = vsub.f32 %v7491_v15, %v3337_v56 }
 0x300   :  { %v3977_v19 = vsel %vm3073_vm1, %v3729_v58, 0.0  ;;  %v2952_v33 = vrot.slane %v2945_v21, %v6865_v34  ;;  %v4001_v16 = vrot.slane %v4000_v27, 2  ;;  %v3745_v45 = vcombine.low %v3737_v39, %v3744_v12 }
 0x301   :  { %v3978_v13 = vrot.slane %v3977_v19, 4  ;;  %v3531_v59 = vsub.f32 %v7504_v52, %v3345_v48  ;;  %v3997_v51 = vadd.f32 %v3996_v55, %v3995_v8  ;;  %v7663_v36 = vadd.f32 %v3973_v9, %v3972_v63 }
 0x302   :  { %v3532_v5 = vsub.f32 %v7498_v38, %v3344_v62  ;;  %v3602_v40 = vmul.f32 1.442695, %v3530_v3  ;;  %v4002_v42 = vadd.f32 %v4001_v16, %v4000_v27  ;;  %v3984_v2 = vsel %vm3073_vm1, %v3745_v45, 0.0 }
 0x303   :  { %v3979_v28 = vadd.f32 %v3978_v13, %v3977_v19  ;;  %v3604_v58 = vmul.f32 1.442695, %v3531_v59  ;;  %6179 = vrcp.f32 %v3997_v51  ;;  %v3985_v56 = vrot.slane %v3984_v2, 4 }
 0x304   :  { %v3606_v15 = vmul.f32 1.442695, %v3532_v5  ;;  %v3113_v21 = vmax.f32 %v3111_v54, %v3112_v46  ;;  %v4003_v47 = vrot.slane %v4002_v42, 1  ;;  %6181 = vpow2.f32 %v3602_v40 }
 0x305   :  { %v3980_v12 = vrot.slane %v3979_v28, 2  ;;  %v2959_v48 = vrot.slane %v7630_v41, %v6865_v34  ;;  %v3986_v8 = vadd.f32 %v3985_v56, %v3984_v2  ;;  %6183 = vpow2.f32 %v3604_v58 }
 0x306   :  { %v3114_v3 = vrot.slane %v3113_v21, 1  ;;  %v4004_v9 = vadd.f32 %v4003_v47, %v4002_v42  ;;  %6185 = vpow2.f32 %v3606_v15  ;;  %v7674_v54 = vrot.slane %v7500_v30, %v6865_v34 }
 0x307   :  { %v7670_v19 = vadd.f32 %v3980_v12, %v3979_v28  ;;  %v2960_v38 = vcombine.low %v2952_v33, %v2959_v48  ;;  %v3987_v51 = vrot.slane %v3986_v8, 2  ;;  %v8706_v46 = vcombine.high %v7500_v30, %v7500_v30 }
 0x308   :  { %v3115_v52 = vmax.f32 %v3113_v21, %v3114_v3  ;;  %6187 = vrcp.f32 %v4004_v9  ;;  %v2961_v47 = vcombine.low %v7618_v31, %v7644_v18  ;;  %v8707_v27 = vcombine.low %v7557_v50, %v7570_v53 }
 0x309   :  { %v7680_v63 = vrot.slane %v8706_v46, %v6865_v34  ;;  %v3137_v2 = vsel %vm3073_vm1, %v2960_v38, -inf  ;;  %v7691_v30 = vadd.f32 %v3987_v51, %v3986_v8  ;;  %v7695_v13 = vcombine.high %v7674_v54, %v7674_v54 }
 0x30a   :  { %v2904_v39 = vrot.slane %v8707_v27, %v6865_v34  ;;  %v3282_v33 = vcombine.high %v3115_v52, %v3115_v52  ;;  %v3289_v16 = vrot.slane %v3115_v52, %v6865_v34  ;;  %v3138_v45 = vrot.slane %v3137_v2, 4 }
 0x30b   :  { %v7699_v59 = vcombine.high %v7680_v63, %v7680_v63  ;;  %v2911_v5 = vrot.slane %v7674_v54, %v6865_v34  ;;  %v2913_v15 = vcombine.low %v7695_v13, %v7680_v63  ;;  %v2719_v12 = vcombine.high %v7526_v29, %v7526_v29 }
 0x30c   :  { %v3296_v40 = vrot.slane %v3282_v33, %v6865_v34  ;;  %v3297_v42 = vcombine.high %v3289_v16, %v3289_v16  ;;  %v3521_v28 = vsub.f32 %v7486_v24, %v3289_v16  ;;  %v3139_v58 = vmax.f32 %v3137_v2, %v3138_v45 }
 0x30d   :  { %v2912_v56 = vcombine.low %v2904_v39, %v2911_v5  ;;  %v2927_v21 = vrot.slane %v7699_v59, %v6865_v34  ;;  %v6180_v48 = vpop.eup %6179  ;;  %v2920_v46 = vrot.slane %v2913_v15, %v6865_v34  ;;  %v7719_v2 = vrot.slane %v7526_v29, %v6865_v34 }
 0x30e   :  { %v3522_v8 = vsub.f32 %v7508_v11, %v3297_v42  ;;  %v3523_v3 = vsub.f32 %v7564_v22, %v3296_v40  ;;  %v3584_v9 = vmul.f32 1.442695, %v3521_v28  ;;  %v3140_v38 = vrot.slane %v3139_v58, 2  ;;  %v7713_v51 = vpop.eup %6181 }
 0x30f   :  { %8708 = vst [vmem:[#allocation75_spill] sm:$0xff] %v7713_v51  ;;  %v4162_v24 = vcombine.high %v6180_v48, %v6180_v48  ;;  %v4169_v52 = vrot.slane %v6180_v48, %v6865_v34  ;;  %v7721_v27 = vpop.eup %6183  ;;  %v3116_v22 = vsel %vm3073_vm1, %v2912_v56, -inf  ;;  %v2928_v28 = vcombine.low %v2920_v46, %v2927_v21 }
 0x310   :  { %8709 = vst [vmem:[#allocation76_spill] sm:$0xff] %v7721_v27  ;;  %v3586_v39 = vmul.f32 1.442695, %v3522_v8  ;;  %v3588_v33 = vmul.f32 1.442695, %v3523_v3  ;;  %v3141_v11 = vmax.f32 %v3139_v58, %v3140_v38  ;;  %v7724_v16 = vpop.eup %6185  ;;  %v3826_v40 = vcombine.low %v7713_v51, %v7721_v27 }
 0x311   :  { %8710 = vst [vmem:[#allocation77_spill] sm:$0xff] %v7724_v16  ;;  %v4176_v45 = vrot.slane %v4162_v24, %v6865_v34  ;;  %v4177_v5 = vcombine.high %v4169_v52, %v4169_v52  ;;  %6189 = vpow2.f32 %v3584_v9  ;;  %v3840_v29 = vrot.slane %v7724_v16, %v6865_v34 }
 0x312   :  { %6191 = vpow2.f32 %v3586_v39  ;;  %v3142_v42 = vrot.slane %v3141_v11, 1  ;;  %v6188_v15 = vpop.eup %6187  ;;  %v3833_v48 = vrot.slane %v3826_v40, %v6865_v34  ;;  %v3117_v38 = vrot.slane %v3116_v22, 4 }
 0x313   :  { %v7732_v58 = vmul.f32 %v7566_v17, %v4177_v5  ;;  %v7735_v56 = vmul.f32 %v7574_v57, %v4176_v45  ;;  %6193 = vpow2.f32 %v3588_v33  ;;  %v4178_v8 = vcombine.high %v6188_v15, %v6188_v15 }
 0x314   :  { %v4185_v3 = vrot.slane %v6188_v15, %v6865_v34  ;;  %v3143_v9 = vmax.f32 %v3141_v11, %v3142_v42  ;;  %v7740_v24 = vmul.f32 %v7551_v10, %v4169_v52  ;;  %v3841_v46 = vcombine.low %v3833_v48, %v3840_v29 }
 0x315   :  { %v3123_v17 = vsel %vm3073_vm1, %v2928_v28, -inf  ;;  %v4192_v57 = vrot.slane %v4178_v8, %v6865_v34  ;;  %v7747_v33 = vrot.slane %v2719_v12, %v6865_v34  ;;  %v3118_v40 = vmax.f32 %v3116_v22, %v3117_v38 }
 0x316   :  { %v4193_v39 = vcombine.high %v4185_v3, %v4185_v3  ;;  %v3346_v45 = vcombine.high %v3143_v9, %v3143_v9  ;;  %v4026_v5 = vsel %vm3073_vm1, %v3841_v46, 0.0  ;;  %v3353_v11 = vrot.slane %v3143_v9, %v6865_v34 }
 0x317   :  { %v3124_v10 = vrot.slane %v3123_v17, 4  ;;  %v7752_v52 = vmul.f32 %v7594_v25, %v4185_v3  ;;  %v4027_v42 = vrot.slane %v4026_v5, 4  ;;  %v3119_v12 = vrot.slane %v3118_v40, 2 }
 0x318   :  { %v7755_v29 = vmul.f32 %v7600_v44, %v4193_v39  ;;  %v3360_v28 = vrot.slane %v3346_v45, %v6865_v34  ;;  %v3361_v15 = vcombine.high %v3353_v11, %v3353_v11  ;;  %v3533_v48 = vsub.f32 %v7585_v1, %v3353_v11 }
 0x319   :  { %v3125_v8 = vmax.f32 %v3123_v17, %v3124_v10  ;;  %v7760_v46 = vmul.f32 %v7609_v32, %v4192_v57  ;;  %v4028_v9 = vadd.f32 %v4027_v42, %v4026_v5  ;;  %v7765_v25 = vcombine.high %v7719_v2, %v7719_v2 }
 0x31a   :  { %v3535_v22 = vsub.f32 %v7630_v41, %v3360_v28  ;;  %v3534_v3 = vsub.f32 %v7607_v14, %v3361_v15  ;;  %v3608_v38 = vmul.f32 1.442695, %v3533_v48  ;;  %v3120_v39 = vmax.f32 %v3118_v40, %v3119_v12 }
 0x31b   :  { %v7767_v44 = vpop.eup %6189  ;;  %v3126_v45 = vrot.slane %v3125_v8, 2  ;;  %v4029_v17 = vrot.slane %v4028_v9, 2  ;;  %v7776_v41 = vcombine.high %v7747_v33, %v7747_v33 }
 0x31c   :  { %v7770_v1 = vpop.eup %6191  ;;  %v3612_v57 = vmul.f32 1.442695, %v3535_v22  ;;  %6195 = vpow2.f32 %v3608_v38  ;;  %v3610_v14 = vmul.f32 1.442695, %v3534_v3  ;;  %v3121_v40 = vrot.slane %v3120_v39, 1 }
 0x31d   :  { %8711 = vst [vmem:[#allocation78_spill] sm:$0xff] %v7770_v1  ;;  %v7778_v5 = vpop.eup %6193  ;;  %v3778_v11 = vcombine.low %v7767_v44, %v7770_v1  ;;  %v7782_v10 = vadd.f32 %v4029_v17, %v4028_v9  ;;  %v3127_v42 = vmax.f32 %v3125_v8, %v3126_v45  ;;  %v2685_v9 = vcombine.high %v7529_v4, %v7529_v4 }
 0x31e   :  { %8712 = vst [vmem:[#allocation79_spill] sm:$0xff] %v7778_v5  ;;  %6197 = vpow2.f32 %v3612_v57  ;;  %v3792_v48 = vrot.slane %v7778_v5, %v6865_v34  ;;  %v3122_v12 = vmax.f32 %v3120_v39, %v3121_v40  ;;  %v7795_v8 = vrot.slane %v7529_v4, %v6865_v34 }
 0x31f   :  { %8713 = vst [vmem:[#allocation80_spill] sm:$0xff] %v7782_v10  ;;  %v3785_v15 = vrot.slane %v3778_v11, %v6865_v34  ;;  %6199 = vpow2.f32 %v3610_v14  ;;  %v3128_v22 = vrot.slane %v3127_v42, 1  ;;  %v2968_v39 = vrot.slane %v2961_v47, %v6865_v34 }
 0x320   :  { %v3298_v45 = vcombine.high %v3122_v12, %v3122_v12  ;;  %v3305_v17 = vrot.slane %v3122_v12, %v6865_v34  ;;  %v7803_v11 = vrot.slane %v2685_v9, %v6865_v34  ;;  %v7807_v14 = vcombine.high %v7795_v8, %v7795_v8 }
 0x321   :  { %v3793_v3 = vcombine.low %v3785_v15, %v3792_v48  ;;  %v3129_v57 = vmax.f32 %v3127_v42, %v3128_v22  ;;  %v2975_v4 = vrot.slane %v7795_v8, %v6865_v34 }
 0x322   :  { %v3312_v15 = vrot.slane %v3298_v45, %v6865_v34  ;;  %v3313_v48 = vcombine.high %v3305_v17, %v3305_v17  ;;  %v3524_v12 = vsub.f32 %v7557_v50, %v3305_v17  ;;  %v7817_v22 = vcombine.high %v7803_v11, %v7803_v11 }
 0x323   :  { %v4005_v40 = vsel %vm3073_vm1, %v3793_v3, 0.0  ;;  %v3314_v47 = vcombine.high %v3129_v57, %v3129_v57  ;;  %v3321_v42 = vrot.slane %v3129_v57, %v6865_v34  ;;  %v2976_v28 = vcombine.low %v2968_v39, %v2975_v4 }
 0x324   :  { %v4006_v32 = vrot.slane %v4005_v40, 4  ;;  %v3525_v9 = vsub.f32 %v7570_v53, %v3313_v48  ;;  %v3526_v21 = vsub.f32 %v7674_v54, %v3312_v15  ;;  %v3590_v62 = vmul.f32 1.442695, %v3524_v12 }
 0x325   :  { %v3328_v45 = vrot.slane %v3314_v47, %v6865_v34  ;;  %v3329_v55 = vcombine.high %v3321_v42, %v3321_v42  ;;  %v3527_v50 = vsub.f32 %v7695_v13, %v3321_v42  ;;  %v2977_v26 = vcombine.low %v7807_v14, %v7803_v11 }
 0x326   :  { %v4007_v3 = vadd.f32 %v4006_v32, %v4005_v40  ;;  %v7823_v17 = vpop.eup %6195  ;;  %6201 = vpow2.f32 %v3590_v62  ;;  %v3592_v57 = vmul.f32 1.442695, %v3525_v9  ;;  %v3594_v38 = vmul.f32 1.442695, %v3526_v21 }
 0x327   :  { %8714 = vst [vmem:[#allocation81_spill] sm:$0xff] %v7823_v17  ;;  %v3528_v54 = vsub.f32 %v7680_v63, %v3329_v55  ;;  %v3529_v32 = vsub.f32 %v7699_v59, %v3328_v45  ;;  %v3596_v39 = vmul.f32 1.442695, %v3527_v50  ;;  %v2984_v62 = vrot.slane %v2977_v26, %v6865_v34 }
 0x328   :  { %v7827_v16 = vpop.eup %6197  ;;  %v4008_v53 = vrot.slane %v4007_v3, 2  ;;  %6203 = vpow2.f32 %v3592_v57  ;;  %v2991_v21 = vrot.slane %v7817_v22, %v6865_v34  ;;  %v3144_v48 = vsel %vm3073_vm1, %v2976_v28, -inf }
 0x329   :  { %8715 = vst [vmem:[#allocation82_spill] sm:$0xff] %v7827_v16  ;;  %v7831_v4 = vpop.eup %6199  ;;  %v3856_v13 = vrot.slane %v7827_v16, %v6865_v34  ;;  %6205 = vpow2.f32 %v3594_v38  ;;  %v3598_v55 = vmul.f32 1.442695, %v3528_v54  ;;  %v3600_v63 = vmul.f32 1.442695, %v3529_v32 }
 0x32a   :  { %8716 = vst [vmem:[#allocation83_spill] sm:$0xff] %v7831_v4  ;;  %v4009_v40 = vadd.f32 %v4008_v53, %v4007_v3  ;;  %v3842_v15 = vcombine.low %v7823_v17, %v7831_v4  ;;  %6207 = vpow2.f32 %v3596_v39  ;;  %v2992_v59 = vcombine.low %v2984_v62, %v2991_v21 }
 0x32b   :  { %6209 = vpow2.f32 %v3598_v55  ;;  %v3145_v42 = vrot.slane %v3144_v48, 4  ;;  %v2736_v9 = vcombine.high %v7533_v43, %v7533_v43  ;;  %v7847_v38 = vrot.slane %v7533_v43, %v6865_v34 }
 0x32c   :  { %v4010_v12 = vrot.slane %v4009_v40, 1  ;;  %v3849_v47 = vrot.slane %v3842_v15, %v6865_v34  ;;  %6211 = vpow2.f32 %v3600_v63  ;;  %v3151_v26 = vsel %vm3073_vm1, %v2992_v59, -inf }
 0x32d   :  { %v3146_v50 = vmax.f32 %v3144_v48, %v3145_v42  ;;  %v3152_v57 = vrot.slane %v3151_v26, 4  ;;  %v7850_v28 = vrot.slane %v2736_v9, %v6865_v34  ;;  %v7854_v53 = vcombine.high %v7847_v38, %v7847_v38 }
 0x32e   :  { %v4011_v3 = vadd.f32 %v4010_v12, %v4009_v40  ;;  %v3857_v45 = vcombine.low %v3849_v47, %v3856_v13  ;;  %v8717_v54 = vcombine.low %v7747_v33, %v7776_v41  ;;  %v3039_v43 = vrot.slane %v7847_v38, %v6865_v34 }
 0x32f   :  { %v3147_v13 = vrot.slane %v3146_v50, 2  ;;  %v3153_v62 = vmax.f32 %v3151_v26, %v3152_v57  ;;  %v7867_v15 = vcombine.high %v7850_v28, %v7850_v28  ;;  %v3041_v63 = vcombine.low %v7854_v53, %v7850_v28 }
 0x330   :  { %v3032_v32 = vrot.slane %v8717_v54, %v6865_v34  ;;  %6213 = vrcp.f32 %v4011_v3  ;;  %v4033_v39 = vsel %vm3073_vm1, %v3857_v45, 0.0  ;;  %v7863_v21 = vpop.eup %6201  ;;  %v2702_v12 = vcombine.high %v7536_v0, %v7536_v0 }
 0x331   :  { %8718 = vst [vmem:[#allocation84_spill] sm:$0xff] %v7863_v21  ;;  %v4034_v40 = vrot.slane %v4033_v39, 4  ;;  %v3148_v59 = vmax.f32 %v3146_v50, %v3147_v13  ;;  %v3154_v48 = vrot.slane %v3153_v62, 2  ;;  %v7875_v47 = vrot.slane %v7536_v0, %v6865_v34 }
 0x332   :  { %v3040_v55 = vcombine.low %v3032_v32, %v3039_v43  ;;  %v7877_v42 = vpop.eup %6203  ;;  %v3048_v9 = vrot.slane %v3041_v63, %v6865_v34  ;;  %v3055_v3 = vrot.slane %v7867_v15, %v6865_v34 }
 0x333   :  { %8719 = vst [vmem:[#allocation85_spill] sm:$0xff] %v7877_v42  ;;  %v4035_v26 = vadd.f32 %v4034_v40, %v4033_v39  ;;  %v7883_v57 = vpop.eup %6205  ;;  %v3794_v50 = vcombine.low %v7863_v21, %v7877_v42  ;;  %v3149_v54 = vrot.slane %v3148_v59, 1  ;;  %v3155_v32 = vmax.f32 %v3153_v62, %v3154_v48 }
 0x334   :  { %v3172_v45 = vsel %vm3073_vm1, %v3040_v55, -inf  ;;  %8720 = vst [vmem:[#allocation86_spill] sm:$0xff] %v7883_v57  ;;  %v7887_v0 = vpop.eup %6207  ;;  %v3808_v40 = vrot.slane %v7883_v57, %v6865_v34  ;;  %v3056_v63 = vcombine.low %v3048_v9, %v3055_v3  ;;  %v7903_v42 = vrot.slane %v2702_v12, %v6865_v34 }
 0x335   :  { %v3173_v43 = vrot.slane %v3172_v45, 4  ;;  %8721 = vst [vmem:[#allocation87_spill] sm:$0xff] %v7887_v0  ;;  %v4036_v39 = vrot.slane %v4035_v26, 2  ;;  %v7892_v16 = vpop.eup %6209  ;;  %v3801_v55 = vrot.slane %v3794_v50, %v6865_v34  ;;  %v3150_v4 = vmax.f32 %v3148_v59, %v3149_v54 }
 0x336   :  { %8722 = vst [vmem:[#allocation88_spill] sm:$0xff] %v7892_v16  ;;  %v3156_v17 = vrot.slane %v3155_v32, 1  ;;  %v7895_v51 = vpop.eup %6211  ;;  %v3810_v48 = vcombine.low %v7887_v0, %v7892_v16  ;;  %v3179_v13 = vsel %vm3073_vm1, %v3056_v63, -inf  ;;  %v7907_v59 = vcombine.high %v7875_v47, %v7875_v47 }
 0x337   :  { %v3174_v27 = vmax.f32 %v3172_v45, %v3173_v43  ;;  %8723 = vst [vmem:[#allocation89_spill] sm:$0xff] %v7895_v51  ;;  %v7897_v62 = vadd.f32 %v4036_v39, %v4035_v26  ;;  %v3809_v9 = vcombine.low %v3801_v55, %v3808_v40  ;;  %v3362_v57 = vcombine.high %v3150_v4, %v3150_v4 }
 0x338   :  { %v3157_v3 = vmax.f32 %v3155_v32, %v3156_v17  ;;  %v3817_v45 = vrot.slane %v3810_v48, %v6865_v34  ;;  %v3824_v26 = vrot.slane %v7895_v51, %v6865_v34  ;;  %v3369_v50 = vrot.slane %v3150_v4, %v6865_v34 }
 0x339   :  { %v3175_v54 = vrot.slane %v3174_v27, 2  ;;  %v4012_v12 = vsel %vm3073_vm1, %v3809_v9, 0.0  ;;  %v3376_v39 = vrot.slane %v3362_v57, %v6865_v34 }
 0x33a   :  { %v7913_v43 = vpop.eup %6213  ;;  %v3378_v17 = vcombine.high %v3157_v3, %v3157_v3  ;;  %v3385_v32 = vrot.slane %v3157_v3, %v6865_v34  ;;  %v3825_v63 = vcombine.low %v3817_v45, %v3824_v26  ;;  %v4013_v55 = vrot.slane %v4012_v12, 4 }
 0x33b   :  { %v7920_v40 = vrot.slane %v7913_v43, %v6865_v34  ;;  %v3377_v48 = vcombine.high %v3369_v50, %v3369_v50  ;;  %v3536_v16 = vsub.f32 %v7618_v31, %v3369_v50  ;;  %v3538_v0 = vsub.f32 %v7795_v8, %v3376_v39 }
 0x33c   :  { %v3392_v51 = vrot.slane %v3378_v17, %v6865_v34  ;;  %v3393_v4 = vcombine.high %v3385_v32, %v3385_v32  ;;  %v4014_v9 = vadd.f32 %v4013_v55, %v4012_v12  ;;  %v4019_v3 = vsel %vm3073_vm1, %v3825_v63, 0.0 }
 0x33d   :  { %8724 = vst [vmem:[#allocation90_spill] sm:$0xff] %v7920_v40  ;;  %v7927_v57 = vmul.f32 %v7767_v44, %v7920_v40  ;;  %v3537_v10 = vsub.f32 %v7644_v18, %v3377_v48  ;;  %v4020_v21 = vrot.slane %v4019_v3, 4  ;;  %v3539_v45 = vsub.f32 %v7807_v14, %v3385_v32 }
 0x33e   :  { %v3540_v26 = vsub.f32 %v7803_v11, %v3393_v4  ;;  %v3541_v17 = vsub.f32 %v7817_v22, %v3392_v51  ;;  %v4015_v5 = vrot.slane %v4014_v9, 2  ;;  %v3614_v31 = vmul.f32 1.442695, %v3536_v16 }
 0x33f   :  { %v3616_v50 = vmul.f32 1.442695, %v3537_v10  ;;  %v3176_v8 = vmax.f32 %v3174_v27, %v3175_v54  ;;  %v4021_v39 = vadd.f32 %v4020_v21, %v4019_v3  ;;  %v3618_v1 = vmul.f32 1.442695, %v3538_v0 }
 0x340   :  { %v3620_v44 = vmul.f32 1.442695, %v3539_v45  ;;  %v3622_v40 = vmul.f32 1.442695, %v3540_v26  ;;  %v4016_v12 = vadd.f32 %v4015_v5, %v4014_v9  ;;  %6215 = vpow2.f32 %v3614_v31 }
 0x341   :  { %v3624_v63 = vmul.f32 1.442695, %v3541_v17  ;;  %v3177_v55 = vrot.slane %v3176_v8, 1  ;;  %v4022_v18 = vrot.slane %v4021_v39, 2  ;;  %6217 = vpow2.f32 %v3616_v50 }
 0x342   :  { %v3180_v48 = vrot.slane %v3179_v13, 4  ;;  %v7936_v11 = vcombine.high %v7903_v42, %v7903_v42  ;;  %v4017_v51 = vrot.slane %v4016_v12, 1  ;;  %6219 = vpow2.f32 %v3618_v1 }
 0x343   :  { %v3178_v16 = vmax.f32 %v3176_v8, %v3177_v55  ;;  %v2993_v27 = vcombine.low %v7875_v47, %v7907_v59  ;;  %v4038_v10 = vrot.slane %v7897_v62, 1  ;;  %6221 = vpow2.f32 %v3620_v44 }
 0x344   :  { %v3181_v5 = vmax.f32 %v3179_v13, %v3180_v48  ;;  %v3007_v14 = vrot.slane %v7903_v42, %v6865_v34  ;;  %v4018_v22 = vadd.f32 %v4017_v51, %v4016_v12  ;;  %6223 = vpow2.f32 %v3622_v40 }
 0x345   :  { %v3426_v21 = vcombine.high %v3178_v16, %v3178_v16  ;;  %v3433_v0 = vrot.slane %v3178_v16, %v6865_v34  ;;  %6225 = vpow2.f32 %v3624_v63  ;;  %v3000_v1 = vrot.slane %v2993_v27, %v6865_v34 }
 0x346   :  { %v3182_v54 = vrot.slane %v3181_v5, 2  ;;  %v3009_v32 = vcombine.low %v7936_v11, %v7719_v2  ;;  %v7947_v4 = vadd.f32 %v4022_v18, %v4021_v39  ;;  %v8725_v17 = vrot.slane %v7663_v36, 1 }
 0x347   :  { %v3440_v9 = vrot.slane %v3426_v21, %v6865_v34  ;;  %v3441_v13 = vcombine.high %v3433_v0, %v3433_v0  ;;  %v3548_v3 = vsub.f32 %v7747_v33, %v3433_v0  ;;  %v3008_v26 = vcombine.low %v3000_v1, %v3007_v14 }
 0x348   :  { %v3183_v45 = vmax.f32 %v3181_v5, %v3182_v54  ;;  %v3016_v40 = vrot.slane %v3009_v32, %v6865_v34  ;;  %v3976_v31 = vadd.f32 %v8725_v17, %v7663_v36  ;;  %6227 = vrcp.f32 %v4018_v22 }
 0x349   :  { %v3549_v50 = vsub.f32 %v7776_v41, %v3441_v13  ;;  %v3550_v8 = vsub.f32 %v7847_v38, %v3440_v9  ;;  %v3638_v39 = vmul.f32 1.442695, %v3548_v3  ;;  %v8726_v12 = vrot.slane %v7765_v25, %v6865_v34 }
 0x34a   :  { %v3184_v44 = vrot.slane %v3183_v45, 1  ;;  %v3158_v33 = vsel %vm3073_vm1, %v3008_v26, -inf  ;;  %v3989_v55 = vrot.slane %v7691_v30, 1  ;;  %v7962_v18 = vpop.eup %6215  ;;  %v8727_v27 = vrot.slane %v7670_v19, 1 }
 0x34b   :  { %v3024_v63 = vcombine.low %v3016_v40, %v8726_v12  ;;  %6229 = vpow2.f32 %v3638_v39  ;;  %v3640_v48 = vmul.f32 1.442695, %v3549_v50  ;;  %v3642_v36 = vmul.f32 1.442695, %v3550_v8  ;;  %v7964_v16 = vpop.eup %6217 }
 0x34c   :  { %v3159_v51 = vrot.slane %v3158_v33, 4  ;;  %v3185_v41 = vmax.f32 %v3183_v45, %v3184_v44  ;;  %v3983_v5 = vadd.f32 %v8727_v27, %v7670_v19  ;;  %6231 = vrcp.f32 %v3976_v31  ;;  %v7970_v14 = vpop.eup %6219 }
 0x34d   :  { %v3165_v38 = vsel %vm3073_vm1, %v3024_v63, -inf  ;;  %v3858_v22 = vcombine.low %v7962_v18, %v7964_v16  ;;  %6233 = vpow2.f32 %v3640_v48  ;;  %v7974_v54 = vpop.eup %6221  ;;  %v3990_v9 = vadd.f32 %v3989_v55, %v7691_v30 }
 0x34e   :  { %v3160_v21 = vmax.f32 %v3158_v33, %v3159_v51  ;;  %v3166_v0 = vrot.slane %v3165_v38, 4  ;;  %v3442_v1 = vcombine.high %v3185_v41, %v3185_v41  ;;  %v3449_v32 = vrot.slane %v3185_v41, %v6865_v34  ;;  %v7978_v13 = vpop.eup %6223 }
 0x34f   :  { %6235 = vpow2.f32 %v3642_v36  ;;  %v3865_v19 = vrot.slane %v3858_v22, %v6865_v34  ;;  %v3872_v3 = vrot.slane %v7970_v14, %v6865_v34  ;;  %v7983_v40 = vpop.eup %6225  ;;  %v3874_v17 = vcombine.low %v7974_v54, %v7978_v13 }
 0x350   :  { %v3161_v45 = vrot.slane %v3160_v21, 2  ;;  %v3167_v26 = vmax.f32 %v3165_v38, %v3166_v0  ;;  %v3456_v31 = vrot.slane %v3442_v1, %v6865_v34  ;;  %v3457_v50 = vcombine.high %v3449_v32, %v3449_v32 }
 0x351   :  { %v3551_v8 = vsub.f32 %v7854_v53, %v3449_v32  ;;  %v3873_v30 = vcombine.low %v3865_v19, %v3872_v3  ;;  %v3888_v39 = vrot.slane %v7983_v40, %v6865_v34  ;;  %v3881_v63 = vrot.slane %v3874_v17, %v6865_v34 }
 0x352   :  { %v3162_v44 = vmax.f32 %v3160_v21, %v3161_v45  ;;  %v3168_v12 = vrot.slane %v3167_v26, 2  ;;  %v3552_v33 = vsub.f32 %v7850_v28, %v3457_v50  ;;  %v3553_v55 = vsub.f32 %v7867_v15, %v3456_v31  ;;  %v7994_v36 = vpop.eup %6227 }
 0x353   :  { %v3644_v48 = vmul.f32 1.442695, %v3551_v8  ;;  %v4040_v51 = vsel %vm3073_vm1, %v3873_v30, 0.0  ;;  %6237 = vrcp.f32 %v3983_v5  ;;  %v3889_v53 = vcombine.low %v3881_v63, %v3888_v39 }
 0x354   :  { %v3163_v41 = vrot.slane %v3162_v44, 1  ;;  %v3169_v38 = vmax.f32 %v3167_v26, %v3168_v12  ;;  %v4041_v27 = vrot.slane %v4040_v51, 4  ;;  %v3646_v22 = vmul.f32 1.442695, %v3552_v33 }
 0x355   :  { %6239 = vrcp.f32 %v3990_v9  ;;  %v7997_v21 = vpop.eup %6229  ;;  %v3648_v0 = vmul.f32 1.442695, %v3553_v55  ;;  %v4047_v19 = vsel %vm3073_vm1, %v3889_v53, 0.0  ;;  %v8728_v3 = vcombine.low %v7732_v58, %v7735_v56 }
 0x356   :  { %6241 = vpow2.f32 %v3644_v48  ;;  %v3164_v1 = vmax.f32 %v3162_v44, %v3163_v41  ;;  %v3170_v28 = vrot.slane %v3169_v38, 1  ;;  %v6232_v32 = vpop.eup %6231  ;;  %v4042_v15 = vadd.f32 %v4041_v27, %v4040_v51 }
 0x357   :  { %6243 = vpow2.f32 %v3646_v22  ;;  %v8004_v5 = vrot.slane %v8728_v3, %v6865_v34  ;;  %v8006_v45 = vpop.eup %6233  ;;  %v4048_v9 = vrot.slane %v4047_v19, 4  ;;  %v4114_v39 = vcombine.high %v6232_v32, %v6232_v32 }
 0x358   :  { %6245 = vpow2.f32 %v3648_v0  ;;  %v3171_v26 = vmax.f32 %v3169_v38, %v3170_v28  ;;  %v3394_v17 = vcombine.high %v3164_v1, %v3164_v1  ;;  %v4043_v50 = vrot.slane %v4042_v15, 2 }
 0x359   :  { %v8008_v31 = vpop.eup %6235  ;;  %v3922_v8 = vcombine.low %v7997_v21, %v8006_v45  ;;  %v3401_v30 = vrot.slane %v3164_v1, %v6865_v34  ;;  %v4049_v44 = vadd.f32 %v4048_v9, %v4047_v19 }
 0x35a   :  { %v3936_v58 = vrot.slane %v8008_v31, %v6865_v34  ;;  %v3408_v56 = vrot.slane %v3394_v17, %v6865_v34  ;;  %v3410_v12 = vcombine.high %v3171_v26, %v3171_v26  ;;  %v4044_v63 = vadd.f32 %v4043_v50, %v4042_v15 }
 0x35b   :  { %v3929_v33 = vrot.slane %v3922_v8, %v6865_v34  ;;  %v3409_v55 = vcombine.high %v3401_v30, %v3401_v30  ;;  %v3417_v48 = vrot.slane %v3171_v26, %v6865_v34  ;;  %v4050_v51 = vrot.slane %v4049_v44, 2 }
 0x35c   :  { %v3424_v41 = vrot.slane %v3410_v12, %v6865_v34  ;;  %v3542_v38 = vsub.f32 %v7875_v47, %v3401_v30  ;;  %v3544_v53 = vsub.f32 %v7903_v42, %v3408_v56  ;;  %v4045_v27 = vrot.slane %v4044_v63, 1 }
 0x35d   :  { %v3937_v22 = vcombine.low %v3929_v33, %v3936_v58  ;;  %v3425_v0 = vcombine.high %v3417_v48, %v3417_v48  ;;  %v3543_v1 = vsub.f32 %v7907_v59, %v3409_v55  ;;  %v6238_v28 = vpop.eup %6237  ;;  %v8022_v19 = vadd.f32 %v4050_v51, %v4049_v44 }
 0x35e   :  { %v3545_v15 = vsub.f32 %v7936_v11, %v3417_v48  ;;  %v3547_v3 = vsub.f32 %v7765_v25, %v3424_v41  ;;  %v3626_v9 = vmul.f32 1.442695, %v3542_v38  ;;  %v4046_v17 = vadd.f32 %v4045_v27, %v4044_v63 }
 0x35f   :  { %v8026_v26 = vpop.eup %6239  ;;  %v4068_v47 = vsel %vm3073_vm1, %v3937_v22, 0.0  ;;  %v3546_v42 = vsub.f32 %v7719_v2, %v3425_v0  ;;  %v3628_v50 = vmul.f32 1.442695, %v3543_v1  ;;  %v3630_v59 = vmul.f32 1.442695, %v3544_v53 }
 0x360   :  { %v8030_v8 = vpop.eup %6241  ;;  %v4069_v30 = vrot.slane %v4068_v47, 4  ;;  %6247 = vpow2.f32 %v3626_v9  ;;  %v3632_v44 = vmul.f32 1.442695, %v3545_v15  ;;  %v3636_v25 = vmul.f32 1.442695, %v3547_v3 }
 0x361   :  { %v8032_v58 = vpop.eup %6243  ;;  %6249 = vrcp.f32 %v4046_v17  ;;  %v3634_v11 = vmul.f32 1.442695, %v3546_v42  ;;  %v4121_v56 = vrot.slane %v6232_v32, %v6865_v34  ;;  %v4128_v33 = vrot.slane %v4114_v39, %v6865_v34 }
 0x362   :  { %v8035_v12 = vpop.eup %6245  ;;  %v3938_v63 = vcombine.low %v8030_v8, %v8032_v58  ;;  %v4070_v2 = vadd.f32 %v4069_v30, %v4068_v47  ;;  %6251 = vpow2.f32 %v3628_v50  ;;  %v4130_v51 = vcombine.high %v6238_v28, %v6238_v28 }
 0x363   :  { %v3952_v55 = vrot.slane %v8035_v12, %v6865_v34  ;;  %6253 = vpow2.f32 %v3630_v59  ;;  %v4129_v48 = vcombine.high %v4121_v56, %v4121_v56  ;;  %v4137_v32 = vrot.slane %v6238_v28, %v6865_v34 }
 0x364   :  { %v3945_v41 = vrot.slane %v3938_v63, %v6865_v34  ;;  %v4071_v38 = vrot.slane %v4070_v2, 2  ;;  %6255 = vpow2.f32 %v3632_v44  ;;  %v4144_v53 = vrot.slane %v4130_v51, %v6865_v34 }
 0x365   :  { %6257 = vpow2.f32 %v3634_v11  ;;  %v4153_v27 = vrot.slane %v8026_v26, %v6865_v34  ;;  %v4418_v39 = vmul.f32 %v7559_v60, %v4121_v56  ;;  %v4145_v1 = vcombine.high %v4137_v32, %v4137_v32 }
 0x366   :  { %v3953_v22 = vcombine.low %v3945_v41, %v3952_v55  ;;  %v4072_v0 = vadd.f32 %v4071_v38, %v4070_v2  ;;  %6259 = vpow2.f32 %v3636_v25  ;;  %v4419_v3 = vmul.f32 %v7580_v35, %v4129_v48 }
 0x367   :  { %v4161_v15 = vcombine.high %v4153_v27, %v4153_v27  ;;  %v4420_v9 = vmul.f32 %v7587_v49, %v4128_v33  ;;  %v4421_v17 = vmul.f32 %v7620_v37, %v4137_v32  ;;  %v4422_v42 = vmul.f32 %v7625_v61, %v4145_v1 }
 0x368   :  { %v4073_v28 = vrot.slane %v4072_v0, 1  ;;  %v4075_v47 = vsel %vm3073_vm1, %v3953_v22, 0.0  ;;  %v4423_v50 = vmul.f32 %v7634_v23, %v4144_v53  ;;  %v4424_v30 = vmul.f32 %v7638_v7, %v4153_v27 }
 0x369   :  { %v4076_v60 = vrot.slane %v4075_v47, 4  ;;  %v4425_v59 = vmul.f32 %v7646_v6, %v4161_v15  ;;  %v4516_v44 = vcombine.low %v4418_v39, %v4419_v3  ;;  %v4517_v49 = vcombine.low %v4420_v9, %v4421_v17 }
 0x36a   :  { %v8056_v11 = vpop.eup %6247  ;;  %v4074_v35 = vadd.f32 %v4073_v28, %v4072_v0  ;;  %v4533_v25 = vcombine.low %v4422_v42, %v4423_v50  ;;  %v4146_v37 = vcombine.high %v8026_v26, %v8026_v26  ;;  %v4568_v7 = vcombine.low %v7760_v46, %v7927_v57 }
 0x36b   :  { %v8060_v56 = vpop.eup %6249  ;;  %v4077_v61 = vadd.f32 %v4076_v60, %v4075_v47  ;;  %v4524_v23 = vrot.slane %v4516_v44, %v6865_v34  ;;  %v4534_v63 = vcombine.low %v4424_v30, %v4425_v59  ;;  %v4531_v6 = vrot.slane %v4517_v49, %v6865_v34  ;;  %v8730_v44 = vld [vmem:[#allocation90_spill] sm:$0xff] }
 0x36c   :  { %v8065_v2 = vpop.eup %6251  ;;  %6261 = vrcp.f32 %v4074_v35  ;;  %v4541_v33 = vrot.slane %v4533_v25, %v6865_v34  ;;  %v4160_v55 = vrot.slane %v4146_v37, %v6865_v34  ;;  %v8729_v46 = vcombine.low %v7752_v52, %v7755_v29 }
 0x36d   :  { %v8070_v48 = vpop.eup %6253  ;;  %v4078_v26 = vrot.slane %v4077_v61, 2  ;;  %v3890_v51 = vcombine.low %v8056_v11, %v8065_v2  ;;  %v4548_v41 = vrot.slane %v4534_v63, %v6865_v34  ;;  %v4532_v53 = vcombine.low %v4524_v23, %v4531_v6  ;;  %v8732_v6 = vld [vmem:[#allocation79_spill] sm:$0xff] }
 0x36e   :  { %v4575_v57 = vrot.slane %v8729_v46, %v6865_v34  ;;  %v8079_v38 = vpop.eup %6255  ;;  %v3904_v32 = vrot.slane %v8070_v48, %v6865_v34  ;;  %v4426_v27 = vmul.f32 %v7650_v20, %v4160_v55  ;;  %v4582_v39 = vrot.slane %v4568_v7, %v6865_v34  ;;  %v8733_v55 = vld [vmem:[#allocation84_spill] sm:$0xff] }
 0x36f   :  { %v8085_v22 = vpop.eup %6257  ;;  %v8087_v0 = vadd.f32 %v4078_v26, %v4077_v61  ;;  %v3897_v1 = vrot.slane %v3890_v51, %v6865_v34  ;;  %v4549_v15 = vcombine.low %v4541_v33, %v4548_v41  ;;  %v4024_v52 = vrot.slane %v7947_v4, 1  ;;  %v8731_v61 = vld [vmem:[#allocation78_spill] sm:$0xff] }
 0x370   :  { %v8091_v29 = vpop.eup %6259  ;;  %v3906_v3 = vcombine.low %v8079_v38, %v8085_v22  ;;  %v4550_v9 = vcombine.low %v4426_v27, %v7740_v24  ;;  %v4583_v17 = vcombine.low %v4575_v57, %v4582_v39  ;;  %v4194_v20 = vcombine.high %v7913_v43, %v7913_v43 }
 0x371   :  { %v3905_v28 = vcombine.low %v3897_v1, %v3904_v32  ;;  %v3920_v47 = vrot.slane %v8091_v29, %v6865_v34  ;;  %v4732_v42 = vpack.c.bf16 %v4549_v15, %v4532_v53  ;;  %v4025_v50 = vadd.f32 %v4024_v52, %v7947_v4  ;;  %v8734_v32 = vld [vmem:[#allocation80_spill] sm:$0xff]  ;;  %v8737_v1 = vld [vmem:[#allocation86_spill] sm:$0xff] }
 0x372   :  { %v3913_v60 = vrot.slane %v3906_v3, %v6865_v34  ;;  %v4558_v30 = vrot.slane %v4550_v9, %v6865_v34  ;;  %v4208_v59 = vrot.slane %v4194_v20, %v6865_v34  ;;  %v4209_v24 = vcombine.high %v8730_v44, %v8730_v44 }
 0x373   :  { %v4054_v35 = vsel %vm3073_vm1, %v3905_v28, 0.0  ;;  %6047 = vmatprep.mubr.msk.bf16.mxu1 %vm4744_vm2, %v4732_v42  ;;  %6263 = vrcp.f32 %v4025_v50  ;;  %v4210_v43 = vcombine.high %v7994_v36, %v7994_v36  ;;  %v4217_v4 = vrot.slane %v7994_v36, %v6865_v34 }
 0x374   :  { %v3921_v49 = vcombine.low %v3913_v60, %v3920_v47  ;;  %v4055_v25 = vrot.slane %v4054_v35, 4  ;;  %v4566_v37 = vcombine.low %v4558_v30, %v8004_v5  ;;  %v4434_v23 = vmul.f32 %v8731_v61, %v4209_v24  ;;  %v8736_v5 = vld [vmem:[#allocation85_spill] sm:$0xff] }
 0x375   :  { %v4224_v63 = vrot.slane %v4210_v43, %v6865_v34  ;;  %v4225_v7 = vcombine.high %v4217_v4, %v4217_v4  ;;  %v4435_v33 = vmul.f32 %v8732_v6, %v4208_v59  ;;  %v4436_v26 = vmul.f32 %v8733_v55, %v4217_v4 }
 0x376   :  { %v6262_v51 = vpop.eup %6261  ;;  %v4056_v41 = vadd.f32 %v4055_v25, %v4054_v35  ;;  %v4061_v46 = vsel %vm3073_vm1, %v3921_v49, 0.0  ;;  %v4733_v57 = vpack.c.bf16 %v4583_v17, %v4566_v37  ;;  %v8735_v36 = vrot.slane %v8734_v32, 1 }
 0x377   :  { %v4062_v27 = vrot.slane %v4061_v46, 4  ;;  %v4437_v39 = vmul.f32 %v8736_v5, %v4225_v7  ;;  %v4438_v15 = vmul.f32 %v8737_v1, %v4224_v63  ;;  %v4584_v52 = vcombine.low %v4434_v23, %v4435_v33  ;;  %v8740_v5 = vld [vmem:[#allocation89_spill] sm:$0xff] }
 0x378   :  { %v4032_v53 = vadd.f32 %v8735_v36, %v8734_v32  ;;  %v4057_v3 = vrot.slane %v4056_v41, 2  ;;  %6048 = vmatmul.mubr.msk.bf16.vlgmr.msra.gmra.mrb[24].mxu1 %vm4744_vm2, %v4733_v57  ;;  %v4039_v9 = vadd.f32 %v4038_v10, %v7897_v62  ;;  %v4281_v17 = vrot.slane %v8060_v56, %v6865_v34 }
 0x379   :  { %v4063_v20 = vadd.f32 %v4062_v27, %v4061_v46  ;;  %v4585_v28 = vcombine.low %v4436_v26, %v4437_v39  ;;  %v8130_v47 = vrot.slane %v4584_v52, %v6865_v34  ;;  %v4052_v42 = vrot.slane %v8022_v19, 1  ;;  %v8738_v26 = vld [vmem:[#allocation87_spill] sm:$0xff] }
 0x37a   :  { %6265 = vrcp.f32 %v4032_v53  ;;  %v4058_v50 = vadd.f32 %v4057_v3, %v4056_v41  ;;  %v4289_v60 = vcombine.high %v4281_v17, %v4281_v17  ;;  %v8134_v30 = vmul.f32 %v7962_v18, %v4281_v17  ;;  %v8739_v53 = vld [vmem:[#allocation88_spill] sm:$0xff] }
 0x37b   :  { %6267 = vrcp.f32 %v4039_v9  ;;  %v4064_v59 = vrot.slane %v4063_v20, 2  ;;  %v4599_v62 = vrot.slane %v4585_v28, %v6865_v34  ;;  %v4053_v10 = vadd.f32 %v4052_v42, %v8022_v19 }
 0x37c   :  { %v4274_v44 = vcombine.high %v8060_v56, %v8060_v56  ;;  %v4059_v24 = vrot.slane %v4058_v50, 1  ;;  %v8141_v35 = vmul.f32 %v7964_v16, %v4289_v60  ;;  %v4080_v43 = vrot.slane %v8087_v0, 1 }
 0x37d   :  { %v4338_v4 = vcombine.high %v6262_v51, %v6262_v51  ;;  %v6264_v49 = vpop.eup %6263  ;;  %v4600_v25 = vcombine.low %v8130_v47, %v4599_v62  ;;  %v4065_v18 = vadd.f32 %v4064_v59, %v4063_v20  ;;  %6269 = vrcp.f32 %v4053_v10  ;;  %v8742_v10 = vld [vmem:[#allocation76_spill] sm:$0xff] }
 0x37e   :  { %v4288_v37 = vrot.slane %v4274_v44, %v6865_v34  ;;  %v4226_v61 = vcombine.high %v6264_v49, %v6264_v49  ;;  %v4233_v19 = vrot.slane %v6264_v49, %v6865_v34  ;;  %v4636_v56 = vcombine.low %v8134_v30, %v8141_v35  ;;  %v8743_v44 = vld [vmem:[#allocation77_spill] sm:$0xff] }
 0x37f   :  { %v4060_v23 = vadd.f32 %v4059_v24, %v4058_v50  ;;  %v4066_v63 = vrot.slane %v4065_v18, 1  ;;  %v4081_v7 = vadd.f32 %v4080_v43, %v8087_v0  ;;  %v4345_v6 = vrot.slane %v6262_v51, %v6865_v34  ;;  %v8744_v43 = vld [vmem:[#allocation81_spill] sm:$0xff] }
 0x380   :  { %v8150_v16 = vmul.f32 %v7970_v14, %v4288_v37  ;;  %v4240_v33 = vrot.slane %v4226_v61, %v6865_v34  ;;  %v4241_v55 = vcombine.high %v4233_v19, %v4233_v19  ;;  %v4439_v41 = vmul.f32 %v8738_v26, %v4233_v19  ;;  %v8745_v37 = vld [vmem:[#allocation83_spill] sm:$0xff]  ;;  %v8746_v19 = vld [vmem:[#allocation82_spill] sm:$0xff] }
 0x381   :  { %v4067_v46 = vadd.f32 %v4066_v63, %v4065_v18  ;;  %6271 = vrcp.f32 %v4060_v23  ;;  %v4352_v57 = vrot.slane %v4338_v4, %v6865_v34  ;;  %v4353_v32 = vcombine.high %v4345_v6, %v4345_v6 }
 0x382   :  { %v4440_v27 = vmul.f32 %v8739_v53, %v4241_v55  ;;  %v4441_v14 = vmul.f32 %v8740_v5, %v4240_v33  ;;  %v4601_v39 = vcombine.low %v4438_v15, %v4439_v41  ;;  %6273 = vrcp.f32 %v4081_v7 }
 0x383   :  { %6275 = vrcp.f32 %v4067_v46  ;;  %v8161_v1 = vmul.f32 %v7997_v21, %v4345_v6  ;;  %v8165_v17 = vmul.f32 %v8006_v45, %v4353_v32  ;;  %v8168_v20 = vmul.f32 %v8008_v31, %v4352_v57  ;;  %v8741_v21 = vld [vmem:[#allocation75_spill] sm:$0xff] }
 0x384   :  { %v6266_v36 = vpop.eup %6265  ;;  %v4602_v3 = vcombine.low %v4440_v27, %v4441_v14  ;;  %v4609_v9 = vrot.slane %v4601_v39, %v6865_v34  ;;  %v4650_v57 = vrot.slane %v4636_v56, %v6865_v34 }
 0x385   :  { %v4242_v0 = vcombine.high %v6266_v36, %v6266_v36  ;;  %v4249_v51 = vrot.slane %v6266_v36, %v6865_v34  ;;  %v6268_v52 = vpop.eup %6267  ;;  %v4687_v30 = vcombine.low %v8161_v1, %v8165_v17  ;;  %v6144_v1 = vld [vmem:[#allocation13 + $0x18] sm:$0xff]   ;;  %v6145_v17 = vld [vmem:[#allocation13 + $0x20] sm:$0xff]  }
 0x386   :  { %v4258_v47 = vcombine.high %v6268_v52, %v6268_v52  ;;  %v4265_v42 = vrot.slane %v6268_v52, %v6865_v34  ;;  %v4616_v50 = vrot.slane %v4602_v3, %v6865_v34 }
 0x387   :  { %v4256_v15 = vrot.slane %v4242_v0, %v6865_v34  ;;  %v4257_v28 = vcombine.high %v4249_v51, %v4249_v51  ;;  %v4442_v60 = vmul.f32 %v8741_v21, %v4249_v51  ;;  %v6270_v59 = vpop.eup %6269 }
 0x388   :  { %v4272_v45 = vrot.slane %v4258_v47, %v6865_v34  ;;  %v4273_v62 = vcombine.high %v4265_v42, %v4265_v42  ;;  %v4617_v35 = vcombine.low %v4609_v9, %v4616_v50  ;;  %v4445_v4 = vmul.f32 %v8744_v43, %v4265_v42 }
 0x389   :  { %v4443_v31 = vmul.f32 %v8742_v10, %v4257_v28  ;;  %v4444_v24 = vmul.f32 %v8743_v44, %v4256_v15  ;;  %v4290_v49 = vcombine.high %v6270_v59, %v6270_v59  ;;  %v4297_v18 = vrot.slane %v6270_v59, %v6865_v34 }
 0x38a   :  { %v4446_v61 = vmul.f32 %v8745_v37, %v4273_v62  ;;  %v4447_v23 = vmul.f32 %v8746_v19, %v4272_v45  ;;  %v4734_v7 = vpack.c.bf16 %v4617_v35, %v4600_v25 }
 0x38b   :  { %v4618_v63 = vcombine.low %v4442_v60, %v4443_v31  ;;  %v4619_v6 = vcombine.low %v4444_v24, %v4445_v4  ;;  %v4304_v33 = vrot.slane %v4290_v49, %v6865_v34  ;;  %v4305_v55 = vcombine.high %v4297_v18, %v4297_v18  ;;  %v6272_v26 = vpop.eup %6271 }
 0x38c   :  { %v4635_v46 = vcombine.low %v4446_v61, %v4447_v23  ;;  %v4451_v32 = vmul.f32 %v7974_v54, %v4297_v18  ;;  %v6274_v36 = vpop.eup %6273  ;;  %6051 = vmatprep.mubr.msk.bf16.mxu1 %vm4744_vm2, %v4734_v7  ;;  %v4306_v27 = vcombine.high %v6272_v26, %v6272_v26  ;;  %v4313_v25 = vrot.slane %v6272_v26, %v6865_v34  ;;  %v6141_v7 = vld [vmem:[#allocation13] sm:$0xff]   ;;  %v6147_v26 = vld [vmem:[#allocation13 + $0x30] sm:$0xff]  }
 0x38d   :  { %v4626_v41 = vrot.slane %v4618_v63, %v6865_v34  ;;  %v4633_v53 = vrot.slane %v4619_v6, %v6865_v34  ;;  %v4452_v5 = vmul.f32 %v7978_v13, %v4305_v55  ;;  %v6276_v14 = vpop.eup %6275  ;;  %v4453_v0 = vmul.f32 %v7983_v40, %v4304_v33  ;;  %6060 = vmatpush3.bf16.msra.mxu0 %v6141_v7  ;;  %v6142_v33 = vld [vmem:[#allocation13 + $0x8] sm:$0xff]   ;;  %v6143_v55 = vld [vmem:[#allocation13 + $0x10] sm:$0xff]   ;;  %v8773_v7 = vld [vmem:[#allocation59_spill] sm:$0xff] }
 0x38e   :  { %v4643_v39 = vrot.slane %v4635_v46, %v6865_v34  ;;  %v4652_v51 = vcombine.low %v8150_v16, %v4451_v32  ;;  %v4354_v56 = vcombine.high %v6274_v36, %v6274_v36  ;;  %v4320_v54 = vrot.slane %v4306_v27, %v6865_v34  ;;  %v8748_v46 = vld [vmem:[#allocation35_spill] sm:$0xff]  ;;  %v8749_v32 = vld [vmem:[#allocation38_spill] sm:$0xff] }
 0x38f   :  { %v4634_v52 = vcombine.low %v4626_v41, %v4633_v53  ;;  %v4321_v3 = vcombine.high %v4313_v25, %v4313_v25  ;;  %v4329_v9 = vrot.slane %v6276_v14, %v6865_v34  ;;  %v4454_v28 = vmul.f32 %v8056_v11, %v4313_v25  ;;  %v6148_v41 = vld [vmem:[#allocation13 + $0x38] sm:$0xff]   ;;  %v8750_v53 = vld [vmem:[#allocation36_spill] sm:$0xff] }
 0x390   :  { %v4651_v15 = vcombine.low %v4643_v39, %v4650_v57  ;;  %v4653_v47 = vcombine.low %v4452_v5, %v4453_v0  ;;  %v4660_v13 = vrot.slane %v4652_v51, %v6865_v34  ;;  %v4456_v50 = vmul.f32 %v8070_v48, %v4320_v54  ;;  %v8751_v25 = vld [vmem:[#allocation39_spill] sm:$0xff]  ;;  %v8753_v0 = vld [vmem:[#allocation29_spill] sm:$0xff] }
 0x391   :  { %v4455_v42 = vmul.f32 %v8065_v2, %v4321_v3  ;;  %v4457_v40 = vmul.f32 %v8079_v38, %v4329_v9  ;;  %v4322_v16 = vcombine.high %v6276_v14, %v6276_v14  ;;  %v4337_v59 = vcombine.high %v4329_v9, %v4329_v9  ;;  %v8752_v14 = vld [vmem:[#allocation27_spill] sm:$0xff]  ;;  %v8755_v54 = vld [vmem:[#allocation37_spill] sm:$0xff] }
 0x392   :  { %v4735_v21 = vpack.c.bf16 %v4651_v15, %v4634_v52  ;;  %v4667_v60 = vrot.slane %v4653_v47, %v6865_v34  ;;  %v4361_v45 = vrot.slane %v6274_v36, %v6865_v34  ;;  %v4368_v31 = vrot.slane %v4354_v56, %v6865_v34  ;;  %v8754_v56 = vld [vmem:[#allocation28_spill] sm:$0xff]  ;;  %v8756_v9 = vld [vmem:[#allocation41_spill] sm:$0xff] }
 0x393   :  { %v4669_v62 = vcombine.low %v4454_v28, %v4455_v42  ;;  %v4670_v10 = vcombine.low %v4456_v50, %v4457_v40  ;;  %v4336_v11 = vrot.slane %v4322_v16, %v6865_v34  ;;  %v4458_v48 = vmul.f32 %v8085_v22, %v4337_v59  ;;  %v8757_v28 = vld [vmem:[#allocation40_spill] sm:$0xff]  ;;  %v8759_v50 = vld [vmem:[#allocation31_spill] sm:$0xff]  ;;  %v8760_v16 = vld [vmem:[#allocation33_spill] sm:$0xff] }
 0x394   :  { %6052 = vmatmul.mubr.msk.bf16.gmra.mrb[28].mxu1 %vm4744_vm2, %v4735_v21  ;;  %v4668_v2 = vcombine.low %v4660_v13, %v4667_v60  ;;  %v4369_v44 = vcombine.high %v4361_v45, %v4361_v45  ;;  %v4463_v38 = vmul.f32 %v8030_v8, %v4361_v45  ;;  %v4465_v4 = vmul.f32 %v8035_v12, %v4368_v31  ;;  %v8758_v13 = vld [vmem:[#allocation30_spill] sm:$0xff]  ;;  %v8761_v60 = vld [vmem:[#allocation32_spill] sm:$0xff]  ;;  %v8764_v31 = vld [vmem:[#allocation53_spill] sm:$0xff] }
 0x395   :  { %v4677_v24 = vrot.slane %v4669_v62, %v6865_v34  ;;  %v4684_v35 = vrot.slane %v4670_v10, %v6865_v34  ;;  %v4459_v43 = vmul.f32 %v8091_v29, %v4336_v11  ;;  %v4701_v63 = vrot.slane %v4687_v30, %v6865_v34  ;;  %v6146_v30 = vld [vmem:[#allocation13 + $0x28] sm:$0xff]   ;;  %v8762_v45 = vld [vmem:[#allocation34_spill] sm:$0xff]  ;;  %v8763_v10 = vld [vmem:[#allocation51_spill] sm:$0xff] }
 0x396   :  { %v4464_v49 = vmul.f32 %v8032_v58, %v4369_v44  ;;  %v4703_v18 = vcombine.low %v8168_v20, %v4463_v38  ;;  %v8747_v6 = vmov 0.0   ;;  %v5116_v57 = vrot.slane %v8748_v46, 2  ;;  %v8765_v44 = vld [vmem:[#allocation52_spill] sm:$0xff]  ;;  %v8766_v38 = vld [vmem:[#allocation42_spill] sm:$0xff] }
 0x397   :  { %v4685_v37 = vcombine.low %v4677_v24, %v4684_v35  ;;  %v4686_v61 = vcombine.low %v4458_v48, %v4459_v43  ;;  %6061 = vmatprep.subr.bf16.mxu0 %v8747_v6  ;;  %v5117_v36 = vrot.slane %v8749_v32, 2  ;;  %v5118_v27 = vrot.slane %v8750_v53, 2  ;;  %v8767_v35 = vld [vmem:[#allocation43_spill] sm:$0xff]  ;;  %v8778_v43 = vld [vmem:[#allocation48_spill] sm:$0xff] }
 0x398   :  { %v4704_v19 = vcombine.low %v4464_v49, %v4465_v4  ;;  %v4711_v23 = vrot.slane %v4703_v18, %v6865_v34  ;;  %6062 = vmatpush3.bf16.msra.mxu0 %v6142_v33  ;;  %v5119_v5 = vrot.slane %v8751_v25, 2  ;;  %v5108_v39 = vrot.slane %v8752_v14, 2  ;;  %v8768_v49 = vld [vmem:[#allocation46_spill] sm:$0xff] }
 0x399   :  { %v4736_v22 = vpack.c.bf16 %v4685_v37, %v4668_v2  ;;  %v4694_v8 = vrot.slane %v4686_v61, %v6865_v34  ;;  %6063 = vmatprep.subr.bf16.mxu0 %v8747_v6  ;;  %v5109_v51 = vrot.slane %v8753_v0, 2  ;;  %v5110_v52 = vrot.slane %v8754_v56, 2  ;;  %v8769_v37 = vld [vmem:[#allocation44_spill] sm:$0xff]  ;;  %v8776_v0 = vld [vmem:[#allocation45_spill] sm:$0xff] }
 0x39a   :  { %v4718_v29 = vrot.slane %v4704_v19, %v6865_v34  ;;  %v5120_v3 = vrot.slane %v8755_v54, 2  ;;  %v5121_v15 = vrot.slane %v8756_v9, 2  ;;  %v5122_v47 = vrot.slane %v8757_v28, 2  ;;  %v8770_v19 = vld [vmem:[#allocation47_spill] sm:$0xff] }
 0x39b   :  { %6055 = vmatprep.mubr.msk.bf16.mxu1 %vm4744_vm2, %v4736_v22  ;;  %v4702_v58 = vcombine.low %v4694_v8, %v4701_v63  ;;  %v5111_v42 = vrot.slane %v8758_v13, 2  ;;  %v5112_v40 = vrot.slane %v8759_v50, 2  ;;  %v5113_v21 = vrot.slane %v8760_v16, 2  ;;  %v8771_v22 = vld [vmem:[#allocation54_spill] sm:$0xff]  ;;  %v8777_v13 = vld [vmem:[#allocation49_spill] sm:$0xff] }
 0x39c   :  { %v4719_v12 = vcombine.low %v4711_v23, %v4718_v29  ;;  %6064 = vmatpush3.bf16.msra.mxu0 %v6143_v55  ;;  %v5114_v59 = vrot.slane %v8761_v60, 2  ;;  %v5115_v62 = vrot.slane %v8762_v45, 2  ;;  %v5132_v11 = vrot.slane %v8763_v10, 2 }
 0x39d   :  { %6065 = vmatprep.subr.bf16.mxu0 %v8747_v6  ;;  %v5134_v48 = vrot.slane %v8765_v44, 2  ;;  %v5123_v24 = vrot.slane %v8766_v38, 2  ;;  %v8798_v44 = vrot.slane %v8768_v49, 2 }
 0x39e   :  { %v4737_v20 = vpack.c.bf16 %v4719_v12, %v4702_v58  ;;  %v8772_v12 = vld [vmem:[#allocation55_spill] sm:$0xff] }
 0x3a0   :  { %6056 = vmatmul.mubr.msk.bf16.gmra.mrb[32].mxu1 %vm4744_vm2, %v4737_v20  ;;  %6066 = vmatpush3.bf16.msra.mxu0 %v6144_v1 }
 0x3a1   :  { %6067 = vmatprep.subr.bf16.mxu0 %v8747_v6 }
 0x3a4   :  { %6068 = vmatpush3.bf16.msra.mxu0 %v6145_v17  ;;  %v8774_v17 = vld [vmem:[#allocation56_spill] sm:$0xff] }
 0x3a5   :  { %6069 = vmatprep.subr.bf16.mxu0 %v8747_v6 }
 0x3a8   :  { %6070 = vmatpush3.bf16.msra.mxu0 %v6146_v30 }
 0x3a9   :  { %6071 = vmatprep.subr.bf16.mxu0 %v8747_v6 }
 0x3ac   :  { %6072 = vmatpush3.bf16.msra.mxu0 %v6147_v26  ;;  %v8775_v26 = vld [vmem:[#allocation60_spill] sm:$0xff] }
 0x3ad   :  { %6073 = vmatprep.subr.bf16.mxu0 %v8747_v6 }
 0x3b0   :  { %6074 = vmatpush3.bf16.msra.mxu0 %v6148_v41 }
 0x44b   :  { %v6049_v4 = vpop.f32.mrb[24].mxu1 }
 0x44c   :  { %v4890_v63 = vcombine.high %v6049_v4, %v6049_v4  ;;  %v4897_v29 = vrot.slane %v6049_v4, %v6865_v34  ;;  %v4797_v58 = vpop.f32.mrb[25].mxu1 }
 0x44d   :  { %v4856_v33 = vcombine.high %v4797_v58, %v4797_v58  ;;  %v4863_v55 = vrot.slane %v4797_v58, %v6865_v34  ;;  %v6050_v1 = vpop.f32.mrb[26].mxu1 }
 0x44e   :  { %v4904_v32 = vrot.slane %v4890_v63, %v6865_v34  ;;  %v4905_v53 = vcombine.high %v4897_v29, %v4897_v29  ;;  %v4907_v25 = vcombine.high %v6050_v1, %v6050_v1  ;;  %v4800_v14 = vpop.f32.mrb[27].mxu1  ;;  %v4914_v28 = vrot.slane %v6050_v1, %v6865_v34 }
 0x44f   :  { %v4870_v54 = vrot.slane %v4856_v33, %v6865_v34  ;;  %v4871_v9 = vcombine.high %v4863_v55, %v4863_v55  ;;  %v5204_v30 = vmul.f32 %v5108_v39, %v4863_v55  ;;  %v5130_v33 = vrot.slane %v8778_v43, 2 }
 0x450   :  { %v4906_v58 = vcombine.high %v4904_v32, %v4904_v32  ;;  %v5213_v6 = vmul.f32 %v5117_v36, %v4905_v53  ;;  %v5214_v20 = vmul.f32 %v5118_v27, %v4904_v32  ;;  %v8266_v63 = vrot.slane %v4907_v25, %v6865_v34 }
 0x451   :  { %v4872_v8 = vcombine.high %v4870_v54, %v4870_v54  ;;  %v5205_v41 = vmul.f32 %v5109_v51, %v4871_v9  ;;  %v5206_v61 = vmul.f32 %v5110_v52, %v4870_v54  ;;  %v4922_v56 = vcombine.high %v4914_v28, %v4914_v28 }
 0x452   :  { %v5215_v23 = vmul.f32 %v5119_v5, %v4906_v58  ;;  %v5348_v18 = vcombine.low %v5213_v6, %v5214_v20  ;;  %v5216_v1 = vmul.f32 %v5120_v3, %v4914_v28  ;;  %v5218_v4 = vmul.f32 %v5122_v47, %v8266_v63  ;;  %v8779_v3 = vld [vmem:[#allocation50_spill] sm:$0xff]  ;;  %v8780_v28 = vld [vmem:[#allocation67_spill] sm:$0xff] }
 0x453   :  { %v5300_v2 = vcombine.low %v5204_v30, %v5205_v41  ;;  %v5217_v39 = vmul.f32 %v5121_v15, %v4922_v56  ;;  %v4873_v51 = vcombine.high %v4800_v14, %v4800_v14  ;;  %v5314_v55 = vrot.slane %v5206_v61, %v6865_v34 }
 0x454   :  { %v5355_v36 = vrot.slane %v5348_v18, %v6865_v34  ;;  %v5362_v27 = vrot.slane %v5215_v23, %v6865_v34  ;;  %v4880_v5 = vrot.slane %v4800_v14, %v6865_v34  ;;  %v5207_v20 = vmul.f32 %v5111_v42, %v4872_v8 }
 0x455   :  { %v5307_v52 = vrot.slane %v5300_v2, %v6865_v34  ;;  %v5364_v32 = vcombine.low %v5216_v1, %v5217_v39  ;;  %v4887_v30 = vrot.slane %v4873_v51, %v6865_v34  ;;  %v5131_v41 = vrot.slane %v8779_v3, 2  ;;  %v8781_v1 = vld [vmem:[#allocation69_spill] sm:$0xff] }
 0x456   :  { %v5363_v6 = vcombine.low %v5355_v36, %v5362_v27  ;;  %v5212_v47 = vmul.f32 %v5116_v57, %v4897_v29  ;;  %v4888_v23 = vcombine.high %v4880_v5, %v4880_v5  ;;  %v5208_v15 = vmul.f32 %v5112_v40, %v4880_v5 }
 0x457   :  { %v5315_v18 = vcombine.low %v5307_v52, %v5314_v55  ;;  %v5371_v61 = vrot.slane %v5364_v32, %v6865_v34  ;;  %v5378_v42 = vrot.slane %v5218_v4, %v6865_v34  ;;  %v4889_v8 = vcombine.high %v4887_v30, %v4887_v30  ;;  %v8783_v55 = vld [vmem:[#allocation70_spill] sm:$0xff] }
 0x458   :  { %v5594_v2 = vsel %vm5572_vm3, %v5363_v6, 0.0  ;;  %v5209_v14 = vmul.f32 %v5113_v21, %v4888_v23  ;;  %v5316_v46 = vcombine.low %v5207_v20, %v5208_v15  ;;  %v5210_v50 = vmul.f32 %v5114_v59, %v4887_v30  ;;  %v8782_v59 = vld [vmem:[#allocation68_spill] sm:$0xff]  ;;  %v8784_v30 = vld [vmem:[#allocation57_spill] sm:$0xff] }
 0x459   :  { %v5595_v53 = vrot.slane %v5594_v2, 4  ;;  %v5573_v25 = vsel %vm5572_vm3, %v5315_v18, 0.0  ;;  %v5379_v29 = vcombine.low %v5371_v61, %v5378_v42  ;;  %v5211_v40 = vmul.f32 %v5115_v62, %v4889_v8  ;;  %v8785_v61 = vld [vmem:[#allocation61_spill] sm:$0xff]  ;;  %v8795_v18 = vld [vmem:[#allocation66_spill] sm:$0xff] }
 0x45a   :  { %v5574_v57 = vrot.slane %v5573_v25, 4  ;;  %v5323_v54 = vrot.slane %v5316_v46, %v6865_v34  ;;  %v5330_v9 = vrot.slane %v5209_v14, %v6865_v34  ;;  %v5346_v45 = vrot.slane %v5212_v47, %v6865_v34  ;;  %v8787_v47 = vld [vmem:[#allocation62_spill] sm:$0xff]  ;;  %v8788_v46 = vld [vmem:[#allocation71_spill] sm:$0xff] }
 0x45b   :  { %v5596_v56 = vadd.f32 %v5595_v53, %v5594_v2  ;;  %v5601_v16 = vsel %vm5572_vm3, %v5379_v29, 0.0  ;;  %v5332_v21 = vcombine.low %v5210_v50, %v5211_v40  ;;  %v8786_v53 = vld [vmem:[#allocation58_spill] sm:$0xff] }
 0x45c   :  { %v5575_v58 = vadd.f32 %v5574_v57, %v5573_v25  ;;  %v5602_v39 = vrot.slane %v5601_v16, 4  ;;  %v5331_v60 = vcombine.low %v5323_v54, %v5330_v9  ;;  %v8792_v25 = vld [vmem:[#allocation63_spill] sm:$0xff] }
 0x45d   :  { %v5597_v27 = vrot.slane %v5596_v56, 2  ;;  %v5339_v52 = vrot.slane %v5332_v21, %v6865_v34  ;;  %v8790_v21 = vld [vmem:[#allocation72_spill] sm:$0xff] }
 0x45e   :  { %v5576_v62 = vrot.slane %v5575_v58, 2  ;;  %v5603_v6 = vadd.f32 %v5602_v39, %v5601_v16  ;;  %v5580_v32 = vsel %vm5572_vm3, %v5331_v60, 0.0  ;;  %v4923_v60 = vcombine.high %v8266_v63, %v8266_v63 }
 0x45f   :  { %v5598_v20 = vadd.f32 %v5597_v27, %v5596_v56  ;;  %v5347_v15 = vcombine.low %v5339_v52, %v5346_v45  ;;  %v5581_v2 = vrot.slane %v5580_v32, 4  ;;  %v8789_v56 = vld [vmem:[#allocation73_spill] sm:$0xff] }
 0x460   :  { %v5577_v23 = vadd.f32 %v5576_v62, %v5575_v58  ;;  %v5604_v8 = vrot.slane %v5603_v6, 2  ;;  %v8791_v62 = vld [vmem:[#allocation74_spill] sm:$0xff] }
 0x461   :  { %v5582_v50 = vadd.f32 %v5581_v2, %v5580_v32  ;;  %v5587_v40 = vsel %vm5572_vm3, %v5347_v15, 0.0  ;;  %v5599_v9 = vrot.slane %v5598_v20, 1  ;;  %v8793_v2 = vld [vmem:[#allocation65_spill] sm:$0xff]  ;;  %v5219_v15 = vmul.f32 %v5123_v24, %v4923_v60 }
 0x462   :  { %v5578_v29 = vrot.slane %v5577_v23, 1  ;;  %v5605_v16 = vadd.f32 %v5604_v8, %v5603_v6  ;;  %v5588_v58 = vrot.slane %v5587_v40, 4  ;;  %v8794_v6 = vld [vmem:[#allocation64_spill] sm:$0xff] }
 0x463   :  { %v5583_v45 = vrot.slane %v5582_v50, 2 }
 0x464   :  { %v5579_v39 = vadd.f32 %v5578_v29, %v5577_v23  ;;  %v5606_v14 = vrot.slane %v5605_v16, 1  ;;  %v5589_v57 = vadd.f32 %v5588_v58, %v5587_v40  ;;  %v8316_v23 = vadd.f32 %v5599_v9, %v5598_v20 }
 0x465   :  { %v5584_v42 = vadd.f32 %v5583_v45, %v5582_v50 }
 0x466   :  { %v5701_v29 = vpack.c.bf16 %v5579_v39, %v5579_v39  ;;  %v5590_v63 = vrot.slane %v5589_v57, 2  ;;  %v8321_v45 = vadd.f32 %v5606_v14, %v5605_v16 }
 0x467   :  { %v6053_v54 = vpop.f32.mrb[28].mxu1  ;;  %v5585_v52 = vrot.slane %v5584_v42, 1 }
 0x468   :  { %v4958_v5 = vcombine.high %v6053_v54, %v6053_v54  ;;  %v4813_v51 = vpop.f32.mrb[29].mxu1  ;;  %v4965_v40 = vrot.slane %v6053_v54, %v6865_v34  ;;  %v5591_v32 = vadd.f32 %v5590_v63, %v5589_v57  ;;  %v5740_v24 = vunpack.c.l.b16 %v5701_v29 }
 0x469   :  { %v4924_v58 = vcombine.high %v4813_v51, %v4813_v51  ;;  %v6054_v50 = vpop.f32.mrb[30].mxu1  ;;  %v4931_v20 = vrot.slane %v4813_v51, %v6865_v34  ;;  %v5586_v39 = vadd.f32 %v5585_v52, %v5584_v42  ;;  %v5705_v10 = vpack.c.bf16 %v8321_v45, %v8321_v45 }
 0x46a   :  { %v4972_v8 = vrot.slane %v4958_v5, %v6865_v34  ;;  %v4816_v9 = vpop.f32.mrb[31].mxu1  ;;  %v4973_v27 = vcombine.high %v4965_v40, %v4965_v40  ;;  %v5228_v36 = vmul.f32 %v5132_v11, %v4965_v40  ;;  %v5592_v60 = vrot.slane %v5591_v32, 1 }
 0x46b   :  { %v4938_v54 = vrot.slane %v4924_v58, %v6865_v34  ;;  %v5702_v57 = vpack.c.bf16 %v5586_v39, %v5586_v39  ;;  %v8796_v5 = vrot.slane %v8764_v31, 2  ;;  %v4939_v16 = vcombine.high %v4931_v20, %v4931_v20 }
 0x46c   :  { %v5230_v14 = vmul.f32 %v5134_v48, %v4972_v8  ;;  %v8336_v11 = vadd.f32 %v5592_v60, %v5591_v32  ;;  %v4974_v52 = vcombine.high %v4972_v8, %v4972_v8  ;;  %v8797_v63 = vrot.slane %v8767_v35, 2 }
 0x46d   :  { %v5229_v51 = vmul.f32 %v8796_v5, %v4973_v27  ;;  %v4940_v42 = vcombine.high %v4938_v54, %v4938_v54  ;;  %v5741_v29 = vunpack.c.l.b16 %v5702_v57  ;;  %v5221_v48 = vmul.f32 %v8798_v44, %v4939_v16 }
 0x46e   :  { %v5220_v40 = vmul.f32 %v8797_v63, %v4931_v20  ;;  %v8799_v39 = vrot.slane %v8770_v19, 2  ;;  %v8800_v27 = vrot.slane %v8769_v37, 2  ;;  %v4975_v4 = vcombine.high %v6054_v50, %v6054_v50 }
 0x46f   :  { %v5428_v58 = vcombine.low %v5228_v36, %v5229_v51  ;;  %v4982_v32 = vrot.slane %v6054_v50, %v6865_v34  ;;  %v8348_v8 = vsel %vm5756_vm4, %v5741_v29, %v5740_v24  ;;  %v5442_v36 = vrot.slane %v5230_v14, %v6865_v34 }
 0x470   :  { %v5223_v31 = vmul.f32 %v8799_v39, %v4940_v42  ;;  %v5222_v5 = vmul.f32 %v8800_v27, %v4938_v54  ;;  %v5380_v38 = vcombine.low %v5219_v15, %v5220_v40  ;;  %v5394_v49 = vrot.slane %v5221_v48, %v6865_v34 }
 0x471   :  { %v5435_v35 = vrot.slane %v5428_v58, %v6865_v34  ;;  %v4989_v60 = vrot.slane %v4975_v4, %v6865_v34  ;;  %v4990_v37 = vcombine.high %v4982_v32, %v4982_v32  ;;  %v8801_v15 = vrot.slane %v8771_v22, 2 }
 0x472   :  { %v5387_v20 = vrot.slane %v5380_v38, %v6865_v34  ;;  %v5396_v19 = vcombine.low %v5222_v5, %v5223_v31  ;;  %v8802_v50 = vrot.slane %v8772_v12, 2  ;;  %v4941_v51 = vcombine.high %v4816_v9, %v4816_v9 }
 0x473   :  { %v5443_v54 = vcombine.low %v5435_v35, %v5442_v36  ;;  %v5231_v57 = vmul.f32 %v8801_v15, %v4974_v52  ;;  %v6057_v16 = vpop.f32.mrb[32].mxu1  ;;  %v4991_v63 = vcombine.high %v4989_v60, %v4989_v60  ;;  %v8803_v14 = vrot.slane %v8773_v7, 2 }
 0x474   :  { %v5232_v24 = vmul.f32 %v8802_v50, %v4982_v32  ;;  %v5395_v42 = vcombine.low %v5387_v20, %v5394_v49  ;;  %v8804_v38 = vrot.slane %v8774_v17, 2  ;;  %v8365_v4 = vpop.f32.mrb[33].mxu1  ;;  %v4948_v52 = vrot.slane %v4816_v9, %v6865_v34 }
 0x475   :  { %v5233_v40 = vmul.f32 %v8803_v14, %v4990_v37  ;;  %v5629_v58 = vsel %vm5572_vm3, %v5443_v54, 0.0  ;;  %v4955_v12 = vrot.slane %v4941_v51, %v6865_v34  ;;  %v8370_v44 = vpop.f32.mrb[34].mxu1  ;;  %v8805_v7 = vrot.slane %v8775_v26, 2 }
 0x476   :  { %v8363_v29 = vmul.f32 %v8804_v38, %v4989_v60  ;;  %v5444_v22 = vcombine.low %v5231_v57, %v5232_v24  ;;  %v5630_v48 = vrot.slane %v5629_v58, 4  ;;  %v5608_v39 = vsel %vm5572_vm3, %v5395_v42, 0.0  ;;  %v8378_v27 = vpop.f32.mrb[35].mxu1 }
 0x477   :  { %v8375_v31 = vmul.f32 %v8805_v7, %v4991_v63  ;;  %v5458_v17 = vrot.slane %v5233_v40, %v6865_v34  ;;  %v5609_v5 = vrot.slane %v5608_v39, 4  ;;  %v4956_v35 = vcombine.high %v4948_v52, %v4948_v52 }
 0x478   :  { %v5451_v32 = vrot.slane %v5444_v22, %v6865_v34  ;;  %v4957_v9 = vcombine.high %v4955_v12, %v4955_v12  ;;  %v5631_v36 = vadd.f32 %v5630_v48, %v5629_v58  ;;  %v8806_v20 = vrot.slane %v8776_v0, 2 }
 0x479   :  { %v5460_v49 = vcombine.low %v8363_v29, %v8375_v31  ;;  %v5226_v26 = vmul.f32 %v5130_v33, %v4955_v12  ;;  %v5610_v37 = vadd.f32 %v5609_v5, %v5608_v39  ;;  %v8807_v15 = vrot.slane %v8777_v13, 2 }
 0x47a   :  { %v5224_v60 = vmul.f32 %v8806_v20, %v4948_v52  ;;  %v5459_v54 = vcombine.low %v5451_v32, %v5458_v17  ;;  %v5227_v50 = vmul.f32 %v5131_v41, %v4957_v9  ;;  %v5632_v24 = vrot.slane %v5631_v36, 2 }
 0x47b   :  { %v5225_v57 = vmul.f32 %v8807_v15, %v4956_v35  ;;  %v5403_v51 = vrot.slane %v5396_v19, %v6865_v34  ;;  %v5026_v63 = vcombine.high %v6057_v16, %v6057_v16  ;;  %v5611_v14 = vrot.slane %v5610_v37, 2 }
 0x47c   :  { %v5410_v42 = vrot.slane %v5224_v60, %v6865_v34  ;;  %v5636_v0 = vsel %vm5572_vm3, %v5459_v54, 0.0  ;;  %v5426_v43 = vrot.slane %v5227_v50, %v6865_v34  ;;  %v5633_v33 = vadd.f32 %v5632_v24, %v5631_v36 }
 0x47d   :  { %v5412_v40 = vcombine.low %v5225_v57, %v5226_v26  ;;  %v5637_v38 = vrot.slane %v5636_v0, 4  ;;  %v5033_v13 = vrot.slane %v6057_v16, %v6865_v34  ;;  %v5703_v3 = vpack.c.bf16 %v8336_v11, %v8336_v11 }
 0x47e   :  { %v5411_v29 = vcombine.low %v5403_v51, %v5410_v42  ;;  %v5612_v41 = vadd.f32 %v5611_v14, %v5610_v37  ;;  %v5040_v58 = vrot.slane %v5026_v63, %v6865_v34  ;;  %v5634_v22 = vrot.slane %v5633_v33, 1 }
 0x47f   :  { %v5419_v19 = vrot.slane %v5412_v40, %v6865_v34  ;;  %v5638_v52 = vadd.f32 %v5637_v38, %v5636_v0  ;;  %v5041_v48 = vcombine.high %v5033_v13, %v5033_v13  ;;  %v4992_v17 = vcombine.high %v8365_v4, %v8365_v4 }
 0x480   :  { %v5615_v12 = vsel %vm5572_vm3, %v5411_v29, 0.0  ;;  %v5042_v31 = vcombine.high %v5040_v58, %v5040_v58  ;;  %v5613_v16 = vrot.slane %v5612_v41, 1  ;;  %v8808_v11 = vrot.slane %v8780_v28, 2 }
 0x481   :  { %v5427_v39 = vcombine.low %v5419_v19, %v5426_v43  ;;  %v5616_v7 = vrot.slane %v5615_v12, 4  ;;  %v5639_v5 = vrot.slane %v5638_v52, 2  ;;  %v8809_v35 = vrot.slane %v8781_v1, 2 }
 0x482   :  { %v8405_v32 = vmul.f32 %v8808_v11, %v5033_v13  ;;  %v5635_v36 = vadd.f32 %v5634_v22, %v5633_v33  ;;  %v8810_v26 = vrot.slane %v8782_v59, 2  ;;  %v8811_v54 = vpack.c.bf16 %v8316_v23, %v8316_v23 }
 0x483   :  { %v8409_v9 = vmul.f32 %v8809_v35, %v5041_v48  ;;  %v5617_v20 = vadd.f32 %v5616_v7, %v5615_v12  ;;  %v5622_v60 = vsel %vm5572_vm3, %v5427_v39, 0.0  ;;  %v5640_v57 = vadd.f32 %v5639_v5, %v5638_v52 }
 0x484   :  { %v5246_v37 = vmul.f32 %v8810_v26, %v5040_v58  ;;  %v8417_v15 = vunpack.c.l.b16 %v8811_v54  ;;  %v5623_v28 = vrot.slane %v5622_v60, 4  ;;  %v8812_v50 = vrot.slane %v8783_v55, 2 }
 0x485   :  { %v8424_v1 = vunpack.c.l.b16 %v5705_v10  ;;  %v8426_v51 = vunpack.c.l.b16 %v5703_v3  ;;  %v5618_v42 = vrot.slane %v5617_v20, 2  ;;  %v4999_v59 = vrot.slane %v8365_v4, %v6865_v34 }
 0x486   :  { %v5247_v24 = vmul.f32 %v8812_v50, %v5042_v31  ;;  %v8430_v63 = vadd.f32 %v5613_v16, %v5612_v41  ;;  %v5641_v23 = vrot.slane %v5640_v57, 1  ;;  %v5624_v14 = vadd.f32 %v5623_v28, %v5622_v60 }
 0x487   :  { %v5709_v40 = vpack.c.bf16 %v5635_v36, %v5635_v36  ;;  %v5619_v43 = vadd.f32 %v5618_v42, %v5617_v20  ;;  %v5006_v55 = vrot.slane %v4992_v17, %v6865_v34  ;;  %v5007_v33 = vcombine.high %v4999_v59, %v4999_v59 }
 0x488   :  { %v5524_v0 = vcombine.low %v5246_v37, %v5247_v24  ;;  %v5642_v38 = vadd.f32 %v5641_v23, %v5640_v57  ;;  %v5625_v45 = vrot.slane %v5624_v14, 2  ;;  %v8813_v10 = vrot.slane %v8784_v30, 2 }
 0x489   :  { %v5467_v13 = vrot.slane %v5460_v49, %v6865_v34  ;;  %v5620_v3 = vrot.slane %v5619_v43, 1  ;;  %v5008_v19 = vcombine.high %v5006_v55, %v5006_v55  ;;  %v8814_v4 = vrot.slane %v8785_v61, 2 }
 0x48a   :  { %v5236_v29 = vmul.f32 %v8813_v10, %v4999_v59  ;;  %v8815_v58 = vrot.slane %v8786_v53, 2  ;;  %v5706_v52 = vpack.c.bf16 %v8430_v63, %v8430_v63  ;;  %v5710_v12 = vpack.c.bf16 %v5642_v38, %v5642_v38 }
 0x48b   :  { %v5237_v41 = vmul.f32 %v8814_v4, %v5007_v33  ;;  %v5043_v30 = vcombine.high %v8370_v44, %v8370_v44  ;;  %v5626_v39 = vadd.f32 %v5625_v45, %v5624_v14  ;;  %v8816_v49 = vrot.slane %v8787_v47, 2 }
 0x48c   :  { %v5238_v22 = vmul.f32 %v8815_v58, %v5006_v55  ;;  %v5474_v48 = vrot.slane %v5236_v29, %v6865_v34  ;;  %v5050_v61 = vrot.slane %v8370_v44, %v6865_v34  ;;  %v5748_v17 = vunpack.c.l.b16 %v5709_v40 }
 0x48d   :  { %v5239_v7 = vmul.f32 %v8816_v49, %v5008_v19  ;;  %v5749_v53 = vunpack.c.l.b16 %v5710_v12  ;;  %v5057_v5 = vrot.slane %v5043_v30, %v6865_v34  ;;  %v8450_v11 = vadd.f32 %v5620_v3, %v5619_v43 }
 0x48e   :  { %v5476_v31 = vcombine.low %v5237_v41, %v5238_v22  ;;  %v5475_v16 = vcombine.low %v5467_v13, %v5474_v48  ;;  %v5058_v20 = vcombine.high %v5050_v61, %v5050_v61  ;;  %v8817_v44 = vrot.slane %v8788_v46, 2 }
 0x48f   :  { %v5490_v36 = vrot.slane %v5239_v7, %v6865_v34  ;;  %v8455_v60 = vsel %vm5756_vm4, %v5749_v53, %v5748_v17  ;;  %v5059_v26 = vcombine.high %v5057_v5, %v5057_v5  ;;  %v5627_v54 = vrot.slane %v5626_v39, 1 }
 0x490   :  { %v5483_v35 = vrot.slane %v5476_v31, %v6865_v34  ;;  %v5643_v47 = vsel %vm5572_vm3, %v5475_v16, 0.0  ;;  %v5248_v37 = vmul.f32 %v8817_v44, %v5050_v61  ;;  %v8818_v50 = vrot.slane %v8789_v56, 2 }
 0x491   :  { %v5644_v28 = vrot.slane %v5643_v47, 4  ;;  %v8819_v42 = vrot.slane %v8790_v21, 2  ;;  %v8820_v23 = vrot.slane %v8791_v62, 2  ;;  %v5531_v40 = vrot.slane %v5524_v0, %v6865_v34 }
 0x492   :  { %v5491_v57 = vcombine.low %v5483_v35, %v5490_v36  ;;  %v5249_v24 = vmul.f32 %v8818_v50, %v5058_v20  ;;  %v5538_v43 = vrot.slane %v5248_v37, %v6865_v34  ;;  %v5009_v33 = vcombine.high %v8378_v27, %v8378_v27 }
 0x493   :  { %v5250_v59 = vmul.f32 %v8819_v42, %v5057_v5  ;;  %v5251_v14 = vmul.f32 %v8820_v23, %v5059_v26  ;;  %v5645_v55 = vadd.f32 %v5644_v28, %v5643_v47  ;;  %v5016_v56 = vrot.slane %v8378_v27, %v6865_v34 }
 0x494   :  { %v5650_v46 = vsel %vm5572_vm3, %v5491_v57, 0.0  ;;  %v5539_v21 = vcombine.low %v5531_v40, %v5538_v43  ;;  %v5023_v0 = vrot.slane %v5009_v33, %v6865_v34  ;;  %v8821_v13 = vrot.slane %v8792_v25, 2 }
 0x495   :  { %v5651_v38 = vrot.slane %v5650_v46, 4  ;;  %v5540_v45 = vcombine.low %v5249_v24, %v5250_v59  ;;  %v5554_v62 = vrot.slane %v5251_v14, %v6865_v34  ;;  %v5646_v10 = vrot.slane %v5645_v55, 2 }
 0x496   :  { %v5024_v29 = vcombine.high %v5016_v56, %v5016_v56  ;;  %v5240_v3 = vmul.f32 %v8821_v13, %v5016_v56  ;;  %v5671_v41 = vsel %vm5572_vm3, %v5539_v21, 0.0  ;;  %v5628_v27 = vadd.f32 %v5627_v54, %v5626_v39 }
 0x497   :  { %v5652_v19 = vadd.f32 %v5651_v38, %v5650_v46  ;;  %v5547_v4 = vrot.slane %v5540_v45, %v6865_v34  ;;  %v5647_v58 = vadd.f32 %v5646_v10, %v5645_v55  ;;  %v5672_v22 = vrot.slane %v5671_v41, 4 }
 0x498   :  { %v5025_v12 = vcombine.high %v5023_v0, %v5023_v0  ;;  %v8822_v48 = vrot.slane %v8793_v2, 2  ;;  %v5522_v49 = vrot.slane %v8409_v9, %v6865_v34  ;;  %v8823_v31 = vrot.slane %v8794_v6, 2 }
 0x499   :  { %v5653_v25 = vrot.slane %v5652_v19, 2  ;;  %v5555_v7 = vcombine.low %v5547_v4, %v5554_v62  ;;  %v5648_v17 = vrot.slane %v5647_v58, 1  ;;  %v5673_v53 = vadd.f32 %v5672_v22, %v5671_v41 }
 0x49a   :  { %v5241_v30 = vmul.f32 %v8822_v48, %v5024_v29  ;;  %v5242_v61 = vmul.f32 %v8823_v31, %v5023_v0  ;;  %v8824_v39 = vrot.slane %v8795_v18, 2  ;;  %v5707_v2 = vpack.c.bf16 %v8450_v11, %v8450_v11 }
 0x49b   :  { %v5654_v35 = vadd.f32 %v5653_v25, %v5652_v19  ;;  %v5678_v36 = vsel %vm5572_vm3, %v5555_v7, 0.0  ;;  %v5708_v20 = vpack.c.bf16 %v5628_v27, %v5628_v27  ;;  %v5649_v9 = vadd.f32 %v5648_v17, %v5647_v58 }
 0x49c   :  { %v5243_v16 = vmul.f32 %v8824_v39, %v5025_v12  ;;  %v5492_v5 = vcombine.low %v5240_v3, %v5241_v30  ;;  %v5679_v47 = vrot.slane %v5678_v36, 4  ;;  %v5506_v6 = vrot.slane %v5242_v61, %v6865_v34 }
 0x49d   :  { %v5745_v44 = vunpack.c.l.b16 %v5706_v52  ;;  %v5655_v18 = vrot.slane %v5654_v35, 1  ;;  %v5759_v11 = vsel %vm5758_vm5, %v8426_v51, %v8348_v8  ;;  %v5711_v54 = vpack.c.bf16 %v5649_v9, %v5649_v9 }
 0x49e   :  { %v5499_v26 = vrot.slane %v5492_v5, %v6865_v34  ;;  %v5508_v37 = vcombine.low %v5243_v16, %v8405_v32  ;;  %v5674_v57 = vrot.slane %v5673_v53, 2  ;;  %v5680_v28 = vadd.f32 %v5679_v47, %v5678_v36 }
 0x49f   :  { %v5746_v24 = vunpack.c.l.b16 %v5707_v2  ;;  %v5656_v42 = vadd.f32 %v5655_v18, %v5654_v35  ;;  %v5761_v23 = vsel %vm5760_vm6, %v8417_v15, %v5759_v11  ;;  %v5750_v63 = vunpack.c.l.b16 %v5711_v54  ;;  %v5949_v35 = vld [vmem:[#allocation14] ss:$0 sm:$0xff] }
 0x4a0   :  { %v5507_v50 = vcombine.low %v5499_v26, %v5506_v6  ;;  %v5515_v59 = vrot.slane %v5508_v37, %v6865_v34  ;;  %v5681_v52 = vrot.slane %v5680_v28, 2  ;;  %v5747_v32 = vunpack.c.l.b16 %v5708_v20 }
 0x4a1   :  { %v5712_v40 = vpack.c.bf16 %v5656_v42, %v5656_v42  ;;  %v5763_v8 = vsel %vm5762_vm7, %v8424_v1, %v5761_v23  ;;  %v5771_v51 = vsel %vm5758_vm5, %v5750_v63, %v8455_v60  ;;  %v5675_v46 = vadd.f32 %v5674_v57, %v5673_v53 }
 0x4a2   :  { %v5657_v14 = vsel %vm5572_vm3, %v5507_v50, 0.0  ;;  %v5523_v43 = vcombine.low %v5515_v59, %v5522_v49  ;;  %v5765_v34 = vsel %vm5764_vm8, %v5745_v44, %v5763_v8  ;;  %v5682_v21 = vadd.f32 %v5681_v52, %v5680_v28 }
 0x4a3   :  { %v5658_v55 = vrot.slane %v5657_v14, 4  ;;  %v5751_v33 = vunpack.c.l.b16 %v5712_v40  ;;  %v5767_v38 = vsel %vm5766_vm9, %v5746_v24, %v5765_v34  ;;  %v5676_v29 = vrot.slane %v5675_v46, 1 }
 0x4a4   :  { %v5664_v15 = vsel %vm5572_vm3, %v5523_v43, 0.0  ;;  %v5769_v62 = vsel %vm5768_vm10, %v5747_v32, %v5767_v38  ;;  %v5683_v60 = vrot.slane %v5682_v21, 1 }
 0x4a5   :  { %v5659_v56 = vadd.f32 %v5658_v55, %v5657_v14  ;;  %v5665_v45 = vrot.slane %v5664_v15, 4  ;;  %v5772_v0 = vsel %vm5760_vm6, %v5751_v33, %v5771_v51  ;;  %v5677_v41 = vadd.f32 %v5676_v29, %v5675_v46 }
 0x4a6   :  { %v5684_v22 = vadd.f32 %v5683_v60, %v5682_v21 }
 0x4a7   :  { %v5660_v10 = vrot.slane %v5659_v56, 2  ;;  %v5666_v1 = vadd.f32 %v5665_v45, %v5664_v15  ;;  %v5715_v30 = vpack.c.bf16 %v5677_v41, %v5677_v41 }
 0x4a8   :  { %v5716_v7 = vpack.c.bf16 %v5684_v22, %v5684_v22 }
 0x4a9   :  { %v5661_v13 = vadd.f32 %v5660_v10, %v5659_v56  ;;  %v5667_v3 = vrot.slane %v5666_v1, 2  ;;  %v5754_v17 = vunpack.c.l.b16 %v5715_v30 }
 0x4aa   :  { %v5755_v53 = vunpack.c.l.b16 %v5716_v7 }
 0x4ab   :  { %v5662_v19 = vrot.slane %v5661_v13, 1  ;;  %v5668_v4 = vadd.f32 %v5667_v3, %v5666_v1 }
 0x4ad   :  { %v5663_v27 = vadd.f32 %v5662_v19, %v5661_v13  ;;  %v5669_v58 = vrot.slane %v5668_v4, 1 }
 0x4af   :  { %v5713_v12 = vpack.c.bf16 %v5663_v27, %v5663_v27  ;;  %v5670_v48 = vadd.f32 %v5669_v58, %v5668_v4 }
 0x4b1   :  { %v5752_v49 = vunpack.c.l.b16 %v5713_v12  ;;  %v5714_v25 = vpack.c.bf16 %v5670_v48, %v5670_v48 }
 0x4b3   :  { %v5773_v31 = vsel %vm5762_vm7, %v5752_v49, %v5772_v0  ;;  %v5753_v61 = vunpack.c.l.b16 %v5714_v25 }
 0x4b5   :  { %v5774_v39 = vsel %vm5764_vm8, %v5753_v61, %v5773_v31 }
 0x4b6   :  { %v5775_v16 = vsel %vm5766_vm9, %v5754_v17, %v5774_v39 }
 0x4b7   :  { %v5776_v5 = vsel %vm5768_vm10, %v5755_v53, %v5775_v16 }
 0x4b8   :  { %v5777_v2 = vpack.c.b16 %v5776_v5, %v5769_v62 }
 0x4ba   :  { %6076 = vmatmul.mubr.bf16.vlgmr.msra.gmra.mrb[16].mxu0 %v5777_v2 }
 0x58d   :  { %v5861_v36 = vpop.f32.mrb[16].mxu0 }
 0x58e   :  { %v5862_v20 = vadd.f32 %v5949_v35, %v5861_v36  ;;  %v6077_v9 = vpop.f32.mrb[17].mxu0 }
 0x58f   :  { %v5864_v47 = vpop.f32.mrb[18].mxu0 }
 0x590   :  { %5868 = vst [vmem:[#allocation19] sm:$0xff] %v5862_v20  ;;  %v5865_v26 = vadd.f32 %v5949_v35, %v5864_v47  ;;  %v6078_v6 = vpop.f32.mrb[19].mxu0 }
 0x592   :  { %5869 = vst [vmem:[#allocation19 + $0x8] sm:$0xff] %v5865_v26 }
 0x593   :  { %6508 = shalt.err (!%p6505_p0)
}
 0x594   :  { %s6509_s11 = scalar_lea.hbm %s8541_s10, 256 }
 0x595   :  { %p6510_p1 = scmp.ne.s32.totalorder %s8541_s10, %s6509_s11  ;;  %p6513_p2 = scmp.lt.u32.totalorder %s6509_s11, %s8541_s10 }
 0x597   :  { %p6515_p3 = pnand %p6513_p2, %p6510_p1 }
 0x599   :  { %6518 = shalt.err (!%p6515_p3)
}
 0x59a   :  { %5881 = dma.vmem_to_hbm [thread:$0]  %s5876_s25, 256, %s8541_s10, [#allocation4], %s6542_s2, %s6542_s2, %s6543_s30  }
 0x59b   :  { %6531 = dma.done.wait [#allocation4], 256  }
 0x59c   :  { %6532 = vsyncadd [#allocation4], 4294967040 }
 0x59d   :  { %5885 = vsyncpa [#allocation3], 1 }
 0x59e   :  { %5886 = vsyncpa [#allocation6], 1 }
 0x59f   :  { %5887 = vsyncpa [#allocation9], 1 }
 0x5a0   :  { %5888 = vsyncpa [#allocation12], 1 }
 0x5a1   :  { %5889 = vsyncpa [#allocation15], 1 }
 0x5a2   :  { %5890 = vsyncpa [#allocation18], 1 }
 0x5a3   :  { %5891 = vsyncpa [#allocation4], 1 }

// kernel: tpu_custom_call.1
= control target key start
LH: loop header
LB: loop body
LE: loop exit
PB: predicated region body
PF: predicated region fallthrough
CT: control target
= control target key end

     0   :  { %15 = vsyncpa [#allocation3], 0  ;;  %s8531_s0 = inlined_call_operand.hbm [shape: bf16[16,128], index: 0, kind: input, shape index: {}]   ;;  %s8532_s1 = inlined_call_operand.hbm [shape: bf16[16,6,128], index: 1, kind: input, shape index: {}]   ;;  %s8533_s2 = inlined_call_operand.hbm [shape: bf16[128,128], index: 2, kind: input, shape index: {}]   ;;  %s8534_s3 = inlined_call_operand.hbm [shape: f32[1,128], index: 3, kind: input, shape index: {}]   ;;  %s8535_s4 = inlined_call_operand.hbm [shape: bf16[128,256], index: 4, kind: input, shape index: {}]   ;;  %s8536_s5 = inlined_call_operand.hbm [shape: f32[1,256], index: 5, kind: input, shape index: {}]   ;;  %s8537_s6 = inlined_call_operand.hbm [shape: bf16[128,128], index: 6, kind: input, shape index: {}]   ;;  %s8538_s7 = inlined_call_operand.hbm [shape: f32[1,128], index: 7, kind: input, shape index: {}]   ;;  %s8539_s8 = inlined_call_operand.hbm [shape: bf16[128,16], index: 8, kind: input, shape index: {}]   ;;  %s8540_s9 = inlined_call_operand.hbm [shape: bf16[16,128], index: 9, kind: input, shape index: {}]   ;;  %s8541_s10 = inlined_call_operand.hbm [shape: f32[16,128], index: 10, kind: output, shape index: {}]  }
   0x1   :  { %16 = vsyncpa [#allocation6], 0 }
   0x2   :  { %17 = vsyncpa [#allocation9], 0 }
   0x3   :  { %18 = vsyncpa [#allocation12], 0 }
   0x4   :  { %19 = vsyncpa [#allocation15], 0 }
   0x5   :  { %20 = vsyncpa [#allocation18], 0 }
   0x6   :  { %21 = vsyncpa [#allocation4], 0  ;;  %s6533_s13 = smov [#allocation5]   ;;  %s6534_s15 = smov [#allocation8]  }
   0x7   :  { %s39_s14 = sshll.u32 %s6533_s13, 4  ;;  %s64_s16 = sshll.u32 %s6534_s15, 4  ;;  %s40_s14 = int_to_ptr.vmem [resolvable:$true] %s39_s14  ;;  %s6608_s16 = int_to_ptr.vmem [resolvable:$true] %s64_s16 }
   0x8   :  { %s6277_s19 = scalar_lea.hbm %s8532_s1, 1024 }
   0x9   :  { %p6278_p0 = scmp.ne.s32.totalorder %s8532_s1, %s6277_s19  ;;  %p6281_p1 = scmp.lt.u32.totalorder %s6277_s19, %s8532_s1 }
   0xb   :  { %p6283_p2 = pnand %p6281_p1, %p6278_p0 }
   0xd   :  { %6286 = shalt.err (!%p6283_p2)
}
   0xe   :  { %s6287_s24 = scalar_lea.vmem %s40_s14, 1024  ;;  %p6292_p4 = scmp.lt.s32.totalorder %s40_s14, %s40_s14 }
   0xf   :  { %p6288_p3 = scmp.ne.s32.totalorder %s40_s14, %s6287_s24  ;;  %p6293_p5 = scmp.lt.s32.totalorder %s6287_s24, %s6287_s24 }
  0x11   :  { %p6294_p6 = por %p6293_p5, %p6292_p4 }
  0x13   :  { %p6295_p7 = pnand %p6294_p6, %p6288_p3 }
  0x15   :  { %6298 = shalt.err (!%p6295_p7)
}
  0x16   :  { %s6535_s25 = smov 64   ;;  %s6536_s26 = smov 4  }
  0x17   :  { %45 = dma.hbm_to_vmem [thread:$0]  %s8532_s1, 1024, %s40_s14, [#allocation6], %s6535_s25, %s6535_s25, %s6536_s26  }
  0x18   :  { %s6299_s11 = scalar_lea.hbm %s8534_s3, 16 }
  0x19   :  { %p6300_p8 = scmp.ne.s32.totalorder %s8534_s3, %s6299_s11  ;;  %p6303_p9 = scmp.lt.u32.totalorder %s6299_s11, %s8534_s3 }
  0x1b   :  { %p6305_p10 = pnand %p6303_p9, %p6300_p8 }
  0x1d   :  { %6308 = shalt.err (!%p6305_p10)
}
  0x1e   :  { %s6309_s18 = scalar_lea.vmem %s6608_s16, 16  ;;  %s6313_s1 = scalar_lea.vmem %s6608_s16, 32 }
  0x1f   :  { %p6310_p11 = scmp.ne.s32.totalorder %s6608_s16, %s6309_s18  ;;  %p6314_p12 = scmp.lt.s32.totalorder %s6608_s16, %s6608_s16 }
  0x20   :  { %p6315_p13 = scmp.lt.s32.totalorder %s6313_s1, %s6309_s18 }
  0x22   :  { %p6316_p0 = por %p6315_p13, %p6314_p12 }
  0x24   :  { %p6317_p1 = pnand %p6316_p0, %p6310_p11 }
  0x26   :  { %6320 = shalt.err (!%p6317_p1)
}
  0x27   :  { %67 = dma.hbm_to_vmem [thread:$0]  %s8534_s3, 16, %s6608_s16, [#allocation9]  }
  0x28   :  { %s6537_s20 = smov [#allocation11]   ;;  %s6538_s22 = smov [#allocation14]  }
  0x29   :  { %s86_s21 = sshll.u32 %s6537_s20, 4  ;;  %s108_s23 = sshll.u32 %s6538_s22, 4  ;;  %s87_s21 = int_to_ptr.vmem [resolvable:$true] %s86_s21  ;;  %s109_s23 = int_to_ptr.vmem [resolvable:$true] %s108_s23 }
  0x2a   :  { %s6321_s28 = scalar_lea.hbm %s8536_s5, 32 }
  0x2b   :  { %p6322_p2 = scmp.ne.s32.totalorder %s8536_s5, %s6321_s28  ;;  %p6325_p3 = scmp.lt.u32.totalorder %s6321_s28, %s8536_s5 }
  0x2d   :  { %p6327_p4 = pnand %p6325_p3, %p6322_p2 }
  0x2f   :  { %6330 = shalt.err (!%p6327_p4)
}
  0x30   :  { %s6331_s3 = scalar_lea.vmem %s87_s21, 32  ;;  %p6336_p6 = scmp.lt.s32.totalorder %s87_s21, %s87_s21 }
  0x31   :  { %p6332_p5 = scmp.ne.s32.totalorder %s87_s21, %s6331_s3  ;;  %p6337_p7 = scmp.lt.s32.totalorder %s6331_s3, %s6331_s3 }
  0x33   :  { %p6338_p8 = por %p6337_p7, %p6336_p6 }
  0x35   :  { %p6339_p9 = pnand %p6338_p8, %p6332_p5 }
  0x37   :  { %6342 = shalt.err (!%p6339_p9)
}
  0x38   :  { %89 = dma.hbm_to_vmem [thread:$0]  %s8536_s5, 32, %s87_s21, [#allocation12]  }
  0x39   :  { %s6343_s18 = scalar_lea.hbm %s8538_s7, 16 }
  0x3a   :  { %p6344_p10 = scmp.ne.s32.totalorder %s8538_s7, %s6343_s18  ;;  %p6347_p11 = scmp.lt.u32.totalorder %s6343_s18, %s8538_s7 }
  0x3c   :  { %p6349_p12 = pnand %p6347_p11, %p6344_p10 }
  0x3e   :  { %6352 = shalt.err (!%p6349_p12)
}
  0x3f   :  { %s6353_s22 = scalar_lea.vmem %s109_s23, 16  ;;  %s6357_s24 = scalar_lea.vmem %s109_s23, 32 }
  0x40   :  { %p6354_p13 = scmp.ne.s32.totalorder %s109_s23, %s6353_s22  ;;  %p6358_p0 = scmp.lt.s32.totalorder %s109_s23, %s109_s23 }
  0x41   :  { %p6359_p1 = scmp.lt.s32.totalorder %s6357_s24, %s6353_s22 }
  0x43   :  { %p6360_p2 = por %p6359_p1, %p6358_p0 }
  0x45   :  { %p6361_p3 = pnand %p6360_p2, %p6354_p13 }
  0x47   :  { %6364 = shalt.err (!%p6361_p3)
}
  0x48   :  { %111 = dma.hbm_to_vmem [thread:$0]  %s8538_s7, 16, %s109_s23, [#allocation15]  }
  0x49   :  { %s6539_s27 = smov [#allocation2]   ;;  %s6540_s29 = smov [#allocation7]  }
  0x4a   :  { %s27_s28 = sshll.u32 %s6539_s27, 4  ;;  %s51_s30 = sshll.u32 %s6540_s29, 4  ;;  %s28_s28 = int_to_ptr.vmem [resolvable:$true] %s27_s28  ;;  %s6667_s30 = int_to_ptr.vmem [resolvable:$true] %s51_s30 }
  0x4b   :  { %s6365_s3 = scalar_lea.hbm %s8531_s0, 128 }
  0x4c   :  { %p6366_p4 = scmp.ne.s32.totalorder %s8531_s0, %s6365_s3  ;;  %p6369_p5 = scmp.lt.u32.totalorder %s6365_s3, %s8531_s0 }
  0x4e   :  { %p6371_p6 = pnand %p6369_p5, %p6366_p4 }
  0x50   :  { %6374 = shalt.err (!%p6371_p6)
}
  0x51   :  { %s6375_s7 = scalar_lea.vmem %s28_s28, 128  ;;  %p6380_p8 = scmp.lt.s32.totalorder %s28_s28, %s28_s28 }
  0x52   :  { %p6376_p7 = scmp.ne.s32.totalorder %s28_s28, %s6375_s7  ;;  %p6381_p9 = scmp.lt.s32.totalorder %s6375_s7, %s6375_s7 }
  0x54   :  { %p6382_p10 = por %p6381_p9, %p6380_p8 }
  0x56   :  { %p6383_p11 = pnand %p6382_p10, %p6376_p7 }
  0x58   :  { %6386 = shalt.err (!%p6383_p11)
}
  0x59   :  { %33 = dma.hbm_to_vmem [thread:$0]  %s8531_s0, 128, %s28_s28, [#allocation3], %s6535_s25, %s6535_s25, %s6536_s26  }
  0x5a   :  { %s6387_s19 = scalar_lea.hbm %s8533_s2, 1024 }
  0x5b   :  { %p6388_p12 = scmp.ne.s32.totalorder %s8533_s2, %s6387_s19  ;;  %p6391_p13 = scmp.lt.u32.totalorder %s6387_s19, %s8533_s2 }
  0x5d   :  { %p6393_p0 = pnand %p6391_p13, %p6388_p12 }
  0x5f   :  { %6396 = shalt.err (!%p6393_p0)
}
  0x60   :  { %s6397_s21 = scalar_lea.vmem %s6667_s30, 1024  ;;  %p6402_p2 = scmp.lt.s32.totalorder %s6667_s30, %s6667_s30 }
  0x61   :  { %p6398_p1 = scmp.ne.s32.totalorder %s6667_s30, %s6397_s21  ;;  %p6403_p3 = scmp.lt.s32.totalorder %s6397_s21, %s6397_s21 }
  0x63   :  { %p6404_p4 = por %p6403_p3, %p6402_p2 }
  0x65   :  { %p6405_p5 = pnand %p6404_p4, %p6398_p1 }
  0x67   :  { %6408 = shalt.err (!%p6405_p5)
}
  0x68   :  { %57 = dma.hbm_to_vmem [thread:$0]  %s8533_s2, 1024, %s6667_s30, [#allocation6], %s6535_s25, %s6535_s25, %s6536_s26  }
  0x69   :  { %s6541_s28 = smov [#allocation10]   ;;  %s6409_s3 = scalar_lea.hbm %s8535_s4, 2048 }
  0x6a   :  { %s73_s29 = sshll.u32 %s6541_s28, 4  ;;  %p6410_p6 = scmp.ne.s32.totalorder %s8535_s4, %s6409_s3  ;;  %s74_s29 = int_to_ptr.vmem [resolvable:$true] %s73_s29 }
  0x6b   :  { %p6413_p7 = scmp.lt.u32.totalorder %s6409_s3, %s8535_s4 }
  0x6d   :  { %p6415_p8 = pnand %p6413_p7, %p6410_p6 }
  0x6f   :  { %6418 = shalt.err (!%p6415_p8)
}
  0x70   :  { %s6419_s7 = scalar_lea.vmem %s74_s29, 2048  ;;  %p6424_p10 = scmp.lt.s32.totalorder %s74_s29, %s74_s29 }
  0x71   :  { %p6420_p9 = scmp.ne.s32.totalorder %s74_s29, %s6419_s7  ;;  %p6425_p11 = scmp.lt.s32.totalorder %s6419_s7, %s6419_s7 }
  0x73   :  { %p6426_p12 = por %p6425_p11, %p6424_p10 }
  0x75   :  { %p6427_p13 = pnand %p6426_p12, %p6420_p9 }
  0x77   :  { %6430 = shalt.err (!%p6427_p13)
}
  0x78   :  { %s6542_s2 = smov 128   ;;  %s6543_s30 = smov 8  }
  0x79   :  { %79 = dma.hbm_to_vmem [thread:$0]  %s8535_s4, 2048, %s74_s29, [#allocation9], %s6542_s2, %s6542_s2, %s6543_s30  }
  0x7a   :  { %s6544_s1 = smov [#allocation13]   ;;  %s6545_s19 = smov [#allocation16]  }
  0x7b   :  { %s95_s14 = sshll.u32 %s6544_s1, 4  ;;  %s117_s20 = sshll.u32 %s6545_s19, 4  ;;  %s96_s14 = int_to_ptr.vmem [resolvable:$true] %s95_s14  ;;  %s118_s20 = int_to_ptr.vmem [resolvable:$true] %s117_s20 }
  0x7c   :  { %s6431_s5 = scalar_lea.hbm %s8537_s6, 1024 }
  0x7d   :  { %p6432_p0 = scmp.ne.s32.totalorder %s8537_s6, %s6431_s5  ;;  %p6435_p1 = scmp.lt.u32.totalorder %s6431_s5, %s8537_s6 }
  0x7f   :  { %p6437_p2 = pnand %p6435_p1, %p6432_p0 }
  0x81   :  { %6440 = shalt.err (!%p6437_p2)
}
  0x82   :  { %s6441_s4 = scalar_lea.vmem %s96_s14, 1024  ;;  %p6446_p4 = scmp.lt.s32.totalorder %s96_s14, %s96_s14 }
  0x83   :  { %p6442_p3 = scmp.ne.s32.totalorder %s96_s14, %s6441_s4  ;;  %p6447_p5 = scmp.lt.s32.totalorder %s6441_s4, %s6441_s4 }
  0x85   :  { %p6448_p6 = por %p6447_p5, %p6446_p4 }
  0x87   :  { %p6449_p7 = pnand %p6448_p6, %p6442_p3 }
  0x89   :  { %6452 = shalt.err (!%p6449_p7)
}
  0x8a   :  { %101 = dma.hbm_to_vmem [thread:$0]  %s8537_s6, 1024, %s96_s14, [#allocation12], %s6535_s25, %s6535_s25, %s6536_s26  }
  0x8b   :  { %s6453_s16 = scalar_lea.hbm %s8539_s8, 1024 }
  0x8c   :  { %p6454_p8 = scmp.ne.s32.totalorder %s8539_s8, %s6453_s16  ;;  %p6457_p9 = scmp.lt.u32.totalorder %s6453_s16, %s8539_s8 }
  0x8e   :  { %p6459_p10 = pnand %p6457_p9, %p6454_p8 }
  0x90   :  { %6462 = shalt.err (!%p6459_p10)
}
  0x91   :  { %s6463_s23 = scalar_lea.vmem %s118_s20, 1024  ;;  %p6468_p12 = scmp.lt.s32.totalorder %s118_s20, %s118_s20 }
  0x92   :  { %p6464_p11 = scmp.ne.s32.totalorder %s118_s20, %s6463_s23  ;;  %p6469_p13 = scmp.lt.s32.totalorder %s6463_s23, %s6463_s23 }
  0x94   :  { %p6470_p0 = por %p6469_p13, %p6468_p12 }
  0x96   :  { %p6471_p1 = pnand %p6470_p0, %p6464_p11 }
  0x98   :  { %6474 = shalt.err (!%p6471_p1)
}
  0x99   :  { %123 = dma.hbm_to_vmem [thread:$0]  %s8539_s8, 1024, %s118_s20, [#allocation15], %s6535_s25, %s6535_s25, %s6536_s26  }
  0x9a   :  { %s6546_s1 = smov [#allocation17]   ;;  %s6475_s24 = scalar_lea.hbm %s8540_s9, 128 }
  0x9b   :  { %s129_s14 = sshll.u32 %s6546_s1, 4  ;;  %p6476_p2 = scmp.ne.s32.totalorder %s8540_s9, %s6475_s24  ;;  %s130_s14 = int_to_ptr.vmem [resolvable:$true] %s129_s14 }
  0x9c   :  { %p6479_p3 = scmp.lt.u32.totalorder %s6475_s24, %s8540_s9 }
  0x9e   :  { %p6481_p4 = pnand %p6479_p3, %p6476_p2 }
  0xa0   :  { %6484 = shalt.err (!%p6481_p4)
}
  0xa1   :  { %s6485_s28 = scalar_lea.vmem %s130_s14, 128  ;;  %p6490_p6 = scmp.lt.s32.totalorder %s130_s14, %s130_s14 }
  0xa2   :  { %p6486_p5 = scmp.ne.s32.totalorder %s130_s14, %s6485_s28  ;;  %p6491_p7 = scmp.lt.s32.totalorder %s6485_s28, %s6485_s28 }
  0xa4   :  { %p6492_p8 = por %p6491_p7, %p6490_p6 }
  0xa6   :  { %p6493_p9 = pnand %p6492_p8, %p6486_p5 }
  0xa8   :  { %6496 = shalt.err (!%p6493_p9)
}
  0xa9   :  { %135 = dma.hbm_to_vmem [thread:$0]  %s8540_s9, 128, %s130_s14, [#allocation18], %s6535_s25, %s6535_s25, %s6536_s26  }
  0xaa   :  { %6519 = dma.done.wait [#allocation3], 128  }
  0xab   :  { %6520 = vsyncadd [#allocation3], 4294967168 }
  0xac   :  { %6521 = dma.done.wait [#allocation6], 2048  }
  0xad   :  { %6522 = vsyncadd [#allocation6], 4294965248 }
  0xae   :  { %6523 = dma.done.wait [#allocation9], 2064  }
  0xaf   :  { %6524 = vsyncadd [#allocation9], 4294965232 }
  0xb0   :  { %6525 = dma.done.wait [#allocation12], 1056  }
  0xb1   :  { %6526 = vsyncadd [#allocation12], 4294966240 }
  0xb2   :  { %6527 = dma.done.wait [#allocation15], 1040  }
  0xb3   :  { %6528 = vsyncadd [#allocation15], 4294966256 }
  0xb4   :  { %6529 = dma.done.wait [#allocation18], 128  }
  0xb5   :  { %6530 = vsyncadd [#allocation18], 4294967168  ;;  %v8542_v0 = vmov 0.0   ;;  %v6548_v1 = vmov 0   ;;  %vm6549_vm0 = vmmov 0   ;;  %v6102_v4 = vld [vmem:[#allocation7] sm:$0xff]   ;;  %v348_v14 = vlaneseq }
  0xb6   :  { %5997 = vmatprep.subr.bf16.mxu0 %v8542_v0  ;;  %1129 = vmatprep.mubr.bf16.mxu1 %v6548_v1  ;;  %v6099_v2 = vld [vmem:[#allocation10 + $0x4] ss:$8 sps:$4 sm:$0xff]   ;;  %v6101_v3 = vld [vmem:[#allocation10] ss:$8 sps:$4 sm:$0xff]   ;;  %v6103_v5 = vld [vmem:[#allocation10 + $0x14] ss:$8 sps:$4 sm:$0xff]  }
  0xb7   :  { %6013 = vmatprep.mubr.msk.bf16.mxu0 %vm6549_vm0, %v8542_v0  ;;  %1097 = vmatprep.subr.bf16.mxu1 %v6099_v2  ;;  %v6105_v6 = vld [vmem:[#allocation10 + $0x10] ss:$8 sps:$4 sm:$0xff]   ;;  %v6106_v7 = vld [vmem:[#allocation7 + $0x8] sm:$0xff]   ;;  %v6111_v11 = vld [vmem:[#allocation10 + $0x34] ss:$8 sps:$4 sm:$0xff]   ;;  %v6770_v19 = vshrl.u32 %v348_v14, 7 }
  0xb8   :  { %1098 = vmatpush1.bf16.msra.mxu1 %v6101_v3  ;;  %5998 = vmatpush3.bf16.msra.mxu0 %v6102_v4  ;;  %v6107_v8 = vld [vmem:[#allocation10 + $0x24] ss:$8 sps:$4 sm:$0xff]   ;;  %v6109_v9 = vld [vmem:[#allocation10 + $0x20] ss:$8 sps:$4 sm:$0xff]   ;;  %v6550_v12 = vmov 1966171168  }
  0xb9   :  { %1099 = vmatprep.subr.bf16.mxu1 %v6103_v5  ;;  %5999 = vmatprep.subr.bf16.mxu0 %v8542_v0  ;;  %v6110_v10 = vld [vmem:[#allocation7 + $0x10] sm:$0xff]   ;;  %v346_v13 = vunpack.c.l.s4 %v6550_v12  ;;  %v6114_v16 = vld [vmem:[#allocation7 + $0x18] sm:$0xff]   ;;  %v6117_v20 = vld [vmem:[#allocation10 + $0x40] ss:$8 sps:$4 sm:$0xff]   ;;  %vm3073_vm1 = vcmask 128000   ;;  %vm4744_vm2 = vcmask 130048  }
  0xba   :  { %v6113_v15 = vld [vmem:[#allocation10 + $0x30] ss:$8 sps:$4 sm:$0xff]   ;;  %v6115_v17 = vld [vmem:[#allocation10 + $0x44] ss:$8 sps:$4 sm:$0xff]   ;;  %v6119_v22 = vld [vmem:[#allocation10 + $0x54] ss:$8 sps:$4 sm:$0xff]  }
  0xbb   :  { %v347_v18 = vunpack.c.0.s8 %v346_v13  ;;  %v6118_v21 = vld [vmem:[#allocation7 + $0x20] sm:$0xff]   ;;  %v6121_v24 = vld [vmem:[#allocation10 + $0x50] ss:$8 sps:$4 sm:$0xff]   ;;  %v6122_v25 = vld [vmem:[#allocation7 + $0x28] sm:$0xff]   ;;  %vm5572_vm3 = vcmask 1045504   ;;  %vm5756_vm4 = vcmask 1041409  }
  0xbc   :  { %1100 = vmatpush1.bf16.msra.mxu1 %v6105_v6  ;;  %6000 = vmatpush3.bf16.msra.mxu0 %v6106_v7  ;;  %v5902_v26 = vld.sshfl [vmem:[#allocation5] sm:$0x13 pattern:$0x75316420]  ;;  %v6123_v27 = vld [vmem:[#allocation10 + $0x64] ss:$8 sps:$4 sm:$0xff]  }
  0xbd   :  { %1101 = vmatprep.subr.bf16.mxu1 %v6107_v8  ;;  %6001 = vmatprep.subr.bf16.mxu0 %v8542_v0  ;;  %v6774_v23 = vsub.s32 %v347_v18, %v6770_v19  ;;  %v5903_v28 = vld.sshfl [vmem:[#allocation5 + $0x4] sm:$0x13 pattern:$0x75316420]  ;;  %v344_v29 = vcombine.high %v5902_v26, %v5902_v26  ;;  %v6126_v35 = vld [vmem:[#allocation7 + $0x30] sm:$0xff]   ;;  %v6130_v60 = vld [vmem:[#allocation7 + $0x38] sm:$0xff]  }
  0xbe   :  { %v6125_v31 = vld [vmem:[#allocation10 + $0x60] ss:$8 sps:$4 sm:$0xff]   ;;  %v367_v33 = vcombine.high %v5903_v28, %v5903_v28  ;;  %v6127_v36 = vld [vmem:[#allocation10 + $0x74] ss:$8 sps:$4 sm:$0xff]   ;;  %v6129_v59 = vld [vmem:[#allocation10 + $0x70] ss:$8 sps:$4 sm:$0xff]  }
  0xbf   :  { %v351_v30 = vrot.slane %v5902_v26, %v6774_v23  ;;  %v5904_v32 = vld.sshfl [vmem:[#allocation5 + $0x8] sm:$0x13 pattern:$0x75316420]  ;;  %v374_v34 = vrot.slane %v5903_v28, %v6774_v23  ;;  %v358_v37 = vrot.slane %v344_v29, %v6774_v23  ;;  %vm5758_vm5 = vcmask 1042434   ;;  %s6552_s9 = smov [#allocation19]  }
  0xc0   :  { %1102 = vmatpush1.bf16.msra.mxu1 %v6109_v9  ;;  %6002 = vmatpush3.bf16.msra.mxu0 %v6110_v10  ;;  %v390_v39 = vcombine.high %v5904_v32, %v5904_v32  ;;  %v397_v40 = vrot.slane %v5904_v32, %v6774_v23  ;;  %v5905_v41 = vld.sshfl [vmem:[#allocation5 + $0xc] sm:$0x13 pattern:$0x75316420]  ;;  %v381_v42 = vrot.slane %v367_v33, %v6774_v23  ;;  %vm5760_vm6 = vcmask 1043459   ;;  %s5875_s25 = sshll.u32 %s6552_s9, 4  ;;  %s5876_s25 = int_to_ptr.vmem [resolvable:$true] %s5875_s25 }
  0xc1   :  { %1103 = vmatprep.subr.bf16.mxu1 %v6111_v11  ;;  %6003 = vmatprep.subr.bf16.mxu0 %v8542_v0  ;;  %v359_v38 = vcombine.high %v351_v30, %v351_v30  ;;  %v382_v43 = vcombine.high %v374_v34, %v374_v34  ;;  %v5906_v44 = vld.sshfl [vmem:[#allocation5 + $0x10] sm:$0x13 pattern:$0x75316420]  ;;  %v413_v45 = vcombine.high %v5905_v41, %v5905_v41  ;;  %vm5762_vm7 = vcmask 1044484   ;;  %s6497_s26 = scalar_lea.vmem %s5876_s25, 256  ;;  %p6502_p11 = scmp.lt.s32.totalorder %s5876_s25, %s5876_s25 }
  0xc2   :  { %v420_v46 = vrot.slane %v5905_v41, %v6774_v23  ;;  %v404_v47 = vrot.slane %v390_v39, %v6774_v23  ;;  %v717_v48 = vcombine.low %v351_v30, %v358_v37  ;;  %v5907_v50 = vld.sshfl [vmem:[#allocation5 + $0x14] sm:$0x13 pattern:$0x75316420]  ;;  %v405_v52 = vcombine.high %v397_v40, %v397_v40  ;;  %p6498_p10 = scmp.ne.s32.totalorder %s5876_s25, %s6497_s26  ;;  %p6503_p12 = scmp.lt.s32.totalorder %s6497_s26, %s6497_s26 }
  0xc3   :  { %v718_v49 = vcombine.low %v359_v38, %v374_v34  ;;  %v719_v51 = vcombine.low %v381_v42, %v382_v43  ;;  %v427_v53 = vrot.slane %v413_v45, %v6774_v23  ;;  %v436_v58 = vcombine.high %v5906_v44, %v5906_v44  ;;  %v5908_v6 = vld.sshfl [vmem:[#allocation5 + $0x18] sm:$0x13 pattern:$0x75316420] }
  0xc4   :  { %1104 = vmatpush1.bf16.msra.mxu1 %v6113_v15  ;;  %6004 = vmatpush3.bf16.msra.mxu0 %v6114_v16  ;;  %v428_v54 = vcombine.high %v420_v46, %v420_v46  ;;  %v720_v55 = vcombine.low %v397_v40, %v404_v47  ;;  %v727_v56 = vrot.slane %v717_v48, %v6774_v23  ;;  %v5909_v10 = vld.sshfl [vmem:[#allocation5 + $0x1c] sm:$0x13 pattern:$0x75316420]  ;;  %vm5764_vm8 = vcmask 1045509   ;;  %p6504_p13 = por %p6503_p12, %p6502_p11 }
  0xc5   :  { %1105 = vmatprep.subr.bf16.mxu1 %v6115_v17  ;;  %6005 = vmatprep.subr.bf16.mxu0 %v8542_v0  ;;  %v734_v57 = vrot.slane %v718_v49, %v6774_v23  ;;  %v741_v61 = vrot.slane %v719_v51, %v6774_v23  ;;  %v443_v62 = vrot.slane %v5906_v44, %v6774_v23  ;;  %v6131_v16 = vld [vmem:[#allocation2] sm:$0xff]   ;;  %v5912_v41 = vld.sshfl [vmem:[#allocation5 + $0x28] sm:$0x13 pattern:$0x75316420]  ;;  %vm5766_vm9 = vcmask 1046534  }
  0xc6   :  { %v466_v63 = vrot.slane %v5907_v50, %v6774_v23  ;;  %v766_v2 = vcombine.low %v405_v52, %v420_v46  ;;  %v748_v3 = vrot.slane %v720_v55, %v6774_v23  ;;  %v450_v5 = vrot.slane %v436_v58, %v6774_v23  ;;  %v5913_v46 = vld.sshfl [vmem:[#allocation5 + $0x2c] sm:$0x13 pattern:$0x75316420]  ;;  %p6505_p0 = pnand %p6504_p13, %p6498_p10 }
  0xc7   :  { %v749_v4 = vcombine.low %v727_v56, %v734_v57  ;;  %v451_v7 = vcombine.high %v443_v62, %v443_v62  ;;  %v767_v8 = vcombine.low %v427_v53, %v428_v54  ;;  %v459_v11 = vcombine.high %v5907_v50, %v5907_v50 }
  0xc8   :  { %1106 = vmatpush1.bf16.msra.mxu1 %v6117_v20  ;;  %6006 = vmatpush3.bf16.msra.mxu0 %v6118_v21  ;;  %v776_v9 = vrot.slane %v766_v2, %v6774_v23  ;;  %v750_v12 = vcombine.low %v741_v61, %v748_v3  ;;  %v768_v14 = vcombine.low %v443_v62, %v450_v5  ;;  %vm5768_vm10 = vcmask 1047559  }
  0xc9   :  { %1107 = vmatprep.subr.bf16.mxu1 %v6119_v22  ;;  %6007 = vmatprep.subr.bf16.mxu0 %v8542_v0  ;;  %v757_v13 = vrot.slane %v749_v4, %v6774_v23  ;;  %v474_v15 = vcombine.high %v466_v63, %v466_v63  ;;  %v769_v17 = vcombine.low %v451_v7, %v466_v63 }
  0xca   :  { %v783_v18 = vrot.slane %v767_v8, %v6774_v23  ;;  %v473_v20 = vrot.slane %v459_v11, %v6774_v23  ;;  %v482_v21 = vcombine.high %v5908_v6, %v5908_v6  ;;  %v764_v22 = vrot.slane %v750_v12, %v6774_v23 }
  0xcb   :  { %v505_v26 = vcombine.high %v5909_v10, %v5909_v10  ;;  %v512_v30 = vrot.slane %v5909_v10, %v6774_v23  ;;  %v574_v61 = vcombine.high %v5912_v41, %v5912_v41  ;;  %v581_v62 = vrot.slane %v5912_v41, %v6774_v23 }
  0xcc   :  { %1108 = vmatpush1.bf16.msra.mxu1 %v6121_v24  ;;  %6008 = vmatpush3.bf16.msra.mxu0 %v6122_v25  ;;  %v790_v24 = vrot.slane %v768_v14, %v6774_v23  ;;  %v489_v25 = vrot.slane %v5908_v6, %v6774_v23  ;;  %v798_v28 = vcombine.low %v776_v9, %v783_v18  ;;  %v5915_v9 = vld.sshfl [vmem:[#allocation5 + $0x34] sm:$0x13 pattern:$0x75316420] }
  0xcd   :  { %1109 = vmatprep.subr.bf16.mxu1 %v6123_v27  ;;  %6009 = vmatprep.subr.bf16.mxu0 %v8542_v0  ;;  %v797_v27 = vrot.slane %v769_v17, %v6774_v23  ;;  %v496_v29 = vrot.slane %v482_v21, %v6774_v23  ;;  %v765_v32 = vcombine.low %v757_v13, %v764_v22 }
  0xce   :  { %v497_v33 = vcombine.high %v489_v25, %v489_v25  ;;  %v519_v34 = vrot.slane %v505_v26, %v6774_v23  ;;  %v806_v38 = vrot.slane %v798_v28, %v6774_v23  ;;  %v520_v39 = vcombine.high %v512_v30, %v512_v30  ;;  %v5916_v28 = vld.sshfl [vmem:[#allocation5 + $0x38] sm:$0x13 pattern:$0x75316420] }
  0xcf   :  { %v799_v37 = vcombine.low %v790_v24, %v797_v27  ;;  %v816_v40 = vcombine.low %v489_v25, %v496_v29  ;;  %v597_v5 = vcombine.high %v5913_v46, %v5913_v46  ;;  %v588_v6 = vrot.slane %v574_v61, %v6774_v23 }
  0xd0   :  { %1110 = vmatpush1.bf16.msra.mxu1 %v6125_v31  ;;  %6010 = vmatpush3.bf16.msra.mxu0 %v6126_v35  ;;  %v5910_v31 = vld.sshfl [vmem:[#allocation5 + $0x20] sm:$0x13 pattern:$0x75316420]  ;;  %v815_v35 = vcombine.low %v473_v20, %v474_v15  ;;  %v817_v42 = vcombine.low %v497_v33, %v512_v30  ;;  %v818_v48 = vcombine.low %v519_v34, %v520_v39 }
  0xd1   :  { %1111 = vmatprep.subr.bf16.mxu1 %v6127_v36  ;;  %6011 = vmatprep.subr.bf16.mxu0 %v8542_v0  ;;  %v5911_v36 = vld.sshfl [vmem:[#allocation5 + $0x24] sm:$0x13 pattern:$0x75316420]  ;;  %v528_v44 = vcombine.high %v5910_v31, %v5910_v31  ;;  %v535_v45 = vrot.slane %v5910_v31, %v6774_v23  ;;  %v813_v47 = vrot.slane %v799_v37, %v6774_v23 }
  0xd2   :  { %v825_v43 = vrot.slane %v815_v35, %v6774_v23  ;;  %v832_v49 = vrot.slane %v816_v40, %v6774_v23  ;;  %v551_v50 = vcombine.high %v5911_v36, %v5911_v36  ;;  %v839_v51 = vrot.slane %v817_v42, %v6774_v23  ;;  %v5917_v31 = vld.sshfl [vmem:[#allocation5 + $0x3c] sm:$0x13 pattern:$0x75316420] }
  0xd3   :  { %v542_v52 = vrot.slane %v528_v44, %v6774_v23  ;;  %v543_v53 = vcombine.high %v535_v45, %v535_v45  ;;  %v558_v54 = vrot.slane %v5911_v36, %v6774_v23  ;;  %v814_v55 = vcombine.low %v806_v38, %v813_v47 }
  0xd4   :  { %1112 = vmatpush1.bf16.msra.mxu1 %v6129_v59  ;;  %6012 = vmatpush3.bf16.msra.mxu0 %v6130_v60  ;;  %v846_v56 = vrot.slane %v818_v48, %v6774_v23  ;;  %v847_v57 = vcombine.low %v825_v43, %v832_v49  ;;  %v565_v58 = vrot.slane %v551_v50, %v6774_v23  ;;  %v5914_v59 = vld.sshfl [vmem:[#allocation5 + $0x30] sm:$0x13 pattern:$0x75316420] }
  0xd5   :  { %v566_v60 = vcombine.high %v558_v54, %v558_v54  ;;  %v864_v63 = vcombine.low %v535_v45, %v542_v52  ;;  %v865_v4 = vcombine.low %v543_v53, %v558_v54  ;;  %v589_v10 = vcombine.high %v581_v62, %v581_v62 }
  0xd6   :  { %v848_v2 = vcombine.low %v839_v51, %v846_v56  ;;  %v855_v3 = vrot.slane %v847_v57, %v6774_v23  ;;  %v604_v13 = vrot.slane %v5913_v46, %v6774_v23  ;;  %v611_v14 = vrot.slane %v597_v5, %v6774_v23 }
  0xd7   :  { %6014 = vmatmul.mubr.bf16.vlgmr.msra.gmra.mrb[0].mxu0 %v6131_v16  ;;  %1130 = vmatmul.mubr.bf16.vlgmr.msra.gmra.mrb[0].mxu1 %v765_v32  ;;  %v866_v7 = vcombine.low %v565_v58, %v566_v60  ;;  %v874_v8 = vrot.slane %v864_v63, %v6774_v23  ;;  %v881_v12 = vrot.slane %v865_v4, %v6774_v23 }
  0xd8   :  { %1139 = vmatprep.mubr.bf16.mxu1 %v6548_v1  ;;  %v862_v11 = vrot.slane %v848_v2, %v6774_v23  ;;  %v867_v15 = vcombine.low %v581_v62, %v588_v6  ;;  %v620_v17 = vcombine.high %v5914_v59, %v5914_v59  ;;  %v627_v18 = vrot.slane %v5914_v59, %v6774_v23 }
  0xd9   :  { %v888_v16 = vrot.slane %v866_v7, %v6774_v23  ;;  %v896_v20 = vcombine.low %v874_v8, %v881_v12  ;;  %v612_v21 = vcombine.high %v604_v13, %v604_v13  ;;  %v650_v22 = vrot.slane %v5915_v9, %v6774_v23  ;;  %v6135_v12 = vld [vmem:[#allocation16 + $0x18] sm:$0xff]  }
  0xda   :  { %v895_v24 = vrot.slane %v867_v15, %v6774_v23  ;;  %v634_v25 = vrot.slane %v620_v17, %v6774_v23  ;;  %v635_v26 = vcombine.high %v627_v18, %v627_v18  ;;  %v913_v27 = vcombine.low %v589_v10, %v604_v13  ;;  %v6133_v10 = vld [vmem:[#allocation16 + $0x8] sm:$0xff]   ;;  %v6136_v13 = vld [vmem:[#allocation16 + $0x20] sm:$0xff]   ;;  %v6139_v15 = vld [vmem:[#allocation16 + $0x38] sm:$0xff]  }
  0xdb   :  { %v863_v29 = vcombine.low %v855_v3, %v862_v11  ;;  %v914_v30 = vcombine.low %v611_v14, %v612_v21  ;;  %v643_v35 = vcombine.high %v5915_v9, %v5915_v9  ;;  %v904_v36 = vrot.slane %v896_v20, %v6774_v23  ;;  %v6132_v9 = vld [vmem:[#allocation16] sm:$0xff]   ;;  %v6134_v11 = vld [vmem:[#allocation16 + $0x10] sm:$0xff]   ;;  %v6137_v14 = vld [vmem:[#allocation16 + $0x28] sm:$0xff]  }
  0xdc   :  { %v897_v32 = vcombine.low %v888_v16, %v895_v24  ;;  %v915_v33 = vcombine.low %v627_v18, %v634_v25  ;;  %v916_v34 = vcombine.low %v635_v26, %v650_v22  ;;  %v666_v37 = vcombine.high %v5916_v28, %v5916_v28  ;;  %6017 = vmatprep.subr.bf16.mxu0 %v6132_v9  ;;  %v705_v20 = vld [vmem:[#allocation11] sm:$0x3]  ;;  %v5892_v24 = vld [vmem:[#allocation8] ss:$0 sm:$0xff] }
  0xdd   :  { %v673_v38 = vrot.slane %v5916_v28, %v6774_v23  ;;  %v923_v39 = vrot.slane %v913_v27, %v6774_v23  ;;  %v930_v40 = vrot.slane %v914_v30, %v6774_v23  ;;  %v658_v41 = vcombine.high %v650_v22, %v650_v22  ;;  %6018 = vmatpush3.bf16.msra.mxu0 %v6132_v9 }
  0xde   :  { %v689_v42 = vcombine.high %v5917_v31, %v5917_v31  ;;  %v911_v43 = vrot.slane %v897_v32, %v6774_v23  ;;  %v937_v44 = vrot.slane %v915_v33, %v6774_v23  ;;  %v944_v45 = vrot.slane %v916_v34, %v6774_v23  ;;  %6019 = vmatprep.subr.bf16.mxu0 %v6133_v10 }
  0xdf   :  { %1140 = vmatmul.mubr.bf16.gmra.mrb[4].mxu1 %v814_v55  ;;  %v696_v46 = vrot.slane %v5917_v31, %v6774_v23  ;;  %v657_v47 = vrot.slane %v643_v35, %v6774_v23  ;;  %v680_v48 = vrot.slane %v666_v37, %v6774_v23  ;;  %v681_v49 = vcombine.high %v673_v38, %v673_v38 }
  0xe0   :  { %1149 = vmatprep.mubr.bf16.mxu1 %v6548_v1  ;;  %v703_v50 = vrot.slane %v689_v42, %v6774_v23  ;;  %v912_v52 = vcombine.low %v904_v36, %v911_v43  ;;  %v945_v53 = vcombine.low %v923_v39, %v930_v40  ;;  %v946_v54 = vcombine.low %v937_v44, %v944_v45 }
  0xe1   :  { %v704_v51 = vcombine.high %v696_v46, %v696_v46  ;;  %v962_v55 = vcombine.low %v657_v47, %v658_v41  ;;  %v963_v56 = vcombine.low %v673_v38, %v680_v48  ;;  %v964_v57 = vcombine.low %v681_v49, %v696_v46  ;;  %6020 = vmatpush3.bf16.msra.mxu0 %v6133_v10 }
  0xe2   :  { %v953_v59 = vrot.slane %v945_v53, %v6774_v23  ;;  %v960_v60 = vrot.slane %v946_v54, %v6774_v23  ;;  %6021 = vmatprep.subr.bf16.mxu0 %v6134_v11  ;;  %v6855_v16 = vsub.s32 0, %v6770_v19  ;;  %v6551_v17 = vmov 1983009808  }
  0xe3   :  { %v965_v58 = vcombine.low %v703_v50, %v704_v51  ;;  %v972_v61 = vrot.slane %v962_v55, %v6774_v23  ;;  %v979_v62 = vrot.slane %v963_v56, %v6774_v23  ;;  %v986_v63 = vrot.slane %v964_v57, %v6774_v23 }
  0xe4   :  { %v961_v3 = vcombine.low %v953_v59, %v960_v60  ;;  %v1217_v18 = vunpack.c.l.s4 %v6551_v17  ;;  %v713_v21 = vsub.s32 1, %v6770_v19  ;;  %v6859_v22 = vrot.slane %v705_v20, %v6855_v16 }
  0xe5   :  { %v993_v2 = vrot.slane %v965_v58, %v6774_v23  ;;  %v994_v4 = vcombine.low %v972_v61, %v979_v62  ;;  %6022 = vmatpush3.bf16.msra.mxu0 %v6134_v11 }
  0xe6   :  { %6023 = vmatprep.subr.bf16.mxu0 %v6135_v12  ;;  %v1218_v25 = vunpack.c.0.s8 %v1217_v18  ;;  %v6861_v26 = vrot.slane %v705_v20, %v713_v21 }
  0xe7   :  { %1150 = vmatmul.mubr.bf16.gmra.mrb[8].mxu1 %v863_v29  ;;  %v995_v5 = vcombine.low %v986_v63, %v993_v2  ;;  %v1002_v6 = vrot.slane %v994_v4, %v6774_v23 }
  0xe8   :  { %1159 = vmatprep.mubr.bf16.mxu1 %v6548_v1  ;;  %v6865_v34 = vsub.s32 %v1218_v25, %v6770_v19 }
  0xe9   :  { %v1009_v7 = vrot.slane %v995_v5, %v6774_v23  ;;  %6024 = vmatpush3.bf16.msra.mxu0 %v6135_v12 }
  0xea   :  { %6025 = vmatprep.subr.bf16.mxu0 %v6136_v13 }
  0xeb   :  { %v1010_v8 = vcombine.low %v1002_v6, %v1009_v7 }
  0xed   :  { %6026 = vmatpush3.bf16.msra.mxu0 %v6136_v13 }
  0xee   :  { %6027 = vmatprep.subr.bf16.mxu0 %v6137_v14 }
  0xef   :  { %1160 = vmatmul.mubr.bf16.gmra.mrb[12].mxu1 %v912_v52 }
  0xf0   :  { %1169 = vmatprep.mubr.bf16.mxu1 %v6548_v1 }
  0xf1   :  { %6028 = vmatpush3.bf16.msra.mxu0 %v6137_v14 }
  0xf7   :  { %1170 = vmatmul.mubr.bf16.gmra.mrb[16].mxu1 %v961_v3 }
  0xf8   :  { %1179 = vmatprep.mubr.bf16.mxu1 %v6548_v1  ;;  %v6138_v1 = vld [vmem:[#allocation16 + $0x30] sm:$0xff]  }
  0xf9   :  { %6029 = vmatprep.subr.bf16.mxu0 %v6138_v1 }
  0xfa   :  { %6030 = vmatpush3.bf16.msra.mxu0 %v6138_v1 }
  0xfb   :  { %6031 = vmatprep.subr.bf16.mxu0 %v6139_v15 }
  0xfe   :  { %6032 = vmatpush3.bf16.msra.mxu0 %v6139_v15 }
  0xff   :  { %1180 = vmatmul.mubr.bf16.gmra.mrb[20].mxu1 %v1010_v8  ;;  %6059 = vmatprep.subr.bf16.mxu0 %v8542_v0 }
 0x1aa   :  { %v280_v27 = vpop.f32.mrb[0].mxu0  ;;  %v1131_v28 = vpop.f32.mrb[0].mxu1 }
 0x1ab   :  { %v281_v29 = vadd.f32 %v5892_v24, %v280_v27  ;;  %v6015_v30 = vpop.f32.mrb[1].mxu0  ;;  %v1132_v31 = vadd.f32 %v1131_v28, %v6859_v22  ;;  %v1133_v32 = vpop.f32.mrb[1].mxu1 }
 0x1ac   :  { %v283_v33 = vpop.f32.mrb[2].mxu0  ;;  %v1134_v35 = vadd.f32 %v1133_v32, %v6861_v26  ;;  %v1135_v36 = vpop.f32.mrb[2].mxu1 }
 0x1ad   :  { %v287_v37 = vmul.f32 0.35355338, %v281_v29  ;;  %v284_v38 = vadd.f32 %v5892_v24, %v283_v33  ;;  %v6016_v39 = vpop.f32.mrb[3].mxu0  ;;  %v1136_v40 = vadd.f32 %v1135_v36, %v6859_v22  ;;  %v1137_v41 = vpop.f32.mrb[3].mxu1 }
 0x1ae   :  { %v1214_v42 = vcombine.low %v1132_v31, %v1134_v35  ;;  %v1215_v43 = vcombine.high %v1132_v31, %v1134_v35  ;;  %v1138_v46 = vadd.f32 %v1137_v41, %v6861_v26 }
 0x1af   :  { %v1432_v44 = vcombine.high %v287_v37, %v287_v37  ;;  %v1439_v45 = vrot.slane %v287_v37, %v6774_v23  ;;  %v6871_v47 = vmul.f32 0.35355338, %v284_v38 }
 0x1b0   :  { %v6874_v19 = vrot.slane %v1214_v42, %v6865_v34  ;;  %v6877_v48 = vrot.slane %v1215_v43, %v6865_v34  ;;  %v1232_v52 = vcombine.low %v1136_v40, %v1138_v46  ;;  %v1233_v53 = vcombine.high %v1136_v40, %v1138_v46 }
 0x1b1   :  { %v1446_v49 = vrot.slane %v1432_v44, %v6774_v23  ;;  %v1447_v50 = vcombine.high %v1439_v45, %v1439_v45  ;;  %v1455_v51 = vrot.slane %v1439_v45, %v6774_v23  ;;  %v1481_v54 = vcombine.high %v6871_v47, %v6871_v47 }
 0x1b2   :  { %8647 = vst [vmem:[#allocation27_spill] sm:$0xff] %v6874_v19  ;;  %8648 = vst [vmem:[#allocation28_spill] sm:$0xff] %v6877_v48  ;;  %v6885_v55 = vcombine.high %v6874_v19, %v6874_v19  ;;  %v6889_v56 = vcombine.high %v6877_v48, %v6877_v48  ;;  %v1624_v57 = vrot.slane %v6877_v48, %v6865_v34  ;;  %v1141_v59 = vpop.f32.mrb[4].mxu1 }
 0x1b3   :  { %v1448_v58 = vcombine.high %v1446_v49, %v1446_v49  ;;  %v6894_v60 = vrot.slane %v1446_v49, %v6774_v23  ;;  %v6897_v61 = vrot.slane %v1447_v50, %v6774_v23  ;;  %v1477_v62 = vcombine.high %v1455_v51, %v1455_v51  ;;  %v1143_v2 = vpop.f32.mrb[5].mxu1 }
 0x1b4   :  { %8649 = vst [vmem:[#allocation29_spill] sm:$0xff] %v6885_v55  ;;  %8650 = vst [vmem:[#allocation30_spill] sm:$0xff] %v6889_v56  ;;  %v1533_v63 = vrot.slane %v1455_v51, %v6855_v16  ;;  %v1610_v3 = vcombine.low %v6874_v19, %v6885_v55  ;;  %v6906_v5 = vrot.slane %v1232_v52, %v6865_v34  ;;  %v1145_v7 = vpop.f32.mrb[6].mxu1 }
 0x1b5   :  { %v6903_v4 = vrot.slane %v1448_v58, %v6774_v23  ;;  %v6909_v6 = vrot.slane %v1233_v53, %v6865_v34  ;;  %v1478_v8 = vcombine.high %v6894_v60, %v6894_v60  ;;  %v1479_v9 = vcombine.high %v6897_v61, %v6897_v61  ;;  %v1147_v12 = vpop.f32.mrb[7].mxu1 }
 0x1b6   :  { %8651 = vst [vmem:[#allocation31_spill] sm:$0xff] %v6906_v5  ;;  %v1541_v11 = vrot.slane %v1477_v62, %v6855_v16  ;;  %v1617_v13 = vrot.slane %v1610_v3, %v6865_v34  ;;  %v1549_v1 = vrot.slane %v6894_v60, %v6855_v16  ;;  %v6933_v20 = vcombine.high %v6906_v5, %v6906_v5 }
 0x1b7   :  { %8652 = vst [vmem:[#allocation32_spill] sm:$0xff] %v6909_v6  ;;  %v1480_v14 = vcombine.high %v6903_v4, %v6903_v4  ;;  %v1553_v15 = vrot.slane %v6903_v4, %v6855_v16  ;;  %v6926_v17 = vrot.slane %v1479_v9, %v6855_v16  ;;  %v6929_v18 = vrot.slane %v1478_v8, %v6855_v16 }
 0x1b8   :  { %8653 = vst [vmem:[#allocation33_spill] sm:$0xff] %v6933_v20  ;;  %v6937_v21 = vcombine.high %v6909_v6, %v6909_v6  ;;  %v1625_v25 = vcombine.low %v1617_v13, %v1624_v57  ;;  %v1626_v27 = vcombine.low %v6889_v56, %v6906_v5  ;;  %v1142_v28 = vadd.f32 %v1141_v59, %v6859_v22 }
 0x1b9   :  { %v6940_v24 = vrot.slane %v1480_v14, %v6855_v16  ;;  %v1640_v29 = vrot.slane %v6933_v20, %v6865_v34  ;;  %v1144_v31 = vadd.f32 %v1143_v2, %v6861_v26  ;;  %v1146_v32 = vadd.f32 %v1145_v7, %v6859_v22 }
 0x1ba   :  { %8654 = vst [vmem:[#allocation34_spill] sm:$0xff] %v6937_v21  ;;  %v1642_v30 = vcombine.low %v6909_v6, %v6937_v21  ;;  %v6951_v33 = vmul.f32 %v1625_v25, %v1533_v63  ;;  %v1633_v35 = vrot.slane %v1626_v27, %v6865_v34  ;;  %v1148_v36 = vadd.f32 %v1147_v12, %v6861_v26  ;;  %v1151_v37 = vpop.f32.mrb[8].mxu1 }
 0x1bb   :  { %v6957_v38 = vrot.slane %v6871_v47, %v6774_v23  ;;  %v1250_v40 = vcombine.low %v1142_v28, %v1144_v31  ;;  %v1251_v41 = vcombine.high %v1142_v28, %v1144_v31  ;;  %v1152_v42 = vadd.f32 %v1151_v37, %v6859_v22  ;;  %v1153_v43 = vpop.f32.mrb[9].mxu1 }
 0x1bc   :  { %v1649_v39 = vrot.slane %v1642_v30, %v6865_v34  ;;  %v6965_v45 = vrot.slane %v6951_v33, %v6865_v34  ;;  %v6967_v46 = vcombine.low %v1633_v35, %v1640_v29  ;;  %v1268_v49 = vcombine.low %v1146_v32, %v1148_v36  ;;  %v1155_v50 = vpop.f32.mrb[10].mxu1 }
 0x1bd   :  { %v6970_v47 = vrot.slane %v1250_v40, %v6865_v34  ;;  %v6973_v51 = vrot.slane %v1251_v41, %v6865_v34  ;;  %v1269_v52 = vcombine.high %v1146_v32, %v1148_v36  ;;  %v1154_v53 = vadd.f32 %v1153_v43, %v6861_v26  ;;  %v1157_v57 = vpop.f32.mrb[11].mxu1 }
 0x1be   :  { %v6977_v58 = vrot.slane %v1268_v49, %v6865_v34  ;;  %v1156_v59 = vadd.f32 %v1155_v50, %v6859_v22  ;;  %v1158_v62 = vadd.f32 %v1157_v57, %v6861_v26  ;;  %v6982_v63 = vrot.slane %v1481_v54, %v6774_v23 }
 0x1bf   :  { %8655 = vst [vmem:[#allocation35_spill] sm:$0xff] %v6970_v47  ;;  %8656 = vst [vmem:[#allocation36_spill] sm:$0xff] %v6973_v51  ;;  %v6986_v2 = vcombine.high %v6970_v47, %v6970_v47  ;;  %v6990_v3 = vcombine.high %v6973_v51, %v6973_v51  ;;  %v1656_v7 = vrot.slane %v6970_v47, %v6865_v34 }
 0x1c0   :  { %8657 = vst [vmem:[#allocation37_spill] sm:$0xff] %v6977_v58  ;;  %v6995_v8 = vrot.slane %v1269_v52, %v6865_v34  ;;  %v6999_v9 = vcombine.high %v6977_v58, %v6977_v58  ;;  %v1286_v54 = vcombine.low %v1152_v42, %v1154_v53  ;;  %v1287_v12 = vcombine.high %v1152_v42, %v1154_v53 }
 0x1c1   :  { %8658 = vst [vmem:[#allocation38_spill] sm:$0xff] %v6986_v2  ;;  %8659 = vst [vmem:[#allocation39_spill] sm:$0xff] %v6990_v3  ;;  %v1304_v13 = vcombine.low %v1156_v59, %v1158_v62  ;;  %v1657_v14 = vcombine.low %v1649_v39, %v1656_v7  ;;  %v1658_v25 = vcombine.low %v6986_v2, %v6973_v51 }
 0x1c2   :  { %8660 = vst [vmem:[#allocation40_spill] sm:$0xff] %v6995_v8  ;;  %8661 = vst [vmem:[#allocation41_spill] sm:$0xff] %v6999_v9  ;;  %v1672_v27 = vrot.slane %v6990_v3, %v6865_v34  ;;  %v7007_v28 = vcombine.high %v6995_v8, %v6995_v8  ;;  %v1674_v29 = vcombine.low %v6977_v58, %v6999_v9  ;;  %v1161_v35 = vpop.f32.mrb[12].mxu1 }
 0x1c3   :  { %v1688_v30 = vrot.slane %v6995_v8, %v6865_v34  ;;  %v7014_v31 = vrot.slane %v1286_v54, %v6865_v34  ;;  %v7017_v32 = vrot.slane %v1287_v12, %v6865_v34  ;;  %v1665_v36 = vrot.slane %v1658_v25, %v6865_v34  ;;  %v1163_v41 = vpop.f32.mrb[13].mxu1 }
 0x1c4   :  { %8662 = vst [vmem:[#allocation42_spill] sm:$0xff] %v7007_v28  ;;  %v7020_v37 = vmul.f32 %v1657_v14, %v1541_v11  ;;  %v1305_v39 = vcombine.high %v1156_v59, %v1158_v62  ;;  %v7023_v40 = vrot.slane %v1304_v13, %v6865_v34  ;;  %v1681_v42 = vrot.slane %v1674_v29, %v6865_v34  ;;  %v1165_v11 = vpop.f32.mrb[14].mxu1 }
 0x1c5   :  { %8663 = vst [vmem:[#allocation43_spill] sm:$0xff] %v7014_v31  ;;  %8664 = vst [vmem:[#allocation44_spill] sm:$0xff] %v7017_v32  ;;  %v7028_v43 = vcombine.high %v7014_v31, %v7014_v31  ;;  %v7032_v49 = vcombine.high %v7017_v32, %v7017_v32  ;;  %v1690_v50 = vcombine.low %v7007_v28, %v7014_v31  ;;  %v1167_v62 = vpop.f32.mrb[15].mxu1 }
 0x1c6   :  { %8665 = vst [vmem:[#allocation45_spill] sm:$0xff] %v7023_v40  ;;  %v1673_v52 = vcombine.low %v1665_v36, %v1672_v27  ;;  %v7039_v57 = vrot.slane %v1305_v39, %v6865_v34  ;;  %v7043_v59 = vcombine.high %v7023_v40, %v7023_v40  ;;  %v1689_v7 = vcombine.low %v1681_v42, %v1688_v30 }
 0x1c7   :  { %8666 = vst [vmem:[#allocation46_spill] sm:$0xff] %v7028_v43  ;;  %8667 = vst [vmem:[#allocation47_spill] sm:$0xff] %v7032_v49  ;;  %v1697_v54 = vrot.slane %v1690_v50, %v6865_v34  ;;  %v1704_v12 = vrot.slane %v7028_v43, %v6865_v34  ;;  %v1706_v13 = vcombine.low %v7017_v32, %v7032_v49 }
 0x1c8   :  { %8668 = vst [vmem:[#allocation48_spill] sm:$0xff] %v7039_v57  ;;  %8669 = vst [vmem:[#allocation49_spill] sm:$0xff] %v7043_v59  ;;  %v7051_v14 = vmul.f32 %v1673_v52, %v6926_v17  ;;  %v7055_v25 = vcombine.high %v7039_v57, %v7039_v57  ;;  %v1720_v27 = vrot.slane %v7023_v40, %v6865_v34 }
 0x1c9   :  { %v1722_v29 = vcombine.low %v7043_v59, %v7039_v57  ;;  %v7064_v30 = vmul.f32 %v1689_v7, %v1549_v1  ;;  %v1705_v36 = vcombine.low %v1697_v54, %v1704_v12  ;;  %v1713_v39 = vrot.slane %v1706_v13, %v6865_v34 }
 0x1ca   :  { %8670 = vst [vmem:[#allocation50_spill] sm:$0xff] %v7055_v25  ;;  %v1162_v17 = vadd.f32 %v1161_v35, %v6859_v22  ;;  %v1736_v52 = vrot.slane %v7055_v25, %v6865_v34  ;;  %v1496_v0 = vcombine.high %v6957_v38, %v6957_v38  ;;  %v1171_v54 = vpop.f32.mrb[16].mxu1  ;;  %v1497_v13 = vcombine.high %v6982_v63, %v6982_v63 }
 0x1cb   :  { %v1729_v50 = vrot.slane %v1722_v29, %v6865_v34  ;;  %v7079_v1 = vrot.slane %v7064_v30, %v6865_v34  ;;  %v7084_v35 = vmul.f32 %v1705_v36, %v1553_v15  ;;  %v1721_v7 = vcombine.low %v1713_v39, %v1720_v27  ;;  %v1173_v42 = vpop.f32.mrb[17].mxu1 }
 0x1cc   :  { %v7092_v29 = vrot.slane %v6957_v38, %v6774_v23  ;;  %v7096_v60 = vrot.slane %v6982_v63, %v6774_v23  ;;  %v7102_v15 = vrot.slane %v1496_v0, %v6774_v23  ;;  %v1164_v27 = vadd.f32 %v1163_v41, %v6861_v26  ;;  %v1175_v39 = vpop.f32.mrb[18].mxu1 }
 0x1cd   :  { %v7086_v12 = vcombine.low %v1729_v50, %v1736_v52  ;;  %v7099_v4 = vmul.f32 %v1721_v7, %v6929_v18  ;;  %v1166_v36 = vadd.f32 %v1165_v11, %v6859_v22  ;;  %v7107_v50 = vrot.slane %v1497_v13, %v6774_v23  ;;  %v7115_v52 = vpop.f32.mrb[19].mxu1 }
 0x1ce   :  { %v1526_v38 = vcombine.high %v7092_v29, %v7092_v29  ;;  %v1527_v63 = vcombine.high %v7096_v60, %v7096_v60  ;;  %v1565_v18 = vrot.slane %v7092_v29, %v6855_v16  ;;  %v1528_v0 = vcombine.high %v7102_v15, %v7102_v15 }
 0x1cf   :  { %v1322_v11 = vcombine.low %v1162_v17, %v1164_v27  ;;  %v1529_v7 = vcombine.high %v7107_v50, %v7107_v50  ;;  %v1323_v41 = vcombine.high %v1162_v17, %v1164_v27  ;;  %v1168_v23 = vadd.f32 %v1167_v62, %v6861_v26 }
 0x1d0   :  { %v7126_v13 = vrot.slane %v1526_v38, %v6855_v16  ;;  %v7131_v53 = vrot.slane %v1527_v63, %v6855_v16  ;;  %v7134_v44 = vrot.slane %v1528_v0, %v6855_v16  ;;  %v1172_v38 = vadd.f32 %v1171_v54, %v6859_v22 }
 0x1d1   :  { %v7137_v10 = vrot.slane %v1322_v11, %v6865_v34  ;;  %v7141_v25 = vrot.slane %v1529_v7, %v6855_v16  ;;  %v1174_v57 = vadd.f32 %v1173_v42, %v6861_v26  ;;  %v7146_v29 = vadd.f32 %v1175_v39, %v6859_v22 }
 0x1d2   :  { %v7149_v63 = vrot.slane %v1323_v41, %v6865_v34  ;;  %v1340_v27 = vcombine.low %v1166_v36, %v1168_v23  ;;  %v1341_v0 = vcombine.high %v1166_v36, %v1168_v23  ;;  %v1181_v62 = vpop.f32.mrb[20].mxu1  ;;  %v8674_v54 = vrot.slane %v6897_v61, %v6855_v16 }
 0x1d3   :  { %8671 = vst [vmem:[#allocation51_spill] sm:$0xff] %v7137_v10  ;;  %v7153_v17 = vcombine.high %v7137_v10, %v7137_v10  ;;  %v1358_v11 = vcombine.low %v1172_v38, %v1174_v57  ;;  %v1359_v7 = vcombine.high %v1172_v38, %v1174_v57  ;;  %v8675_v39 = vcombine.high %v6951_v33, %v6951_v33  ;;  %v1183_v59 = vpop.f32.mrb[21].mxu1 }
 0x1d4   :  { %8672 = vst [vmem:[#allocation52_spill] sm:$0xff] %v7149_v63  ;;  %v1883_v42 = vmul.f32 %v6967_v46, %v8674_v54  ;;  %v7165_v40 = vcombine.high %v7149_v63, %v7149_v63  ;;  %v1752_v57 = vrot.slane %v7149_v63, %v6865_v34  ;;  %v7172_v61 = vrot.slane %v1340_v27, %v6865_v34  ;;  %v1185_v46 = vpop.f32.mrb[22].mxu1 }
 0x1d5   :  { %8673 = vst [vmem:[#allocation53_spill] sm:$0xff] %v7153_v17  ;;  %v1944_v41 = vrot.slane %v8675_v39, %v6865_v34  ;;  %v1738_v36 = vcombine.low %v7137_v10, %v7153_v17  ;;  %v7175_v23 = vrot.slane %v1341_v0, %v6865_v34  ;;  %v7178_v33 = vrot.slane %v1358_v11, %v6865_v34  ;;  %v7185_v39 = vpop.f32.mrb[23].mxu1 }
 0x1d6   :  { %8676 = vst [vmem:[#allocation54_spill] sm:$0xff] %v7165_v40  ;;  %8677 = vst [vmem:[#allocation55_spill] sm:$0xff] %v7172_v61  ;;  %v7181_v38 = vrot.slane %v1359_v7, %v6865_v34  ;;  %v1945_v54 = vcombine.high %v6965_v45, %v6965_v45  ;;  %v7190_v27 = vcombine.high %v7172_v61, %v7172_v61 }
 0x1d7   :  { %8678 = vst [vmem:[#allocation56_spill] sm:$0xff] %v7175_v23  ;;  %8679 = vst [vmem:[#allocation57_spill] sm:$0xff] %v7178_v33  ;;  %v1745_v49 = vrot.slane %v1738_v36, %v6865_v34  ;;  %v1754_v0 = vcombine.low %v7165_v40, %v7172_v61  ;;  %v1946_v32 = vcombine.high %v1883_v42, %v1883_v42 }
 0x1d8   :  { %8680 = vst [vmem:[#allocation58_spill] sm:$0xff] %v7181_v38  ;;  %8681 = vst [vmem:[#allocation59_spill] sm:$0xff] %v7190_v27  ;;  %v7196_v11 = vcombine.high %v7175_v23, %v7175_v23  ;;  %v7200_v7 = vcombine.high %v7178_v33, %v7178_v33  ;;  %v7204_v43 = vcombine.high %v7181_v38, %v7181_v38 }
 0x1d9   :  { %v1784_v36 = vrot.slane %v7178_v33, %v6865_v34  ;;  %v1753_v31 = vcombine.low %v1745_v49, %v1752_v57  ;;  %v1761_v28 = vrot.slane %v1754_v0, %v6865_v34  ;;  %v1768_v61 = vrot.slane %v7190_v27, %v6865_v34 }
 0x1da   :  { %8682 = vst [vmem:[#allocation60_spill] sm:$0xff] %v7196_v11  ;;  %8683 = vst [vmem:[#allocation61_spill] sm:$0xff] %v7200_v7  ;;  %v1953_v40 = vrot.slane %v1883_v42, %v6865_v34  ;;  %v1770_v63 = vcombine.low %v7175_v23, %v7196_v11  ;;  %v1786_v17 = vcombine.low %v7200_v7, %v7181_v38 }
 0x1db   :  { %8684 = vst [vmem:[#allocation62_spill] sm:$0xff] %v7204_v43  ;;  %v1800_v10 = vrot.slane %v7204_v43, %v6865_v34  ;;  %v1960_v21 = vrot.slane %v1946_v32, %v6865_v34  ;;  %v7219_v33 = vmul.f32 %v1753_v31, %v1565_v18  ;;  %v7221_v49 = vcombine.low %v1761_v28, %v1768_v61 }
 0x1dc   :  { %v1961_v57 = vcombine.high %v1953_v40, %v1953_v40  ;;  %v1969_v0 = vrot.slane %v7020_v37, %v6865_v34  ;;  %v1777_v42 = vrot.slane %v1770_v63, %v6865_v34  ;;  %v1793_v11 = vrot.slane %v1786_v17, %v6865_v34 }
 0x1dd   :  { %v2186_v23 = vcombine.low %v6965_v45, %v1945_v54  ;;  %v2187_v38 = vcombine.low %v1944_v41, %v1953_v40  ;;  %v1178_v32 = vadd.f32 %v7115_v52, %v6861_v26  ;;  %v1182_v31 = vadd.f32 %v1181_v62, %v6859_v22 }
 0x1de   :  { %v1977_v7 = vcombine.high %v1969_v0, %v1969_v0  ;;  %v2203_v27 = vcombine.low %v1961_v57, %v1960_v21  ;;  %v1785_v28 = vcombine.low %v1777_v42, %v1784_v36  ;;  %v7231_v18 = vcombine.low %v1793_v11, %v1800_v10 }
 0x1df   :  { %v2194_v61 = vrot.slane %v2186_v23, %v6865_v34  ;;  %v2201_v43 = vrot.slane %v2187_v38, %v6865_v34  ;;  %v1376_v45 = vcombine.low %v7146_v29, %v1178_v32  ;;  %v1377_v40 = vcombine.high %v7146_v29, %v1178_v32 }
 0x1e0   :  { %v2204_v63 = vcombine.low %v1969_v0, %v1977_v7  ;;  %v2211_v17 = vrot.slane %v2203_v27, %v6865_v34  ;;  %v7239_v21 = vmul.f32 %v1785_v28, %v7126_v13  ;;  %v1184_v62 = vadd.f32 %v1183_v59, %v6861_v26 }
 0x1e1   :  { %v2202_v52 = vcombine.low %v2194_v61, %v2201_v43  ;;  %v1186_v10 = vadd.f32 %v1185_v46, %v6859_v22  ;;  %v7245_v23 = vrot.slane %v1376_v45, %v6865_v34  ;;  %v7248_v38 = vrot.slane %v1377_v40, %v6865_v34 }
 0x1e2   :  { %v2218_v41 = vrot.slane %v2204_v63, %v6865_v34  ;;  %v8687_v29 = vcombine.high %v7020_v37, %v7020_v37  ;;  %v1394_v13 = vcombine.low %v1182_v31, %v1184_v62  ;;  %v1395_v27 = vcombine.high %v1182_v31, %v1184_v62 }
 0x1e3   :  { %8685 = vst [vmem:[#allocation63_spill] sm:$0xff] %v7245_v23  ;;  %8686 = vst [vmem:[#allocation64_spill] sm:$0xff] %v7248_v38  ;;  %v1985_v43 = vrot.slane %v7051_v14, %v6865_v34  ;;  %v8688_v22 = vcombine.high %v7051_v14, %v7051_v14  ;;  %v7262_v11 = vcombine.high %v7245_v23, %v7245_v23 }
 0x1e4   :  { %v1976_v54 = vrot.slane %v8687_v29, %v6865_v34  ;;  %v2219_v46 = vcombine.low %v2211_v17, %v2218_v41  ;;  %v7266_v7 = vcombine.high %v7248_v38, %v7248_v38  ;;  %v1816_v37 = vrot.slane %v7248_v38, %v6865_v34 }
 0x1e5   :  { %v1992_v59 = vrot.slane %v8688_v22, %v6865_v34  ;;  %8689 = vst [vmem:[#allocation65_spill] sm:$0xff] %v7262_v11  ;;  %v7271_v36 = vrot.slane %v1394_v13, %v6865_v34  ;;  %v7274_v57 = vrot.slane %v1395_v27, %v6865_v34  ;;  %v1993_v14 = vcombine.high %v1985_v43, %v1985_v43 }
 0x1e6   :  { %8690 = vst [vmem:[#allocation66_spill] sm:$0xff] %v7266_v7  ;;  %v8693_v0 = vcombine.high %v7064_v30, %v7064_v30  ;;  %v2402_v32 = vpack.c.bf16 %v2219_v46, %v2202_v52  ;;  %v1802_v31 = vcombine.low %v7245_v23, %v7262_v11  ;;  %v2009_v28 = vcombine.high %v7079_v1, %v7079_v1 }
 0x1e7   :  { %8691 = vst [vmem:[#allocation67_spill] sm:$0xff] %v7271_v36  ;;  %8692 = vst [vmem:[#allocation68_spill] sm:$0xff] %v7274_v57  ;;  %v2017_v61 = vrot.slane %v7084_v35, %v6865_v34  ;;  %v7288_v63 = vcombine.high %v7271_v36, %v7271_v36  ;;  %v7292_v17 = vcombine.high %v7274_v57, %v7274_v57 }
 0x1e8   :  { %v2008_v42 = vrot.slane %v8693_v0, %v6865_v34  ;;  %v1818_v30 = vcombine.low %v7266_v7, %v7271_v36  ;;  %v2220_v45 = vcombine.low %v1976_v54, %v1985_v43  ;;  %6033 = vmatprep.mubr.bf16.mxu0 %v2402_v32  ;;  %v1809_v40 = vrot.slane %v1802_v31, %v6865_v34  ;;  %v6140_v36 = vld [vmem:[#allocation17] sm:$0xff]  }
 0x1e9   :  { %8694 = vst [vmem:[#allocation69_spill] sm:$0xff] %v7288_v63  ;;  %8695 = vst [vmem:[#allocation70_spill] sm:$0xff] %v7292_v17  ;;  %v2221_v52 = vcombine.low %v1993_v14, %v1992_v59  ;;  %v2237_v62 = vcombine.low %v7079_v1, %v2009_v28  ;;  %v1832_v13 = vrot.slane %v7288_v63, %v6865_v34  ;;  %6045 = vmatprep.subr.bf16.mxu1 %v6140_v36 }
 0x1ea   :  { %v2238_v41 = vcombine.low %v2008_v42, %v2017_v61  ;;  %v1825_v29 = vrot.slane %v1818_v30, %v6865_v34  ;;  %v1834_v27 = vcombine.low %v7274_v57, %v7292_v17  ;;  %v2228_v22 = vrot.slane %v2220_v45, %v6865_v34  ;;  %6046 = vmatpush3.bf16.msra.mxu1 %v6140_v36 }
 0x1eb   :  { %v1817_v46 = vcombine.low %v1809_v40, %v1816_v37  ;;  %v2235_v54 = vrot.slane %v2221_v52, %v6865_v34  ;;  %v2245_v43 = vrot.slane %v2237_v62, %v6865_v34  ;;  %v1188_v0 = vadd.f32 %v7185_v39, %v6861_v26 }
 0x1ec   :  { %v2252_v59 = vrot.slane %v2238_v41, %v6865_v34  ;;  %v1833_v14 = vcombine.low %v1825_v29, %v1832_v13  ;;  %v1841_v1 = vrot.slane %v1834_v27, %v6865_v34  ;;  %v1889_v42 = vmul.f32 %v7086_v12, %v6940_v24 }
 0x1ed   :  { %v8696_v32 = vrot.slane %v7096_v60, %v6855_v16  ;;  %v2236_v37 = vcombine.low %v2228_v22, %v2235_v54  ;;  %v2010_v30 = vcombine.high %v7084_v35, %v7084_v35  ;;  %v1412_v45 = vcombine.low %v1186_v10, %v1188_v0 }
 0x1ee   :  { %v2253_v28 = vcombine.low %v2245_v43, %v2252_v59  ;;  %v1413_v40 = vcombine.high %v1186_v10, %v1188_v0  ;;  %v2025_v52 = vcombine.high %v2017_v61, %v2017_v61  ;;  %v2026_v62 = vcombine.high %v7099_v4, %v7099_v4 }
 0x1ef   :  { %v7315_v31 = vmul.f32 %v1817_v46, %v8696_v32  ;;  %v2024_v39 = vrot.slane %v2010_v30, %v6865_v34  ;;  %v2033_v24 = vrot.slane %v7099_v4, %v6865_v34  ;;  %v2042_v60 = vcombine.high %v1889_v42, %v1889_v42 }
 0x1f0   :  { %v2403_v26 = vpack.c.bf16 %v2253_v28, %v2236_v37  ;;  %v7325_v12 = vrot.slane %v1412_v45, %v6865_v34  ;;  %v7328_v41 = vrot.slane %v1413_v40, %v6865_v34  ;;  %v2040_v35 = vrot.slane %v2026_v62, %v6865_v34 }
 0x1f1   :  { %v2049_v10 = vrot.slane %v1889_v42, %v6865_v34  ;;  %v2041_v61 = vcombine.high %v2033_v24, %v2033_v24  ;;  %v2056_v29 = vrot.slane %v2042_v60, %v6865_v34  ;;  %v2254_v13 = vcombine.low %v2025_v52, %v2024_v39 }
 0x1f2   :  { %8697 = vst [vmem:[#allocation71_spill] sm:$0xff] %v7325_v12  ;;  %8698 = vst [vmem:[#allocation72_spill] sm:$0xff] %v7328_v41  ;;  %6034 = vmatmul.mubr.bf16.vlgmr.msra.gmra.mrb[4].mxu0 %v2403_v26  ;;  %v8699_v27 = vrot.slane %v7102_v15, %v6855_v16  ;;  %v7339_v22 = vcombine.high %v7325_v12, %v7325_v12  ;;  %v7343_v46 = vcombine.high %v7328_v41, %v7328_v41 }
 0x1f3   :  { %v1848_v54 = vrot.slane %v7325_v12, %v6865_v34  ;;  %v2057_v43 = vcombine.high %v2049_v10, %v2049_v10  ;;  %v2255_v59 = vcombine.low %v2033_v24, %v2041_v61  ;;  %v2262_v0 = vrot.slane %v2254_v13, %v6865_v34 }
 0x1f4   :  { %v1891_v4 = vmul.f32 %v7221_v49, %v8699_v27  ;;  %8700 = vst [vmem:[#allocation73_spill] sm:$0xff] %v7339_v22  ;;  %8701 = vst [vmem:[#allocation74_spill] sm:$0xff] %v7343_v46  ;;  %v2271_v42 = vcombine.low %v2040_v35, %v2049_v10  ;;  %v2058_v15 = vcombine.high %v7219_v33, %v7219_v33 }
 0x1f5   :  { %v1849_v49 = vcombine.low %v1841_v1, %v1848_v54  ;;  %v1850_v32 = vcombine.low %v7339_v22, %v7328_v41  ;;  %v1864_v37 = vrot.slane %v7343_v46, %v6865_v34  ;;  %v2272_v28 = vcombine.low %v2057_v43, %v2056_v29 }
 0x1f6   :  { %v2269_v30 = vrot.slane %v2255_v59, %v6865_v34  ;;  %v2279_v45 = vrot.slane %v2271_v42, %v6865_v34  ;;  %v2065_v40 = vrot.slane %v7219_v33, %v6865_v34  ;;  %v2072_v52 = vrot.slane %v2058_v15, %v6865_v34 }
 0x1f7   :  { %v1857_v62 = vrot.slane %v1850_v32, %v6865_v34  ;;  %v1896_v1 = vmul.f32 %v1849_v49, %v7131_v53  ;;  %v2286_v26 = vrot.slane %v2272_v28, %v6865_v34  ;;  %v2074_v39 = vcombine.high %v1891_v4, %v1891_v4 }
 0x1f8   :  { %v2270_v24 = vcombine.low %v2262_v0, %v2269_v30  ;;  %v2073_v60 = vcombine.high %v2065_v40, %v2065_v40  ;;  %v2081_v35 = vrot.slane %v1891_v4, %v6865_v34  ;;  %v2097_v10 = vrot.slane %v7239_v21, %v6865_v34 }
 0x1f9   :  { %v1865_v61 = vcombine.low %v1857_v62, %v1864_v37  ;;  %v2287_v29 = vcombine.low %v2279_v45, %v2286_v26  ;;  %v2088_v33 = vrot.slane %v2074_v39, %v6865_v34  ;;  %v1893_v13 = vmul.f32 %v7231_v18, %v7134_v44 }
 0x1fa   :  { %v2089_v27 = vcombine.high %v2081_v35, %v2081_v35  ;;  %v2105_v54 = vcombine.high %v2097_v10, %v2097_v10  ;;  %v2288_v53 = vcombine.low %v2065_v40, %v2073_v60  ;;  %v2289_v43 = vcombine.low %v2072_v52, %v2081_v35 }
 0x1fb   :  { %v2404_v59 = vpack.c.bf16 %v2287_v29, %v2270_v24  ;;  %v8702_v0 = vrot.slane %v7107_v50, %v6855_v16  ;;  %v2090_v4 = vcombine.high %v7239_v21, %v7239_v21  ;;  %v2106_v15 = vcombine.high %v1893_v13, %v1893_v13 }
 0x1fc   :  { %v2296_v49 = vrot.slane %v2288_v53, %v6865_v34  ;;  %v2303_v32 = vrot.slane %v2289_v43, %v6865_v34  ;;  %v2305_v37 = vcombine.low %v2089_v27, %v2088_v33  ;;  %v2306_v28 = vcombine.low %v2097_v10, %v2105_v54 }
 0x1fd   :  { %v1895_v42 = vmul.f32 %v1833_v14, %v8702_v0  ;;  %6037 = vmatprep.mubr.bf16.mxu0 %v2404_v59  ;;  %v2104_v44 = vrot.slane %v2090_v4, %v6865_v34  ;;  %v2113_v18 = vrot.slane %v1893_v13, %v6865_v34  ;;  %v2120_v30 = vrot.slane %v2106_v15, %v6865_v34 }
 0x1fe   :  { %v2122_v16 = vcombine.high %v7315_v31, %v7315_v31  ;;  %v2304_v50 = vcombine.low %v2296_v49, %v2303_v32  ;;  %v2313_v21 = vrot.slane %v2305_v37, %v6865_v34  ;;  %v2320_v14 = vrot.slane %v2306_v28, %v6865_v34 }
 0x1ff   :  { %v2129_v45 = vrot.slane %v7315_v31, %v6865_v34  ;;  %v2121_v40 = vcombine.high %v2113_v18, %v2113_v18  ;;  %v2145_v62 = vrot.slane %v1895_v42, %v6865_v34  ;;  %v2322_v26 = vcombine.low %v2104_v44, %v2113_v18 }
 0x200   :  { %v2136_v52 = vrot.slane %v2122_v16, %v6865_v34  ;;  %v2321_v39 = vcombine.low %v2313_v21, %v2320_v14  ;;  %v1897_v60 = vmul.f32 %v1865_v61, %v7141_v25  ;;  %v2138_v35 = vcombine.high %v1895_v42, %v1895_v42 }
 0x201   :  { %v2137_v24 = vcombine.high %v2129_v45, %v2129_v45  ;;  %v2323_v10 = vcombine.low %v2121_v40, %v2120_v30  ;;  %v2330_v29 = vrot.slane %v2322_v26, %v6865_v34  ;;  %v2153_v13 = vcombine.high %v2145_v62, %v2145_v62 }
 0x202   :  { %v2340_v33 = vcombine.low %v2136_v52, %v2145_v62  ;;  %v2405_v27 = vpack.c.bf16 %v2321_v39, %v2304_v50  ;;  %v2152_v31 = vrot.slane %v2138_v35, %v6865_v34  ;;  %v2154_v53 = vcombine.high %v1896_v1, %v1896_v1 }
 0x203   :  { %v2339_v54 = vcombine.low %v2129_v45, %v2137_v24  ;;  %v2337_v43 = vrot.slane %v2323_v10, %v6865_v34  ;;  %v2161_v0 = vrot.slane %v1896_v1, %v6865_v34  ;;  %v2170_v4 = vcombine.high %v1897_v60, %v1897_v60 }
 0x204   :  { %v2354_v59 = vrot.slane %v2340_v33, %v6865_v34  ;;  %6038 = vmatmul.mubr.bf16.gmra.mrb[8].mxu0 %v2405_v27  ;;  %v2168_v61 = vrot.slane %v2154_v53, %v6865_v34  ;;  %v2177_v42 = vrot.slane %v1897_v60, %v6865_v34  ;;  %v2356_v37 = vcombine.low %v2153_v13, %v2152_v31 }
 0x205   :  { %v2347_v25 = vrot.slane %v2339_v54, %v6865_v34  ;;  %v2338_v15 = vcombine.low %v2330_v29, %v2337_v43  ;;  %v2169_v49 = vcombine.high %v2161_v0, %v2161_v0  ;;  %v2184_v32 = vrot.slane %v2170_v4, %v6865_v34 }
 0x206   :  { %v2185_v44 = vcombine.high %v2177_v42, %v2177_v42  ;;  %v2373_v18 = vcombine.low %v2168_v61, %v2177_v42  ;;  %v2364_v1 = vrot.slane %v2356_v37, %v6865_v34  ;;  %v8703_v26 = vmov 0.0  }
 0x207   :  { %v2355_v28 = vcombine.low %v2347_v25, %v2354_v59  ;;  %v2357_v30 = vcombine.low %v2161_v0, %v2169_v49 }
 0x208   :  { %v2374_v50 = vcombine.low %v2185_v44, %v2184_v32  ;;  %v2381_v14 = vrot.slane %v2373_v18, %v6865_v34 }
 0x209   :  { %v2406_v16 = vpack.c.bf16 %v2355_v28, %v2338_v15  ;;  %v2371_v21 = vrot.slane %v2357_v30, %v6865_v34 }
 0x20a   :  { %v2388_v45 = vrot.slane %v2374_v50, %v6865_v34 }
 0x20b   :  { %6041 = vmatprep.mubr.bf16.mxu0 %v2406_v16  ;;  %v2372_v40 = vcombine.low %v2364_v1, %v2371_v21 }
 0x20c   :  { %v2389_v52 = vcombine.low %v2381_v14, %v2388_v45 }
 0x20e   :  { %v2407_v62 = vpack.c.bf16 %v2389_v52, %v2372_v40 }
 0x210   :  { %6042 = vmatmul.mubr.bf16.gmra.mrb[12].mxu0 %v2407_v62 }
 0x211   :  { %6075 = vmatprep.mubr.msk.bf16.mxu0 %vm6549_vm0, %v8703_v26 }
 0x2c5   :  { %v6035_v39 = vpop.f32.mrb[4].mxu0 }
 0x2c6   :  { %v2583_v24 = vcombine.high %v6035_v39, %v6035_v39  ;;  %v7403_v60 = vrot.slane %v6035_v39, %v6865_v34  ;;  %v2490_v35 = vpop.f32.mrb[5].mxu0 }
 0x2c7   :  { %v2549_v10 = vcombine.high %v2490_v35, %v2490_v35  ;;  %v7406_v29 = vrot.slane %v2490_v35, %v6865_v34  ;;  %v6036_v33 = vpop.f32.mrb[6].mxu0 }
 0x2c8   :  { %v7409_v13 = vrot.slane %v2583_v24, %v6865_v34  ;;  %v7413_v27 = vcombine.high %v7403_v60, %v7403_v60  ;;  %v2600_v54 = vcombine.high %v6036_v33, %v6036_v33  ;;  %v2493_v31 = vpop.f32.mrb[7].mxu0  ;;  %v7423_v59 = vrot.slane %v6036_v33, %v6865_v34 }
 0x2c9   :  { %v7416_v53 = vrot.slane %v2549_v10, %v6865_v34  ;;  %v7420_v43 = vcombine.high %v7406_v29, %v7406_v29  ;;  %v2566_v0 = vcombine.high %v2493_v31, %v2493_v31  ;;  %v7435_v42 = vrot.slane %v2493_v31, %v6865_v34 }
 0x2ca   :  { %v7427_v4 = vcombine.high %v7409_v13, %v7409_v13  ;;  %v2849_v25 = vcombine.low %v7413_v27, %v7409_v13  ;;  %v7432_v61 = vrot.slane %v2600_v54, %v6865_v34  ;;  %v7441_v49 = vcombine.high %v7423_v59, %v7423_v59 }
 0x2cb   :  { %v2801_v15 = vcombine.low %v7406_v29, %v7420_v43  ;;  %v7445_v32 = vcombine.high %v7416_v53, %v7416_v53  ;;  %v2815_v44 = vrot.slane %v7416_v53, %v6865_v34  ;;  %v7453_v18 = vrot.slane %v2566_v0, %v6865_v34 }
 0x2cc   :  { %v2856_v37 = vrot.slane %v2849_v25, %v6865_v34  ;;  %v2863_v28 = vrot.slane %v7427_v4, %v6865_v34  ;;  %v2865_v16 = vcombine.low %v7423_v59, %v7441_v49  ;;  %v7460_v50 = vcombine.high %v7435_v42, %v7435_v42 }
 0x2cd   :  { %v2808_v30 = vrot.slane %v2801_v15, %v6865_v34  ;;  %v2817_v1 = vcombine.low %v7445_v32, %v7435_v42  ;;  %v2879_v14 = vrot.slane %v7432_v61, %v6865_v34  ;;  %v7468_v45 = vcombine.high %v7453_v18, %v7453_v18 }
 0x2ce   :  { %v2864_v21 = vcombine.low %v2856_v37, %v2863_v28  ;;  %v2872_v52 = vrot.slane %v2865_v16, %v6865_v34  ;;  %v2831_v39 = vrot.slane %v7460_v50, %v6865_v34  ;;  %v2847_v0 = vrot.slane %v7403_v60, %v6865_v34 }
 0x2cf   :  { %v2816_v40 = vcombine.low %v2808_v30, %v2815_v44  ;;  %v2824_v62 = vrot.slane %v2817_v1, %v6865_v34  ;;  %v2833_v35 = vcombine.low %v7453_v18, %v7468_v45 }
 0x2d0   :  { %v3095_v24 = vsel %vm3073_vm1, %v2864_v21, -inf  ;;  %v2880_v54 = vcombine.low %v2872_v52, %v2879_v14 }
 0x2d1   :  { %v3096_v10 = vrot.slane %v3095_v24, 4  ;;  %v3074_v33 = vsel %vm3073_vm1, %v2816_v40, -inf  ;;  %v2832_v31 = vcombine.low %v2824_v62, %v2831_v39  ;;  %v2840_v15 = vrot.slane %v2833_v35, %v6865_v34 }
 0x2d2   :  { %v3075_v25 = vrot.slane %v3074_v33, 4  ;;  %v3102_v28 = vsel %vm3073_vm1, %v2880_v54, -inf }
 0x2d3   :  { %v3097_v37 = vmax.f32 %v3095_v24, %v3096_v10  ;;  %v3081_v44 = vsel %vm3073_vm1, %v2832_v31, -inf  ;;  %v3103_v16 = vrot.slane %v3102_v28, 4  ;;  %v2848_v1 = vcombine.low %v2840_v15, %v2847_v0 }
 0x2d4   :  { %v3076_v30 = vmax.f32 %v3074_v33, %v3075_v25  ;;  %v3082_v21 = vrot.slane %v3081_v44, 4  ;;  %v7486_v24 = vcombine.high %v7432_v61, %v7432_v61 }
 0x2d5   :  { %v3098_v7 = vrot.slane %v3097_v37, 2  ;;  %v3104_v40 = vmax.f32 %v3102_v28, %v3103_v16  ;;  %v3088_v52 = vsel %vm3073_vm1, %v2848_v1, -inf }
 0x2d6   :  { %v3077_v38 = vrot.slane %v3076_v30, 2  ;;  %v3083_v14 = vmax.f32 %v3081_v44, %v3082_v21  ;;  %v3089_v39 = vrot.slane %v3088_v52, 4 }
 0x2d7   :  { %v3099_v62 = vmax.f32 %v3097_v37, %v3098_v7  ;;  %v6039_v11 = vpop.f32.mrb[8].mxu0  ;;  %v3105_v10 = vrot.slane %v3104_v40, 2 }
 0x2d8   :  { %v3078_v35 = vmax.f32 %v3076_v30, %v3077_v38  ;;  %v3084_v54 = vrot.slane %v3083_v14, 2  ;;  %v2651_v33 = vcombine.high %v6039_v11, %v6039_v11  ;;  %v7488_v31 = vpop.f32.mrb[9].mxu0  ;;  %v3090_v25 = vmax.f32 %v3088_v52, %v3089_v39 }
 0x2d9   :  { %v3100_v0 = vrot.slane %v3099_v62, 1  ;;  %v7491_v15 = vrot.slane %v6039_v11, %v6865_v34  ;;  %v7495_v37 = vpop.f32.mrb[10].mxu0  ;;  %v3106_v44 = vmax.f32 %v3104_v40, %v3105_v10  ;;  %v7508_v11 = vrot.slane %v7488_v31, %v6865_v34 }
 0x2da   :  { %v3079_v28 = vrot.slane %v3078_v35, 1  ;;  %v3085_v16 = vmax.f32 %v3083_v14, %v3084_v54  ;;  %v7498_v38 = vrot.slane %v2651_v33, %v6865_v34  ;;  %v7500_v30 = vpop.f32.mrb[11].mxu0  ;;  %v3091_v21 = vrot.slane %v3090_v25, 2 }
 0x2db   :  { %v3101_v1 = vmax.f32 %v3099_v62, %v3100_v0  ;;  %v7504_v52 = vcombine.high %v7491_v15, %v7491_v15  ;;  %v3107_v7 = vrot.slane %v3106_v44, 1 }
 0x2dc   :  { %v3080_v39 = vmax.f32 %v3078_v35, %v3079_v28  ;;  %v3086_v23 = vrot.slane %v3085_v16, 1  ;;  %v3092_v54 = vmax.f32 %v3090_v25, %v3091_v21 }
 0x2dd   :  { %v3250_v14 = vcombine.high %v3101_v1, %v3101_v1  ;;  %v3257_v10 = vrot.slane %v3101_v1, %v6865_v34  ;;  %v2929_v62 = vcombine.low %v7491_v15, %v7504_v52  ;;  %v3108_v46 = vmax.f32 %v3106_v44, %v3107_v7 }
 0x2de   :  { %v3202_v33 = vcombine.high %v3080_v39, %v3080_v39  ;;  %v3209_v0 = vrot.slane %v3080_v39, %v6865_v34  ;;  %v3087_v41 = vmax.f32 %v3085_v16, %v3086_v23  ;;  %v3093_v12 = vrot.slane %v3092_v54, 1 }
 0x2df   :  { %v3264_v22 = vrot.slane %v3250_v14, %v6865_v34  ;;  %v3265_v35 = vcombine.high %v3257_v10, %v3257_v10  ;;  %v3515_v28 = vsub.f32 %v7413_v27, %v3257_v10  ;;  %v3266_v25 = vcombine.high %v3108_v46, %v3108_v46 }
 0x2e0   :  { %v3216_v40 = vrot.slane %v3202_v33, %v6865_v34  ;;  %v3217_v17 = vcombine.high %v3209_v0, %v3209_v0  ;;  %v3506_v1 = vsub.f32 %v7406_v29, %v3209_v0  ;;  %v3273_v7 = vrot.slane %v3108_v46, %v6865_v34 }
 0x2e1   :  { %v3516_v21 = vsub.f32 %v7409_v13, %v3265_v35  ;;  %v3517_v57 = vsub.f32 %v7427_v4, %v3264_v22  ;;  %v3572_v63 = vmul.f32 1.442695, %v3515_v28  ;;  %v3280_v27 = vrot.slane %v3266_v25, %v6865_v34 }
 0x2e2   :  { %v3507_v23 = vsub.f32 %v7420_v43, %v3217_v17  ;;  %v3508_v44 = vsub.f32 %v7416_v53, %v3216_v40  ;;  %v3554_v16 = vmul.f32 1.442695, %v3506_v1  ;;  %v3281_v10 = vcombine.high %v3273_v7, %v3273_v7 }
 0x2e3   :  { %6149 = vpow2.f32 %v3572_v63  ;;  %v3574_v39 = vmul.f32 1.442695, %v3516_v21  ;;  %v3576_v14 = vmul.f32 1.442695, %v3517_v57  ;;  %v7526_v29 = vpop.f32.mrb[12].mxu0  ;;  %v3518_v22 = vsub.f32 %v7423_v59, %v3273_v7 }
 0x2e4   :  { %6151 = vpow2.f32 %v3554_v16  ;;  %v3556_v13 = vmul.f32 1.442695, %v3507_v23  ;;  %v3558_v33 = vmul.f32 1.442695, %v3508_v44  ;;  %v7529_v4 = vpop.f32.mrb[13].mxu0  ;;  %v3519_v17 = vsub.f32 %v7441_v49, %v3281_v10 }
 0x2e5   :  { %6153 = vpow2.f32 %v3574_v39  ;;  %v3520_v46 = vsub.f32 %v7432_v61, %v3280_v27  ;;  %v3094_v53 = vmax.f32 %v3092_v54, %v3093_v12  ;;  %v7533_v43 = vpop.f32.mrb[14].mxu0  ;;  %v3578_v57 = vmul.f32 1.442695, %v3518_v22 }
 0x2e6   :  { %6155 = vpow2.f32 %v3576_v14  ;;  %v3218_v63 = vcombine.high %v3087_v41, %v3087_v41  ;;  %v3225_v40 = vrot.slane %v3087_v41, %v6865_v34  ;;  %v7536_v0 = vpop.f32.mrb[15].mxu0  ;;  %v3580_v35 = vmul.f32 1.442695, %v3519_v17 }
 0x2e7   :  { %6157 = vpow2.f32 %v3556_v13  ;;  %v3582_v59 = vmul.f32 1.442695, %v3520_v46  ;;  %v3234_v28 = vcombine.high %v3094_v53, %v3094_v53  ;;  %v3241_v61 = vrot.slane %v3094_v53, %v6865_v34 }
 0x2e8   :  { %6159 = vpow2.f32 %v3558_v33  ;;  %v3232_v1 = vrot.slane %v3218_v63, %v6865_v34  ;;  %v3233_v49 = vcombine.high %v3225_v40, %v3225_v40  ;;  %v3509_v54 = vsub.f32 %v7445_v32, %v3225_v40 }
 0x2e9   :  { %6161 = vpow2.f32 %v3578_v57  ;;  %v3248_v12 = vrot.slane %v3234_v28, %v6865_v34  ;;  %v2936_v25 = vrot.slane %v2929_v62, %v6865_v34  ;;  %v3249_v41 = vcombine.high %v3241_v61, %v3241_v61 }
 0x2ea   :  { %6163 = vpow2.f32 %v3580_v35  ;;  %v3510_v21 = vsub.f32 %v7435_v42, %v3233_v49  ;;  %v3511_v7 = vsub.f32 %v7460_v50, %v3232_v1  ;;  %v3512_v23 = vsub.f32 %v7453_v18, %v3241_v61 }
 0x2eb   :  { %6165 = vpow2.f32 %v3582_v59  ;;  %v3514_v44 = vsub.f32 %v7403_v60, %v3248_v12  ;;  %v3560_v16 = vmul.f32 1.442695, %v3509_v54  ;;  %v3513_v27 = vsub.f32 %v7468_v45, %v3249_v41 }
 0x2ec   :  { %v3562_v39 = vmul.f32 1.442695, %v3510_v21  ;;  %v3564_v14 = vmul.f32 1.442695, %v3511_v7  ;;  %v8704_v32 = vrot.slane %v7498_v38, %v6865_v34  ;;  %v3566_v42 = vmul.f32 1.442695, %v3512_v23 }
 0x2ed   :  { %v7551_v10 = vpop.eup %6149  ;;  %6167 = vpow2.f32 %v3560_v16  ;;  %v3570_v13 = vmul.f32 1.442695, %v3514_v44  ;;  %v8705_v18 = vcombine.high %v7488_v31, %v7488_v31  ;;  %v3568_v45 = vmul.f32 1.442695, %v3513_v27 }
 0x2ee   :  { %v2944_v62 = vcombine.low %v2936_v25, %v8704_v32  ;;  %v7559_v60 = vpop.eup %6151  ;;  %6169 = vpow2.f32 %v3562_v39  ;;  %v7564_v22 = vcombine.high %v7508_v11, %v7508_v11  ;;  %v2881_v31 = vcombine.low %v7486_v24, %v7508_v11 }
 0x2ef   :  { %v7557_v50 = vrot.slane %v8705_v18, %v6865_v34  ;;  %v7566_v17 = vpop.eup %6153  ;;  %6171 = vpow2.f32 %v3564_v14  ;;  %v7585_v1 = vcombine.high %v7498_v38, %v7498_v38  ;;  %v2668_v23 = vcombine.high %v7495_v37, %v7495_v37 }
 0x2f0   :  { %v3130_v33 = vsel %vm3073_vm1, %v2944_v62, -inf  ;;  %v7574_v57 = vpop.eup %6155  ;;  %v3746_v63 = vcombine.low %v7551_v10, %v7566_v17  ;;  %6173 = vpow2.f32 %v3566_v42  ;;  %v2895_v40 = vrot.slane %v7564_v22, %v6865_v34 }
 0x2f1   :  { %v3131_v46 = vrot.slane %v3130_v33, 4  ;;  %v7570_v53 = vcombine.high %v7557_v50, %v7557_v50  ;;  %v7580_v35 = vpop.eup %6157  ;;  %6175 = vpow2.f32 %v3568_v45  ;;  %v2888_v28 = vrot.slane %v2881_v31, %v6865_v34 }
 0x2f2   :  { %v7587_v49 = vpop.eup %6159  ;;  %v3753_v61 = vrot.slane %v3746_v63, %v6865_v34  ;;  %v3760_v12 = vrot.slane %v7574_v57, %v6865_v34  ;;  %v3698_v54 = vcombine.low %v7559_v60, %v7580_v35  ;;  %6177 = vpow2.f32 %v3570_v13 }
 0x2f3   :  { %v3132_v59 = vmax.f32 %v3130_v33, %v3131_v46  ;;  %v7594_v25 = vpop.eup %6161  ;;  %v2896_v21 = vcombine.low %v2888_v28, %v2895_v40  ;;  %v3712_v39 = vrot.slane %v7587_v49, %v6865_v34  ;;  %v7607_v14 = vrot.slane %v7495_v37, %v6865_v34 }
 0x2f4   :  { %v7600_v44 = vpop.eup %6163  ;;  %v3761_v16 = vcombine.low %v3753_v61, %v3760_v12  ;;  %v3705_v27 = vrot.slane %v3698_v54, %v6865_v34  ;;  %v7618_v31 = vrot.slane %v2668_v23, %v6865_v34 }
 0x2f5   :  { %v3133_v41 = vrot.slane %v3132_v59, 2  ;;  %v7609_v32 = vpop.eup %6165  ;;  %v3762_v62 = vcombine.low %v7594_v25, %v7600_v44  ;;  %v3109_v13 = vsel %vm3073_vm1, %v2896_v21, -inf  ;;  %v2945_v21 = vcombine.low %v7585_v1, %v7607_v14 }
 0x2f6   :  { %v3991_v45 = vsel %vm3073_vm1, %v3761_v16, 0.0  ;;  %v3713_v33 = vcombine.low %v3705_v27, %v3712_v39  ;;  %v3110_v46 = vrot.slane %v3109_v13, 4  ;;  %v7644_v18 = vcombine.high %v7618_v31, %v7618_v31 }
 0x2f7   :  { %v3134_v42 = vmax.f32 %v3132_v59, %v3133_v41  ;;  %v7620_v37 = vpop.eup %6167  ;;  %v3992_v63 = vrot.slane %v3991_v45, 4  ;;  %v3769_v40 = vrot.slane %v3762_v62, %v6865_v34  ;;  %v3776_v59 = vrot.slane %v7609_v32, %v6865_v34 }
 0x2f8   :  { %v7625_v61 = vpop.eup %6169  ;;  %v3970_v12 = vsel %vm3073_vm1, %v3713_v33, 0.0  ;;  %v3111_v54 = vmax.f32 %v3109_v13, %v3110_v46  ;;  %v7630_v41 = vcombine.high %v7607_v14, %v7607_v14 }
 0x2f9   :  { %v3135_v28 = vrot.slane %v3134_v42, 1  ;;  %v7634_v23 = vpop.eup %6171  ;;  %v3993_v16 = vadd.f32 %v3992_v63, %v3991_v45  ;;  %v3971_v27 = vrot.slane %v3970_v12, 4  ;;  %v3777_v39 = vcombine.low %v3769_v40, %v3776_v59 }
 0x2fa   :  { %v3714_v62 = vcombine.low %v7620_v37, %v7625_v61  ;;  %v7638_v7 = vpop.eup %6173  ;;  %v3728_v13 = vrot.slane %v7634_v23, %v6865_v34  ;;  %v3112_v46 = vrot.slane %v3111_v54, 2 }
 0x2fb   :  { %v3136_v33 = vmax.f32 %v3134_v42, %v3135_v28  ;;  %v7646_v6 = vpop.eup %6175  ;;  %v3994_v45 = vrot.slane %v3993_v16, 2  ;;  %v3972_v63 = vadd.f32 %v3971_v27, %v3970_v12  ;;  %v3998_v40 = vsel %vm3073_vm1, %v3777_v39, 0.0 }
 0x2fc   :  { %v3721_v59 = vrot.slane %v3714_v62, %v6865_v34  ;;  %v7650_v20 = vpop.eup %6177  ;;  %v3999_v5 = vrot.slane %v3998_v40, 4  ;;  %v3730_v42 = vcombine.low %v7638_v7, %v7646_v6 }
 0x2fd   :  { %v3330_v28 = vcombine.high %v3136_v33, %v3136_v33  ;;  %v3337_v56 = vrot.slane %v3136_v33, %v6865_v34  ;;  %v3995_v8 = vadd.f32 %v3994_v45, %v3993_v16  ;;  %v3973_v9 = vrot.slane %v3972_v63, 2 }
 0x2fe   :  { %v3729_v58 = vcombine.low %v3721_v59, %v3728_v13  ;;  %v3744_v12 = vrot.slane %v7650_v20, %v6865_v34  ;;  %v4000_v27 = vadd.f32 %v3999_v5, %v3998_v40  ;;  %v3737_v39 = vrot.slane %v3730_v42, %v6865_v34 }
 0x2ff   :  { %v3344_v62 = vrot.slane %v3330_v28, %v6865_v34  ;;  %v3345_v48 = vcombine.high %v3337_v56, %v3337_v56  ;;  %v3996_v55 = vrot.slane %v3995_v8, 1  ;;  %v3530_v3 = vsub.f32 %v7491_v15, %v3337_v56 }
 0x300   :  { %v3977_v19 = vsel %vm3073_vm1, %v3729_v58, 0.0  ;;  %v2952_v33 = vrot.slane %v2945_v21, %v6865_v34  ;;  %v4001_v16 = vrot.slane %v4000_v27, 2  ;;  %v3745_v45 = vcombine.low %v3737_v39, %v3744_v12 }
 0x301   :  { %v3978_v13 = vrot.slane %v3977_v19, 4  ;;  %v3531_v59 = vsub.f32 %v7504_v52, %v3345_v48  ;;  %v3997_v51 = vadd.f32 %v3996_v55, %v3995_v8  ;;  %v7663_v36 = vadd.f32 %v3973_v9, %v3972_v63 }
 0x302   :  { %v3532_v5 = vsub.f32 %v7498_v38, %v3344_v62  ;;  %v3602_v40 = vmul.f32 1.442695, %v3530_v3  ;;  %v4002_v42 = vadd.f32 %v4001_v16, %v4000_v27  ;;  %v3984_v2 = vsel %vm3073_vm1, %v3745_v45, 0.0 }
 0x303   :  { %v3979_v28 = vadd.f32 %v3978_v13, %v3977_v19  ;;  %v3604_v58 = vmul.f32 1.442695, %v3531_v59  ;;  %6179 = vrcp.f32 %v3997_v51  ;;  %v3985_v56 = vrot.slane %v3984_v2, 4 }
 0x304   :  { %v3606_v15 = vmul.f32 1.442695, %v3532_v5  ;;  %v3113_v21 = vmax.f32 %v3111_v54, %v3112_v46  ;;  %v4003_v47 = vrot.slane %v4002_v42, 1  ;;  %6181 = vpow2.f32 %v3602_v40 }
 0x305   :  { %v3980_v12 = vrot.slane %v3979_v28, 2  ;;  %v2959_v48 = vrot.slane %v7630_v41, %v6865_v34  ;;  %v3986_v8 = vadd.f32 %v3985_v56, %v3984_v2  ;;  %6183 = vpow2.f32 %v3604_v58 }
 0x306   :  { %v3114_v3 = vrot.slane %v3113_v21, 1  ;;  %v4004_v9 = vadd.f32 %v4003_v47, %v4002_v42  ;;  %6185 = vpow2.f32 %v3606_v15  ;;  %v7674_v54 = vrot.slane %v7500_v30, %v6865_v34 }
 0x307   :  { %v7670_v19 = vadd.f32 %v3980_v12, %v3979_v28  ;;  %v2960_v38 = vcombine.low %v2952_v33, %v2959_v48  ;;  %v3987_v51 = vrot.slane %v3986_v8, 2  ;;  %v8706_v46 = vcombine.high %v7500_v30, %v7500_v30 }
 0x308   :  { %v3115_v52 = vmax.f32 %v3113_v21, %v3114_v3  ;;  %6187 = vrcp.f32 %v4004_v9  ;;  %v2961_v47 = vcombine.low %v7618_v31, %v7644_v18  ;;  %v8707_v27 = vcombine.low %v7557_v50, %v7570_v53 }
 0x309   :  { %v7680_v63 = vrot.slane %v8706_v46, %v6865_v34  ;;  %v3137_v2 = vsel %vm3073_vm1, %v2960_v38, -inf  ;;  %v7691_v30 = vadd.f32 %v3987_v51, %v3986_v8  ;;  %v7695_v13 = vcombine.high %v7674_v54, %v7674_v54 }
 0x30a   :  { %v2904_v39 = vrot.slane %v8707_v27, %v6865_v34  ;;  %v3282_v33 = vcombine.high %v3115_v52, %v3115_v52  ;;  %v3289_v16 = vrot.slane %v3115_v52, %v6865_v34  ;;  %v3138_v45 = vrot.slane %v3137_v2, 4 }
 0x30b   :  { %v7699_v59 = vcombine.high %v7680_v63, %v7680_v63  ;;  %v2911_v5 = vrot.slane %v7674_v54, %v6865_v34  ;;  %v2913_v15 = vcombine.low %v7695_v13, %v7680_v63  ;;  %v2719_v12 = vcombine.high %v7526_v29, %v7526_v29 }
 0x30c   :  { %v3296_v40 = vrot.slane %v3282_v33, %v6865_v34  ;;  %v3297_v42 = vcombine.high %v3289_v16, %v3289_v16  ;;  %v3521_v28 = vsub.f32 %v7486_v24, %v3289_v16  ;;  %v3139_v58 = vmax.f32 %v3137_v2, %v3138_v45 }
 0x30d   :  { %v2912_v56 = vcombine.low %v2904_v39, %v2911_v5  ;;  %v2927_v21 = vrot.slane %v7699_v59, %v6865_v34  ;;  %v6180_v48 = vpop.eup %6179  ;;  %v2920_v46 = vrot.slane %v2913_v15, %v6865_v34  ;;  %v7719_v2 = vrot.slane %v7526_v29, %v6865_v34 }
 0x30e   :  { %v3522_v8 = vsub.f32 %v7508_v11, %v3297_v42  ;;  %v3523_v3 = vsub.f32 %v7564_v22, %v3296_v40  ;;  %v3584_v9 = vmul.f32 1.442695, %v3521_v28  ;;  %v3140_v38 = vrot.slane %v3139_v58, 2  ;;  %v7713_v51 = vpop.eup %6181 }
 0x30f   :  { %8708 = vst [vmem:[#allocation75_spill] sm:$0xff] %v7713_v51  ;;  %v4162_v24 = vcombine.high %v6180_v48, %v6180_v48  ;;  %v4169_v52 = vrot.slane %v6180_v48, %v6865_v34  ;;  %v7721_v27 = vpop.eup %6183  ;;  %v3116_v22 = vsel %vm3073_vm1, %v2912_v56, -inf  ;;  %v2928_v28 = vcombine.low %v2920_v46, %v2927_v21 }
 0x310   :  { %8709 = vst [vmem:[#allocation76_spill] sm:$0xff] %v7721_v27  ;;  %v3586_v39 = vmul.f32 1.442695, %v3522_v8  ;;  %v3588_v33 = vmul.f32 1.442695, %v3523_v3  ;;  %v3141_v11 = vmax.f32 %v3139_v58, %v3140_v38  ;;  %v7724_v16 = vpop.eup %6185  ;;  %v3826_v40 = vcombine.low %v7713_v51, %v7721_v27 }
 0x311   :  { %8710 = vst [vmem:[#allocation77_spill] sm:$0xff] %v7724_v16  ;;  %v4176_v45 = vrot.slane %v4162_v24, %v6865_v34  ;;  %v4177_v5 = vcombine.high %v4169_v52, %v4169_v52  ;;  %6189 = vpow2.f32 %v3584_v9  ;;  %v3840_v29 = vrot.slane %v7724_v16, %v6865_v34 }
 0x312   :  { %6191 = vpow2.f32 %v3586_v39  ;;  %v3142_v42 = vrot.slane %v3141_v11, 1  ;;  %v6188_v15 = vpop.eup %6187  ;;  %v3833_v48 = vrot.slane %v3826_v40, %v6865_v34  ;;  %v3117_v38 = vrot.slane %v3116_v22, 4 }
 0x313   :  { %v7732_v58 = vmul.f32 %v7566_v17, %v4177_v5  ;;  %v7735_v56 = vmul.f32 %v7574_v57, %v4176_v45  ;;  %6193 = vpow2.f32 %v3588_v33  ;;  %v4178_v8 = vcombine.high %v6188_v15, %v6188_v15 }
 0x314   :  { %v4185_v3 = vrot.slane %v6188_v15, %v6865_v34  ;;  %v3143_v9 = vmax.f32 %v3141_v11, %v3142_v42  ;;  %v7740_v24 = vmul.f32 %v7551_v10, %v4169_v52  ;;  %v3841_v46 = vcombine.low %v3833_v48, %v3840_v29 }
 0x315   :  { %v3123_v17 = vsel %vm3073_vm1, %v2928_v28, -inf  ;;  %v4192_v57 = vrot.slane %v4178_v8, %v6865_v34  ;;  %v7747_v33 = vrot.slane %v2719_v12, %v6865_v34  ;;  %v3118_v40 = vmax.f32 %v3116_v22, %v3117_v38 }
 0x316   :  { %v4193_v39 = vcombine.high %v4185_v3, %v4185_v3  ;;  %v3346_v45 = vcombine.high %v3143_v9, %v3143_v9  ;;  %v4026_v5 = vsel %vm3073_vm1, %v3841_v46, 0.0  ;;  %v3353_v11 = vrot.slane %v3143_v9, %v6865_v34 }
 0x317   :  { %v3124_v10 = vrot.slane %v3123_v17, 4  ;;  %v7752_v52 = vmul.f32 %v7594_v25, %v4185_v3  ;;  %v4027_v42 = vrot.slane %v4026_v5, 4  ;;  %v3119_v12 = vrot.slane %v3118_v40, 2 }
 0x318   :  { %v7755_v29 = vmul.f32 %v7600_v44, %v4193_v39  ;;  %v3360_v28 = vrot.slane %v3346_v45, %v6865_v34  ;;  %v3361_v15 = vcombine.high %v3353_v11, %v3353_v11  ;;  %v3533_v48 = vsub.f32 %v7585_v1, %v3353_v11 }
 0x319   :  { %v3125_v8 = vmax.f32 %v3123_v17, %v3124_v10  ;;  %v7760_v46 = vmul.f32 %v7609_v32, %v4192_v57  ;;  %v4028_v9 = vadd.f32 %v4027_v42, %v4026_v5  ;;  %v7765_v25 = vcombine.high %v7719_v2, %v7719_v2 }
 0x31a   :  { %v3535_v22 = vsub.f32 %v7630_v41, %v3360_v28  ;;  %v3534_v3 = vsub.f32 %v7607_v14, %v3361_v15  ;;  %v3608_v38 = vmul.f32 1.442695, %v3533_v48  ;;  %v3120_v39 = vmax.f32 %v3118_v40, %v3119_v12 }
 0x31b   :  { %v7767_v44 = vpop.eup %6189  ;;  %v3126_v45 = vrot.slane %v3125_v8, 2  ;;  %v4029_v17 = vrot.slane %v4028_v9, 2  ;;  %v7776_v41 = vcombine.high %v7747_v33, %v7747_v33 }
 0x31c   :  { %v7770_v1 = vpop.eup %6191  ;;  %v3612_v57 = vmul.f32 1.442695, %v3535_v22  ;;  %6195 = vpow2.f32 %v3608_v38  ;;  %v3610_v14 = vmul.f32 1.442695, %v3534_v3  ;;  %v3121_v40 = vrot.slane %v3120_v39, 1 }
 0x31d   :  { %8711 = vst [vmem:[#allocation78_spill] sm:$0xff] %v7770_v1  ;;  %v7778_v5 = vpop.eup %6193  ;;  %v3778_v11 = vcombine.low %v7767_v44, %v7770_v1  ;;  %v7782_v10 = vadd.f32 %v4029_v17, %v4028_v9  ;;  %v3127_v42 = vmax.f32 %v3125_v8, %v3126_v45  ;;  %v2685_v9 = vcombine.high %v7529_v4, %v7529_v4 }
 0x31e   :  { %8712 = vst [vmem:[#allocation79_spill] sm:$0xff] %v7778_v5  ;;  %6197 = vpow2.f32 %v3612_v57  ;;  %v3792_v48 = vrot.slane %v7778_v5, %v6865_v34  ;;  %v3122_v12 = vmax.f32 %v3120_v39, %v3121_v40  ;;  %v7795_v8 = vrot.slane %v7529_v4, %v6865_v34 }
 0x31f   :  { %8713 = vst [vmem:[#allocation80_spill] sm:$0xff] %v7782_v10  ;;  %v3785_v15 = vrot.slane %v3778_v11, %v6865_v34  ;;  %6199 = vpow2.f32 %v3610_v14  ;;  %v3128_v22 = vrot.slane %v3127_v42, 1  ;;  %v2968_v39 = vrot.slane %v2961_v47, %v6865_v34 }
 0x320   :  { %v3298_v45 = vcombine.high %v3122_v12, %v3122_v12  ;;  %v3305_v17 = vrot.slane %v3122_v12, %v6865_v34  ;;  %v7803_v11 = vrot.slane %v2685_v9, %v6865_v34  ;;  %v7807_v14 = vcombine.high %v7795_v8, %v7795_v8 }
 0x321   :  { %v3793_v3 = vcombine.low %v3785_v15, %v3792_v48  ;;  %v3129_v57 = vmax.f32 %v3127_v42, %v3128_v22  ;;  %v2975_v4 = vrot.slane %v7795_v8, %v6865_v34 }
 0x322   :  { %v3312_v15 = vrot.slane %v3298_v45, %v6865_v34  ;;  %v3313_v48 = vcombine.high %v3305_v17, %v3305_v17  ;;  %v3524_v12 = vsub.f32 %v7557_v50, %v3305_v17  ;;  %v7817_v22 = vcombine.high %v7803_v11, %v7803_v11 }
 0x323   :  { %v4005_v40 = vsel %vm3073_vm1, %v3793_v3, 0.0  ;;  %v3314_v47 = vcombine.high %v3129_v57, %v3129_v57  ;;  %v3321_v42 = vrot.slane %v3129_v57, %v6865_v34  ;;  %v2976_v28 = vcombine.low %v2968_v39, %v2975_v4 }
 0x324   :  { %v4006_v32 = vrot.slane %v4005_v40, 4  ;;  %v3525_v9 = vsub.f32 %v7570_v53, %v3313_v48  ;;  %v3526_v21 = vsub.f32 %v7674_v54, %v3312_v15  ;;  %v3590_v62 = vmul.f32 1.442695, %v3524_v12 }
 0x325   :  { %v3328_v45 = vrot.slane %v3314_v47, %v6865_v34  ;;  %v3329_v55 = vcombine.high %v3321_v42, %v3321_v42  ;;  %v3527_v50 = vsub.f32 %v7695_v13, %v3321_v42  ;;  %v2977_v26 = vcombine.low %v7807_v14, %v7803_v11 }
 0x326   :  { %v4007_v3 = vadd.f32 %v4006_v32, %v4005_v40  ;;  %v7823_v17 = vpop.eup %6195  ;;  %6201 = vpow2.f32 %v3590_v62  ;;  %v3592_v57 = vmul.f32 1.442695, %v3525_v9  ;;  %v3594_v38 = vmul.f32 1.442695, %v3526_v21 }
 0x327   :  { %8714 = vst [vmem:[#allocation81_spill] sm:$0xff] %v7823_v17  ;;  %v3528_v54 = vsub.f32 %v7680_v63, %v3329_v55  ;;  %v3529_v32 = vsub.f32 %v7699_v59, %v3328_v45  ;;  %v3596_v39 = vmul.f32 1.442695, %v3527_v50  ;;  %v2984_v62 = vrot.slane %v2977_v26, %v6865_v34 }
 0x328   :  { %v7827_v16 = vpop.eup %6197  ;;  %v4008_v53 = vrot.slane %v4007_v3, 2  ;;  %6203 = vpow2.f32 %v3592_v57  ;;  %v2991_v21 = vrot.slane %v7817_v22, %v6865_v34  ;;  %v3144_v48 = vsel %vm3073_vm1, %v2976_v28, -inf }
 0x329   :  { %8715 = vst [vmem:[#allocation82_spill] sm:$0xff] %v7827_v16  ;;  %v7831_v4 = vpop.eup %6199  ;;  %v3856_v13 = vrot.slane %v7827_v16, %v6865_v34  ;;  %6205 = vpow2.f32 %v3594_v38  ;;  %v3598_v55 = vmul.f32 1.442695, %v3528_v54  ;;  %v3600_v63 = vmul.f32 1.442695, %v3529_v32 }
 0x32a   :  { %8716 = vst [vmem:[#allocation83_spill] sm:$0xff] %v7831_v4  ;;  %v4009_v40 = vadd.f32 %v4008_v53, %v4007_v3  ;;  %v3842_v15 = vcombine.low %v7823_v17, %v7831_v4  ;;  %6207 = vpow2.f32 %v3596_v39  ;;  %v2992_v59 = vcombine.low %v2984_v62, %v2991_v21 }
 0x32b   :  { %6209 = vpow2.f32 %v3598_v55  ;;  %v3145_v42 = vrot.slane %v3144_v48, 4  ;;  %v2736_v9 = vcombine.high %v7533_v43, %v7533_v43  ;;  %v7847_v38 = vrot.slane %v7533_v43, %v6865_v34 }
 0x32c   :  { %v4010_v12 = vrot.slane %v4009_v40, 1  ;;  %v3849_v47 = vrot.slane %v3842_v15, %v6865_v34  ;;  %6211 = vpow2.f32 %v3600_v63  ;;  %v3151_v26 = vsel %vm3073_vm1, %v2992_v59, -inf }
 0x32d   :  { %v3146_v50 = vmax.f32 %v3144_v48, %v3145_v42  ;;  %v3152_v57 = vrot.slane %v3151_v26, 4  ;;  %v7850_v28 = vrot.slane %v2736_v9, %v6865_v34  ;;  %v7854_v53 = vcombine.high %v7847_v38, %v7847_v38 }
 0x32e   :  { %v4011_v3 = vadd.f32 %v4010_v12, %v4009_v40  ;;  %v3857_v45 = vcombine.low %v3849_v47, %v3856_v13  ;;  %v8717_v54 = vcombine.low %v7747_v33, %v7776_v41  ;;  %v3039_v43 = vrot.slane %v7847_v38, %v6865_v34 }
 0x32f   :  { %v3147_v13 = vrot.slane %v3146_v50, 2  ;;  %v3153_v62 = vmax.f32 %v3151_v26, %v3152_v57  ;;  %v7867_v15 = vcombine.high %v7850_v28, %v7850_v28  ;;  %v3041_v63 = vcombine.low %v7854_v53, %v7850_v28 }
 0x330   :  { %v3032_v32 = vrot.slane %v8717_v54, %v6865_v34  ;;  %6213 = vrcp.f32 %v4011_v3  ;;  %v4033_v39 = vsel %vm3073_vm1, %v3857_v45, 0.0  ;;  %v7863_v21 = vpop.eup %6201  ;;  %v2702_v12 = vcombine.high %v7536_v0, %v7536_v0 }
 0x331   :  { %8718 = vst [vmem:[#allocation84_spill] sm:$0xff] %v7863_v21  ;;  %v4034_v40 = vrot.slane %v4033_v39, 4  ;;  %v3148_v59 = vmax.f32 %v3146_v50, %v3147_v13  ;;  %v3154_v48 = vrot.slane %v3153_v62, 2  ;;  %v7875_v47 = vrot.slane %v7536_v0, %v6865_v34 }
 0x332   :  { %v3040_v55 = vcombine.low %v3032_v32, %v3039_v43  ;;  %v7877_v42 = vpop.eup %6203  ;;  %v3048_v9 = vrot.slane %v3041_v63, %v6865_v34  ;;  %v3055_v3 = vrot.slane %v7867_v15, %v6865_v34 }
 0x333   :  { %8719 = vst [vmem:[#allocation85_spill] sm:$0xff] %v7877_v42  ;;  %v4035_v26 = vadd.f32 %v4034_v40, %v4033_v39  ;;  %v7883_v57 = vpop.eup %6205  ;;  %v3794_v50 = vcombine.low %v7863_v21, %v7877_v42  ;;  %v3149_v54 = vrot.slane %v3148_v59, 1  ;;  %v3155_v32 = vmax.f32 %v3153_v62, %v3154_v48 }
 0x334   :  { %v3172_v45 = vsel %vm3073_vm1, %v3040_v55, -inf  ;;  %8720 = vst [vmem:[#allocation86_spill] sm:$0xff] %v7883_v57  ;;  %v7887_v0 = vpop.eup %6207  ;;  %v3808_v40 = vrot.slane %v7883_v57, %v6865_v34  ;;  %v3056_v63 = vcombine.low %v3048_v9, %v3055_v3  ;;  %v7903_v42 = vrot.slane %v2702_v12, %v6865_v34 }
 0x335   :  { %v3173_v43 = vrot.slane %v3172_v45, 4  ;;  %8721 = vst [vmem:[#allocation87_spill] sm:$0xff] %v7887_v0  ;;  %v4036_v39 = vrot.slane %v4035_v26, 2  ;;  %v7892_v16 = vpop.eup %6209  ;;  %v3801_v55 = vrot.slane %v3794_v50, %v6865_v34  ;;  %v3150_v4 = vmax.f32 %v3148_v59, %v3149_v54 }
 0x336   :  { %8722 = vst [vmem:[#allocation88_spill] sm:$0xff] %v7892_v16  ;;  %v3156_v17 = vrot.slane %v3155_v32, 1  ;;  %v7895_v51 = vpop.eup %6211  ;;  %v3810_v48 = vcombine.low %v7887_v0, %v7892_v16  ;;  %v3179_v13 = vsel %vm3073_vm1, %v3056_v63, -inf  ;;  %v7907_v59 = vcombine.high %v7875_v47, %v7875_v47 }
 0x337   :  { %v3174_v27 = vmax.f32 %v3172_v45, %v3173_v43  ;;  %8723 = vst [vmem:[#allocation89_spill] sm:$0xff] %v7895_v51  ;;  %v7897_v62 = vadd.f32 %v4036_v39, %v4035_v26  ;;  %v3809_v9 = vcombine.low %v3801_v55, %v3808_v40  ;;  %v3362_v57 = vcombine.high %v3150_v4, %v3150_v4 }
 0x338   :  { %v3157_v3 = vmax.f32 %v3155_v32, %v3156_v17  ;;  %v3817_v45 = vrot.slane %v3810_v48, %v6865_v34  ;;  %v3824_v26 = vrot.slane %v7895_v51, %v6865_v34  ;;  %v3369_v50 = vrot.slane %v3150_v4, %v6865_v34 }
 0x339   :  { %v3175_v54 = vrot.slane %v3174_v27, 2  ;;  %v4012_v12 = vsel %vm3073_vm1, %v3809_v9, 0.0  ;;  %v3376_v39 = vrot.slane %v3362_v57, %v6865_v34 }
 0x33a   :  { %v7913_v43 = vpop.eup %6213  ;;  %v3378_v17 = vcombine.high %v3157_v3, %v3157_v3  ;;  %v3385_v32 = vrot.slane %v3157_v3, %v6865_v34  ;;  %v3825_v63 = vcombine.low %v3817_v45, %v3824_v26  ;;  %v4013_v55 = vrot.slane %v4012_v12, 4 }
 0x33b   :  { %v7920_v40 = vrot.slane %v7913_v43, %v6865_v34  ;;  %v3377_v48 = vcombine.high %v3369_v50, %v3369_v50  ;;  %v3536_v16 = vsub.f32 %v7618_v31, %v3369_v50  ;;  %v3538_v0 = vsub.f32 %v7795_v8, %v3376_v39 }
 0x33c   :  { %v3392_v51 = vrot.slane %v3378_v17, %v6865_v34  ;;  %v3393_v4 = vcombine.high %v3385_v32, %v3385_v32  ;;  %v4014_v9 = vadd.f32 %v4013_v55, %v4012_v12  ;;  %v4019_v3 = vsel %vm3073_vm1, %v3825_v63, 0.0 }
 0x33d   :  { %8724 = vst [vmem:[#allocation90_spill] sm:$0xff] %v7920_v40  ;;  %v7927_v57 = vmul.f32 %v7767_v44, %v7920_v40  ;;  %v3537_v10 = vsub.f32 %v7644_v18, %v3377_v48  ;;  %v4020_v21 = vrot.slane %v4019_v3, 4  ;;  %v3539_v45 = vsub.f32 %v7807_v14, %v3385_v32 }
 0x33e   :  { %v3540_v26 = vsub.f32 %v7803_v11, %v3393_v4  ;;  %v3541_v17 = vsub.f32 %v7817_v22, %v3392_v51  ;;  %v4015_v5 = vrot.slane %v4014_v9, 2  ;;  %v3614_v31 = vmul.f32 1.442695, %v3536_v16 }
 0x33f   :  { %v3616_v50 = vmul.f32 1.442695, %v3537_v10  ;;  %v3176_v8 = vmax.f32 %v3174_v27, %v3175_v54  ;;  %v4021_v39 = vadd.f32 %v4020_v21, %v4019_v3  ;;  %v3618_v1 = vmul.f32 1.442695, %v3538_v0 }
 0x340   :  { %v3620_v44 = vmul.f32 1.442695, %v3539_v45  ;;  %v3622_v40 = vmul.f32 1.442695, %v3540_v26  ;;  %v4016_v12 = vadd.f32 %v4015_v5, %v4014_v9  ;;  %6215 = vpow2.f32 %v3614_v31 }
 0x341   :  { %v3624_v63 = vmul.f32 1.442695, %v3541_v17  ;;  %v3177_v55 = vrot.slane %v3176_v8, 1  ;;  %v4022_v18 = vrot.slane %v4021_v39, 2  ;;  %6217 = vpow2.f32 %v3616_v50 }
 0x342   :  { %v3180_v48 = vrot.slane %v3179_v13, 4  ;;  %v7936_v11 = vcombine.high %v7903_v42, %v7903_v42  ;;  %v4017_v51 = vrot.slane %v4016_v12, 1  ;;  %6219 = vpow2.f32 %v3618_v1 }
 0x343   :  { %v3178_v16 = vmax.f32 %v3176_v8, %v3177_v55  ;;  %v2993_v27 = vcombine.low %v7875_v47, %v7907_v59  ;;  %v4038_v10 = vrot.slane %v7897_v62, 1  ;;  %6221 = vpow2.f32 %v3620_v44 }
 0x344   :  { %v3181_v5 = vmax.f32 %v3179_v13, %v3180_v48  ;;  %v3007_v14 = vrot.slane %v7903_v42, %v6865_v34  ;;  %v4018_v22 = vadd.f32 %v4017_v51, %v4016_v12  ;;  %6223 = vpow2.f32 %v3622_v40 }
 0x345   :  { %v3426_v21 = vcombine.high %v3178_v16, %v3178_v16  ;;  %v3433_v0 = vrot.slane %v3178_v16, %v6865_v34  ;;  %6225 = vpow2.f32 %v3624_v63  ;;  %v3000_v1 = vrot.slane %v2993_v27, %v6865_v34 }
 0x346   :  { %v3182_v54 = vrot.slane %v3181_v5, 2  ;;  %v3009_v32 = vcombine.low %v7936_v11, %v7719_v2  ;;  %v7947_v4 = vadd.f32 %v4022_v18, %v4021_v39  ;;  %v8725_v17 = vrot.slane %v7663_v36, 1 }
 0x347   :  { %v3440_v9 = vrot.slane %v3426_v21, %v6865_v34  ;;  %v3441_v13 = vcombine.high %v3433_v0, %v3433_v0  ;;  %v3548_v3 = vsub.f32 %v7747_v33, %v3433_v0  ;;  %v3008_v26 = vcombine.low %v3000_v1, %v3007_v14 }
 0x348   :  { %v3183_v45 = vmax.f32 %v3181_v5, %v3182_v54  ;;  %v3016_v40 = vrot.slane %v3009_v32, %v6865_v34  ;;  %v3976_v31 = vadd.f32 %v8725_v17, %v7663_v36  ;;  %6227 = vrcp.f32 %v4018_v22 }
 0x349   :  { %v3549_v50 = vsub.f32 %v7776_v41, %v3441_v13  ;;  %v3550_v8 = vsub.f32 %v7847_v38, %v3440_v9  ;;  %v3638_v39 = vmul.f32 1.442695, %v3548_v3  ;;  %v8726_v12 = vrot.slane %v7765_v25, %v6865_v34 }
 0x34a   :  { %v3184_v44 = vrot.slane %v3183_v45, 1  ;;  %v3158_v33 = vsel %vm3073_vm1, %v3008_v26, -inf  ;;  %v3989_v55 = vrot.slane %v7691_v30, 1  ;;  %v7962_v18 = vpop.eup %6215  ;;  %v8727_v27 = vrot.slane %v7670_v19, 1 }
 0x34b   :  { %v3024_v63 = vcombine.low %v3016_v40, %v8726_v12  ;;  %6229 = vpow2.f32 %v3638_v39  ;;  %v3640_v48 = vmul.f32 1.442695, %v3549_v50  ;;  %v3642_v36 = vmul.f32 1.442695, %v3550_v8  ;;  %v7964_v16 = vpop.eup %6217 }
 0x34c   :  { %v3159_v51 = vrot.slane %v3158_v33, 4  ;;  %v3185_v41 = vmax.f32 %v3183_v45, %v3184_v44  ;;  %v3983_v5 = vadd.f32 %v8727_v27, %v7670_v19  ;;  %6231 = vrcp.f32 %v3976_v31  ;;  %v7970_v14 = vpop.eup %6219 }
 0x34d   :  { %v3165_v38 = vsel %vm3073_vm1, %v3024_v63, -inf  ;;  %v3858_v22 = vcombine.low %v7962_v18, %v7964_v16  ;;  %6233 = vpow2.f32 %v3640_v48  ;;  %v7974_v54 = vpop.eup %6221  ;;  %v3990_v9 = vadd.f32 %v3989_v55, %v7691_v30 }
 0x34e   :  { %v3160_v21 = vmax.f32 %v3158_v33, %v3159_v51  ;;  %v3166_v0 = vrot.slane %v3165_v38, 4  ;;  %v3442_v1 = vcombine.high %v3185_v41, %v3185_v41  ;;  %v3449_v32 = vrot.slane %v3185_v41, %v6865_v34  ;;  %v7978_v13 = vpop.eup %6223 }
 0x34f   :  { %6235 = vpow2.f32 %v3642_v36  ;;  %v3865_v19 = vrot.slane %v3858_v22, %v6865_v34  ;;  %v3872_v3 = vrot.slane %v7970_v14, %v6865_v34  ;;  %v7983_v40 = vpop.eup %6225  ;;  %v3874_v17 = vcombine.low %v7974_v54, %v7978_v13 }
 0x350   :  { %v3161_v45 = vrot.slane %v3160_v21, 2  ;;  %v3167_v26 = vmax.f32 %v3165_v38, %v3166_v0  ;;  %v3456_v31 = vrot.slane %v3442_v1, %v6865_v34  ;;  %v3457_v50 = vcombine.high %v3449_v32, %v3449_v32 }
 0x351   :  { %v3551_v8 = vsub.f32 %v7854_v53, %v3449_v32  ;;  %v3873_v30 = vcombine.low %v3865_v19, %v3872_v3  ;;  %v3888_v39 = vrot.slane %v7983_v40, %v6865_v34  ;;  %v3881_v63 = vrot.slane %v3874_v17, %v6865_v34 }
 0x352   :  { %v3162_v44 = vmax.f32 %v3160_v21, %v3161_v45  ;;  %v3168_v12 = vrot.slane %v3167_v26, 2  ;;  %v3552_v33 = vsub.f32 %v7850_v28, %v3457_v50  ;;  %v3553_v55 = vsub.f32 %v7867_v15, %v3456_v31  ;;  %v7994_v36 = vpop.eup %6227 }
 0x353   :  { %v3644_v48 = vmul.f32 1.442695, %v3551_v8  ;;  %v4040_v51 = vsel %vm3073_vm1, %v3873_v30, 0.0  ;;  %6237 = vrcp.f32 %v3983_v5  ;;  %v3889_v53 = vcombine.low %v3881_v63, %v3888_v39 }
 0x354   :  { %v3163_v41 = vrot.slane %v3162_v44, 1  ;;  %v3169_v38 = vmax.f32 %v3167_v26, %v3168_v12  ;;  %v4041_v27 = vrot.slane %v4040_v51, 4  ;;  %v3646_v22 = vmul.f32 1.442695, %v3552_v33 }
 0x355   :  { %6239 = vrcp.f32 %v3990_v9  ;;  %v7997_v21 = vpop.eup %6229  ;;  %v3648_v0 = vmul.f32 1.442695, %v3553_v55  ;;  %v4047_v19 = vsel %vm3073_vm1, %v3889_v53, 0.0  ;;  %v8728_v3 = vcombine.low %v7732_v58, %v7735_v56 }
 0x356   :  { %6241 = vpow2.f32 %v3644_v48  ;;  %v3164_v1 = vmax.f32 %v3162_v44, %v3163_v41  ;;  %v3170_v28 = vrot.slane %v3169_v38, 1  ;;  %v6232_v32 = vpop.eup %6231  ;;  %v4042_v15 = vadd.f32 %v4041_v27, %v4040_v51 }
 0x357   :  { %6243 = vpow2.f32 %v3646_v22  ;;  %v8004_v5 = vrot.slane %v8728_v3, %v6865_v34  ;;  %v8006_v45 = vpop.eup %6233  ;;  %v4048_v9 = vrot.slane %v4047_v19, 4  ;;  %v4114_v39 = vcombine.high %v6232_v32, %v6232_v32 }
 0x358   :  { %6245 = vpow2.f32 %v3648_v0  ;;  %v3171_v26 = vmax.f32 %v3169_v38, %v3170_v28  ;;  %v3394_v17 = vcombine.high %v3164_v1, %v3164_v1  ;;  %v4043_v50 = vrot.slane %v4042_v15, 2 }
 0x359   :  { %v8008_v31 = vpop.eup %6235  ;;  %v3922_v8 = vcombine.low %v7997_v21, %v8006_v45  ;;  %v3401_v30 = vrot.slane %v3164_v1, %v6865_v34  ;;  %v4049_v44 = vadd.f32 %v4048_v9, %v4047_v19 }
 0x35a   :  { %v3936_v58 = vrot.slane %v8008_v31, %v6865_v34  ;;  %v3408_v56 = vrot.slane %v3394_v17, %v6865_v34  ;;  %v3410_v12 = vcombine.high %v3171_v26, %v3171_v26  ;;  %v4044_v63 = vadd.f32 %v4043_v50, %v4042_v15 }
 0x35b   :  { %v3929_v33 = vrot.slane %v3922_v8, %v6865_v34  ;;  %v3409_v55 = vcombine.high %v3401_v30, %v3401_v30  ;;  %v3417_v48 = vrot.slane %v3171_v26, %v6865_v34  ;;  %v4050_v51 = vrot.slane %v4049_v44, 2 }
 0x35c   :  { %v3424_v41 = vrot.slane %v3410_v12, %v6865_v34  ;;  %v3542_v38 = vsub.f32 %v7875_v47, %v3401_v30  ;;  %v3544_v53 = vsub.f32 %v7903_v42, %v3408_v56  ;;  %v4045_v27 = vrot.slane %v4044_v63, 1 }
 0x35d   :  { %v3937_v22 = vcombine.low %v3929_v33, %v3936_v58  ;;  %v3425_v0 = vcombine.high %v3417_v48, %v3417_v48  ;;  %v3543_v1 = vsub.f32 %v7907_v59, %v3409_v55  ;;  %v6238_v28 = vpop.eup %6237  ;;  %v8022_v19 = vadd.f32 %v4050_v51, %v4049_v44 }
 0x35e   :  { %v3545_v15 = vsub.f32 %v7936_v11, %v3417_v48  ;;  %v3547_v3 = vsub.f32 %v7765_v25, %v3424_v41  ;;  %v3626_v9 = vmul.f32 1.442695, %v3542_v38  ;;  %v4046_v17 = vadd.f32 %v4045_v27, %v4044_v63 }
 0x35f   :  { %v8026_v26 = vpop.eup %6239  ;;  %v4068_v47 = vsel %vm3073_vm1, %v3937_v22, 0.0  ;;  %v3546_v42 = vsub.f32 %v7719_v2, %v3425_v0  ;;  %v3628_v50 = vmul.f32 1.442695, %v3543_v1  ;;  %v3630_v59 = vmul.f32 1.442695, %v3544_v53 }
 0x360   :  { %v8030_v8 = vpop.eup %6241  ;;  %v4069_v30 = vrot.slane %v4068_v47, 4  ;;  %6247 = vpow2.f32 %v3626_v9  ;;  %v3632_v44 = vmul.f32 1.442695, %v3545_v15  ;;  %v3636_v25 = vmul.f32 1.442695, %v3547_v3 }
 0x361   :  { %v8032_v58 = vpop.eup %6243  ;;  %6249 = vrcp.f32 %v4046_v17  ;;  %v3634_v11 = vmul.f32 1.442695, %v3546_v42  ;;  %v4121_v56 = vrot.slane %v6232_v32, %v6865_v34  ;;  %v4128_v33 = vrot.slane %v4114_v39, %v6865_v34 }
 0x362   :  { %v8035_v12 = vpop.eup %6245  ;;  %v3938_v63 = vcombine.low %v8030_v8, %v8032_v58  ;;  %v4070_v2 = vadd.f32 %v4069_v30, %v4068_v47  ;;  %6251 = vpow2.f32 %v3628_v50  ;;  %v4130_v51 = vcombine.high %v6238_v28, %v6238_v28 }
 0x363   :  { %v3952_v55 = vrot.slane %v8035_v12, %v6865_v34  ;;  %6253 = vpow2.f32 %v3630_v59  ;;  %v4129_v48 = vcombine.high %v4121_v56, %v4121_v56  ;;  %v4137_v32 = vrot.slane %v6238_v28, %v6865_v34 }
 0x364   :  { %v3945_v41 = vrot.slane %v3938_v63, %v6865_v34  ;;  %v4071_v38 = vrot.slane %v4070_v2, 2  ;;  %6255 = vpow2.f32 %v3632_v44  ;;  %v4144_v53 = vrot.slane %v4130_v51, %v6865_v34 }
 0x365   :  { %6257 = vpow2.f32 %v3634_v11  ;;  %v4153_v27 = vrot.slane %v8026_v26, %v6865_v34  ;;  %v4418_v39 = vmul.f32 %v7559_v60, %v4121_v56  ;;  %v4145_v1 = vcombine.high %v4137_v32, %v4137_v32 }
 0x366   :  { %v3953_v22 = vcombine.low %v3945_v41, %v3952_v55  ;;  %v4072_v0 = vadd.f32 %v4071_v38, %v4070_v2  ;;  %6259 = vpow2.f32 %v3636_v25  ;;  %v4419_v3 = vmul.f32 %v7580_v35, %v4129_v48 }
 0x367   :  { %v4161_v15 = vcombine.high %v4153_v27, %v4153_v27  ;;  %v4420_v9 = vmul.f32 %v7587_v49, %v4128_v33  ;;  %v4421_v17 = vmul.f32 %v7620_v37, %v4137_v32  ;;  %v4422_v42 = vmul.f32 %v7625_v61, %v4145_v1 }
 0x368   :  { %v4073_v28 = vrot.slane %v4072_v0, 1  ;;  %v4075_v47 = vsel %vm3073_vm1, %v3953_v22, 0.0  ;;  %v4423_v50 = vmul.f32 %v7634_v23, %v4144_v53  ;;  %v4424_v30 = vmul.f32 %v7638_v7, %v4153_v27 }
 0x369   :  { %v4076_v60 = vrot.slane %v4075_v47, 4  ;;  %v4425_v59 = vmul.f32 %v7646_v6, %v4161_v15  ;;  %v4516_v44 = vcombine.low %v4418_v39, %v4419_v3  ;;  %v4517_v49 = vcombine.low %v4420_v9, %v4421_v17 }
 0x36a   :  { %v8056_v11 = vpop.eup %6247  ;;  %v4074_v35 = vadd.f32 %v4073_v28, %v4072_v0  ;;  %v4533_v25 = vcombine.low %v4422_v42, %v4423_v50  ;;  %v4146_v37 = vcombine.high %v8026_v26, %v8026_v26  ;;  %v4568_v7 = vcombine.low %v7760_v46, %v7927_v57 }
 0x36b   :  { %v8060_v56 = vpop.eup %6249  ;;  %v4077_v61 = vadd.f32 %v4076_v60, %v4075_v47  ;;  %v4524_v23 = vrot.slane %v4516_v44, %v6865_v34  ;;  %v4534_v63 = vcombine.low %v4424_v30, %v4425_v59  ;;  %v4531_v6 = vrot.slane %v4517_v49, %v6865_v34  ;;  %v8730_v44 = vld [vmem:[#allocation90_spill] sm:$0xff] }
 0x36c   :  { %v8065_v2 = vpop.eup %6251  ;;  %6261 = vrcp.f32 %v4074_v35  ;;  %v4541_v33 = vrot.slane %v4533_v25, %v6865_v34  ;;  %v4160_v55 = vrot.slane %v4146_v37, %v6865_v34  ;;  %v8729_v46 = vcombine.low %v7752_v52, %v7755_v29 }
 0x36d   :  { %v8070_v48 = vpop.eup %6253  ;;  %v4078_v26 = vrot.slane %v4077_v61, 2  ;;  %v3890_v51 = vcombine.low %v8056_v11, %v8065_v2  ;;  %v4548_v41 = vrot.slane %v4534_v63, %v6865_v34  ;;  %v4532_v53 = vcombine.low %v4524_v23, %v4531_v6  ;;  %v8732_v6 = vld [vmem:[#allocation79_spill] sm:$0xff] }
 0x36e   :  { %v4575_v57 = vrot.slane %v8729_v46, %v6865_v34  ;;  %v8079_v38 = vpop.eup %6255  ;;  %v3904_v32 = vrot.slane %v8070_v48, %v6865_v34  ;;  %v4426_v27 = vmul.f32 %v7650_v20, %v4160_v55  ;;  %v4582_v39 = vrot.slane %v4568_v7, %v6865_v34  ;;  %v8733_v55 = vld [vmem:[#allocation84_spill] sm:$0xff] }
 0x36f   :  { %v8085_v22 = vpop.eup %6257  ;;  %v8087_v0 = vadd.f32 %v4078_v26, %v4077_v61  ;;  %v3897_v1 = vrot.slane %v3890_v51, %v6865_v34  ;;  %v4549_v15 = vcombine.low %v4541_v33, %v4548_v41  ;;  %v4024_v52 = vrot.slane %v7947_v4, 1  ;;  %v8731_v61 = vld [vmem:[#allocation78_spill] sm:$0xff] }
 0x370   :  { %v8091_v29 = vpop.eup %6259  ;;  %v3906_v3 = vcombine.low %v8079_v38, %v8085_v22  ;;  %v4550_v9 = vcombine.low %v4426_v27, %v7740_v24  ;;  %v4583_v17 = vcombine.low %v4575_v57, %v4582_v39  ;;  %v4194_v20 = vcombine.high %v7913_v43, %v7913_v43 }
 0x371   :  { %v3905_v28 = vcombine.low %v3897_v1, %v3904_v32  ;;  %v3920_v47 = vrot.slane %v8091_v29, %v6865_v34  ;;  %v4732_v42 = vpack.c.bf16 %v4549_v15, %v4532_v53  ;;  %v4025_v50 = vadd.f32 %v4024_v52, %v7947_v4  ;;  %v8734_v32 = vld [vmem:[#allocation80_spill] sm:$0xff]  ;;  %v8737_v1 = vld [vmem:[#allocation86_spill] sm:$0xff] }
 0x372   :  { %v3913_v60 = vrot.slane %v3906_v3, %v6865_v34  ;;  %v4558_v30 = vrot.slane %v4550_v9, %v6865_v34  ;;  %v4208_v59 = vrot.slane %v4194_v20, %v6865_v34  ;;  %v4209_v24 = vcombine.high %v8730_v44, %v8730_v44 }
 0x373   :  { %v4054_v35 = vsel %vm3073_vm1, %v3905_v28, 0.0  ;;  %6047 = vmatprep.mubr.msk.bf16.mxu1 %vm4744_vm2, %v4732_v42  ;;  %6263 = vrcp.f32 %v4025_v50  ;;  %v4210_v43 = vcombine.high %v7994_v36, %v7994_v36  ;;  %v4217_v4 = vrot.slane %v7994_v36, %v6865_v34 }
 0x374   :  { %v3921_v49 = vcombine.low %v3913_v60, %v3920_v47  ;;  %v4055_v25 = vrot.slane %v4054_v35, 4  ;;  %v4566_v37 = vcombine.low %v4558_v30, %v8004_v5  ;;  %v4434_v23 = vmul.f32 %v8731_v61, %v4209_v24  ;;  %v8736_v5 = vld [vmem:[#allocation85_spill] sm:$0xff] }
 0x375   :  { %v4224_v63 = vrot.slane %v4210_v43, %v6865_v34  ;;  %v4225_v7 = vcombine.high %v4217_v4, %v4217_v4  ;;  %v4435_v33 = vmul.f32 %v8732_v6, %v4208_v59  ;;  %v4436_v26 = vmul.f32 %v8733_v55, %v4217_v4 }
 0x376   :  { %v6262_v51 = vpop.eup %6261  ;;  %v4056_v41 = vadd.f32 %v4055_v25, %v4054_v35  ;;  %v4061_v46 = vsel %vm3073_vm1, %v3921_v49, 0.0  ;;  %v4733_v57 = vpack.c.bf16 %v4583_v17, %v4566_v37  ;;  %v8735_v36 = vrot.slane %v8734_v32, 1 }
 0x377   :  { %v4062_v27 = vrot.slane %v4061_v46, 4  ;;  %v4437_v39 = vmul.f32 %v8736_v5, %v4225_v7  ;;  %v4438_v15 = vmul.f32 %v8737_v1, %v4224_v63  ;;  %v4584_v52 = vcombine.low %v4434_v23, %v4435_v33  ;;  %v8740_v5 = vld [vmem:[#allocation89_spill] sm:$0xff] }
 0x378   :  { %v4032_v53 = vadd.f32 %v8735_v36, %v8734_v32  ;;  %v4057_v3 = vrot.slane %v4056_v41, 2  ;;  %6048 = vmatmul.mubr.msk.bf16.vlgmr.msra.gmra.mrb[24].mxu1 %vm4744_vm2, %v4733_v57  ;;  %v4039_v9 = vadd.f32 %v4038_v10, %v7897_v62  ;;  %v4281_v17 = vrot.slane %v8060_v56, %v6865_v34 }
 0x379   :  { %v4063_v20 = vadd.f32 %v4062_v27, %v4061_v46  ;;  %v4585_v28 = vcombine.low %v4436_v26, %v4437_v39  ;;  %v8130_v47 = vrot.slane %v4584_v52, %v6865_v34  ;;  %v4052_v42 = vrot.slane %v8022_v19, 1  ;;  %v8738_v26 = vld [vmem:[#allocation87_spill] sm:$0xff] }
 0x37a   :  { %6265 = vrcp.f32 %v4032_v53  ;;  %v4058_v50 = vadd.f32 %v4057_v3, %v4056_v41  ;;  %v4289_v60 = vcombine.high %v4281_v17, %v4281_v17  ;;  %v8134_v30 = vmul.f32 %v7962_v18, %v4281_v17  ;;  %v8739_v53 = vld [vmem:[#allocation88_spill] sm:$0xff] }
 0x37b   :  { %6267 = vrcp.f32 %v4039_v9  ;;  %v4064_v59 = vrot.slane %v4063_v20, 2  ;;  %v4599_v62 = vrot.slane %v4585_v28, %v6865_v34  ;;  %v4053_v10 = vadd.f32 %v4052_v42, %v8022_v19 }
 0x37c   :  { %v4274_v44 = vcombine.high %v8060_v56, %v8060_v56  ;;  %v4059_v24 = vrot.slane %v4058_v50, 1  ;;  %v8141_v35 = vmul.f32 %v7964_v16, %v4289_v60  ;;  %v4080_v43 = vrot.slane %v8087_v0, 1 }
 0x37d   :  { %v4338_v4 = vcombine.high %v6262_v51, %v6262_v51  ;;  %v6264_v49 = vpop.eup %6263  ;;  %v4600_v25 = vcombine.low %v8130_v47, %v4599_v62  ;;  %v4065_v18 = vadd.f32 %v4064_v59, %v4063_v20  ;;  %6269 = vrcp.f32 %v4053_v10  ;;  %v8742_v10 = vld [vmem:[#allocation76_spill] sm:$0xff] }
 0x37e   :  { %v4288_v37 = vrot.slane %v4274_v44, %v6865_v34  ;;  %v4226_v61 = vcombine.high %v6264_v49, %v6264_v49  ;;  %v4233_v19 = vrot.slane %v6264_v49, %v6865_v34  ;;  %v4636_v56 = vcombine.low %v8134_v30, %v8141_v35  ;;  %v8743_v44 = vld [vmem:[#allocation77_spill] sm:$0xff] }
 0x37f   :  { %v4060_v23 = vadd.f32 %v4059_v24, %v4058_v50  ;;  %v4066_v63 = vrot.slane %v4065_v18, 1  ;;  %v4081_v7 = vadd.f32 %v4080_v43, %v8087_v0  ;;  %v4345_v6 = vrot.slane %v6262_v51, %v6865_v34  ;;  %v8744_v43 = vld [vmem:[#allocation81_spill] sm:$0xff] }
 0x380   :  { %v8150_v16 = vmul.f32 %v7970_v14, %v4288_v37  ;;  %v4240_v33 = vrot.slane %v4226_v61, %v6865_v34  ;;  %v4241_v55 = vcombine.high %v4233_v19, %v4233_v19  ;;  %v4439_v41 = vmul.f32 %v8738_v26, %v4233_v19  ;;  %v8745_v37 = vld [vmem:[#allocation83_spill] sm:$0xff]  ;;  %v8746_v19 = vld [vmem:[#allocation82_spill] sm:$0xff] }
 0x381   :  { %v4067_v46 = vadd.f32 %v4066_v63, %v4065_v18  ;;  %6271 = vrcp.f32 %v4060_v23  ;;  %v4352_v57 = vrot.slane %v4338_v4, %v6865_v34  ;;  %v4353_v32 = vcombine.high %v4345_v6, %v4345_v6 }
 0x382   :  { %v4440_v27 = vmul.f32 %v8739_v53, %v4241_v55  ;;  %v4441_v14 = vmul.f32 %v8740_v5, %v4240_v33  ;;  %v4601_v39 = vcombine.low %v4438_v15, %v4439_v41  ;;  %6273 = vrcp.f32 %v4081_v7 }
 0x383   :  { %6275 = vrcp.f32 %v4067_v46  ;;  %v8161_v1 = vmul.f32 %v7997_v21, %v4345_v6  ;;  %v8165_v17 = vmul.f32 %v8006_v45, %v4353_v32  ;;  %v8168_v20 = vmul.f32 %v8008_v31, %v4352_v57  ;;  %v8741_v21 = vld [vmem:[#allocation75_spill] sm:$0xff] }
 0x384   :  { %v6266_v36 = vpop.eup %6265  ;;  %v4602_v3 = vcombine.low %v4440_v27, %v4441_v14  ;;  %v4609_v9 = vrot.slane %v4601_v39, %v6865_v34  ;;  %v4650_v57 = vrot.slane %v4636_v56, %v6865_v34 }
 0x385   :  { %v4242_v0 = vcombine.high %v6266_v36, %v6266_v36  ;;  %v4249_v51 = vrot.slane %v6266_v36, %v6865_v34  ;;  %v6268_v52 = vpop.eup %6267  ;;  %v4687_v30 = vcombine.low %v8161_v1, %v8165_v17  ;;  %v6144_v1 = vld [vmem:[#allocation13 + $0x18] sm:$0xff]   ;;  %v6145_v17 = vld [vmem:[#allocation13 + $0x20] sm:$0xff]  }
 0x386   :  { %v4258_v47 = vcombine.high %v6268_v52, %v6268_v52  ;;  %v4265_v42 = vrot.slane %v6268_v52, %v6865_v34  ;;  %v4616_v50 = vrot.slane %v4602_v3, %v6865_v34 }
 0x387   :  { %v4256_v15 = vrot.slane %v4242_v0, %v6865_v34  ;;  %v4257_v28 = vcombine.high %v4249_v51, %v4249_v51  ;;  %v4442_v60 = vmul.f32 %v8741_v21, %v4249_v51  ;;  %v6270_v59 = vpop.eup %6269 }
 0x388   :  { %v4272_v45 = vrot.slane %v4258_v47, %v6865_v34  ;;  %v4273_v62 = vcombine.high %v4265_v42, %v4265_v42  ;;  %v4617_v35 = vcombine.low %v4609_v9, %v4616_v50  ;;  %v4445_v4 = vmul.f32 %v8744_v43, %v4265_v42 }
 0x389   :  { %v4443_v31 = vmul.f32 %v8742_v10, %v4257_v28  ;;  %v4444_v24 = vmul.f32 %v8743_v44, %v4256_v15  ;;  %v4290_v49 = vcombine.high %v6270_v59, %v6270_v59  ;;  %v4297_v18 = vrot.slane %v6270_v59, %v6865_v34 }
 0x38a   :  { %v4446_v61 = vmul.f32 %v8745_v37, %v4273_v62  ;;  %v4447_v23 = vmul.f32 %v8746_v19, %v4272_v45  ;;  %v4734_v7 = vpack.c.bf16 %v4617_v35, %v4600_v25 }
 0x38b   :  { %v4618_v63 = vcombine.low %v4442_v60, %v4443_v31  ;;  %v4619_v6 = vcombine.low %v4444_v24, %v4445_v4  ;;  %v4304_v33 = vrot.slane %v4290_v49, %v6865_v34  ;;  %v4305_v55 = vcombine.high %v4297_v18, %v4297_v18  ;;  %v6272_v26 = vpop.eup %6271 }
 0x38c   :  { %v4635_v46 = vcombine.low %v4446_v61, %v4447_v23  ;;  %v4451_v32 = vmul.f32 %v7974_v54, %v4297_v18  ;;  %v6274_v36 = vpop.eup %6273  ;;  %6051 = vmatprep.mubr.msk.bf16.mxu1 %vm4744_vm2, %v4734_v7  ;;  %v4306_v27 = vcombine.high %v6272_v26, %v6272_v26  ;;  %v4313_v25 = vrot.slane %v6272_v26, %v6865_v34  ;;  %v6141_v7 = vld [vmem:[#allocation13] sm:$0xff]   ;;  %v6147_v26 = vld [vmem:[#allocation13 + $0x30] sm:$0xff]  }
 0x38d   :  { %v4626_v41 = vrot.slane %v4618_v63, %v6865_v34  ;;  %v4633_v53 = vrot.slane %v4619_v6, %v6865_v34  ;;  %v4452_v5 = vmul.f32 %v7978_v13, %v4305_v55  ;;  %v6276_v14 = vpop.eup %6275  ;;  %v4453_v0 = vmul.f32 %v7983_v40, %v4304_v33  ;;  %6060 = vmatpush3.bf16.msra.mxu0 %v6141_v7  ;;  %v6142_v33 = vld [vmem:[#allocation13 + $0x8] sm:$0xff]   ;;  %v6143_v55 = vld [vmem:[#allocation13 + $0x10] sm:$0xff]   ;;  %v8773_v7 = vld [vmem:[#allocation59_spill] sm:$0xff] }
 0x38e   :  { %v4643_v39 = vrot.slane %v4635_v46, %v6865_v34  ;;  %v4652_v51 = vcombine.low %v8150_v16, %v4451_v32  ;;  %v4354_v56 = vcombine.high %v6274_v36, %v6274_v36  ;;  %v4320_v54 = vrot.slane %v4306_v27, %v6865_v34  ;;  %v8748_v46 = vld [vmem:[#allocation35_spill] sm:$0xff]  ;;  %v8749_v32 = vld [vmem:[#allocation38_spill] sm:$0xff] }
 0x38f   :  { %v4634_v52 = vcombine.low %v4626_v41, %v4633_v53  ;;  %v4321_v3 = vcombine.high %v4313_v25, %v4313_v25  ;;  %v4329_v9 = vrot.slane %v6276_v14, %v6865_v34  ;;  %v4454_v28 = vmul.f32 %v8056_v11, %v4313_v25  ;;  %v6148_v41 = vld [vmem:[#allocation13 + $0x38] sm:$0xff]   ;;  %v8750_v53 = vld [vmem:[#allocation36_spill] sm:$0xff] }
 0x390   :  { %v4651_v15 = vcombine.low %v4643_v39, %v4650_v57  ;;  %v4653_v47 = vcombine.low %v4452_v5, %v4453_v0  ;;  %v4660_v13 = vrot.slane %v4652_v51, %v6865_v34  ;;  %v4456_v50 = vmul.f32 %v8070_v48, %v4320_v54  ;;  %v8751_v25 = vld [vmem:[#allocation39_spill] sm:$0xff]  ;;  %v8753_v0 = vld [vmem:[#allocation29_spill] sm:$0xff] }
 0x391   :  { %v4455_v42 = vmul.f32 %v8065_v2, %v4321_v3  ;;  %v4457_v40 = vmul.f32 %v8079_v38, %v4329_v9  ;;  %v4322_v16 = vcombine.high %v6276_v14, %v6276_v14  ;;  %v4337_v59 = vcombine.high %v4329_v9, %v4329_v9  ;;  %v8752_v14 = vld [vmem:[#allocation27_spill] sm:$0xff]  ;;  %v8755_v54 = vld [vmem:[#allocation37_spill] sm:$0xff] }
 0x392   :  { %v4735_v21 = vpack.c.bf16 %v4651_v15, %v4634_v52  ;;  %v4667_v60 = vrot.slane %v4653_v47, %v6865_v34  ;;  %v4361_v45 = vrot.slane %v6274_v36, %v6865_v34  ;;  %v4368_v31 = vrot.slane %v4354_v56, %v6865_v34  ;;  %v8754_v56 = vld [vmem:[#allocation28_spill] sm:$0xff]  ;;  %v8756_v9 = vld [vmem:[#allocation41_spill] sm:$0xff] }
 0x393   :  { %v4669_v62 = vcombine.low %v4454_v28, %v4455_v42  ;;  %v4670_v10 = vcombine.low %v4456_v50, %v4457_v40  ;;  %v4336_v11 = vrot.slane %v4322_v16, %v6865_v34  ;;  %v4458_v48 = vmul.f32 %v8085_v22, %v4337_v59  ;;  %v8757_v28 = vld [vmem:[#allocation40_spill] sm:$0xff]  ;;  %v8759_v50 = vld [vmem:[#allocation31_spill] sm:$0xff]  ;;  %v8760_v16 = vld [vmem:[#allocation33_spill] sm:$0xff] }
 0x394   :  { %6052 = vmatmul.mubr.msk.bf16.gmra.mrb[28].mxu1 %vm4744_vm2, %v4735_v21  ;;  %v4668_v2 = vcombine.low %v4660_v13, %v4667_v60  ;;  %v4369_v44 = vcombine.high %v4361_v45, %v4361_v45  ;;  %v4463_v38 = vmul.f32 %v8030_v8, %v4361_v45  ;;  %v4465_v4 = vmul.f32 %v8035_v12, %v4368_v31  ;;  %v8758_v13 = vld [vmem:[#allocation30_spill] sm:$0xff]  ;;  %v8761_v60 = vld [vmem:[#allocation32_spill] sm:$0xff]  ;;  %v8764_v31 = vld [vmem:[#allocation53_spill] sm:$0xff] }
 0x395   :  { %v4677_v24 = vrot.slane %v4669_v62, %v6865_v34  ;;  %v4684_v35 = vrot.slane %v4670_v10, %v6865_v34  ;;  %v4459_v43 = vmul.f32 %v8091_v29, %v4336_v11  ;;  %v4701_v63 = vrot.slane %v4687_v30, %v6865_v34  ;;  %v6146_v30 = vld [vmem:[#allocation13 + $0x28] sm:$0xff]   ;;  %v8762_v45 = vld [vmem:[#allocation34_spill] sm:$0xff]  ;;  %v8763_v10 = vld [vmem:[#allocation51_spill] sm:$0xff] }
 0x396   :  { %v4464_v49 = vmul.f32 %v8032_v58, %v4369_v44  ;;  %v4703_v18 = vcombine.low %v8168_v20, %v4463_v38  ;;  %v8747_v6 = vmov 0.0   ;;  %v5116_v57 = vrot.slane %v8748_v46, 2  ;;  %v8765_v44 = vld [vmem:[#allocation52_spill] sm:$0xff]  ;;  %v8766_v38 = vld [vmem:[#allocation42_spill] sm:$0xff] }
 0x397   :  { %v4685_v37 = vcombine.low %v4677_v24, %v4684_v35  ;;  %v4686_v61 = vcombine.low %v4458_v48, %v4459_v43  ;;  %6061 = vmatprep.subr.bf16.mxu0 %v8747_v6  ;;  %v5117_v36 = vrot.slane %v8749_v32, 2  ;;  %v5118_v27 = vrot.slane %v8750_v53, 2  ;;  %v8767_v35 = vld [vmem:[#allocation43_spill] sm:$0xff]  ;;  %v8778_v43 = vld [vmem:[#allocation48_spill] sm:$0xff] }
 0x398   :  { %v4704_v19 = vcombine.low %v4464_v49, %v4465_v4  ;;  %v4711_v23 = vrot.slane %v4703_v18, %v6865_v34  ;;  %6062 = vmatpush3.bf16.msra.mxu0 %v6142_v33  ;;  %v5119_v5 = vrot.slane %v8751_v25, 2  ;;  %v5108_v39 = vrot.slane %v8752_v14, 2  ;;  %v8768_v49 = vld [vmem:[#allocation46_spill] sm:$0xff] }
 0x399   :  { %v4736_v22 = vpack.c.bf16 %v4685_v37, %v4668_v2  ;;  %v4694_v8 = vrot.slane %v4686_v61, %v6865_v34  ;;  %6063 = vmatprep.subr.bf16.mxu0 %v8747_v6  ;;  %v5109_v51 = vrot.slane %v8753_v0, 2  ;;  %v5110_v52 = vrot.slane %v8754_v56, 2  ;;  %v8769_v37 = vld [vmem:[#allocation44_spill] sm:$0xff]  ;;  %v8776_v0 = vld [vmem:[#allocation45_spill] sm:$0xff] }
 0x39a   :  { %v4718_v29 = vrot.slane %v4704_v19, %v6865_v34  ;;  %v5120_v3 = vrot.slane %v8755_v54, 2  ;;  %v5121_v15 = vrot.slane %v8756_v9, 2  ;;  %v5122_v47 = vrot.slane %v8757_v28, 2  ;;  %v8770_v19 = vld [vmem:[#allocation47_spill] sm:$0xff] }
 0x39b   :  { %6055 = vmatprep.mubr.msk.bf16.mxu1 %vm4744_vm2, %v4736_v22  ;;  %v4702_v58 = vcombine.low %v4694_v8, %v4701_v63  ;;  %v5111_v42 = vrot.slane %v8758_v13, 2  ;;  %v5112_v40 = vrot.slane %v8759_v50, 2  ;;  %v5113_v21 = vrot.slane %v8760_v16, 2  ;;  %v8771_v22 = vld [vmem:[#allocation54_spill] sm:$0xff]  ;;  %v8777_v13 = vld [vmem:[#allocation49_spill] sm:$0xff] }
 0x39c   :  { %v4719_v12 = vcombine.low %v4711_v23, %v4718_v29  ;;  %6064 = vmatpush3.bf16.msra.mxu0 %v6143_v55  ;;  %v5114_v59 = vrot.slane %v8761_v60, 2  ;;  %v5115_v62 = vrot.slane %v8762_v45, 2  ;;  %v5132_v11 = vrot.slane %v8763_v10, 2 }
 0x39d   :  { %6065 = vmatprep.subr.bf16.mxu0 %v8747_v6  ;;  %v5134_v48 = vrot.slane %v8765_v44, 2  ;;  %v5123_v24 = vrot.slane %v8766_v38, 2  ;;  %v8798_v44 = vrot.slane %v8768_v49, 2 }
 0x39e   :  { %v4737_v20 = vpack.c.bf16 %v4719_v12, %v4702_v58  ;;  %v8772_v12 = vld [vmem:[#allocation55_spill] sm:$0xff] }
 0x3a0   :  { %6056 = vmatmul.mubr.msk.bf16.gmra.mrb[32].mxu1 %vm4744_vm2, %v4737_v20  ;;  %6066 = vmatpush3.bf16.msra.mxu0 %v6144_v1 }
 0x3a1   :  { %6067 = vmatprep.subr.bf16.mxu0 %v8747_v6 }
 0x3a4   :  { %6068 = vmatpush3.bf16.msra.mxu0 %v6145_v17  ;;  %v8774_v17 = vld [vmem:[#allocation56_spill] sm:$0xff] }
 0x3a5   :  { %6069 = vmatprep.subr.bf16.mxu0 %v8747_v6 }
 0x3a8   :  { %6070 = vmatpush3.bf16.msra.mxu0 %v6146_v30 }
 0x3a9   :  { %6071 = vmatprep.subr.bf16.mxu0 %v8747_v6 }
 0x3ac   :  { %6072 = vmatpush3.bf16.msra.mxu0 %v6147_v26  ;;  %v8775_v26 = vld [vmem:[#allocation60_spill] sm:$0xff] }
 0x3ad   :  { %6073 = vmatprep.subr.bf16.mxu0 %v8747_v6 }
 0x3b0   :  { %6074 = vmatpush3.bf16.msra.mxu0 %v6148_v41 }
 0x44b   :  { %v6049_v4 = vpop.f32.mrb[24].mxu1 }
 0x44c   :  { %v4890_v63 = vcombine.high %v6049_v4, %v6049_v4  ;;  %v4897_v29 = vrot.slane %v6049_v4, %v6865_v34  ;;  %v4797_v58 = vpop.f32.mrb[25].mxu1 }
 0x44d   :  { %v4856_v33 = vcombine.high %v4797_v58, %v4797_v58  ;;  %v4863_v55 = vrot.slane %v4797_v58, %v6865_v34  ;;  %v6050_v1 = vpop.f32.mrb[26].mxu1 }
 0x44e   :  { %v4904_v32 = vrot.slane %v4890_v63, %v6865_v34  ;;  %v4905_v53 = vcombine.high %v4897_v29, %v4897_v29  ;;  %v4907_v25 = vcombine.high %v6050_v1, %v6050_v1  ;;  %v4800_v14 = vpop.f32.mrb[27].mxu1  ;;  %v4914_v28 = vrot.slane %v6050_v1, %v6865_v34 }
 0x44f   :  { %v4870_v54 = vrot.slane %v4856_v33, %v6865_v34  ;;  %v4871_v9 = vcombine.high %v4863_v55, %v4863_v55  ;;  %v5204_v30 = vmul.f32 %v5108_v39, %v4863_v55  ;;  %v5130_v33 = vrot.slane %v8778_v43, 2 }
 0x450   :  { %v4906_v58 = vcombine.high %v4904_v32, %v4904_v32  ;;  %v5213_v6 = vmul.f32 %v5117_v36, %v4905_v53  ;;  %v5214_v20 = vmul.f32 %v5118_v27, %v4904_v32  ;;  %v8266_v63 = vrot.slane %v4907_v25, %v6865_v34 }
 0x451   :  { %v4872_v8 = vcombine.high %v4870_v54, %v4870_v54  ;;  %v5205_v41 = vmul.f32 %v5109_v51, %v4871_v9  ;;  %v5206_v61 = vmul.f32 %v5110_v52, %v4870_v54  ;;  %v4922_v56 = vcombine.high %v4914_v28, %v4914_v28 }
 0x452   :  { %v5215_v23 = vmul.f32 %v5119_v5, %v4906_v58  ;;  %v5348_v18 = vcombine.low %v5213_v6, %v5214_v20  ;;  %v5216_v1 = vmul.f32 %v5120_v3, %v4914_v28  ;;  %v5218_v4 = vmul.f32 %v5122_v47, %v8266_v63  ;;  %v8779_v3 = vld [vmem:[#allocation50_spill] sm:$0xff]  ;;  %v8780_v28 = vld [vmem:[#allocation67_spill] sm:$0xff] }
 0x453   :  { %v5300_v2 = vcombine.low %v5204_v30, %v5205_v41  ;;  %v5217_v39 = vmul.f32 %v5121_v15, %v4922_v56  ;;  %v4873_v51 = vcombine.high %v4800_v14, %v4800_v14  ;;  %v5314_v55 = vrot.slane %v5206_v61, %v6865_v34 }
 0x454   :  { %v5355_v36 = vrot.slane %v5348_v18, %v6865_v34  ;;  %v5362_v27 = vrot.slane %v5215_v23, %v6865_v34  ;;  %v4880_v5 = vrot.slane %v4800_v14, %v6865_v34  ;;  %v5207_v20 = vmul.f32 %v5111_v42, %v4872_v8 }
 0x455   :  { %v5307_v52 = vrot.slane %v5300_v2, %v6865_v34  ;;  %v5364_v32 = vcombine.low %v5216_v1, %v5217_v39  ;;  %v4887_v30 = vrot.slane %v4873_v51, %v6865_v34  ;;  %v5131_v41 = vrot.slane %v8779_v3, 2  ;;  %v8781_v1 = vld [vmem:[#allocation69_spill] sm:$0xff] }
 0x456   :  { %v5363_v6 = vcombine.low %v5355_v36, %v5362_v27  ;;  %v5212_v47 = vmul.f32 %v5116_v57, %v4897_v29  ;;  %v4888_v23 = vcombine.high %v4880_v5, %v4880_v5  ;;  %v5208_v15 = vmul.f32 %v5112_v40, %v4880_v5 }
 0x457   :  { %v5315_v18 = vcombine.low %v5307_v52, %v5314_v55  ;;  %v5371_v61 = vrot.slane %v5364_v32, %v6865_v34  ;;  %v5378_v42 = vrot.slane %v5218_v4, %v6865_v34  ;;  %v4889_v8 = vcombine.high %v4887_v30, %v4887_v30  ;;  %v8783_v55 = vld [vmem:[#allocation70_spill] sm:$0xff] }
 0x458   :  { %v5594_v2 = vsel %vm5572_vm3, %v5363_v6, 0.0  ;;  %v5209_v14 = vmul.f32 %v5113_v21, %v4888_v23  ;;  %v5316_v46 = vcombine.low %v5207_v20, %v5208_v15  ;;  %v5210_v50 = vmul.f32 %v5114_v59, %v4887_v30  ;;  %v8782_v59 = vld [vmem:[#allocation68_spill] sm:$0xff]  ;;  %v8784_v30 = vld [vmem:[#allocation57_spill] sm:$0xff] }
 0x459   :  { %v5595_v53 = vrot.slane %v5594_v2, 4  ;;  %v5573_v25 = vsel %vm5572_vm3, %v5315_v18, 0.0  ;;  %v5379_v29 = vcombine.low %v5371_v61, %v5378_v42  ;;  %v5211_v40 = vmul.f32 %v5115_v62, %v4889_v8  ;;  %v8785_v61 = vld [vmem:[#allocation61_spill] sm:$0xff]  ;;  %v8795_v18 = vld [vmem:[#allocation66_spill] sm:$0xff] }
 0x45a   :  { %v5574_v57 = vrot.slane %v5573_v25, 4  ;;  %v5323_v54 = vrot.slane %v5316_v46, %v6865_v34  ;;  %v5330_v9 = vrot.slane %v5209_v14, %v6865_v34  ;;  %v5346_v45 = vrot.slane %v5212_v47, %v6865_v34  ;;  %v8787_v47 = vld [vmem:[#allocation62_spill] sm:$0xff]  ;;  %v8788_v46 = vld [vmem:[#allocation71_spill] sm:$0xff] }
 0x45b   :  { %v5596_v56 = vadd.f32 %v5595_v53, %v5594_v2  ;;  %v5601_v16 = vsel %vm5572_vm3, %v5379_v29, 0.0  ;;  %v5332_v21 = vcombine.low %v5210_v50, %v5211_v40  ;;  %v8786_v53 = vld [vmem:[#allocation58_spill] sm:$0xff] }
 0x45c   :  { %v5575_v58 = vadd.f32 %v5574_v57, %v5573_v25  ;;  %v5602_v39 = vrot.slane %v5601_v16, 4  ;;  %v5331_v60 = vcombine.low %v5323_v54, %v5330_v9  ;;  %v8792_v25 = vld [vmem:[#allocation63_spill] sm:$0xff] }
 0x45d   :  { %v5597_v27 = vrot.slane %v5596_v56, 2  ;;  %v5339_v52 = vrot.slane %v5332_v21, %v6865_v34  ;;  %v8790_v21 = vld [vmem:[#allocation72_spill] sm:$0xff] }
 0x45e   :  { %v5576_v62 = vrot.slane %v5575_v58, 2  ;;  %v5603_v6 = vadd.f32 %v5602_v39, %v5601_v16  ;;  %v5580_v32 = vsel %vm5572_vm3, %v5331_v60, 0.0  ;;  %v4923_v60 = vcombine.high %v8266_v63, %v8266_v63 }
 0x45f   :  { %v5598_v20 = vadd.f32 %v5597_v27, %v5596_v56  ;;  %v5347_v15 = vcombine.low %v5339_v52, %v5346_v45  ;;  %v5581_v2 = vrot.slane %v5580_v32, 4  ;;  %v8789_v56 = vld [vmem:[#allocation73_spill] sm:$0xff] }
 0x460   :  { %v5577_v23 = vadd.f32 %v5576_v62, %v5575_v58  ;;  %v5604_v8 = vrot.slane %v5603_v6, 2  ;;  %v8791_v62 = vld [vmem:[#allocation74_spill] sm:$0xff] }
 0x461   :  { %v5582_v50 = vadd.f32 %v5581_v2, %v5580_v32  ;;  %v5587_v40 = vsel %vm5572_vm3, %v5347_v15, 0.0  ;;  %v5599_v9 = vrot.slane %v5598_v20, 1  ;;  %v8793_v2 = vld [vmem:[#allocation65_spill] sm:$0xff]  ;;  %v5219_v15 = vmul.f32 %v5123_v24, %v4923_v60 }
 0x462   :  { %v5578_v29 = vrot.slane %v5577_v23, 1  ;;  %v5605_v16 = vadd.f32 %v5604_v8, %v5603_v6  ;;  %v5588_v58 = vrot.slane %v5587_v40, 4  ;;  %v8794_v6 = vld [vmem:[#allocation64_spill] sm:$0xff] }
 0x463   :  { %v5583_v45 = vrot.slane %v5582_v50, 2 }
 0x464   :  { %v5579_v39 = vadd.f32 %v5578_v29, %v5577_v23  ;;  %v5606_v14 = vrot.slane %v5605_v16, 1  ;;  %v5589_v57 = vadd.f32 %v5588_v58, %v5587_v40  ;;  %v8316_v23 = vadd.f32 %v5599_v9, %v5598_v20 }
 0x465   :  { %v5584_v42 = vadd.f32 %v5583_v45, %v5582_v50 }
 0x466   :  { %v5701_v29 = vpack.c.bf16 %v5579_v39, %v5579_v39  ;;  %v5590_v63 = vrot.slane %v5589_v57, 2  ;;  %v8321_v45 = vadd.f32 %v5606_v14, %v5605_v16 }
 0x467   :  { %v6053_v54 = vpop.f32.mrb[28].mxu1  ;;  %v5585_v52 = vrot.slane %v5584_v42, 1 }
 0x468   :  { %v4958_v5 = vcombine.high %v6053_v54, %v6053_v54  ;;  %v4813_v51 = vpop.f32.mrb[29].mxu1  ;;  %v4965_v40 = vrot.slane %v6053_v54, %v6865_v34  ;;  %v5591_v32 = vadd.f32 %v5590_v63, %v5589_v57  ;;  %v5740_v24 = vunpack.c.l.b16 %v5701_v29 }
 0x469   :  { %v4924_v58 = vcombine.high %v4813_v51, %v4813_v51  ;;  %v6054_v50 = vpop.f32.mrb[30].mxu1  ;;  %v4931_v20 = vrot.slane %v4813_v51, %v6865_v34  ;;  %v5586_v39 = vadd.f32 %v5585_v52, %v5584_v42  ;;  %v5705_v10 = vpack.c.bf16 %v8321_v45, %v8321_v45 }
 0x46a   :  { %v4972_v8 = vrot.slane %v4958_v5, %v6865_v34  ;;  %v4816_v9 = vpop.f32.mrb[31].mxu1  ;;  %v4973_v27 = vcombine.high %v4965_v40, %v4965_v40  ;;  %v5228_v36 = vmul.f32 %v5132_v11, %v4965_v40  ;;  %v5592_v60 = vrot.slane %v5591_v32, 1 }
 0x46b   :  { %v4938_v54 = vrot.slane %v4924_v58, %v6865_v34  ;;  %v5702_v57 = vpack.c.bf16 %v5586_v39, %v5586_v39  ;;  %v8796_v5 = vrot.slane %v8764_v31, 2  ;;  %v4939_v16 = vcombine.high %v4931_v20, %v4931_v20 }
 0x46c   :  { %v5230_v14 = vmul.f32 %v5134_v48, %v4972_v8  ;;  %v8336_v11 = vadd.f32 %v5592_v60, %v5591_v32  ;;  %v4974_v52 = vcombine.high %v4972_v8, %v4972_v8  ;;  %v8797_v63 = vrot.slane %v8767_v35, 2 }
 0x46d   :  { %v5229_v51 = vmul.f32 %v8796_v5, %v4973_v27  ;;  %v4940_v42 = vcombine.high %v4938_v54, %v4938_v54  ;;  %v5741_v29 = vunpack.c.l.b16 %v5702_v57  ;;  %v5221_v48 = vmul.f32 %v8798_v44, %v4939_v16 }
 0x46e   :  { %v5220_v40 = vmul.f32 %v8797_v63, %v4931_v20  ;;  %v8799_v39 = vrot.slane %v8770_v19, 2  ;;  %v8800_v27 = vrot.slane %v8769_v37, 2  ;;  %v4975_v4 = vcombine.high %v6054_v50, %v6054_v50 }
 0x46f   :  { %v5428_v58 = vcombine.low %v5228_v36, %v5229_v51  ;;  %v4982_v32 = vrot.slane %v6054_v50, %v6865_v34  ;;  %v8348_v8 = vsel %vm5756_vm4, %v5741_v29, %v5740_v24  ;;  %v5442_v36 = vrot.slane %v5230_v14, %v6865_v34 }
 0x470   :  { %v5223_v31 = vmul.f32 %v8799_v39, %v4940_v42  ;;  %v5222_v5 = vmul.f32 %v8800_v27, %v4938_v54  ;;  %v5380_v38 = vcombine.low %v5219_v15, %v5220_v40  ;;  %v5394_v49 = vrot.slane %v5221_v48, %v6865_v34 }
 0x471   :  { %v5435_v35 = vrot.slane %v5428_v58, %v6865_v34  ;;  %v4989_v60 = vrot.slane %v4975_v4, %v6865_v34  ;;  %v4990_v37 = vcombine.high %v4982_v32, %v4982_v32  ;;  %v8801_v15 = vrot.slane %v8771_v22, 2 }
 0x472   :  { %v5387_v20 = vrot.slane %v5380_v38, %v6865_v34  ;;  %v5396_v19 = vcombine.low %v5222_v5, %v5223_v31  ;;  %v8802_v50 = vrot.slane %v8772_v12, 2  ;;  %v4941_v51 = vcombine.high %v4816_v9, %v4816_v9 }
 0x473   :  { %v5443_v54 = vcombine.low %v5435_v35, %v5442_v36  ;;  %v5231_v57 = vmul.f32 %v8801_v15, %v4974_v52  ;;  %v6057_v16 = vpop.f32.mrb[32].mxu1  ;;  %v4991_v63 = vcombine.high %v4989_v60, %v4989_v60  ;;  %v8803_v14 = vrot.slane %v8773_v7, 2 }
 0x474   :  { %v5232_v24 = vmul.f32 %v8802_v50, %v4982_v32  ;;  %v5395_v42 = vcombine.low %v5387_v20, %v5394_v49  ;;  %v8804_v38 = vrot.slane %v8774_v17, 2  ;;  %v8365_v4 = vpop.f32.mrb[33].mxu1  ;;  %v4948_v52 = vrot.slane %v4816_v9, %v6865_v34 }
 0x475   :  { %v5233_v40 = vmul.f32 %v8803_v14, %v4990_v37  ;;  %v5629_v58 = vsel %vm5572_vm3, %v5443_v54, 0.0  ;;  %v4955_v12 = vrot.slane %v4941_v51, %v6865_v34  ;;  %v8370_v44 = vpop.f32.mrb[34].mxu1  ;;  %v8805_v7 = vrot.slane %v8775_v26, 2 }
 0x476   :  { %v8363_v29 = vmul.f32 %v8804_v38, %v4989_v60  ;;  %v5444_v22 = vcombine.low %v5231_v57, %v5232_v24  ;;  %v5630_v48 = vrot.slane %v5629_v58, 4  ;;  %v5608_v39 = vsel %vm5572_vm3, %v5395_v42, 0.0  ;;  %v8378_v27 = vpop.f32.mrb[35].mxu1 }
 0x477   :  { %v8375_v31 = vmul.f32 %v8805_v7, %v4991_v63  ;;  %v5458_v17 = vrot.slane %v5233_v40, %v6865_v34  ;;  %v5609_v5 = vrot.slane %v5608_v39, 4  ;;  %v4956_v35 = vcombine.high %v4948_v52, %v4948_v52 }
 0x478   :  { %v5451_v32 = vrot.slane %v5444_v22, %v6865_v34  ;;  %v4957_v9 = vcombine.high %v4955_v12, %v4955_v12  ;;  %v5631_v36 = vadd.f32 %v5630_v48, %v5629_v58  ;;  %v8806_v20 = vrot.slane %v8776_v0, 2 }
 0x479   :  { %v5460_v49 = vcombine.low %v8363_v29, %v8375_v31  ;;  %v5226_v26 = vmul.f32 %v5130_v33, %v4955_v12  ;;  %v5610_v37 = vadd.f32 %v5609_v5, %v5608_v39  ;;  %v8807_v15 = vrot.slane %v8777_v13, 2 }
 0x47a   :  { %v5224_v60 = vmul.f32 %v8806_v20, %v4948_v52  ;;  %v5459_v54 = vcombine.low %v5451_v32, %v5458_v17  ;;  %v5227_v50 = vmul.f32 %v5131_v41, %v4957_v9  ;;  %v5632_v24 = vrot.slane %v5631_v36, 2 }
 0x47b   :  { %v5225_v57 = vmul.f32 %v8807_v15, %v4956_v35  ;;  %v5403_v51 = vrot.slane %v5396_v19, %v6865_v34  ;;  %v5026_v63 = vcombine.high %v6057_v16, %v6057_v16  ;;  %v5611_v14 = vrot.slane %v5610_v37, 2 }
 0x47c   :  { %v5410_v42 = vrot.slane %v5224_v60, %v6865_v34  ;;  %v5636_v0 = vsel %vm5572_vm3, %v5459_v54, 0.0  ;;  %v5426_v43 = vrot.slane %v5227_v50, %v6865_v34  ;;  %v5633_v33 = vadd.f32 %v5632_v24, %v5631_v36 }
 0x47d   :  { %v5412_v40 = vcombine.low %v5225_v57, %v5226_v26  ;;  %v5637_v38 = vrot.slane %v5636_v0, 4  ;;  %v5033_v13 = vrot.slane %v6057_v16, %v6865_v34  ;;  %v5703_v3 = vpack.c.bf16 %v8336_v11, %v8336_v11 }
 0x47e   :  { %v5411_v29 = vcombine.low %v5403_v51, %v5410_v42  ;;  %v5612_v41 = vadd.f32 %v5611_v14, %v5610_v37  ;;  %v5040_v58 = vrot.slane %v5026_v63, %v6865_v34  ;;  %v5634_v22 = vrot.slane %v5633_v33, 1 }
 0x47f   :  { %v5419_v19 = vrot.slane %v5412_v40, %v6865_v34  ;;  %v5638_v52 = vadd.f32 %v5637_v38, %v5636_v0  ;;  %v5041_v48 = vcombine.high %v5033_v13, %v5033_v13  ;;  %v4992_v17 = vcombine.high %v8365_v4, %v8365_v4 }
 0x480   :  { %v5615_v12 = vsel %vm5572_vm3, %v5411_v29, 0.0  ;;  %v5042_v31 = vcombine.high %v5040_v58, %v5040_v58  ;;  %v5613_v16 = vrot.slane %v5612_v41, 1  ;;  %v8808_v11 = vrot.slane %v8780_v28, 2 }
 0x481   :  { %v5427_v39 = vcombine.low %v5419_v19, %v5426_v43  ;;  %v5616_v7 = vrot.slane %v5615_v12, 4  ;;  %v5639_v5 = vrot.slane %v5638_v52, 2  ;;  %v8809_v35 = vrot.slane %v8781_v1, 2 }
 0x482   :  { %v8405_v32 = vmul.f32 %v8808_v11, %v5033_v13  ;;  %v5635_v36 = vadd.f32 %v5634_v22, %v5633_v33  ;;  %v8810_v26 = vrot.slane %v8782_v59, 2  ;;  %v8811_v54 = vpack.c.bf16 %v8316_v23, %v8316_v23 }
 0x483   :  { %v8409_v9 = vmul.f32 %v8809_v35, %v5041_v48  ;;  %v5617_v20 = vadd.f32 %v5616_v7, %v5615_v12  ;;  %v5622_v60 = vsel %vm5572_vm3, %v5427_v39, 0.0  ;;  %v5640_v57 = vadd.f32 %v5639_v5, %v5638_v52 }
 0x484   :  { %v5246_v37 = vmul.f32 %v8810_v26, %v5040_v58  ;;  %v8417_v15 = vunpack.c.l.b16 %v8811_v54  ;;  %v5623_v28 = vrot.slane %v5622_v60, 4  ;;  %v8812_v50 = vrot.slane %v8783_v55, 2 }
 0x485   :  { %v8424_v1 = vunpack.c.l.b16 %v5705_v10  ;;  %v8426_v51 = vunpack.c.l.b16 %v5703_v3  ;;  %v5618_v42 = vrot.slane %v5617_v20, 2  ;;  %v4999_v59 = vrot.slane %v8365_v4, %v6865_v34 }
 0x486   :  { %v5247_v24 = vmul.f32 %v8812_v50, %v5042_v31  ;;  %v8430_v63 = vadd.f32 %v5613_v16, %v5612_v41  ;;  %v5641_v23 = vrot.slane %v5640_v57, 1  ;;  %v5624_v14 = vadd.f32 %v5623_v28, %v5622_v60 }
 0x487   :  { %v5709_v40 = vpack.c.bf16 %v5635_v36, %v5635_v36  ;;  %v5619_v43 = vadd.f32 %v5618_v42, %v5617_v20  ;;  %v5006_v55 = vrot.slane %v4992_v17, %v6865_v34  ;;  %v5007_v33 = vcombine.high %v4999_v59, %v4999_v59 }
 0x488   :  { %v5524_v0 = vcombine.low %v5246_v37, %v5247_v24  ;;  %v5642_v38 = vadd.f32 %v5641_v23, %v5640_v57  ;;  %v5625_v45 = vrot.slane %v5624_v14, 2  ;;  %v8813_v10 = vrot.slane %v8784_v30, 2 }
 0x489   :  { %v5467_v13 = vrot.slane %v5460_v49, %v6865_v34  ;;  %v5620_v3 = vrot.slane %v5619_v43, 1  ;;  %v5008_v19 = vcombine.high %v5006_v55, %v5006_v55  ;;  %v8814_v4 = vrot.slane %v8785_v61, 2 }
 0x48a   :  { %v5236_v29 = vmul.f32 %v8813_v10, %v4999_v59  ;;  %v8815_v58 = vrot.slane %v8786_v53, 2  ;;  %v5706_v52 = vpack.c.bf16 %v8430_v63, %v8430_v63  ;;  %v5710_v12 = vpack.c.bf16 %v5642_v38, %v5642_v38 }
 0x48b   :  { %v5237_v41 = vmul.f32 %v8814_v4, %v5007_v33  ;;  %v5043_v30 = vcombine.high %v8370_v44, %v8370_v44  ;;  %v5626_v39 = vadd.f32 %v5625_v45, %v5624_v14  ;;  %v8816_v49 = vrot.slane %v8787_v47, 2 }
 0x48c   :  { %v5238_v22 = vmul.f32 %v8815_v58, %v5006_v55  ;;  %v5474_v48 = vrot.slane %v5236_v29, %v6865_v34  ;;  %v5050_v61 = vrot.slane %v8370_v44, %v6865_v34  ;;  %v5748_v17 = vunpack.c.l.b16 %v5709_v40 }
 0x48d   :  { %v5239_v7 = vmul.f32 %v8816_v49, %v5008_v19  ;;  %v5749_v53 = vunpack.c.l.b16 %v5710_v12  ;;  %v5057_v5 = vrot.slane %v5043_v30, %v6865_v34  ;;  %v8450_v11 = vadd.f32 %v5620_v3, %v5619_v43 }
 0x48e   :  { %v5476_v31 = vcombine.low %v5237_v41, %v5238_v22  ;;  %v5475_v16 = vcombine.low %v5467_v13, %v5474_v48  ;;  %v5058_v20 = vcombine.high %v5050_v61, %v5050_v61  ;;  %v8817_v44 = vrot.slane %v8788_v46, 2 }
 0x48f   :  { %v5490_v36 = vrot.slane %v5239_v7, %v6865_v34  ;;  %v8455_v60 = vsel %vm5756_vm4, %v5749_v53, %v5748_v17  ;;  %v5059_v26 = vcombine.high %v5057_v5, %v5057_v5  ;;  %v5627_v54 = vrot.slane %v5626_v39, 1 }
 0x490   :  { %v5483_v35 = vrot.slane %v5476_v31, %v6865_v34  ;;  %v5643_v47 = vsel %vm5572_vm3, %v5475_v16, 0.0  ;;  %v5248_v37 = vmul.f32 %v8817_v44, %v5050_v61  ;;  %v8818_v50 = vrot.slane %v8789_v56, 2 }
 0x491   :  { %v5644_v28 = vrot.slane %v5643_v47, 4  ;;  %v8819_v42 = vrot.slane %v8790_v21, 2  ;;  %v8820_v23 = vrot.slane %v8791_v62, 2  ;;  %v5531_v40 = vrot.slane %v5524_v0, %v6865_v34 }
 0x492   :  { %v5491_v57 = vcombine.low %v5483_v35, %v5490_v36  ;;  %v5249_v24 = vmul.f32 %v8818_v50, %v5058_v20  ;;  %v5538_v43 = vrot.slane %v5248_v37, %v6865_v34  ;;  %v5009_v33 = vcombine.high %v8378_v27, %v8378_v27 }
 0x493   :  { %v5250_v59 = vmul.f32 %v8819_v42, %v5057_v5  ;;  %v5251_v14 = vmul.f32 %v8820_v23, %v5059_v26  ;;  %v5645_v55 = vadd.f32 %v5644_v28, %v5643_v47  ;;  %v5016_v56 = vrot.slane %v8378_v27, %v6865_v34 }
 0x494   :  { %v5650_v46 = vsel %vm5572_vm3, %v5491_v57, 0.0  ;;  %v5539_v21 = vcombine.low %v5531_v40, %v5538_v43  ;;  %v5023_v0 = vrot.slane %v5009_v33, %v6865_v34  ;;  %v8821_v13 = vrot.slane %v8792_v25, 2 }
 0x495   :  { %v5651_v38 = vrot.slane %v5650_v46, 4  ;;  %v5540_v45 = vcombine.low %v5249_v24, %v5250_v59  ;;  %v5554_v62 = vrot.slane %v5251_v14, %v6865_v34  ;;  %v5646_v10 = vrot.slane %v5645_v55, 2 }
 0x496   :  { %v5024_v29 = vcombine.high %v5016_v56, %v5016_v56  ;;  %v5240_v3 = vmul.f32 %v8821_v13, %v5016_v56  ;;  %v5671_v41 = vsel %vm5572_vm3, %v5539_v21, 0.0  ;;  %v5628_v27 = vadd.f32 %v5627_v54, %v5626_v39 }
 0x497   :  { %v5652_v19 = vadd.f32 %v5651_v38, %v5650_v46  ;;  %v5547_v4 = vrot.slane %v5540_v45, %v6865_v34  ;;  %v5647_v58 = vadd.f32 %v5646_v10, %v5645_v55  ;;  %v5672_v22 = vrot.slane %v5671_v41, 4 }
 0x498   :  { %v5025_v12 = vcombine.high %v5023_v0, %v5023_v0  ;;  %v8822_v48 = vrot.slane %v8793_v2, 2  ;;  %v5522_v49 = vrot.slane %v8409_v9, %v6865_v34  ;;  %v8823_v31 = vrot.slane %v8794_v6, 2 }
 0x499   :  { %v5653_v25 = vrot.slane %v5652_v19, 2  ;;  %v5555_v7 = vcombine.low %v5547_v4, %v5554_v62  ;;  %v5648_v17 = vrot.slane %v5647_v58, 1  ;;  %v5673_v53 = vadd.f32 %v5672_v22, %v5671_v41 }
 0x49a   :  { %v5241_v30 = vmul.f32 %v8822_v48, %v5024_v29  ;;  %v5242_v61 = vmul.f32 %v8823_v31, %v5023_v0  ;;  %v8824_v39 = vrot.slane %v8795_v18, 2  ;;  %v5707_v2 = vpack.c.bf16 %v8450_v11, %v8450_v11 }
 0x49b   :  { %v5654_v35 = vadd.f32 %v5653_v25, %v5652_v19  ;;  %v5678_v36 = vsel %vm5572_vm3, %v5555_v7, 0.0  ;;  %v5708_v20 = vpack.c.bf16 %v5628_v27, %v5628_v27  ;;  %v5649_v9 = vadd.f32 %v5648_v17, %v5647_v58 }
 0x49c   :  { %v5243_v16 = vmul.f32 %v8824_v39, %v5025_v12  ;;  %v5492_v5 = vcombine.low %v5240_v3, %v5241_v30  ;;  %v5679_v47 = vrot.slane %v5678_v36, 4  ;;  %v5506_v6 = vrot.slane %v5242_v61, %v6865_v34 }
 0x49d   :  { %v5745_v44 = vunpack.c.l.b16 %v5706_v52  ;;  %v5655_v18 = vrot.slane %v5654_v35, 1  ;;  %v5759_v11 = vsel %vm5758_vm5, %v8426_v51, %v8348_v8  ;;  %v5711_v54 = vpack.c.bf16 %v5649_v9, %v5649_v9 }
 0x49e   :  { %v5499_v26 = vrot.slane %v5492_v5, %v6865_v34  ;;  %v5508_v37 = vcombine.low %v5243_v16, %v8405_v32  ;;  %v5674_v57 = vrot.slane %v5673_v53, 2  ;;  %v5680_v28 = vadd.f32 %v5679_v47, %v5678_v36 }
 0x49f   :  { %v5746_v24 = vunpack.c.l.b16 %v5707_v2  ;;  %v5656_v42 = vadd.f32 %v5655_v18, %v5654_v35  ;;  %v5761_v23 = vsel %vm5760_vm6, %v8417_v15, %v5759_v11  ;;  %v5750_v63 = vunpack.c.l.b16 %v5711_v54  ;;  %v5949_v35 = vld [vmem:[#allocation14] ss:$0 sm:$0xff] }
 0x4a0   :  { %v5507_v50 = vcombine.low %v5499_v26, %v5506_v6  ;;  %v5515_v59 = vrot.slane %v5508_v37, %v6865_v34  ;;  %v5681_v52 = vrot.slane %v5680_v28, 2  ;;  %v5747_v32 = vunpack.c.l.b16 %v5708_v20 }
 0x4a1   :  { %v5712_v40 = vpack.c.bf16 %v5656_v42, %v5656_v42  ;;  %v5763_v8 = vsel %vm5762_vm7, %v8424_v1, %v5761_v23  ;;  %v5771_v51 = vsel %vm5758_vm5, %v5750_v63, %v8455_v60  ;;  %v5675_v46 = vadd.f32 %v5674_v57, %v5673_v53 }
 0x4a2   :  { %v5657_v14 = vsel %vm5572_vm3, %v5507_v50, 0.0  ;;  %v5523_v43 = vcombine.low %v5515_v59, %v5522_v49  ;;  %v5765_v34 = vsel %vm5764_vm8, %v5745_v44, %v5763_v8  ;;  %v5682_v21 = vadd.f32 %v5681_v52, %v5680_v28 }
 0x4a3   :  { %v5658_v55 = vrot.slane %v5657_v14, 4  ;;  %v5751_v33 = vunpack.c.l.b16 %v5712_v40  ;;  %v5767_v38 = vsel %vm5766_vm9, %v5746_v24, %v5765_v34  ;;  %v5676_v29 = vrot.slane %v5675_v46, 1 }
 0x4a4   :  { %v5664_v15 = vsel %vm5572_vm3, %v5523_v43, 0.0  ;;  %v5769_v62 = vsel %vm5768_vm10, %v5747_v32, %v5767_v38  ;;  %v5683_v60 = vrot.slane %v5682_v21, 1 }
 0x4a5   :  { %v5659_v56 = vadd.f32 %v5658_v55, %v5657_v14  ;;  %v5665_v45 = vrot.slane %v5664_v15, 4  ;;  %v5772_v0 = vsel %vm5760_vm6, %v5751_v33, %v5771_v51  ;;  %v5677_v41 = vadd.f32 %v5676_v29, %v5675_v46 }
 0x4a6   :  { %v5684_v22 = vadd.f32 %v5683_v60, %v5682_v21 }
 0x4a7   :  { %v5660_v10 = vrot.slane %v5659_v56, 2  ;;  %v5666_v1 = vadd.f32 %v5665_v45, %v5664_v15  ;;  %v5715_v30 = vpack.c.bf16 %v5677_v41, %v5677_v41 }
 0x4a8   :  { %v5716_v7 = vpack.c.bf16 %v5684_v22, %v5684_v22 }
 0x4a9   :  { %v5661_v13 = vadd.f32 %v5660_v10, %v5659_v56  ;;  %v5667_v3 = vrot.slane %v5666_v1, 2  ;;  %v5754_v17 = vunpack.c.l.b16 %v5715_v30 }
 0x4aa   :  { %v5755_v53 = vunpack.c.l.b16 %v5716_v7 }
 0x4ab   :  { %v5662_v19 = vrot.slane %v5661_v13, 1  ;;  %v5668_v4 = vadd.f32 %v5667_v3, %v5666_v1 }
 0x4ad   :  { %v5663_v27 = vadd.f32 %v5662_v19, %v5661_v13  ;;  %v5669_v58 = vrot.slane %v5668_v4, 1 }
 0x4af   :  { %v5713_v12 = vpack.c.bf16 %v5663_v27, %v5663_v27  ;;  %v5670_v48 = vadd.f32 %v5669_v58, %v5668_v4 }
 0x4b1   :  { %v5752_v49 = vunpack.c.l.b16 %v5713_v12  ;;  %v5714_v25 = vpack.c.bf16 %v5670_v48, %v5670_v48 }
 0x4b3   :  { %v5773_v31 = vsel %vm5762_vm7, %v5752_v49, %v5772_v0  ;;  %v5753_v61 = vunpack.c.l.b16 %v5714_v25 }
 0x4b5   :  { %v5774_v39 = vsel %vm5764_vm8, %v5753_v61, %v5773_v31 }
 0x4b6   :  { %v5775_v16 = vsel %vm5766_vm9, %v5754_v17, %v5774_v39 }
 0x4b7   :  { %v5776_v5 = vsel %vm5768_vm10, %v5755_v53, %v5775_v16 }
 0x4b8   :  { %v5777_v2 = vpack.c.b16 %v5776_v5, %v5769_v62 }
 0x4ba   :  { %6076 = vmatmul.mubr.bf16.vlgmr.msra.gmra.mrb[16].mxu0 %v5777_v2 }
 0x58d   :  { %v5861_v36 = vpop.f32.mrb[16].mxu0 }
 0x58e   :  { %v5862_v20 = vadd.f32 %v5949_v35, %v5861_v36  ;;  %v6077_v9 = vpop.f32.mrb[17].mxu0 }
 0x58f   :  { %v5864_v47 = vpop.f32.mrb[18].mxu0 }
 0x590   :  { %5868 = vst [vmem:[#allocation19] sm:$0xff] %v5862_v20  ;;  %v5865_v26 = vadd.f32 %v5949_v35, %v5864_v47  ;;  %v6078_v6 = vpop.f32.mrb[19].mxu0 }
 0x592   :  { %5869 = vst [vmem:[#allocation19 + $0x8] sm:$0xff] %v5865_v26 }
 0x593   :  { %6508 = shalt.err (!%p6505_p0)
}
 0x594   :  { %s6509_s11 = scalar_lea.hbm %s8541_s10, 256 }
 0x595   :  { %p6510_p1 = scmp.ne.s32.totalorder %s8541_s10, %s6509_s11  ;;  %p6513_p2 = scmp.lt.u32.totalorder %s6509_s11, %s8541_s10 }
 0x597   :  { %p6515_p3 = pnand %p6513_p2, %p6510_p1 }
 0x599   :  { %6518 = shalt.err (!%p6515_p3)
}
 0x59a   :  { %5881 = dma.vmem_to_hbm [thread:$0]  %s5876_s25, 256, %s8541_s10, [#allocation4], %s6542_s2, %s6542_s2, %s6543_s30  }
 0x59b   :  { %6531 = dma.done.wait [#allocation4], 256  }
 0x59c   :  { %6532 = vsyncadd [#allocation4], 4294967040 }
 0x59d   :  { %5885 = vsyncpa [#allocation3], 1 }
 0x59e   :  { %5886 = vsyncpa [#allocation6], 1 }
 0x59f   :  { %5887 = vsyncpa [#allocation9], 1 }
 0x5a0   :  { %5888 = vsyncpa [#allocation12], 1 }
 0x5a1   :  { %5889 = vsyncpa [#allocation15], 1 }
 0x5a2   :  { %5890 = vsyncpa [#allocation18], 1 }
 0x5a3   :  { %5891 = vsyncpa [#allocation4], 1 }

</bundles_post_ra>
